<compile_context>
chip_gen: v6e
topology: v6e:2x2x1
jax: 0.10.0
libtpu: 0.0.40
codegen_flags: <defaults>
</compile_context>

<pallas_src>
import jax
import jax.numpy as jnp
from jax.experimental import pallas as pl
from jax.experimental.pallas import tpu as pltpu

IN_FEATURES = 512 * 7   # 3584
OUT_FEATURES = 512


def multifusion_kernel(img_ref, txt_ref, w_ref, b_ref, out_ref):
    """One batch tile, both heads.

    img_ref : (tb, 3584)        f32   flattened image embedding tile
    txt_ref : (tb, 3584)        f32   flattened text embedding tile
    w_ref   : (2, 3584, 512)    bf16  pre-transposed weights (head 0 = image)
    b_ref   : (2, 1, 512)       f32   biases
    out_ref : (tb, 1024)        f32   [image | text] lane-dense output slab
    """
    x_img = img_ref[...].astype(jnp.bfloat16)
    x_txt = txt_ref[...].astype(jnp.bfloat16)

    acc_img = jnp.dot(x_img, w_ref[0], preferred_element_type=jnp.float32)
    acc_txt = jnp.dot(x_txt, w_ref[1], preferred_element_type=jnp.float32)

    out_ref[:, :OUT_FEATURES] = (acc_img + b_ref[0]).astype(out_ref.dtype)
    out_ref[:, OUT_FEATURES:] = (acc_txt + b_ref[1]).astype(out_ref.dtype)


def pack_params(w_img_t, b_img, w_txt_t, b_txt):
    """One-time packing: stack the two heads; weights cast to bf16."""
    w = jnp.stack([w_img_t, w_txt_t], axis=0).astype(jnp.bfloat16)          # (2, 3584, 512)
    b = jnp.stack([b_img, b_txt], axis=0).reshape(
        2, 1, OUT_FEATURES).astype(jnp.float32)                              # (2, 1, 512)
    return w, b


def _batch_tile(batch):
    """Largest convenient batch tile (sublane-friendly); full extent if small/ragged."""
    for tb in (512, 256, 128, 64, 32, 16, 8):
        if batch % tb == 0:
            return tb
    return batch


def multifusion(image_embedding, text_embedding, w_packed, b_packed):
    """image_embedding, text_embedding: (B, 7, 512) -> out: (B, 2, 512)."""
    batch = image_embedding.shape[0]
    img_flat = image_embedding.reshape(batch, IN_FEATURES).astype(jnp.float32)
    txt_flat = text_embedding.reshape(batch, IN_FEATURES).astype(jnp.float32)

    tb = _batch_tile(batch)
    n_bt = batch // tb

    # Explicit VMEM budget: weights+bias resident (budgeted x2 for the default
    # double-buffer allocation), activations/outputs double-buffered per tile.
    w_bytes = w_packed.size * 2                 # bf16
    b_bytes = b_packed.size * 4                 # f32
    x_tile_bytes = tb * IN_FEATURES * 4         # f32, per head
    o_tile_bytes = tb * 2 * OUT_FEATURES * 4    # f32
    vmem_limit = int(2 * (w_bytes + b_bytes + 2 * x_tile_bytes + o_tile_bytes)
                     + (2 << 20))

    flops = 2 * 2 * batch * IN_FEATURES * OUT_FEATURES
    bytes_accessed = (w_bytes + b_bytes
                      + 2 * batch * IN_FEATURES * 4        # both activations, f32
                      + batch * 2 * OUT_FEATURES * 4)      # output, f32

    out = pl.pallas_call(
        multifusion_kernel,
        out_shape=jax.ShapeDtypeStruct((batch, 2 * OUT_FEATURES), jnp.float32),
        grid_spec=pltpu.PrefetchScalarGridSpec(
            num_scalar_prefetch=0,
            grid=(n_bt,),
            in_specs=[
                pl.BlockSpec((tb, IN_FEATURES), lambda i: (i, 0)),                # image
                pl.BlockSpec((tb, IN_FEATURES), lambda i: (i, 0)),                # text
                pl.BlockSpec((2, IN_FEATURES, OUT_FEATURES), lambda i: (0, 0, 0)),  # W^T (resident)
                pl.BlockSpec((2, 1, OUT_FEATURES), lambda i: (0, 0, 0)),            # bias (resident)
            ],
            out_specs=pl.BlockSpec((tb, 2 * OUT_FEATURES), lambda i: (i, 0)),
        ),
        compiler_params=pltpu.CompilerParams(
            dimension_semantics=("parallel",),
            vmem_limit_bytes=vmem_limit,
        ),
        cost_estimate=pl.CostEstimate(
            flops=flops, transcendentals=0, bytes_accessed=bytes_accessed),
    )(img_flat, txt_flat, w_packed, b_packed)

    # (B, 1024) -> (B, 2, 512): row-major contiguous, so this reshape is free.
    return out.reshape(batch, 2, OUT_FEATURES)


if __name__ == "__main__":
    key = jax.random.PRNGKey(0)
    k_img, k_txt, k_wi, k_bi, k_wt, k_bt = jax.random.split(key, 6)

    batch = 2
    # Inputs shaped (B, 7, 512); flatten(1) -> (B, 3584), matching Linear(3584, 512).
    image_embedding = jax.random.normal(k_img, (batch, 7, 512), dtype=jnp.float32)
    text_embedding = jax.random.normal(k_txt, (batch, 7, 512), dtype=jnp.float32)

    # Deterministic parameter init, mimicking nn.Linear's U(-1/sqrt(fan_in), +1/sqrt(fan_in)).
    bound = 1.0 / (IN_FEATURES ** 0.5)
    # Stored pre-transposed: (in, out).
    w_img_t = jax.random.uniform(k_wi, (IN_FEATURES, OUT_FEATURES),
                                 minval=-bound, maxval=bound, dtype=jnp.float32)
    b_img = jax.random.uniform(k_bi, (OUT_FEATURES,),
                               minval=-bound, maxval=bound, dtype=jnp.float32)
    w_txt_t = jax.random.uniform(k_wt, (IN_FEATURES, OUT_FEATURES),
                                 minval=-bound, maxval=bound, dtype=jnp.float32)
    b_txt = jax.random.uniform(k_bt, (OUT_FEATURES,),
                               minval=-bound, maxval=bound, dtype=jnp.float32)

    w_packed, b_packed = pack_params(w_img_t, b_img, w_txt_t, b_txt)
    out = multifusion(image_embedding, text_embedding, w_packed, b_packed)
    out = jax.block_until_ready(out)
    assert out.shape == (batch, 2, OUT_FEATURES), out.shape

    # Reference matching the kernel's bf16-operand / f32-accumulate arithmetic.
    def bf16_f32(a):
        return a.astype(jnp.bfloat16).astype(jnp.float32)

    img_flat = bf16_f32(image_embedding.reshape(batch, -1))
    txt_flat = bf16_f32(text_embedding.reshape(batch, -1))
    ref = jnp.stack([img_flat @ bf16_f32(w_img_t) + b_img,
                     txt_flat @ bf16_f32(w_txt_t) + b_txt], axis=1)
    assert jnp.allclose(out, ref, atol=1e-3, rtol=1e-3), "mismatch vs bf16 reference"

    # Loose check against the exact f32 module semantics (bf16 streaming is a
    # deliberate precision/bandwidth trade-off from the perf review).
    ref_f32 = jnp.stack(
        [image_embedding.reshape(batch, -1) @ w_img_t + b_img,
         text_embedding.reshape(batch, -1) @ w_txt_t + b_txt], axis=1)
    assert jnp.allclose(out, ref_f32, atol=5e-2, rtol=5e-2), "mismatch vs f32 reference"

    print("KERNEL_OK")
</pallas_src>

<mosaic_0001>
module attributes {stable_mosaic.version = 11 : i64} {
  func.func @multifusion_kernel(%arg0: i32, %arg1: memref<2x3584xf32, #tpu.memory_space<vmem>>, %arg2: memref<2x3584xf32, #tpu.memory_space<vmem>>, %arg3: memref<2x3584x512xbf16, #tpu.memory_space<vmem>>, %arg4: memref<2x1x512xf32, #tpu.memory_space<vmem>>, %arg5: memref<2x1024xf32, #tpu.memory_space<vmem>>) attributes {dimension_semantics = [#tpu.dimension_semantics<parallel>], iteration_bounds = array<i64: 1>, scalar_prefetch = 0 : i64, scratch_operands = 0 : i64, tpu.core_type = #tpu.core_type<tc>, window_params = [{transform_indices = @transform_0, window_bounds = array<i64: 2, 3584>}, {transform_indices = @transform_1, window_bounds = array<i64: 2, 3584>}, {pipeline_mode = #tpu.pipeline_mode<synchronous>, transform_indices = @transform_2, window_bounds = array<i64: 2, 3584, 512>}, {pipeline_mode = #tpu.pipeline_mode<synchronous>, transform_indices = @transform_3, window_bounds = array<i64: 2, 1, 512>}, {transform_indices = @transform_4, window_bounds = array<i64: 2, 1024>}]} {
    %c0 = arith.constant 0 : index
    %c0_0 = arith.constant 0 : index
    %0 = vector.load %arg1[%c0, %c0_0] : memref<2x3584xf32, #tpu.memory_space<vmem>>, vector<2x3584xf32>
    %1 = arith.truncf %0 : vector<2x3584xf32> to vector<2x3584xbf16>
    %c0_1 = arith.constant 0 : index
    %c0_2 = arith.constant 0 : index
    %2 = vector.load %arg2[%c0_1, %c0_2] : memref<2x3584xf32, #tpu.memory_space<vmem>>, vector<2x3584xf32>
    %3 = arith.truncf %2 : vector<2x3584xf32> to vector<2x3584xbf16>
    %c0_3 = arith.constant 0 : index
    %c0_4 = arith.constant 0 : index
    %c0_5 = arith.constant 0 : index
    %4 = vector.load %arg3[%c0_3, %c0_4, %c0_5] : memref<2x3584x512xbf16, #tpu.memory_space<vmem>>, vector<1x3584x512xbf16>
    %5 = vector.shape_cast %4 : vector<1x3584x512xbf16> to vector<3584x512xbf16>
    %cst = arith.constant dense<0.000000e+00> : vector<2x512xf32>
    %6 = tpu.matmul %1, %5, %cst {dimension_numbers = #tpu.dot_dimension_numbers<[1], [0], [0], [1], [0, 0, 1, 1], [], []>} : vector<2x3584xbf16>, vector<3584x512xbf16>, vector<2x512xf32> -> vector<2x512xf32>
    %c1 = arith.constant 1 : index
    %c0_6 = arith.constant 0 : index
    %c0_7 = arith.constant 0 : index
    %7 = vector.load %arg3[%c1, %c0_6, %c0_7] : memref<2x3584x512xbf16, #tpu.memory_space<vmem>>, vector<1x3584x512xbf16>
    %8 = vector.shape_cast %7 : vector<1x3584x512xbf16> to vector<3584x512xbf16>
    %cst_8 = arith.constant dense<0.000000e+00> : vector<2x512xf32>
    %9 = tpu.matmul %3, %8, %cst_8 {dimension_numbers = #tpu.dot_dimension_numbers<[1], [0], [0], [1], [0, 0, 1, 1], [], []>} : vector<2x3584xbf16>, vector<3584x512xbf16>, vector<2x512xf32> -> vector<2x512xf32>
    %c0_9 = arith.constant 0 : index
    %c0_10 = arith.constant 0 : index
    %c0_11 = arith.constant 0 : index
    %10 = vector.load %arg4[%c0_9, %c0_10, %c0_11] : memref<2x1x512xf32, #tpu.memory_space<vmem>>, vector<1x1x512xf32>
    %11 = vector.shape_cast %10 : vector<1x1x512xf32> to vector<1x512xf32>
    %12 = vector.broadcast %11 : vector<1x512xf32> to vector<2x512xf32>
    %13 = arith.addf %6, %12 : vector<2x512xf32>
    %c0_12 = arith.constant 0 : index
    %c0_13 = arith.constant 0 : index
    %14 = vector.load %arg5[%c0_12, %c0_13] : memref<2x1024xf32, #tpu.memory_space<vmem>>, vector<2x512xf32>
    tpu.vector_store %arg5[%c0_12, %c0_13], %13 {strides = array<i32>} : memref<2x1024xf32, #tpu.memory_space<vmem>>, vector<2x512xf32>,
    %c1_14 = arith.constant 1 : index
    %c0_15 = arith.constant 0 : index
    %c0_16 = arith.constant 0 : index
    %15 = vector.load %arg4[%c1_14, %c0_15, %c0_16] : memref<2x1x512xf32, #tpu.memory_space<vmem>>, vector<1x1x512xf32>
    %16 = vector.shape_cast %15 : vector<1x1x512xf32> to vector<1x512xf32>
    %17 = vector.broadcast %16 : vector<1x512xf32> to vector<2x512xf32>
    %18 = arith.addf %9, %17 : vector<2x512xf32>
    %c0_17 = arith.constant 0 : index
    %c512 = arith.constant 512 : index
    %19 = vector.load %arg5[%c0_17, %c512] : memref<2x1024xf32, #tpu.memory_space<vmem>>, vector<2x512xf32>
    tpu.vector_store %arg5[%c0_17, %c512], %18 {strides = array<i32>} : memref<2x1024xf32, #tpu.memory_space<vmem>>, vector<2x512xf32>,
    return
  }
  func.func @transform_0(%arg0: i32) -> (i32, i32) {
    %c0_i32 = arith.constant 0 : i32
    %c0_i32_0 = arith.constant 0 : i32
    return %arg0, %c0_i32 : i32, i32
  }
  func.func @transform_1(%arg0: i32) -> (i32, i32) {
    %c0_i32 = arith.constant 0 : i32
    %c0_i32_0 = arith.constant 0 : i32
    return %arg0, %c0_i32 : i32, i32
  }
  func.func @transform_2(%arg0: i32) -> (i32, i32, i32) {
    %c0_i32 = arith.constant 0 : i32
    %c0_i32_0 = arith.constant 0 : i32
    %c0_i32_1 = arith.constant 0 : i32
    %c0_i32_2 = arith.constant 0 : i32
    return %c0_i32, %c0_i32_0, %c0_i32_1 : i32, i32, i32
  }
  func.func @transform_3(%arg0: i32) -> (i32, i32, i32) {
    %c0_i32 = arith.constant 0 : i32
    %c0_i32_0 = arith.constant 0 : i32
    %c0_i32_1 = arith.constant 0 : i32
    %c0_i32_2 = arith.constant 0 : i32
    return %c0_i32, %c0_i32_0, %c0_i32_1 : i32, i32, i32
  }
  func.func @transform_4(%arg0: i32) -> (i32, i32) {
    %c0_i32 = arith.constant 0 : i32
    %c0_i32_0 = arith.constant 0 : i32
    return %arg0, %c0_i32 : i32, i32
  }
}

</mosaic_0001>

<bundles_post_ra>
// kernel: tpu_custom_call.1
= control target key start
LH: loop header
LB: loop body
LE: loop exit
PB: predicated region body
PF: predicated region fallthrough
CT: control target
= control target key end

     0   :  { %9 = vsyncpa [#allocation3], 0  ;;  %s18852_s0 = inlined_call_operand.hbm [shape: f32[2,3584], index: 0, kind: input, shape index: {}]   ;;  %s18853_s1 = inlined_call_operand.hbm [shape: f32[2,3584], index: 1, kind: input, shape index: {}]   ;;  %s18854_s2 = inlined_call_operand.hbm [shape: bf16[2,3584,512], index: 2, kind: input, shape index: {}]   ;;  %s18855_s3 = inlined_call_operand.hbm [shape: f32[2,1,512], index: 3, kind: input, shape index: {}]   ;;  %s18856_s4 = inlined_call_operand.hbm [shape: f32[2,1024], index: 4, kind: output, shape index: {}]  }
   0x1   :  { %10 = vsyncpa [#allocation6], 0 }
   0x2   :  { %11 = vsyncpa [#allocation9], 0 }
   0x3   :  { %12 = vsyncpa [#allocation4], 0  ;;  %s18218_s15 = smov [#allocation5]   ;;  %s18219_s17 = smov [#allocation2]  }
   0x4   :  { %s29_s16 = sshll.u32 %s18218_s15, 4  ;;  %s19_s18 = sshll.u32 %s18219_s17, 4  ;;  %s30_s16 = int_to_ptr.vmem [resolvable:$true] %s29_s16  ;;  %s20_s18 = int_to_ptr.vmem [resolvable:$true] %s19_s18 }
   0x5   :  { %s18118_s19 = scalar_lea.vmem %s30_s16, 896  ;;  %p18123_p1 = scmp.lt.s32.totalorder %s30_s16, %s30_s16 }
   0x6   :  { %p18119_p0 = scmp.ne.s32.totalorder %s30_s16, %s18118_s19  ;;  %p18124_p2 = scmp.lt.s32.totalorder %s18118_s19, %s18118_s19 }
   0x8   :  { %p18125_p3 = por %p18124_p2, %p18123_p1 }
   0xa   :  { %p18126_p4 = pnand %p18125_p3, %p18119_p0 }
   0xc   :  { %18129 = shalt.err (!%p18126_p4)
}
   0xd   :  { %32 = dma.hbm_to_vmem [thread:$0]  %s18853_s1, 896, %s30_s16, [#allocation6]  }
   0xe   :  { %s18138_s22 = scalar_lea.vmem %s20_s18, 896  ;;  %p18143_p6 = scmp.lt.s32.totalorder %s20_s18, %s20_s18 }
   0xf   :  { %p18139_p5 = scmp.ne.s32.totalorder %s20_s18, %s18138_s22  ;;  %p18144_p7 = scmp.lt.s32.totalorder %s18138_s22, %s18138_s22 }
  0x11   :  { %p18145_p8 = por %p18144_p7, %p18143_p6 }
  0x13   :  { %p18146_p9 = pnand %p18145_p8, %p18139_p5 }
  0x15   :  { %18149 = shalt.err (!%p18146_p9)
}
  0x16   :  { %22 = dma.hbm_to_vmem [thread:$0]  %s18852_s0, 896, %s20_s18, [#allocation3]  }
  0x17   :  { %s18220_s25 = smov [#allocation7]  }
  0x18   :  { %s38_s26 = sshll.u32 %s18220_s25, 4  ;;  %s39_s26 = int_to_ptr.vmem [resolvable:$true] %s38_s26 }
  0x19   :  { %s18158_s27 = scalar_lea.vmem %s39_s26, 229376  ;;  %p18163_p11 = scmp.lt.s32.totalorder %s39_s26, %s39_s26 }
  0x1a   :  { %p18159_p10 = scmp.ne.s32.totalorder %s39_s26, %s18158_s27  ;;  %p18164_p12 = scmp.lt.s32.totalorder %s18158_s27, %s18158_s27 }
  0x1c   :  { %p18165_p13 = por %p18164_p12, %p18163_p11 }
  0x1e   :  { %p18166_p0 = pnand %p18165_p13, %p18159_p10 }
  0x20   :  { %18169 = shalt.err (!%p18166_p0)
}
  0x21   :  { %s18221_s1 = smov 256   ;;  %s18222_s28 = smov 16  }
  0x22   :  { %44 = dma.hbm_to_vmem [thread:$0]  %s18854_s2, 229376, %s39_s26, [#allocation6], %s18221_s1, %s18221_s1, %s18222_s28  }
  0x23   :  { %s18223_s5 = smov [#allocation8]  }
  0x24   :  { %s50_s6 = sshll.u32 %s18223_s5, 4  ;;  %s51_s6 = int_to_ptr.vmem [resolvable:$true] %s50_s6 }
  0x25   :  { %s18178_s0 = scalar_lea.vmem %s51_s6, 128  ;;  %p18183_p2 = scmp.lt.s32.totalorder %s51_s6, %s51_s6 }
  0x26   :  { %p18179_p1 = scmp.ne.s32.totalorder %s51_s6, %s18178_s0  ;;  %p18184_p3 = scmp.lt.s32.totalorder %s18178_s0, %s18178_s0 }
  0x28   :  { %p18185_p4 = por %p18184_p3, %p18183_p2 }
  0x2a   :  { %p18186_p5 = pnand %p18185_p4, %p18179_p1 }
  0x2c   :  { %18189 = shalt.err (!%p18186_p5)
}
  0x2d   :  { %s18224_s7 = smov 64   ;;  %s18225_s8 = smov 4  }
  0x2e   :  { %56 = dma.hbm_to_vmem [thread:$0]  %s18855_s3, 128, %s51_s6, [#allocation9], %s18224_s7, %s18224_s7, %s18225_s8  }
  0x2f   :  { %18210 = dma.done.wait [#allocation3], 896  }
  0x30   :  { %18211 = vsyncadd [#allocation3], 4294966400 }
  0x31   :  { %18212 = dma.done.wait [#allocation6], 230272  }
  0x32   :  { %18213 = vsyncadd [#allocation6], 4294737024 }
  0x33   :  { %18214 = dma.done.wait [#allocation9], 128  }
  0x34   :  { %18215 = vsyncadd [#allocation9], 4294967168  ;;  %v15406_v0 = vld [vmem:[#allocation7 + $0xe4] ss:$16 sps:$4 sm:$0xff]   ;;  %v15410_v2 = vld [vmem:[#allocation7 + $0xe0] ss:$16 sps:$4 sm:$0xff]   ;;  %v87_v38 = vlaneseq }
  0x35   :  { %v15408_v1 = vld [vmem:[#allocation7 + $0x2e4] ss:$16 sps:$4 sm:$0xff]   ;;  %6742 = vmatprep.subr.bf16.mxu0 %v15406_v0  ;;  %v15411_v3 = vld [vmem:[#allocation7 + $0x2e0] ss:$16 sps:$4 sm:$0xff]   ;;  %v18226_v36 = vmov 1983009808  }
  0x36   :  { %6783 = vmatprep.subr.bf16.mxu1 %v15408_v1  ;;  %v15412_v4 = vld [vmem:[#allocation7 + $0xc4] ss:$16 sps:$4 sm:$0xff]   ;;  %6743 = vmatpush1.bf16.msra.mxu0 %v15410_v2  ;;  %v15416_v6 = vld [vmem:[#allocation7 + $0xc0] ss:$16 sps:$4 sm:$0xff]   ;;  %v85_v37 = vunpack.c.l.s4 %v18226_v36  ;;  %v18265_v43 = vshrl.u32 %v87_v38, 7  ;;  %s18227_s2 = smov [#allocation10]  }
  0x37   :  { %6784 = vmatpush1.bf16.msra.mxu1 %v15411_v3  ;;  %v15414_v5 = vld [vmem:[#allocation7 + $0x2c4] ss:$16 sps:$4 sm:$0xff]   ;;  %6744 = vmatprep.subr.bf16.mxu0 %v15412_v4  ;;  %v15417_v7 = vld [vmem:[#allocation7 + $0x2c0] ss:$16 sps:$4 sm:$0xff]   ;;  %s13593_s3 = sshll.u32 %s18227_s2, 4  ;;  %s13594_s3 = int_to_ptr.vmem [resolvable:$true] %s13593_s3 }
  0x38   :  { %6785 = vmatprep.subr.bf16.mxu1 %v15414_v5  ;;  %v15418_v8 = vld [vmem:[#allocation7 + $0xa4] ss:$16 sps:$4 sm:$0xff]   ;;  %v15422_v10 = vld [vmem:[#allocation7 + $0xa0] ss:$16 sps:$4 sm:$0xff]   ;;  %v86_v42 = vunpack.c.0.s8 %v85_v37  ;;  %s18190_s11 = scalar_lea.vmem %s13594_s3, 256  ;;  %p18195_p7 = scmp.lt.s32.totalorder %s13594_s3, %s13594_s3 }
  0x39   :  { %v15420_v9 = vld [vmem:[#allocation7 + $0x2a4] ss:$16 sps:$4 sm:$0xff]   ;;  %v15423_v11 = vld [vmem:[#allocation7 + $0x2a0] ss:$16 sps:$4 sm:$0xff]   ;;  %p18191_p6 = scmp.ne.s32.totalorder %s13594_s3, %s18190_s11  ;;  %p18196_p8 = scmp.lt.s32.totalorder %s18190_s11, %s18190_s11 }
  0x3a   :  { %6745 = vmatpush1.bf16.msra.mxu0 %v15416_v6  ;;  %v15424_v12 = vld [vmem:[#allocation7 + $0x84] ss:$16 sps:$4 sm:$0xff]   ;;  %v15428_v14 = vld [vmem:[#allocation7 + $0x80] ss:$16 sps:$4 sm:$0xff]   ;;  %v18268_v49 = vsub.s32 %v86_v42, %v18265_v43  ;;  %v70_v42 = vld [vmem:[#allocation2 + $0x8] sm:$0xff] }
  0x3b   :  { %6786 = vmatpush1.bf16.msra.mxu1 %v15417_v7  ;;  %6746 = vmatprep.subr.bf16.mxu0 %v15418_v8  ;;  %v15426_v13 = vld [vmem:[#allocation7 + $0x284] ss:$16 sps:$4 sm:$0xff]   ;;  %v15429_v15 = vld [vmem:[#allocation7 + $0x280] ss:$16 sps:$4 sm:$0xff]   ;;  %p18197_p9 = por %p18196_p8, %p18195_p7 }
  0x3c   :  { %6787 = vmatprep.subr.bf16.mxu1 %v15420_v9  ;;  %v15430_v16 = vld [vmem:[#allocation7 + $0x64] ss:$16 sps:$4 sm:$0xff]   ;;  %v15434_v18 = vld [vmem:[#allocation7 + $0x60] ss:$16 sps:$4 sm:$0xff]  }
  0x3d   :  { %v15432_v17 = vld [vmem:[#allocation7 + $0x264] ss:$16 sps:$4 sm:$0xff]   ;;  %v15435_v19 = vld [vmem:[#allocation7 + $0x260] ss:$16 sps:$4 sm:$0xff]   ;;  %p18198_p10 = pnand %p18197_p9, %p18191_p6 }
  0x3e   :  { %6747 = vmatpush1.bf16.msra.mxu0 %v15422_v10  ;;  %v15436_v20 = vld [vmem:[#allocation7 + $0x44] ss:$16 sps:$4 sm:$0xff]   ;;  %v15440_v22 = vld [vmem:[#allocation7 + $0x40] ss:$16 sps:$4 sm:$0xff]  }
  0x3f   :  { %6788 = vmatpush1.bf16.msra.mxu1 %v15423_v11  ;;  %6748 = vmatprep.subr.bf16.mxu0 %v15424_v12  ;;  %v15438_v21 = vld [vmem:[#allocation7 + $0x244] ss:$16 sps:$4 sm:$0xff]   ;;  %v15441_v23 = vld [vmem:[#allocation7 + $0x240] ss:$16 sps:$4 sm:$0xff]  }
  0x40   :  { %6789 = vmatprep.subr.bf16.mxu1 %v15426_v13  ;;  %v15442_v24 = vld [vmem:[#allocation7 + $0x24] ss:$16 sps:$4 sm:$0xff]   ;;  %v15446_v26 = vld [vmem:[#allocation7 + $0x20] ss:$16 sps:$4 sm:$0xff]  }
  0x41   :  { %v15444_v25 = vld [vmem:[#allocation7 + $0x224] ss:$16 sps:$4 sm:$0xff]   ;;  %v15447_v27 = vld [vmem:[#allocation7 + $0x220] ss:$16 sps:$4 sm:$0xff]  }
  0x42   :  { %6749 = vmatpush1.bf16.msra.mxu0 %v15428_v14  ;;  %v15448_v28 = vld [vmem:[#allocation7 + $0x4] ss:$16 sps:$4 sm:$0xff]   ;;  %v15452_v30 = vld [vmem:[#allocation7] ss:$16 sps:$4 sm:$0xff]  }
  0x43   :  { %6790 = vmatpush1.bf16.msra.mxu1 %v15429_v15  ;;  %6750 = vmatprep.subr.bf16.mxu0 %v15430_v16  ;;  %v15450_v29 = vld [vmem:[#allocation7 + $0x204] ss:$16 sps:$4 sm:$0xff]   ;;  %v15453_v31 = vld [vmem:[#allocation7 + $0x200] ss:$16 sps:$4 sm:$0xff]  }
  0x44   :  { %6791 = vmatprep.subr.bf16.mxu1 %v15432_v17  ;;  %v15454_v32 = vld [vmem:[#allocation7 + $0x1e4] ss:$16 sps:$4 sm:$0xff]   ;;  %v15458_v34 = vld [vmem:[#allocation7 + $0x1e0] ss:$16 sps:$4 sm:$0xff]  }
  0x45   :  { %v15456_v33 = vld [vmem:[#allocation7 + $0x3e4] ss:$16 sps:$4 sm:$0xff]   ;;  %v15459_v35 = vld [vmem:[#allocation7 + $0x3e0] ss:$16 sps:$4 sm:$0xff]  }
  0x46   :  { %6751 = vmatpush1.bf16.msra.mxu0 %v15434_v18  ;;  %v15460_v39 = vld [vmem:[#allocation7 + $0x1c4] ss:$16 sps:$4 sm:$0xff]   ;;  %v15464_v41 = vld [vmem:[#allocation7 + $0x1c0] ss:$16 sps:$4 sm:$0xff]  }
  0x47   :  { %6792 = vmatpush1.bf16.msra.mxu1 %v15435_v19  ;;  %6752 = vmatprep.subr.bf16.mxu0 %v15436_v20  ;;  %v15462_v40 = vld [vmem:[#allocation7 + $0x3c4] ss:$16 sps:$4 sm:$0xff]   ;;  %v15465_v44 = vld [vmem:[#allocation7 + $0x3c0] ss:$16 sps:$4 sm:$0xff]  }
  0x48   :  { %6793 = vmatprep.subr.bf16.mxu1 %v15438_v21  ;;  %v15466_v45 = vld [vmem:[#allocation7 + $0x1a4] ss:$16 sps:$4 sm:$0xff]   ;;  %v15470_v47 = vld [vmem:[#allocation7 + $0x1a0] ss:$16 sps:$4 sm:$0xff]  }
  0x49   :  { %v15468_v46 = vld [vmem:[#allocation7 + $0x3a4] ss:$16 sps:$4 sm:$0xff]   ;;  %v15471_v48 = vld [vmem:[#allocation7 + $0x3a0] ss:$16 sps:$4 sm:$0xff]  }
  0x4a   :  { %6753 = vmatpush1.bf16.msra.mxu0 %v15440_v22  ;;  %v15472_v50 = vld [vmem:[#allocation7 + $0x184] ss:$16 sps:$4 sm:$0xff]   ;;  %v15476_v53 = vld [vmem:[#allocation7 + $0x180] ss:$16 sps:$4 sm:$0xff]  }
  0x4b   :  { %6794 = vmatpush1.bf16.msra.mxu1 %v15441_v23  ;;  %6754 = vmatprep.subr.bf16.mxu0 %v15442_v24  ;;  %v15474_v51 = vld [vmem:[#allocation7 + $0x384] ss:$16 sps:$4 sm:$0xff]   ;;  %v15477_v56 = vld [vmem:[#allocation7 + $0x380] ss:$16 sps:$4 sm:$0xff]  }
  0x4c   :  { %6795 = vmatprep.subr.bf16.mxu1 %v15444_v25  ;;  %v69_v52 = vld [vmem:[#allocation2] sm:$0xff] }
  0x4d   :  { %v90_v54 = vrot.slane %v69_v52, %v18268_v49  ;;  %v83_v55 = vcombine.high %v69_v52, %v69_v52  ;;  %v15478_v57 = vld [vmem:[#allocation7 + $0x164] ss:$16 sps:$4 sm:$0xff]   ;;  %v15482_v61 = vld [vmem:[#allocation7 + $0x160] ss:$16 sps:$4 sm:$0xff]  }
  0x4e   :  { %6755 = vmatpush1.bf16.msra.mxu0 %v15446_v26  ;;  %v15480_v58 = vld [vmem:[#allocation7 + $0x364] ss:$16 sps:$4 sm:$0xff]   ;;  %v15483_v0 = vld [vmem:[#allocation7 + $0x360] ss:$16 sps:$4 sm:$0xff]  }
  0x4f   :  { %6796 = vmatpush1.bf16.msra.mxu1 %v15447_v27  ;;  %6756 = vmatprep.subr.bf16.mxu0 %v15448_v28  ;;  %v98_v59 = vcombine.high %v90_v54, %v90_v54  ;;  %v97_v60 = vrot.slane %v83_v55, %v18268_v49  ;;  %v15484_v1 = vld [vmem:[#allocation7 + $0x144] ss:$16 sps:$4 sm:$0xff]   ;;  %v15488_v4 = vld [vmem:[#allocation7 + $0x140] ss:$16 sps:$4 sm:$0xff]   ;;  %v18278_v16 = vpack.c.bf16 %v90_v54, %v90_v54 }
  0x50   :  { %6797 = vmatprep.subr.bf16.mxu1 %v15450_v29  ;;  %v15486_v2 = vld [vmem:[#allocation7 + $0x344] ss:$16 sps:$4 sm:$0xff]   ;;  %v15489_v5 = vld [vmem:[#allocation7 + $0x340] ss:$16 sps:$4 sm:$0xff]  }
  0x51   :  { %v18272_v62 = vpack.c.bf16 %v98_v59, %v98_v59  ;;  %v99_v63 = vcombine.high %v97_v60, %v97_v60  ;;  %v15490_v6 = vld [vmem:[#allocation7 + $0x124] ss:$16 sps:$4 sm:$0xff]   ;;  %v15494_v8 = vld [vmem:[#allocation7 + $0x120] ss:$16 sps:$4 sm:$0xff]   ;;  %v18280_v17 = vpack.c.bf16 %v97_v60, %v97_v60 }
  0x52   :  { %6757 = vmatpush1.bf16.msra.mxu0 %v15452_v30  ;;  %v15492_v7 = vld [vmem:[#allocation7 + $0x324] ss:$16 sps:$4 sm:$0xff]   ;;  %v15495_v9 = vld [vmem:[#allocation7 + $0x320] ss:$16 sps:$4 sm:$0xff]  }
  0x53   :  { %6798 = vmatpush1.bf16.msra.mxu1 %v15453_v31  ;;  %6758 = vmatprep.subr.bf16.mxu0 %v15454_v32  ;;  %v18274_v3 = vpack.c.bf16 %v99_v63, %v99_v63  ;;  %v15496_v10 = vld [vmem:[#allocation7 + $0x104] ss:$16 sps:$4 sm:$0xff]   ;;  %v15500_v12 = vld [vmem:[#allocation7 + $0x100] ss:$16 sps:$4 sm:$0xff]  }
  0x54   :  { %6799 = vmatprep.subr.bf16.mxu1 %v15456_v33  ;;  %6774 = vmatprep.mubr.bf16.mxu0 %v18272_v62  ;;  %v15498_v11 = vld [vmem:[#allocation7 + $0x304] ss:$16 sps:$4 sm:$0xff]   ;;  %v15501_v13 = vld [vmem:[#allocation7 + $0x300] ss:$16 sps:$4 sm:$0xff]  }
  0x55   :  { %6815 = vmatprep.mubr.bf16.mxu1 %v18274_v3  ;;  %v15505_v14 = vld [vmem:[#allocation7 + $0x4e4] ss:$16 sps:$4 sm:$0xff]   ;;  %v15503_v18 = vld [vmem:[#allocation7 + $0x4e0] ss:$16 sps:$4 sm:$0xff]  }
  0x56   :  { %6759 = vmatpush2.bf16.msra.mxu0 %v15458_v34  ;;  %v15508_v15 = vld [vmem:[#allocation7 + $0x6e4] ss:$16 sps:$4 sm:$0xff]   ;;  %v15506_v19 = vld [vmem:[#allocation7 + $0x6e0] ss:$16 sps:$4 sm:$0xff]  }
  0x57   :  { %6800 = vmatpush2.bf16.msra.mxu1 %v15459_v35  ;;  %6760 = vmatprep.subr.bf16.mxu0 %v15460_v39  ;;  %v15511_v20 = vld [vmem:[#allocation7 + $0x4c4] ss:$16 sps:$4 sm:$0xff]   ;;  %v15509_v22 = vld [vmem:[#allocation7 + $0x4c0] ss:$16 sps:$4 sm:$0xff]  }
  0x58   :  { %6801 = vmatprep.subr.bf16.mxu1 %v15462_v40  ;;  %v15514_v21 = vld [vmem:[#allocation7 + $0x6c4] ss:$16 sps:$4 sm:$0xff]   ;;  %v15512_v23 = vld [vmem:[#allocation7 + $0x6c0] ss:$16 sps:$4 sm:$0xff]  }
  0x59   :  { %v15517_v24 = vld [vmem:[#allocation7 + $0x4a4] ss:$16 sps:$4 sm:$0xff]   ;;  %v15515_v26 = vld [vmem:[#allocation7 + $0x4a0] ss:$16 sps:$4 sm:$0xff]  }
  0x5a   :  { %6761 = vmatpush2.bf16.msra.mxu0 %v15464_v41  ;;  %v15520_v25 = vld [vmem:[#allocation7 + $0x6a4] ss:$16 sps:$4 sm:$0xff]   ;;  %v15518_v27 = vld [vmem:[#allocation7 + $0x6a0] ss:$16 sps:$4 sm:$0xff]  }
  0x5b   :  { %6802 = vmatpush2.bf16.msra.mxu1 %v15465_v44  ;;  %6762 = vmatprep.subr.bf16.mxu0 %v15466_v45  ;;  %v15523_v28 = vld [vmem:[#allocation7 + $0x484] ss:$16 sps:$4 sm:$0xff]   ;;  %v15521_v30 = vld [vmem:[#allocation7 + $0x480] ss:$16 sps:$4 sm:$0xff]   ;;  %v18285_v44 = vrot.slane %v70_v42, %v18268_v49  ;;  %v100_v45 = vcombine.high %v70_v42, %v70_v42 }
  0x5c   :  { %6803 = vmatprep.subr.bf16.mxu1 %v15468_v46  ;;  %v15526_v29 = vld [vmem:[#allocation7 + $0x684] ss:$16 sps:$4 sm:$0xff]   ;;  %v15524_v31 = vld [vmem:[#allocation7 + $0x680] ss:$16 sps:$4 sm:$0xff]  }
  0x5d   :  { %v15529_v32 = vld [vmem:[#allocation7 + $0x464] ss:$16 sps:$4 sm:$0xff]   ;;  %v15527_v34 = vld [vmem:[#allocation7 + $0x460] ss:$16 sps:$4 sm:$0xff]  }
  0x5e   :  { %6763 = vmatpush2.bf16.msra.mxu0 %v15470_v47  ;;  %v15532_v33 = vld [vmem:[#allocation7 + $0x664] ss:$16 sps:$4 sm:$0xff]   ;;  %v15530_v35 = vld [vmem:[#allocation7 + $0x660] ss:$16 sps:$4 sm:$0xff]  }
  0x5f   :  { %6804 = vmatpush2.bf16.msra.mxu1 %v15471_v48  ;;  %6764 = vmatprep.subr.bf16.mxu0 %v15472_v50  ;;  %v15535_v36 = vld [vmem:[#allocation7 + $0x444] ss:$16 sps:$4 sm:$0xff]   ;;  %v15533_v38 = vld [vmem:[#allocation7 + $0x440] ss:$16 sps:$4 sm:$0xff]   ;;  %v115_v48 = vcombine.high %v18285_v44, %v18285_v44  ;;  %v18290_v50 = vrot.slane %v100_v45, %v18268_v49 }
  0x60   :  { %6805 = vmatprep.subr.bf16.mxu1 %v15474_v51  ;;  %v15538_v37 = vld [vmem:[#allocation7 + $0x644] ss:$16 sps:$4 sm:$0xff]   ;;  %v15536_v39 = vld [vmem:[#allocation7 + $0x640] ss:$16 sps:$4 sm:$0xff]  }
  0x61   :  { %v15541_v40 = vld [vmem:[#allocation7 + $0x424] ss:$16 sps:$4 sm:$0xff]   ;;  %v15539_v46 = vld [vmem:[#allocation7 + $0x420] ss:$16 sps:$4 sm:$0xff]   ;;  %v116_v54 = vcombine.high %v18290_v50, %v18290_v50 }
  0x62   :  { %6765 = vmatpush2.bf16.msra.mxu0 %v15476_v53  ;;  %v15544_v41 = vld [vmem:[#allocation7 + $0x624] ss:$16 sps:$4 sm:$0xff]   ;;  %v15542_v47 = vld [vmem:[#allocation7 + $0x620] ss:$16 sps:$4 sm:$0xff]   ;;  %v18292_v53 = vpack.c.bf16 %v115_v48, %v115_v48 }
  0x63   :  { %6806 = vmatpush2.bf16.msra.mxu1 %v15477_v56  ;;  %6766 = vmatprep.subr.bf16.mxu0 %v15478_v57  ;;  %v15547_v51 = vld [vmem:[#allocation7 + $0x404] ss:$16 sps:$4 sm:$0xff]   ;;  %v15545_v55 = vld [vmem:[#allocation7 + $0x400] ss:$16 sps:$4 sm:$0xff]   ;;  %v18296_v57 = vpack.c.bf16 %v116_v54, %v116_v54 }
  0x64   :  { %6807 = vmatprep.subr.bf16.mxu1 %v15480_v58  ;;  %v15550_v52 = vld [vmem:[#allocation7 + $0x604] ss:$16 sps:$4 sm:$0xff]   ;;  %v15548_v56 = vld [vmem:[#allocation7 + $0x600] ss:$16 sps:$4 sm:$0xff]  }
  0x65   :  { %v15553_v58 = vld [vmem:[#allocation7 + $0x5e4] ss:$16 sps:$4 sm:$0xff]   ;;  %v15551_v60 = vld [vmem:[#allocation7 + $0x5e0] ss:$16 sps:$4 sm:$0xff]  }
  0x66   :  { %6767 = vmatpush2.bf16.msra.mxu0 %v15482_v61  ;;  %v15556_v59 = vld [vmem:[#allocation7 + $0x7e4] ss:$16 sps:$4 sm:$0xff]   ;;  %v15554_v61 = vld [vmem:[#allocation7 + $0x7e0] ss:$16 sps:$4 sm:$0xff]  }
  0x67   :  { %6808 = vmatpush2.bf16.msra.mxu1 %v15483_v0  ;;  %6768 = vmatprep.subr.bf16.mxu0 %v15484_v1  ;;  %v15559_v63 = vld [vmem:[#allocation7 + $0x5c4] ss:$16 sps:$4 sm:$0xff]   ;;  %v15557_v1 = vld [vmem:[#allocation7 + $0x5c0] ss:$16 sps:$4 sm:$0xff]  }
  0x68   :  { %6809 = vmatprep.subr.bf16.mxu1 %v15486_v2  ;;  %v15562_v0 = vld [vmem:[#allocation7 + $0x7c4] ss:$16 sps:$4 sm:$0xff]   ;;  %v15560_v2 = vld [vmem:[#allocation7 + $0x7c0] ss:$16 sps:$4 sm:$0xff]  }
  0x69   :  { %v15609_v45 = vld [vmem:[#allocation7 + $0xac0] ss:$16 sps:$4 sm:$0xff]  }
  0x6a   :  { %6769 = vmatpush2.bf16.msra.mxu0 %v15488_v4  ;;  %v15565_v4 = vld [vmem:[#allocation7 + $0x5a4] ss:$16 sps:$4 sm:$0xff]   ;;  %v15615_v54 = vld [vmem:[#allocation7 + $0xaa0] ss:$16 sps:$4 sm:$0xff]  }
  0x6b   :  { %6810 = vmatpush2.bf16.msra.mxu1 %v15489_v5  ;;  %6770 = vmatprep.subr.bf16.mxu0 %v15490_v6  ;;  %v15568_v5 = vld [vmem:[#allocation7 + $0x7a4] ss:$16 sps:$4 sm:$0xff]   ;;  %v15563_v6 = vld [vmem:[#allocation7 + $0x5a0] ss:$16 sps:$4 sm:$0xff]  }
  0x6c   :  { %6811 = vmatprep.subr.bf16.mxu1 %v15492_v7  ;;  %v15566_v7 = vld [vmem:[#allocation7 + $0x7a0] ss:$16 sps:$4 sm:$0xff]  }
  0x6e   :  { %6771 = vmatpush2.bf16.msra.mxu0 %v15494_v8  ;;  %v15571_v8 = vld [vmem:[#allocation7 + $0x584] ss:$16 sps:$4 sm:$0xff]  }
  0x6f   :  { %6812 = vmatpush2.bf16.msra.mxu1 %v15495_v9  ;;  %6772 = vmatprep.subr.bf16.mxu0 %v15496_v10  ;;  %v15574_v9 = vld [vmem:[#allocation7 + $0x784] ss:$16 sps:$4 sm:$0xff]   ;;  %v15569_v10 = vld [vmem:[#allocation7 + $0x580] ss:$16 sps:$4 sm:$0xff]  }
  0x70   :  { %6813 = vmatprep.subr.bf16.mxu1 %v15498_v11  ;;  %v15572_v11 = vld [vmem:[#allocation7 + $0x780] ss:$16 sps:$4 sm:$0xff]  }
  0x72   :  { %6773 = vmatpush2.bf16.msra.mxu0 %v15500_v12  ;;  %v15577_v12 = vld [vmem:[#allocation7 + $0x564] ss:$16 sps:$4 sm:$0xff]  }
  0x73   :  { %6814 = vmatpush2.bf16.msra.mxu1 %v15501_v13  ;;  %6824 = vmatprep.subr.bf16.mxu0 %v15505_v14  ;;  %v15580_v13 = vld [vmem:[#allocation7 + $0x764] ss:$16 sps:$4 sm:$0xff]   ;;  %v15575_v14 = vld [vmem:[#allocation7 + $0x560] ss:$16 sps:$4 sm:$0xff]  }
  0x74   :  { %6865 = vmatprep.subr.bf16.mxu1 %v15508_v15  ;;  %v15578_v15 = vld [vmem:[#allocation7 + $0x760] ss:$16 sps:$4 sm:$0xff]  }
  0x75   :  { %6775 = vmatmul.mubr.bf16.vlgmr.msra.gmra.mxu0 %v18278_v16 }
  0x76   :  { %6816 = vmatmul.mubr.bf16.vlgmr.msra.gmra.mxu1 %v18280_v17  ;;  %6825 = vmatpush1.bf16.msra.mxu0 %v15503_v18  ;;  %v15583_v18 = vld [vmem:[#allocation7 + $0x544] ss:$16 sps:$4 sm:$0xff]  }
  0x77   :  { %6866 = vmatpush1.bf16.msra.mxu1 %v15506_v19  ;;  %6826 = vmatprep.subr.bf16.mxu0 %v15511_v20  ;;  %v15586_v19 = vld [vmem:[#allocation7 + $0x744] ss:$16 sps:$4 sm:$0xff]   ;;  %v15581_v20 = vld [vmem:[#allocation7 + $0x540] ss:$16 sps:$4 sm:$0xff]  }
  0x78   :  { %6867 = vmatprep.subr.bf16.mxu1 %v15514_v21  ;;  %6856 = vmatprep.mubr.bf16.mxu0 %v18292_v53  ;;  %v15584_v21 = vld [vmem:[#allocation7 + $0x740] ss:$16 sps:$4 sm:$0xff]  }
  0x79   :  { %6897 = vmatprep.mubr.bf16.mxu1 %v18296_v57 }
  0x7a   :  { %6827 = vmatpush1.bf16.msra.mxu0 %v15509_v22  ;;  %v15589_v22 = vld [vmem:[#allocation7 + $0x524] ss:$16 sps:$4 sm:$0xff]  }
  0x7b   :  { %6868 = vmatpush1.bf16.msra.mxu1 %v15512_v23  ;;  %6828 = vmatprep.subr.bf16.mxu0 %v15517_v24  ;;  %v15592_v23 = vld [vmem:[#allocation7 + $0x724] ss:$16 sps:$4 sm:$0xff]   ;;  %v15587_v24 = vld [vmem:[#allocation7 + $0x520] ss:$16 sps:$4 sm:$0xff]  }
  0x7c   :  { %6869 = vmatprep.subr.bf16.mxu1 %v15520_v25  ;;  %v15590_v25 = vld [vmem:[#allocation7 + $0x720] ss:$16 sps:$4 sm:$0xff]  }
  0x7e   :  { %6829 = vmatpush1.bf16.msra.mxu0 %v15515_v26  ;;  %v15595_v26 = vld [vmem:[#allocation7 + $0x504] ss:$16 sps:$4 sm:$0xff]  }
  0x7f   :  { %6870 = vmatpush1.bf16.msra.mxu1 %v15518_v27  ;;  %6830 = vmatprep.subr.bf16.mxu0 %v15523_v28  ;;  %v15598_v27 = vld [vmem:[#allocation7 + $0x704] ss:$16 sps:$4 sm:$0xff]   ;;  %v15593_v28 = vld [vmem:[#allocation7 + $0x500] ss:$16 sps:$4 sm:$0xff]  }
  0x80   :  { %6871 = vmatprep.subr.bf16.mxu1 %v15526_v29  ;;  %v15596_v29 = vld [vmem:[#allocation7 + $0x700] ss:$16 sps:$4 sm:$0xff]  }
  0x82   :  { %6831 = vmatpush1.bf16.msra.mxu0 %v15521_v30  ;;  %v15602_v30 = vld [vmem:[#allocation7 + $0x8e4] ss:$16 sps:$4 sm:$0xff]  }
  0x83   :  { %6872 = vmatpush1.bf16.msra.mxu1 %v15524_v31  ;;  %6832 = vmatprep.subr.bf16.mxu0 %v15529_v32  ;;  %v15605_v31 = vld [vmem:[#allocation7 + $0xae4] ss:$16 sps:$4 sm:$0xff]   ;;  %v18302_v32 = vpack.c.bf16 %v18285_v44, %v18285_v44 }
  0x84   :  { %6873 = vmatprep.subr.bf16.mxu1 %v15532_v33  ;;  %v18306_v33 = vpack.c.bf16 %v18290_v50, %v18290_v50 }
  0x86   :  { %6833 = vmatpush1.bf16.msra.mxu0 %v15527_v34  ;;  %v15600_v34 = vld [vmem:[#allocation7 + $0x8e0] ss:$16 sps:$4 sm:$0xff]  }
  0x87   :  { %6874 = vmatpush1.bf16.msra.mxu1 %v15530_v35  ;;  %6834 = vmatprep.subr.bf16.mxu0 %v15535_v36  ;;  %v15603_v35 = vld [vmem:[#allocation7 + $0xae0] ss:$16 sps:$4 sm:$0xff]   ;;  %v15608_v36 = vld [vmem:[#allocation7 + $0x8c4] ss:$16 sps:$4 sm:$0xff]  }
  0x88   :  { %6875 = vmatprep.subr.bf16.mxu1 %v15538_v37  ;;  %v71_v37 = vld [vmem:[#allocation2 + $0x10] sm:$0xff] }
  0x8a   :  { %6835 = vmatpush1.bf16.msra.mxu0 %v15533_v38  ;;  %v15611_v38 = vld [vmem:[#allocation7 + $0xac4] ss:$16 sps:$4 sm:$0xff]  }
  0x8b   :  { %6876 = vmatpush1.bf16.msra.mxu1 %v15536_v39  ;;  %6836 = vmatprep.subr.bf16.mxu0 %v15541_v40  ;;  %v18309_v39 = vrot.slane %v71_v37, %v18268_v49  ;;  %v117_v40 = vcombine.high %v71_v37, %v71_v37  ;;  %v15675_v37 = vld [vmem:[#allocation7 + $0xb60] ss:$16 sps:$4 sm:$0xff]  }
  0x8c   :  { %6877 = vmatprep.subr.bf16.mxu1 %v15544_v41  ;;  %v15606_v41 = vld [vmem:[#allocation7 + $0x8c0] ss:$16 sps:$4 sm:$0xff]  }
  0x8d   :  { %v132_v42 = vcombine.high %v18309_v39, %v18309_v39  ;;  %v18316_v44 = vrot.slane %v117_v40, %v18268_v49  ;;  %v15683_v40 = vld [vmem:[#allocation7 + $0xb44] ss:$16 sps:$4 sm:$0xff]  }
  0x8e   :  { %6837 = vmatpush1.bf16.msra.mxu0 %v15539_v46  ;;  %v15614_v46 = vld [vmem:[#allocation7 + $0x8a4] ss:$16 sps:$4 sm:$0xff]  }
  0x8f   :  { %6878 = vmatpush1.bf16.msra.mxu1 %v15542_v47  ;;  %6838 = vmatprep.subr.bf16.mxu0 %v15547_v51  ;;  %v15617_v47 = vld [vmem:[#allocation7 + $0xaa4] ss:$16 sps:$4 sm:$0xff]   ;;  %v18318_v48 = vpack.c.bf16 %v132_v42, %v132_v42  ;;  %v133_v50 = vcombine.high %v18316_v44, %v18316_v44  ;;  %v15612_v51 = vld [vmem:[#allocation7 + $0x8a0] ss:$16 sps:$4 sm:$0xff]   ;;  %v72_v42 = vld [vmem:[#allocation2 + $0x18] sm:$0xff] }
  0x90   :  { %6879 = vmatprep.subr.bf16.mxu1 %v15550_v52 }
  0x91   :  { %v18323_v52 = vpack.c.bf16 %v133_v50, %v133_v50  ;;  %v134_v50 = vcombine.high %v72_v42, %v72_v42 }
  0x92   :  { %6839 = vmatpush1.bf16.msra.mxu0 %v15545_v55  ;;  %v15620_v55 = vld [vmem:[#allocation7 + $0x884] ss:$16 sps:$4 sm:$0xff]  }
  0x93   :  { %6880 = vmatpush1.bf16.msra.mxu1 %v15548_v56  ;;  %6840 = vmatprep.subr.bf16.mxu0 %v15553_v58  ;;  %v15623_v56 = vld [vmem:[#allocation7 + $0xa84] ss:$16 sps:$4 sm:$0xff]   ;;  %v15618_v58 = vld [vmem:[#allocation7 + $0x880] ss:$16 sps:$4 sm:$0xff]  }
  0x94   :  { %6881 = vmatprep.subr.bf16.mxu1 %v15556_v59  ;;  %v15621_v59 = vld [vmem:[#allocation7 + $0xa80] ss:$16 sps:$4 sm:$0xff]  }
  0x96   :  { %6841 = vmatpush2.bf16.msra.mxu0 %v15551_v60  ;;  %v15626_v60 = vld [vmem:[#allocation7 + $0x864] ss:$16 sps:$4 sm:$0xff]  }
  0x97   :  { %6882 = vmatpush2.bf16.msra.mxu1 %v15554_v61  ;;  %6842 = vmatprep.subr.bf16.mxu0 %v15559_v63  ;;  %v15629_v61 = vld [vmem:[#allocation7 + $0xa64] ss:$16 sps:$4 sm:$0xff]   ;;  %v15624_v63 = vld [vmem:[#allocation7 + $0x860] ss:$16 sps:$4 sm:$0xff]  }
  0x98   :  { %6883 = vmatprep.subr.bf16.mxu1 %v15562_v0  ;;  %v15627_v0 = vld [vmem:[#allocation7 + $0xa60] ss:$16 sps:$4 sm:$0xff]  }
  0x9a   :  { %6843 = vmatpush2.bf16.msra.mxu0 %v15557_v1  ;;  %v15632_v1 = vld [vmem:[#allocation7 + $0x844] ss:$16 sps:$4 sm:$0xff]  }
  0x9b   :  { %6884 = vmatpush2.bf16.msra.mxu1 %v15560_v2  ;;  %6844 = vmatprep.subr.bf16.mxu0 %v15565_v4  ;;  %v15635_v2 = vld [vmem:[#allocation7 + $0xa44] ss:$16 sps:$4 sm:$0xff]   ;;  %v15630_v4 = vld [vmem:[#allocation7 + $0x840] ss:$16 sps:$4 sm:$0xff]  }
  0x9c   :  { %6885 = vmatprep.subr.bf16.mxu1 %v15568_v5  ;;  %v15633_v5 = vld [vmem:[#allocation7 + $0xa40] ss:$16 sps:$4 sm:$0xff]  }
  0x9e   :  { %6845 = vmatpush2.bf16.msra.mxu0 %v15563_v6  ;;  %v15638_v6 = vld [vmem:[#allocation7 + $0x824] ss:$16 sps:$4 sm:$0xff]  }
  0x9f   :  { %6886 = vmatpush2.bf16.msra.mxu1 %v15566_v7  ;;  %6846 = vmatprep.subr.bf16.mxu0 %v15571_v8  ;;  %v15641_v7 = vld [vmem:[#allocation7 + $0xa24] ss:$16 sps:$4 sm:$0xff]   ;;  %v15636_v8 = vld [vmem:[#allocation7 + $0x820] ss:$16 sps:$4 sm:$0xff]  }
  0xa0   :  { %6887 = vmatprep.subr.bf16.mxu1 %v15574_v9  ;;  %v15639_v9 = vld [vmem:[#allocation7 + $0xa20] ss:$16 sps:$4 sm:$0xff]  }
  0xa2   :  { %6847 = vmatpush2.bf16.msra.mxu0 %v15569_v10  ;;  %v15644_v10 = vld [vmem:[#allocation7 + $0x804] ss:$16 sps:$4 sm:$0xff]  }
  0xa3   :  { %6888 = vmatpush2.bf16.msra.mxu1 %v15572_v11  ;;  %6848 = vmatprep.subr.bf16.mxu0 %v15577_v12  ;;  %v15647_v11 = vld [vmem:[#allocation7 + $0xa04] ss:$16 sps:$4 sm:$0xff]   ;;  %v15642_v12 = vld [vmem:[#allocation7 + $0x800] ss:$16 sps:$4 sm:$0xff]  }
  0xa4   :  { %6889 = vmatprep.subr.bf16.mxu1 %v15580_v13  ;;  %v15645_v13 = vld [vmem:[#allocation7 + $0xa00] ss:$16 sps:$4 sm:$0xff]  }
  0xa6   :  { %6849 = vmatpush2.bf16.msra.mxu0 %v15575_v14  ;;  %v15650_v14 = vld [vmem:[#allocation7 + $0x9e4] ss:$16 sps:$4 sm:$0xff]  }
  0xa7   :  { %6890 = vmatpush2.bf16.msra.mxu1 %v15578_v15  ;;  %6850 = vmatprep.subr.bf16.mxu0 %v15583_v18  ;;  %v15653_v15 = vld [vmem:[#allocation7 + $0xbe4] ss:$16 sps:$4 sm:$0xff]   ;;  %v15648_v18 = vld [vmem:[#allocation7 + $0x9e0] ss:$16 sps:$4 sm:$0xff]  }
  0xa8   :  { %6891 = vmatprep.subr.bf16.mxu1 %v15586_v19  ;;  %v15651_v19 = vld [vmem:[#allocation7 + $0xbe0] ss:$16 sps:$4 sm:$0xff]  }
  0xaa   :  { %6851 = vmatpush2.bf16.msra.mxu0 %v15581_v20  ;;  %v15656_v20 = vld [vmem:[#allocation7 + $0x9c4] ss:$16 sps:$4 sm:$0xff]  }
  0xab   :  { %6892 = vmatpush2.bf16.msra.mxu1 %v15584_v21  ;;  %6852 = vmatprep.subr.bf16.mxu0 %v15589_v22  ;;  %v15659_v21 = vld [vmem:[#allocation7 + $0xbc4] ss:$16 sps:$4 sm:$0xff]   ;;  %v15654_v22 = vld [vmem:[#allocation7 + $0x9c0] ss:$16 sps:$4 sm:$0xff]  }
  0xac   :  { %6893 = vmatprep.subr.bf16.mxu1 %v15592_v23  ;;  %v15657_v23 = vld [vmem:[#allocation7 + $0xbc0] ss:$16 sps:$4 sm:$0xff]  }
  0xae   :  { %6853 = vmatpush2.bf16.msra.mxu0 %v15587_v24  ;;  %v15662_v24 = vld [vmem:[#allocation7 + $0x9a4] ss:$16 sps:$4 sm:$0xff]  }
  0xaf   :  { %6894 = vmatpush2.bf16.msra.mxu1 %v15590_v25  ;;  %6854 = vmatprep.subr.bf16.mxu0 %v15595_v26  ;;  %v15665_v25 = vld [vmem:[#allocation7 + $0xba4] ss:$16 sps:$4 sm:$0xff]   ;;  %v15660_v26 = vld [vmem:[#allocation7 + $0x9a0] ss:$16 sps:$4 sm:$0xff]  }
  0xb0   :  { %6895 = vmatprep.subr.bf16.mxu1 %v15598_v27  ;;  %v15663_v27 = vld [vmem:[#allocation7 + $0xba0] ss:$16 sps:$4 sm:$0xff]  }
  0xb2   :  { %6855 = vmatpush2.bf16.msra.mxu0 %v15593_v28  ;;  %v15668_v28 = vld [vmem:[#allocation7 + $0x984] ss:$16 sps:$4 sm:$0xff]  }
  0xb3   :  { %6896 = vmatpush2.bf16.msra.mxu1 %v15596_v29  ;;  %6906 = vmatprep.subr.bf16.mxu0 %v15602_v30  ;;  %v15671_v29 = vld [vmem:[#allocation7 + $0xb84] ss:$16 sps:$4 sm:$0xff]   ;;  %v15666_v30 = vld [vmem:[#allocation7 + $0x980] ss:$16 sps:$4 sm:$0xff]  }
  0xb4   :  { %6947 = vmatprep.subr.bf16.mxu1 %v15605_v31  ;;  %v15669_v31 = vld [vmem:[#allocation7 + $0xb80] ss:$16 sps:$4 sm:$0xff]  }
  0xb5   :  { %6857 = vmatmul.mubr.bf16.vlgmr.msra.gmra.mxu0 %v18302_v32 }
  0xb6   :  { %6898 = vmatmul.mubr.bf16.vlgmr.msra.gmra.mxu1 %v18306_v33  ;;  %6907 = vmatpush1.bf16.msra.mxu0 %v15600_v34  ;;  %v15674_v34 = vld [vmem:[#allocation7 + $0x964] ss:$16 sps:$4 sm:$0xff]  }
  0xb7   :  { %6948 = vmatpush1.bf16.msra.mxu1 %v15603_v35  ;;  %6908 = vmatprep.subr.bf16.mxu0 %v15608_v36  ;;  %v15677_v35 = vld [vmem:[#allocation7 + $0xb64] ss:$16 sps:$4 sm:$0xff]   ;;  %v15672_v36 = vld [vmem:[#allocation7 + $0x960] ss:$16 sps:$4 sm:$0xff]  }
  0xb8   :  { %6949 = vmatprep.subr.bf16.mxu1 %v15611_v38  ;;  %6938 = vmatprep.mubr.bf16.mxu0 %v18318_v48  ;;  %v15680_v38 = vld [vmem:[#allocation7 + $0x944] ss:$16 sps:$4 sm:$0xff]  }
  0xb9   :  { %6979 = vmatprep.mubr.bf16.mxu1 %v18323_v52 }
  0xba   :  { %6909 = vmatpush1.bf16.msra.mxu0 %v15606_v41  ;;  %v15678_v41 = vld [vmem:[#allocation7 + $0x940] ss:$16 sps:$4 sm:$0xff]  }
  0xbb   :  { %6950 = vmatpush1.bf16.msra.mxu1 %v15609_v45  ;;  %6910 = vmatprep.subr.bf16.mxu0 %v15614_v46  ;;  %v15681_v45 = vld [vmem:[#allocation7 + $0xb40] ss:$16 sps:$4 sm:$0xff]   ;;  %v15686_v46 = vld [vmem:[#allocation7 + $0x924] ss:$16 sps:$4 sm:$0xff]  }
  0xbc   :  { %6951 = vmatprep.subr.bf16.mxu1 %v15617_v47  ;;  %v15689_v47 = vld [vmem:[#allocation7 + $0xb24] ss:$16 sps:$4 sm:$0xff]  }
  0xbe   :  { %6911 = vmatpush1.bf16.msra.mxu0 %v15612_v51  ;;  %v15684_v51 = vld [vmem:[#allocation7 + $0x920] ss:$16 sps:$4 sm:$0xff]  }
  0xbf   :  { %6952 = vmatpush1.bf16.msra.mxu1 %v15615_v54  ;;  %6912 = vmatprep.subr.bf16.mxu0 %v15620_v55  ;;  %v15687_v54 = vld [vmem:[#allocation7 + $0xb20] ss:$16 sps:$4 sm:$0xff]   ;;  %v15692_v55 = vld [vmem:[#allocation7 + $0x904] ss:$16 sps:$4 sm:$0xff]  }
  0xc0   :  { %6953 = vmatprep.subr.bf16.mxu1 %v15623_v56  ;;  %v15695_v56 = vld [vmem:[#allocation7 + $0xb04] ss:$16 sps:$4 sm:$0xff]  }
  0xc2   :  { %6913 = vmatpush1.bf16.msra.mxu0 %v15618_v58  ;;  %v18327_v58 = vrot.slane %v72_v42, %v18268_v49  ;;  %v15750_v42 = vld [vmem:[#allocation7 + $0xfe4] ss:$16 sps:$4 sm:$0xff]  }
  0xc3   :  { %6954 = vmatpush1.bf16.msra.mxu1 %v15621_v59  ;;  %6914 = vmatprep.subr.bf16.mxu0 %v15626_v60  ;;  %v18330_v59 = vrot.slane %v134_v50, %v18268_v49  ;;  %v15690_v60 = vld [vmem:[#allocation7 + $0x900] ss:$16 sps:$4 sm:$0xff]   ;;  %v15756_v50 = vld [vmem:[#allocation7 + $0xfc4] ss:$16 sps:$4 sm:$0xff]  }
  0xc4   :  { %6955 = vmatprep.subr.bf16.mxu1 %v15629_v61  ;;  %v15693_v61 = vld [vmem:[#allocation7 + $0xb00] ss:$16 sps:$4 sm:$0xff]  }
  0xc6   :  { %6915 = vmatpush1.bf16.msra.mxu0 %v15624_v63  ;;  %v15699_v63 = vld [vmem:[#allocation7 + $0xce4] ss:$16 sps:$4 sm:$0xff]  }
  0xc7   :  { %6956 = vmatpush1.bf16.msra.mxu1 %v15627_v0  ;;  %6916 = vmatprep.subr.bf16.mxu0 %v15632_v1  ;;  %v15702_v0 = vld [vmem:[#allocation7 + $0xee4] ss:$16 sps:$4 sm:$0xff]   ;;  %v149_v1 = vcombine.high %v18327_v58, %v18327_v58 }
  0xc8   :  { %6957 = vmatprep.subr.bf16.mxu1 %v15635_v2  ;;  %v150_v2 = vcombine.high %v18330_v59, %v18330_v59 }
  0xca   :  { %6917 = vmatpush1.bf16.msra.mxu0 %v15630_v4  ;;  %v18338_v4 = vpack.c.bf16 %v18309_v39, %v18309_v39  ;;  %v15703_v39 = vld [vmem:[#allocation7 + $0xcc0] ss:$16 sps:$4 sm:$0xff]  }
  0xcb   :  { %6958 = vmatpush1.bf16.msra.mxu1 %v15633_v5  ;;  %6918 = vmatprep.subr.bf16.mxu0 %v15638_v6  ;;  %v18342_v5 = vpack.c.bf16 %v18316_v44, %v18316_v44  ;;  %v15697_v6 = vld [vmem:[#allocation7 + $0xce0] ss:$16 sps:$4 sm:$0xff]  }
  0xcc   :  { %6959 = vmatprep.subr.bf16.mxu1 %v15641_v7  ;;  %v15700_v7 = vld [vmem:[#allocation7 + $0xee0] ss:$16 sps:$4 sm:$0xff]  }
  0xcd   :  { %v15706_v44 = vld [vmem:[#allocation7 + $0xec0] ss:$16 sps:$4 sm:$0xff]  }
  0xce   :  { %6919 = vmatpush1.bf16.msra.mxu0 %v15636_v8  ;;  %v15705_v8 = vld [vmem:[#allocation7 + $0xcc4] ss:$16 sps:$4 sm:$0xff]  }
  0xcf   :  { %6960 = vmatpush1.bf16.msra.mxu1 %v15639_v9  ;;  %6920 = vmatprep.subr.bf16.mxu0 %v15644_v10  ;;  %v15708_v9 = vld [vmem:[#allocation7 + $0xec4] ss:$16 sps:$4 sm:$0xff]   ;;  %v18344_v10 = vpack.c.bf16 %v149_v1, %v149_v1  ;;  %v15763_v1 = vld [vmem:[#allocation7 + $0xd80] ss:$16 sps:$4 sm:$0xff]  }
  0xd0   :  { %6961 = vmatprep.subr.bf16.mxu1 %v15647_v11  ;;  %v18346_v11 = vpack.c.bf16 %v150_v2, %v150_v2  ;;  %v15766_v2 = vld [vmem:[#allocation7 + $0xf80] ss:$16 sps:$4 sm:$0xff]  }
  0xd2   :  { %6921 = vmatpush1.bf16.msra.mxu0 %v15642_v12  ;;  %v15711_v12 = vld [vmem:[#allocation7 + $0xca4] ss:$16 sps:$4 sm:$0xff]  }
  0xd3   :  { %6962 = vmatpush1.bf16.msra.mxu1 %v15645_v13  ;;  %6922 = vmatprep.subr.bf16.mxu0 %v15650_v14  ;;  %v15714_v13 = vld [vmem:[#allocation7 + $0xea4] ss:$16 sps:$4 sm:$0xff]   ;;  %v15709_v14 = vld [vmem:[#allocation7 + $0xca0] ss:$16 sps:$4 sm:$0xff]  }
  0xd4   :  { %6963 = vmatprep.subr.bf16.mxu1 %v15653_v15  ;;  %v15712_v15 = vld [vmem:[#allocation7 + $0xea0] ss:$16 sps:$4 sm:$0xff]  }
  0xd6   :  { %6923 = vmatpush2.bf16.msra.mxu0 %v15648_v18  ;;  %v15717_v18 = vld [vmem:[#allocation7 + $0xc84] ss:$16 sps:$4 sm:$0xff]  }
  0xd7   :  { %6964 = vmatpush2.bf16.msra.mxu1 %v15651_v19  ;;  %6924 = vmatprep.subr.bf16.mxu0 %v15656_v20  ;;  %v15720_v19 = vld [vmem:[#allocation7 + $0xe84] ss:$16 sps:$4 sm:$0xff]   ;;  %v15715_v20 = vld [vmem:[#allocation7 + $0xc80] ss:$16 sps:$4 sm:$0xff]  }
  0xd8   :  { %6965 = vmatprep.subr.bf16.mxu1 %v15659_v21  ;;  %v15718_v21 = vld [vmem:[#allocation7 + $0xe80] ss:$16 sps:$4 sm:$0xff]  }
  0xda   :  { %6925 = vmatpush2.bf16.msra.mxu0 %v15654_v22  ;;  %v15723_v22 = vld [vmem:[#allocation7 + $0xc64] ss:$16 sps:$4 sm:$0xff]  }
  0xdb   :  { %6966 = vmatpush2.bf16.msra.mxu1 %v15657_v23  ;;  %6926 = vmatprep.subr.bf16.mxu0 %v15662_v24  ;;  %v15726_v23 = vld [vmem:[#allocation7 + $0xe64] ss:$16 sps:$4 sm:$0xff]   ;;  %v15721_v24 = vld [vmem:[#allocation7 + $0xc60] ss:$16 sps:$4 sm:$0xff]  }
  0xdc   :  { %6967 = vmatprep.subr.bf16.mxu1 %v15665_v25  ;;  %v15724_v25 = vld [vmem:[#allocation7 + $0xe60] ss:$16 sps:$4 sm:$0xff]  }
  0xde   :  { %6927 = vmatpush2.bf16.msra.mxu0 %v15660_v26  ;;  %v15729_v26 = vld [vmem:[#allocation7 + $0xc44] ss:$16 sps:$4 sm:$0xff]  }
  0xdf   :  { %6968 = vmatpush2.bf16.msra.mxu1 %v15663_v27  ;;  %6928 = vmatprep.subr.bf16.mxu0 %v15668_v28  ;;  %v15732_v27 = vld [vmem:[#allocation7 + $0xe44] ss:$16 sps:$4 sm:$0xff]   ;;  %v15727_v28 = vld [vmem:[#allocation7 + $0xc40] ss:$16 sps:$4 sm:$0xff]  }
  0xe0   :  { %6969 = vmatprep.subr.bf16.mxu1 %v15671_v29  ;;  %v15730_v29 = vld [vmem:[#allocation7 + $0xe40] ss:$16 sps:$4 sm:$0xff]  }
  0xe2   :  { %6929 = vmatpush2.bf16.msra.mxu0 %v15666_v30  ;;  %v15735_v30 = vld [vmem:[#allocation7 + $0xc24] ss:$16 sps:$4 sm:$0xff]  }
  0xe3   :  { %6970 = vmatpush2.bf16.msra.mxu1 %v15669_v31  ;;  %6930 = vmatprep.subr.bf16.mxu0 %v15674_v34  ;;  %v15738_v31 = vld [vmem:[#allocation7 + $0xe24] ss:$16 sps:$4 sm:$0xff]   ;;  %v15733_v34 = vld [vmem:[#allocation7 + $0xc20] ss:$16 sps:$4 sm:$0xff]  }
  0xe4   :  { %6971 = vmatprep.subr.bf16.mxu1 %v15677_v35  ;;  %v15736_v35 = vld [vmem:[#allocation7 + $0xe20] ss:$16 sps:$4 sm:$0xff]  }
  0xe6   :  { %6931 = vmatpush2.bf16.msra.mxu0 %v15672_v36  ;;  %v15741_v36 = vld [vmem:[#allocation7 + $0xc04] ss:$16 sps:$4 sm:$0xff]  }
  0xe7   :  { %6972 = vmatpush2.bf16.msra.mxu1 %v15675_v37  ;;  %6932 = vmatprep.subr.bf16.mxu0 %v15680_v38  ;;  %v15744_v37 = vld [vmem:[#allocation7 + $0xe04] ss:$16 sps:$4 sm:$0xff]   ;;  %v15739_v38 = vld [vmem:[#allocation7 + $0xc00] ss:$16 sps:$4 sm:$0xff]  }
  0xe8   :  { %6973 = vmatprep.subr.bf16.mxu1 %v15683_v40  ;;  %v15742_v40 = vld [vmem:[#allocation7 + $0xe00] ss:$16 sps:$4 sm:$0xff]  }
  0xea   :  { %6933 = vmatpush2.bf16.msra.mxu0 %v15678_v41  ;;  %v15747_v41 = vld [vmem:[#allocation7 + $0xde4] ss:$16 sps:$4 sm:$0xff]  }
  0xeb   :  { %6974 = vmatpush2.bf16.msra.mxu1 %v15681_v45  ;;  %6934 = vmatprep.subr.bf16.mxu0 %v15686_v46  ;;  %v15745_v45 = vld [vmem:[#allocation7 + $0xde0] ss:$16 sps:$4 sm:$0xff]  }
  0xec   :  { %6975 = vmatprep.subr.bf16.mxu1 %v15689_v47  ;;  %v15748_v46 = vld [vmem:[#allocation7 + $0xfe0] ss:$16 sps:$4 sm:$0xff]   ;;  %v15753_v47 = vld [vmem:[#allocation7 + $0xdc4] ss:$16 sps:$4 sm:$0xff]  }
  0xee   :  { %6935 = vmatpush2.bf16.msra.mxu0 %v15684_v51  ;;  %v15751_v51 = vld [vmem:[#allocation7 + $0xdc0] ss:$16 sps:$4 sm:$0xff]  }
  0xef   :  { %6976 = vmatpush2.bf16.msra.mxu1 %v15687_v54  ;;  %6936 = vmatprep.subr.bf16.mxu0 %v15692_v55  ;;  %v15754_v54 = vld [vmem:[#allocation7 + $0xfc0] ss:$16 sps:$4 sm:$0xff]   ;;  %v15759_v55 = vld [vmem:[#allocation7 + $0xda4] ss:$16 sps:$4 sm:$0xff]  }
  0xf0   :  { %6977 = vmatprep.subr.bf16.mxu1 %v15695_v56  ;;  %v15762_v56 = vld [vmem:[#allocation7 + $0xfa4] ss:$16 sps:$4 sm:$0xff]  }
  0xf2   :  { %6937 = vmatpush2.bf16.msra.mxu0 %v15690_v60  ;;  %v15757_v60 = vld [vmem:[#allocation7 + $0xda0] ss:$16 sps:$4 sm:$0xff]  }
  0xf3   :  { %6978 = vmatpush2.bf16.msra.mxu1 %v15693_v61  ;;  %6988 = vmatprep.subr.bf16.mxu0 %v15699_v63  ;;  %v15760_v61 = vld [vmem:[#allocation7 + $0xfa0] ss:$16 sps:$4 sm:$0xff]   ;;  %v15765_v63 = vld [vmem:[#allocation7 + $0xd84] ss:$16 sps:$4 sm:$0xff]  }
  0xf4   :  { %7029 = vmatprep.subr.bf16.mxu1 %v15702_v0  ;;  %v15768_v0 = vld [vmem:[#allocation7 + $0xf84] ss:$16 sps:$4 sm:$0xff]  }
  0xf5   :  { %6939 = vmatmul.mubr.bf16.vlgmr.msra.gmra.mxu0 %v18338_v4 }
  0xf6   :  { %6980 = vmatmul.mubr.bf16.vlgmr.msra.gmra.mxu1 %v18342_v5  ;;  %6989 = vmatpush1.bf16.msra.mxu0 %v15697_v6  ;;  %v15771_v6 = vld [vmem:[#allocation7 + $0xd64] ss:$16 sps:$4 sm:$0xff]  }
  0xf7   :  { %7030 = vmatpush1.bf16.msra.mxu1 %v15700_v7  ;;  %6990 = vmatprep.subr.bf16.mxu0 %v15705_v8  ;;  %v15774_v7 = vld [vmem:[#allocation7 + $0xf64] ss:$16 sps:$4 sm:$0xff]   ;;  %v15769_v8 = vld [vmem:[#allocation7 + $0xd60] ss:$16 sps:$4 sm:$0xff]  }
  0xf8   :  { %7031 = vmatprep.subr.bf16.mxu1 %v15708_v9  ;;  %7020 = vmatprep.mubr.bf16.mxu0 %v18344_v10  ;;  %v15772_v9 = vld [vmem:[#allocation7 + $0xf60] ss:$16 sps:$4 sm:$0xff]  }
  0xf9   :  { %7061 = vmatprep.mubr.bf16.mxu1 %v18346_v11 }
  0xfa   :  { %6991 = vmatpush1.bf16.msra.mxu0 %v15703_v39  ;;  %v15777_v39 = vld [vmem:[#allocation7 + $0xd44] ss:$16 sps:$4 sm:$0xff]  }
  0xfb   :  { %7032 = vmatpush1.bf16.msra.mxu1 %v15706_v44  ;;  %6992 = vmatprep.subr.bf16.mxu0 %v15711_v12  ;;  %v15780_v44 = vld [vmem:[#allocation7 + $0xf44] ss:$16 sps:$4 sm:$0xff]  }
  0xfc   :  { %7033 = vmatprep.subr.bf16.mxu1 %v15714_v13  ;;  %v73_v12 = vld [vmem:[#allocation2 + $0x20] sm:$0xff] }
  0xfd   :  { %v15775_v13 = vld [vmem:[#allocation7 + $0xd40] ss:$16 sps:$4 sm:$0xff]  }
  0xfe   :  { %6993 = vmatpush1.bf16.msra.mxu0 %v15709_v14  ;;  %v15778_v14 = vld [vmem:[#allocation7 + $0xf40] ss:$16 sps:$4 sm:$0xff]  }
  0xff   :  { %7034 = vmatpush1.bf16.msra.mxu1 %v15712_v15  ;;  %6994 = vmatprep.subr.bf16.mxu0 %v15717_v18  ;;  %v15783_v15 = vld [vmem:[#allocation7 + $0xd24] ss:$16 sps:$4 sm:$0xff]  }
 0x100   :  { %7035 = vmatprep.subr.bf16.mxu1 %v15720_v19  ;;  %v15786_v18 = vld [vmem:[#allocation7 + $0xf24] ss:$16 sps:$4 sm:$0xff]   ;;  %v151_v19 = vcombine.high %v73_v12, %v73_v12 }
 0x102   :  { %6995 = vmatpush1.bf16.msra.mxu0 %v15715_v20  ;;  %v15781_v20 = vld [vmem:[#allocation7 + $0xd20] ss:$16 sps:$4 sm:$0xff]  }
 0x103   :  { %7036 = vmatpush1.bf16.msra.mxu1 %v15718_v21  ;;  %6996 = vmatprep.subr.bf16.mxu0 %v15723_v22  ;;  %v15784_v21 = vld [vmem:[#allocation7 + $0xf20] ss:$16 sps:$4 sm:$0xff]   ;;  %v15789_v22 = vld [vmem:[#allocation7 + $0xd04] ss:$16 sps:$4 sm:$0xff]  }
 0x104   :  { %7037 = vmatprep.subr.bf16.mxu1 %v15726_v23  ;;  %v15792_v23 = vld [vmem:[#allocation7 + $0xf04] ss:$16 sps:$4 sm:$0xff]  }
 0x106   :  { %6997 = vmatpush1.bf16.msra.mxu0 %v15721_v24  ;;  %v18353_v24 = vrot.slane %v73_v12, %v18268_v49 }
 0x107   :  { %7038 = vmatpush1.bf16.msra.mxu1 %v15724_v25  ;;  %6998 = vmatprep.subr.bf16.mxu0 %v15729_v26  ;;  %v18356_v25 = vrot.slane %v151_v19, %v18268_v49  ;;  %v15787_v26 = vld [vmem:[#allocation7 + $0xd00] ss:$16 sps:$4 sm:$0xff]   ;;  %v15820_v19 = vld [vmem:[#allocation7 + $0x1064] ss:$16 sps:$4 sm:$0xff]  }
 0x108   :  { %7039 = vmatprep.subr.bf16.mxu1 %v15732_v27  ;;  %v15790_v27 = vld [vmem:[#allocation7 + $0xf00] ss:$16 sps:$4 sm:$0xff]  }
 0x10a   :  { %6999 = vmatpush1.bf16.msra.mxu0 %v15727_v28  ;;  %v2240_v28 = vld [vmem:[#allocation8] sm:$0xf] }
 0x10b   :  { %7040 = vmatpush1.bf16.msra.mxu1 %v15730_v29  ;;  %7000 = vmatprep.subr.bf16.mxu0 %v15735_v30  ;;  %v2244_v29 = vsub.s32 0, %v18265_v43  ;;  %v15796_v30 = vld [vmem:[#allocation7 + $0x10e4] ss:$16 sps:$4 sm:$0xff]  }
 0x10c   :  { %7041 = vmatprep.subr.bf16.mxu1 %v15738_v31  ;;  %v15799_v31 = vld [vmem:[#allocation7 + $0x12e4] ss:$16 sps:$4 sm:$0xff]  }
 0x10e   :  { %7001 = vmatpush1.bf16.msra.mxu0 %v15733_v34  ;;  %v2248_v34 = vsub.s32 1, %v18265_v43 }
 0x10f   :  { %7042 = vmatpush1.bf16.msra.mxu1 %v15736_v35  ;;  %7002 = vmatprep.subr.bf16.mxu0 %v15741_v36  ;;  %v166_v35 = vcombine.high %v18353_v24, %v18353_v24  ;;  %v167_v36 = vcombine.high %v18356_v25, %v18356_v25 }
 0x110   :  { %7043 = vmatprep.subr.bf16.mxu1 %v15744_v37  ;;  %v18366_v37 = vpack.c.bf16 %v18327_v58, %v18327_v58 }
 0x111   :  { %v18376_v58 = vpack.c.bf16 %v166_v35, %v166_v35  ;;  %v15830_v35 = vld [vmem:[#allocation7 + $0x1020] ss:$16 sps:$4 sm:$0xff]  }
 0x112   :  { %7003 = vmatpush1.bf16.msra.mxu0 %v15739_v38  ;;  %v18370_v38 = vpack.c.bf16 %v18330_v59, %v18330_v59 }
 0x113   :  { %7044 = vmatpush1.bf16.msra.mxu1 %v15742_v40  ;;  %7004 = vmatprep.subr.bf16.mxu0 %v15747_v41  ;;  %v2245_v40 = vrot.slane %v2240_v28, %v2244_v29  ;;  %v15794_v41 = vld [vmem:[#allocation7 + $0x10e0] ss:$16 sps:$4 sm:$0xff]  }
 0x114   :  { %7045 = vmatprep.subr.bf16.mxu1 %v15750_v42  ;;  %v15797_v42 = vld [vmem:[#allocation7 + $0x12e0] ss:$16 sps:$4 sm:$0xff]  }
 0x116   :  { %7005 = vmatpush2.bf16.msra.mxu0 %v15745_v45  ;;  %v15802_v45 = vld [vmem:[#allocation7 + $0x10c4] ss:$16 sps:$4 sm:$0xff]  }
 0x117   :  { %7046 = vmatpush2.bf16.msra.mxu1 %v15748_v46  ;;  %7006 = vmatprep.subr.bf16.mxu0 %v15753_v47  ;;  %v15805_v46 = vld [vmem:[#allocation7 + $0x12c4] ss:$16 sps:$4 sm:$0xff]   ;;  %v2249_v47 = vrot.slane %v2240_v28, %v2248_v34  ;;  %v15827_v28 = vld [vmem:[#allocation7 + $0x1240] ss:$16 sps:$4 sm:$0xff]  }
 0x118   :  { %7047 = vmatprep.subr.bf16.mxu1 %v15756_v50  ;;  %v18378_v50 = vpack.c.bf16 %v167_v36, %v167_v36  ;;  %v15833_v36 = vld [vmem:[#allocation7 + $0x1220] ss:$16 sps:$4 sm:$0xff]  }
 0x11a   :  { %7007 = vmatpush2.bf16.msra.mxu0 %v15751_v51 }
 0x11b   :  { %7048 = vmatpush2.bf16.msra.mxu1 %v15754_v54  ;;  %7008 = vmatprep.subr.bf16.mxu0 %v15759_v55  ;;  %v15800_v54 = vld [vmem:[#allocation7 + $0x10c0] ss:$16 sps:$4 sm:$0xff]  }
 0x11c   :  { %7049 = vmatprep.subr.bf16.mxu1 %v15762_v56  ;;  %v15803_v56 = vld [vmem:[#allocation7 + $0x12c0] ss:$16 sps:$4 sm:$0xff]  }
 0x11e   :  { %7009 = vmatpush2.bf16.msra.mxu0 %v15757_v60  ;;  %v15808_v60 = vld [vmem:[#allocation7 + $0x10a4] ss:$16 sps:$4 sm:$0xff]  }
 0x11f   :  { %7050 = vmatpush2.bf16.msra.mxu1 %v15760_v61  ;;  %7010 = vmatprep.subr.bf16.mxu0 %v15765_v63 }
 0x120   :  { %7051 = vmatprep.subr.bf16.mxu1 %v15768_v0  ;;  %v15811_v0 = vld [vmem:[#allocation7 + $0x12a4] ss:$16 sps:$4 sm:$0xff]  }
 0x122   :  { %7011 = vmatpush2.bf16.msra.mxu0 %v15763_v1 }
 0x123   :  { %7052 = vmatpush2.bf16.msra.mxu1 %v15766_v2  ;;  %7012 = vmatprep.subr.bf16.mxu0 %v15771_v6 }
 0x124   :  { %7053 = vmatprep.subr.bf16.mxu1 %v15774_v7 }
 0x126   :  { %7013 = vmatpush2.bf16.msra.mxu0 %v15769_v8  ;;  %v15806_v8 = vld [vmem:[#allocation7 + $0x10a0] ss:$16 sps:$4 sm:$0xff]  }
 0x127   :  { %7054 = vmatpush2.bf16.msra.mxu1 %v15772_v9  ;;  %7014 = vmatprep.subr.bf16.mxu0 %v15777_v39  ;;  %v15809_v9 = vld [vmem:[#allocation7 + $0x12a0] ss:$16 sps:$4 sm:$0xff]  }
 0x128   :  { %7055 = vmatprep.subr.bf16.mxu1 %v15780_v44 }
 0x12a   :  { %7015 = vmatpush2.bf16.msra.mxu0 %v15775_v13  ;;  %v15814_v13 = vld [vmem:[#allocation7 + $0x1084] ss:$16 sps:$4 sm:$0xff]  }
 0x12b   :  { %7056 = vmatpush2.bf16.msra.mxu1 %v15778_v14  ;;  %7016 = vmatprep.subr.bf16.mxu0 %v15783_v15  ;;  %v15817_v14 = vld [vmem:[#allocation7 + $0x1284] ss:$16 sps:$4 sm:$0xff]   ;;  %v15812_v15 = vld [vmem:[#allocation7 + $0x1080] ss:$16 sps:$4 sm:$0xff]  }
 0x12c   :  { %7057 = vmatprep.subr.bf16.mxu1 %v15786_v18  ;;  %v15815_v18 = vld [vmem:[#allocation7 + $0x1280] ss:$16 sps:$4 sm:$0xff]  }
 0x12e   :  { %7017 = vmatpush2.bf16.msra.mxu0 %v15781_v20  ;;  %v15823_v20 = vld [vmem:[#allocation7 + $0x1264] ss:$16 sps:$4 sm:$0xff]  }
 0x12f   :  { %7058 = vmatpush2.bf16.msra.mxu1 %v15784_v21  ;;  %7018 = vmatprep.subr.bf16.mxu0 %v15789_v22  ;;  %v15818_v21 = vld [vmem:[#allocation7 + $0x1060] ss:$16 sps:$4 sm:$0xff]  }
 0x130   :  { %7059 = vmatprep.subr.bf16.mxu1 %v15792_v23  ;;  %v15821_v22 = vld [vmem:[#allocation7 + $0x1260] ss:$16 sps:$4 sm:$0xff]   ;;  %v15826_v23 = vld [vmem:[#allocation7 + $0x1044] ss:$16 sps:$4 sm:$0xff]  }
 0x132   :  { %7019 = vmatpush2.bf16.msra.mxu0 %v15787_v26  ;;  %v15829_v26 = vld [vmem:[#allocation7 + $0x1244] ss:$16 sps:$4 sm:$0xff]  }
 0x133   :  { %7060 = vmatpush2.bf16.msra.mxu1 %v15790_v27  ;;  %7070 = vmatprep.subr.bf16.mxu0 %v15796_v30  ;;  %v15824_v27 = vld [vmem:[#allocation7 + $0x1040] ss:$16 sps:$4 sm:$0xff]   ;;  %v15832_v30 = vld [vmem:[#allocation7 + $0x1024] ss:$16 sps:$4 sm:$0xff]  }
 0x134   :  { %7111 = vmatprep.subr.bf16.mxu1 %v15799_v31  ;;  %v15835_v31 = vld [vmem:[#allocation7 + $0x1224] ss:$16 sps:$4 sm:$0xff]  }
 0x135   :  { %v6776_v59 = vpop.f32.mrf.mxu0  ;;  %7021 = vmatmul.mubr.bf16.vlgmr.msra.gmra.mxu0 %v18366_v37 }
 0x136   :  { %v6817_v51 = vpop.f32.mrf.mxu1  ;;  %7062 = vmatmul.mubr.bf16.vlgmr.msra.gmra.mxu1 %v18370_v38  ;;  %v6777_v55 = vadd.f32 %v6776_v59, %v2245_v40  ;;  %7071 = vmatpush1.bf16.msra.mxu0 %v15794_v41  ;;  %v15838_v40 = vld [vmem:[#allocation7 + $0x1004] ss:$16 sps:$4 sm:$0xff]   ;;  %v15842_v59 = vld [vmem:[#allocation7 + $0x11e0] ss:$16 sps:$4 sm:$0xff]  }
 0x137   :  { %7112 = vmatpush1.bf16.msra.mxu1 %v15797_v42  ;;  %v6778_v61 = vpop.f32.mrf.mxu0  ;;  %7072 = vmatprep.subr.bf16.mxu0 %v15802_v45  ;;  %v15841_v41 = vld [vmem:[#allocation7 + $0x1204] ss:$16 sps:$4 sm:$0xff]   ;;  %v15836_v42 = vld [vmem:[#allocation7 + $0x1000] ss:$16 sps:$4 sm:$0xff]  }
 0x138   :  { %v6819_v63 = vpop.f32.mrf.mxu1  ;;  %7113 = vmatprep.subr.bf16.mxu1 %v15805_v46  ;;  %v18382_v1 = vadd.f32 %v6817_v51, %v6777_v55  ;;  %v6779_v2 = vadd.f32 %v6778_v61, %v2249_v47  ;;  %7102 = vmatprep.mubr.bf16.mxu0 %v18376_v58  ;;  %v15839_v45 = vld [vmem:[#allocation7 + $0x1200] ss:$16 sps:$4 sm:$0xff]   ;;  %v15844_v46 = vld [vmem:[#allocation7 + $0x11e4] ss:$16 sps:$4 sm:$0xff]  }
 0x139   :  { %7143 = vmatprep.mubr.bf16.mxu1 %v18378_v50  ;;  %v6780_v6 = vpop.f32.mrf.mxu0  ;;  %v15847_v47 = vld [vmem:[#allocation7 + $0x13e4] ss:$16 sps:$4 sm:$0xff]   ;;  %v15845_v51 = vld [vmem:[#allocation7 + $0x13e0] ss:$16 sps:$4 sm:$0xff]  }
 0x13a   :  { %v6821_v7 = vpop.f32.mrf.mxu1  ;;  %v18386_v39 = vadd.f32 %v6819_v63, %v6779_v2  ;;  %7073 = vmatpush1.bf16.msra.mxu0 %v15800_v54  ;;  %v15850_v54 = vld [vmem:[#allocation7 + $0x11c4] ss:$16 sps:$4 sm:$0xff]   ;;  %v15857_v2 = vld [vmem:[#allocation7 + $0x13a0] ss:$16 sps:$4 sm:$0xff]  }
 0x13b   :  { %7114 = vmatpush1.bf16.msra.mxu1 %v15803_v56  ;;  %v6781_v44 = vpop.f32.mrf.mxu0  ;;  %7074 = vmatprep.subr.bf16.mxu0 %v15808_v60  ;;  %v15853_v55 = vld [vmem:[#allocation7 + $0x13c4] ss:$16 sps:$4 sm:$0xff]   ;;  %v15848_v56 = vld [vmem:[#allocation7 + $0x11c0] ss:$16 sps:$4 sm:$0xff]  }
 0x13c   :  { %v6822_v12 = vpop.f32.mrf.mxu1  ;;  %7115 = vmatprep.subr.bf16.mxu1 %v15811_v0  ;;  %v15851_v60 = vld [vmem:[#allocation7 + $0x13c0] ss:$16 sps:$4 sm:$0xff]   ;;  %v15856_v61 = vld [vmem:[#allocation7 + $0x11a4] ss:$16 sps:$4 sm:$0xff]  }
 0x13d   :  { %v15859_v63 = vld [vmem:[#allocation7 + $0x13a4] ss:$16 sps:$4 sm:$0xff]   ;;  %v15854_v0 = vld [vmem:[#allocation7 + $0x11a0] ss:$16 sps:$4 sm:$0xff]  }
 0x13e   :  { %7075 = vmatpush1.bf16.msra.mxu0 %v15806_v8  ;;  %v15862_v6 = vld [vmem:[#allocation7 + $0x1184] ss:$16 sps:$4 sm:$0xff]   ;;  %v15860_v8 = vld [vmem:[#allocation7 + $0x1180] ss:$16 sps:$4 sm:$0xff]  }
 0x13f   :  { %7116 = vmatpush1.bf16.msra.mxu1 %v15809_v9  ;;  %7076 = vmatprep.subr.bf16.mxu0 %v15814_v13  ;;  %v15865_v7 = vld [vmem:[#allocation7 + $0x1384] ss:$16 sps:$4 sm:$0xff]   ;;  %v15863_v9 = vld [vmem:[#allocation7 + $0x1380] ss:$16 sps:$4 sm:$0xff]  }
 0x140   :  { %7117 = vmatprep.subr.bf16.mxu1 %v15817_v14  ;;  %v15868_v44 = vld [vmem:[#allocation7 + $0x1164] ss:$16 sps:$4 sm:$0xff]   ;;  %v15866_v13 = vld [vmem:[#allocation7 + $0x1160] ss:$16 sps:$4 sm:$0xff]  }
 0x141   :  { %v15871_v12 = vld [vmem:[#allocation7 + $0x1364] ss:$16 sps:$4 sm:$0xff]   ;;  %v15869_v14 = vld [vmem:[#allocation7 + $0x1360] ss:$16 sps:$4 sm:$0xff]  }
 0x142   :  { %7077 = vmatpush1.bf16.msra.mxu0 %v15812_v15  ;;  %v15874_v15 = vld [vmem:[#allocation7 + $0x1144] ss:$16 sps:$4 sm:$0xff]  }
 0x143   :  { %7118 = vmatpush1.bf16.msra.mxu1 %v15815_v18  ;;  %7078 = vmatprep.subr.bf16.mxu0 %v15820_v19  ;;  %v15877_v18 = vld [vmem:[#allocation7 + $0x1344] ss:$16 sps:$4 sm:$0xff]   ;;  %v74_v19 = vld [vmem:[#allocation2 + $0x28] sm:$0xff] }
 0x144   :  { %7119 = vmatprep.subr.bf16.mxu1 %v15823_v20  ;;  %v15872_v20 = vld [vmem:[#allocation7 + $0x1140] ss:$16 sps:$4 sm:$0xff]  }
 0x146   :  { %7079 = vmatpush1.bf16.msra.mxu0 %v15818_v21  ;;  %v15875_v21 = vld [vmem:[#allocation7 + $0x1340] ss:$16 sps:$4 sm:$0xff]  }
 0x147   :  { %7120 = vmatpush1.bf16.msra.mxu1 %v15821_v22  ;;  %7080 = vmatprep.subr.bf16.mxu0 %v15826_v23  ;;  %v15880_v22 = vld [vmem:[#allocation7 + $0x1124] ss:$16 sps:$4 sm:$0xff]  }
 0x148   :  { %7121 = vmatprep.subr.bf16.mxu1 %v15829_v26  ;;  %v15883_v23 = vld [vmem:[#allocation7 + $0x1324] ss:$16 sps:$4 sm:$0xff]   ;;  %v168_v26 = vcombine.high %v74_v19, %v74_v19 }
 0x14a   :  { %7081 = vmatpush1.bf16.msra.mxu0 %v15824_v27  ;;  %v15878_v27 = vld [vmem:[#allocation7 + $0x1120] ss:$16 sps:$4 sm:$0xff]  }
 0x14b   :  { %7122 = vmatpush1.bf16.msra.mxu1 %v15827_v28  ;;  %7082 = vmatprep.subr.bf16.mxu0 %v15832_v30  ;;  %v15881_v28 = vld [vmem:[#allocation7 + $0x1320] ss:$16 sps:$4 sm:$0xff]   ;;  %v15886_v30 = vld [vmem:[#allocation7 + $0x1104] ss:$16 sps:$4 sm:$0xff]  }
 0x14c   :  { %7123 = vmatprep.subr.bf16.mxu1 %v15835_v31  ;;  %v15889_v31 = vld [vmem:[#allocation7 + $0x1304] ss:$16 sps:$4 sm:$0xff]  }
 0x14e   :  { %7083 = vmatpush1.bf16.msra.mxu0 %v15830_v35  ;;  %v18389_v35 = vrot.slane %v74_v19, %v18268_v49 }
 0x14f   :  { %7124 = vmatpush1.bf16.msra.mxu1 %v15833_v36  ;;  %7084 = vmatprep.subr.bf16.mxu0 %v15838_v40  ;;  %v18392_v36 = vrot.slane %v168_v26, %v18268_v49  ;;  %v15884_v40 = vld [vmem:[#allocation7 + $0x1100] ss:$16 sps:$4 sm:$0xff]  }
 0x150   :  { %7125 = vmatprep.subr.bf16.mxu1 %v15841_v41  ;;  %v15887_v41 = vld [vmem:[#allocation7 + $0x1300] ss:$16 sps:$4 sm:$0xff]  }
 0x151   :  { %v15912_v26 = vld [vmem:[#allocation7 + $0x1680] ss:$16 sps:$4 sm:$0xff]  }
 0x152   :  { %7085 = vmatpush1.bf16.msra.mxu0 %v15836_v42  ;;  %v15893_v42 = vld [vmem:[#allocation7 + $0x14e4] ss:$16 sps:$4 sm:$0xff]  }
 0x153   :  { %7126 = vmatpush1.bf16.msra.mxu1 %v15839_v45  ;;  %7086 = vmatprep.subr.bf16.mxu0 %v15844_v46  ;;  %v15896_v45 = vld [vmem:[#allocation7 + $0x16e4] ss:$16 sps:$4 sm:$0xff]   ;;  %v15891_v46 = vld [vmem:[#allocation7 + $0x14e0] ss:$16 sps:$4 sm:$0xff]  }
 0x154   :  { %7127 = vmatprep.subr.bf16.mxu1 %v15847_v47  ;;  %v15894_v47 = vld [vmem:[#allocation7 + $0x16e0] ss:$16 sps:$4 sm:$0xff]  }
 0x156   :  { %7087 = vmatpush2.bf16.msra.mxu0 %v15842_v59  ;;  %v183_v59 = vcombine.high %v18389_v35, %v18389_v35 }
 0x157   :  { %7128 = vmatpush2.bf16.msra.mxu1 %v15845_v51  ;;  %7088 = vmatprep.subr.bf16.mxu0 %v15850_v54  ;;  %v184_v51 = vcombine.high %v18392_v36, %v18392_v36  ;;  %v18400_v54 = vpack.c.bf16 %v18353_v24, %v18353_v24 }
 0x158   :  { %7129 = vmatprep.subr.bf16.mxu1 %v15853_v55  ;;  %v18404_v55 = vpack.c.bf16 %v18356_v25, %v18356_v25 }
 0x15a   :  { %7089 = vmatpush2.bf16.msra.mxu0 %v15848_v56  ;;  %v15899_v56 = vld [vmem:[#allocation7 + $0x14c4] ss:$16 sps:$4 sm:$0xff]  }
 0x15b   :  { %7130 = vmatpush2.bf16.msra.mxu1 %v15851_v60  ;;  %7090 = vmatprep.subr.bf16.mxu0 %v15856_v61  ;;  %v15902_v60 = vld [vmem:[#allocation7 + $0x16c4] ss:$16 sps:$4 sm:$0xff]   ;;  %v15897_v61 = vld [vmem:[#allocation7 + $0x14c0] ss:$16 sps:$4 sm:$0xff]  }
 0x15c   :  { %7131 = vmatprep.subr.bf16.mxu1 %v15859_v63  ;;  %v15900_v63 = vld [vmem:[#allocation7 + $0x16c0] ss:$16 sps:$4 sm:$0xff]  }
 0x15e   :  { %7091 = vmatpush2.bf16.msra.mxu0 %v15854_v0  ;;  %v18406_v0 = vpack.c.bf16 %v183_v59, %v183_v59  ;;  %v15927_v59 = vld [vmem:[#allocation7 + $0x1420] ss:$16 sps:$4 sm:$0xff]  }
 0x15f   :  { %7132 = vmatpush2.bf16.msra.mxu1 %v15857_v2  ;;  %7092 = vmatprep.subr.bf16.mxu0 %v15862_v6  ;;  %v18408_v2 = vpack.c.bf16 %v184_v51, %v184_v51  ;;  %v15930_v51 = vld [vmem:[#allocation7 + $0x1620] ss:$16 sps:$4 sm:$0xff]  }
 0x160   :  { %7133 = vmatprep.subr.bf16.mxu1 %v15865_v7 }
 0x162   :  { %7093 = vmatpush2.bf16.msra.mxu0 %v15860_v8 }
 0x163   :  { %7134 = vmatpush2.bf16.msra.mxu1 %v15863_v9  ;;  %7094 = vmatprep.subr.bf16.mxu0 %v15868_v44  ;;  %v15905_v9 = vld [vmem:[#allocation7 + $0x14a4] ss:$16 sps:$4 sm:$0xff]  }
 0x164   :  { %7135 = vmatprep.subr.bf16.mxu1 %v15871_v12  ;;  %v15908_v44 = vld [vmem:[#allocation7 + $0x16a4] ss:$16 sps:$4 sm:$0xff]  }
 0x166   :  { %7095 = vmatpush2.bf16.msra.mxu0 %v15866_v13 }
 0x167   :  { %7136 = vmatpush2.bf16.msra.mxu1 %v15869_v14  ;;  %7096 = vmatprep.subr.bf16.mxu0 %v15874_v15  ;;  %v15903_v14 = vld [vmem:[#allocation7 + $0x14a0] ss:$16 sps:$4 sm:$0xff]  }
 0x168   :  { %7137 = vmatprep.subr.bf16.mxu1 %v15877_v18  ;;  %v15906_v15 = vld [vmem:[#allocation7 + $0x16a0] ss:$16 sps:$4 sm:$0xff]  }
 0x16a   :  { %7097 = vmatpush2.bf16.msra.mxu0 %v15872_v20 }
 0x16b   :  { %7138 = vmatpush2.bf16.msra.mxu1 %v15875_v21  ;;  %7098 = vmatprep.subr.bf16.mxu0 %v15880_v22  ;;  %v15911_v22 = vld [vmem:[#allocation7 + $0x1484] ss:$16 sps:$4 sm:$0xff]  }
 0x16c   :  { %7139 = vmatprep.subr.bf16.mxu1 %v15883_v23  ;;  %v15914_v23 = vld [vmem:[#allocation7 + $0x1684] ss:$16 sps:$4 sm:$0xff]  }
 0x16e   :  { %7099 = vmatpush2.bf16.msra.mxu0 %v15878_v27  ;;  %v15917_v27 = vld [vmem:[#allocation7 + $0x1464] ss:$16 sps:$4 sm:$0xff]  }
 0x16f   :  { %7140 = vmatpush2.bf16.msra.mxu1 %v15881_v28  ;;  %7100 = vmatprep.subr.bf16.mxu0 %v15886_v30  ;;  %v15920_v28 = vld [vmem:[#allocation7 + $0x1664] ss:$16 sps:$4 sm:$0xff]   ;;  %v15915_v30 = vld [vmem:[#allocation7 + $0x1460] ss:$16 sps:$4 sm:$0xff]  }
 0x170   :  { %7141 = vmatprep.subr.bf16.mxu1 %v15889_v31  ;;  %v15918_v31 = vld [vmem:[#allocation7 + $0x1660] ss:$16 sps:$4 sm:$0xff]  }
 0x172   :  { %7101 = vmatpush2.bf16.msra.mxu0 %v15884_v40  ;;  %v15923_v40 = vld [vmem:[#allocation7 + $0x1444] ss:$16 sps:$4 sm:$0xff]  }
 0x173   :  { %7142 = vmatpush2.bf16.msra.mxu1 %v15887_v41  ;;  %7152 = vmatprep.subr.bf16.mxu0 %v15893_v42  ;;  %v15926_v41 = vld [vmem:[#allocation7 + $0x1644] ss:$16 sps:$4 sm:$0xff]   ;;  %v15921_v42 = vld [vmem:[#allocation7 + $0x1440] ss:$16 sps:$4 sm:$0xff]  }
 0x174   :  { %7193 = vmatprep.subr.bf16.mxu1 %v15896_v45  ;;  %v15924_v45 = vld [vmem:[#allocation7 + $0x1640] ss:$16 sps:$4 sm:$0xff]  }
 0x175   :  { %v6858_v6 = vpop.f32.mrf.mxu0  ;;  %7103 = vmatmul.mubr.bf16.vlgmr.msra.gmra.mxu0 %v18400_v54 }
 0x176   :  { %v6899_v7 = vpop.f32.mrf.mxu1  ;;  %7144 = vmatmul.mubr.bf16.vlgmr.msra.gmra.mxu1 %v18404_v55  ;;  %v6859_v24 = vadd.f32 %v6858_v6, %v18382_v1  ;;  %7153 = vmatpush1.bf16.msra.mxu0 %v15891_v46  ;;  %v15929_v46 = vld [vmem:[#allocation7 + $0x1424] ss:$16 sps:$4 sm:$0xff]  }
 0x177   :  { %7194 = vmatpush1.bf16.msra.mxu1 %v15894_v47  ;;  %v6860_v25 = vpop.f32.mrf.mxu0  ;;  %7154 = vmatprep.subr.bf16.mxu0 %v15899_v56  ;;  %v15932_v47 = vld [vmem:[#allocation7 + $0x1624] ss:$16 sps:$4 sm:$0xff]  }
 0x178   :  { %v6901_v8 = vpop.f32.mrf.mxu1  ;;  %7195 = vmatprep.subr.bf16.mxu1 %v15902_v60  ;;  %v18413_v12 = vadd.f32 %v6899_v7, %v6859_v24  ;;  %v6861_v13 = vadd.f32 %v6860_v25, %v18386_v39  ;;  %7184 = vmatprep.mubr.bf16.mxu0 %v18406_v0  ;;  %v15909_v39 = vld [vmem:[#allocation7 + $0x1480] ss:$16 sps:$4 sm:$0xff]   ;;  %v15935_v56 = vld [vmem:[#allocation7 + $0x1404] ss:$16 sps:$4 sm:$0xff]  }
 0x179   :  { %7225 = vmatprep.mubr.bf16.mxu1 %v18408_v2  ;;  %v6862_v18 = vpop.f32.mrf.mxu0  ;;  %v15938_v60 = vld [vmem:[#allocation7 + $0x1604] ss:$16 sps:$4 sm:$0xff]   ;;  %v15939_v24 = vld [vmem:[#allocation7 + $0x15e0] ss:$16 sps:$4 sm:$0xff]  }
 0x17a   :  { %v6903_v1 = vpop.f32.mrf.mxu1  ;;  %v18418_v19 = vadd.f32 %v6901_v8, %v6861_v13  ;;  %7155 = vmatpush1.bf16.msra.mxu0 %v15897_v61  ;;  %v15933_v61 = vld [vmem:[#allocation7 + $0x1400] ss:$16 sps:$4 sm:$0xff]   ;;  %v15941_v6 = vld [vmem:[#allocation7 + $0x15e4] ss:$16 sps:$4 sm:$0xff]  }
 0x17b   :  { %7196 = vmatpush1.bf16.msra.mxu1 %v15900_v63  ;;  %v6863_v20 = vpop.f32.mrf.mxu0  ;;  %7156 = vmatprep.subr.bf16.mxu0 %v15905_v9  ;;  %v15936_v63 = vld [vmem:[#allocation7 + $0x1600] ss:$16 sps:$4 sm:$0xff]   ;;  %v15944_v7 = vld [vmem:[#allocation7 + $0x17e4] ss:$16 sps:$4 sm:$0xff]  }
 0x17c   :  { %v6904_v21 = vpop.f32.mrf.mxu1  ;;  %7197 = vmatprep.subr.bf16.mxu1 %v15908_v44  ;;  %v15942_v25 = vld [vmem:[#allocation7 + $0x17e0] ss:$16 sps:$4 sm:$0xff]   ;;  %v15947_v8 = vld [vmem:[#allocation7 + $0x15c4] ss:$16 sps:$4 sm:$0xff]  }
 0x17d   :  { %v15950_v9 = vld [vmem:[#allocation7 + $0x17c4] ss:$16 sps:$4 sm:$0xff]   ;;  %v15945_v44 = vld [vmem:[#allocation7 + $0x15c0] ss:$16 sps:$4 sm:$0xff]  }
 0x17e   :  { %7157 = vmatpush1.bf16.msra.mxu0 %v15903_v14  ;;  %v15948_v13 = vld [vmem:[#allocation7 + $0x17c0] ss:$16 sps:$4 sm:$0xff]   ;;  %v15953_v14 = vld [vmem:[#allocation7 + $0x15a4] ss:$16 sps:$4 sm:$0xff]  }
 0x17f   :  { %7198 = vmatpush1.bf16.msra.mxu1 %v15906_v15  ;;  %7158 = vmatprep.subr.bf16.mxu0 %v15911_v22  ;;  %v15956_v15 = vld [vmem:[#allocation7 + $0x17a4] ss:$16 sps:$4 sm:$0xff]   ;;  %v15951_v18 = vld [vmem:[#allocation7 + $0x15a0] ss:$16 sps:$4 sm:$0xff]  }
 0x180   :  { %7199 = vmatprep.subr.bf16.mxu1 %v15914_v23  ;;  %v15954_v1 = vld [vmem:[#allocation7 + $0x17a0] ss:$16 sps:$4 sm:$0xff]   ;;  %v15959_v20 = vld [vmem:[#allocation7 + $0x1584] ss:$16 sps:$4 sm:$0xff]  }
 0x181   :  { %v15962_v21 = vld [vmem:[#allocation7 + $0x1784] ss:$16 sps:$4 sm:$0xff]   ;;  %v15957_v22 = vld [vmem:[#allocation7 + $0x1580] ss:$16 sps:$4 sm:$0xff]  }
 0x182   :  { %7159 = vmatpush1.bf16.msra.mxu0 %v15909_v39  ;;  %v15960_v23 = vld [vmem:[#allocation7 + $0x1780] ss:$16 sps:$4 sm:$0xff]   ;;  %v15965_v39 = vld [vmem:[#allocation7 + $0x1564] ss:$16 sps:$4 sm:$0xff]  }
 0x183   :  { %7200 = vmatpush1.bf16.msra.mxu1 %v15912_v26  ;;  %7160 = vmatprep.subr.bf16.mxu0 %v15917_v27  ;;  %v15968_v26 = vld [vmem:[#allocation7 + $0x1764] ss:$16 sps:$4 sm:$0xff]   ;;  %v15963_v27 = vld [vmem:[#allocation7 + $0x1560] ss:$16 sps:$4 sm:$0xff]  }
 0x184   :  { %7201 = vmatprep.subr.bf16.mxu1 %v15920_v28  ;;  %v15966_v28 = vld [vmem:[#allocation7 + $0x1760] ss:$16 sps:$4 sm:$0xff]  }
 0x186   :  { %7161 = vmatpush1.bf16.msra.mxu0 %v15915_v30  ;;  %v15971_v30 = vld [vmem:[#allocation7 + $0x1544] ss:$16 sps:$4 sm:$0xff]  }
 0x187   :  { %7202 = vmatpush1.bf16.msra.mxu1 %v15918_v31  ;;  %7162 = vmatprep.subr.bf16.mxu0 %v15923_v40  ;;  %v15974_v31 = vld [vmem:[#allocation7 + $0x1744] ss:$16 sps:$4 sm:$0xff]  }
 0x188   :  { %7203 = vmatprep.subr.bf16.mxu1 %v15926_v41  ;;  %v75_v40 = vld [vmem:[#allocation2 + $0x30] sm:$0xff] }
 0x189   :  { %v15969_v41 = vld [vmem:[#allocation7 + $0x1540] ss:$16 sps:$4 sm:$0xff]  }
 0x18a   :  { %7163 = vmatpush1.bf16.msra.mxu0 %v15921_v42  ;;  %v15972_v42 = vld [vmem:[#allocation7 + $0x1740] ss:$16 sps:$4 sm:$0xff]  }
 0x18b   :  { %7204 = vmatpush1.bf16.msra.mxu1 %v15924_v45  ;;  %7164 = vmatprep.subr.bf16.mxu0 %v15929_v46  ;;  %v15977_v45 = vld [vmem:[#allocation7 + $0x1524] ss:$16 sps:$4 sm:$0xff]  }
 0x18c   :  { %7205 = vmatprep.subr.bf16.mxu1 %v15932_v47  ;;  %v15980_v46 = vld [vmem:[#allocation7 + $0x1724] ss:$16 sps:$4 sm:$0xff]   ;;  %v185_v47 = vcombine.high %v75_v40, %v75_v40 }
 0x18e   :  { %7165 = vmatpush1.bf16.msra.mxu0 %v15927_v59  ;;  %v15975_v59 = vld [vmem:[#allocation7 + $0x1520] ss:$16 sps:$4 sm:$0xff]  }
 0x18f   :  { %7206 = vmatpush1.bf16.msra.mxu1 %v15930_v51  ;;  %7166 = vmatprep.subr.bf16.mxu0 %v15935_v56  ;;  %v15978_v51 = vld [vmem:[#allocation7 + $0x1720] ss:$16 sps:$4 sm:$0xff]   ;;  %v15983_v56 = vld [vmem:[#allocation7 + $0x1504] ss:$16 sps:$4 sm:$0xff]  }
 0x190   :  { %7207 = vmatprep.subr.bf16.mxu1 %v15938_v60  ;;  %v15986_v60 = vld [vmem:[#allocation7 + $0x1704] ss:$16 sps:$4 sm:$0xff]  }
 0x192   :  { %7167 = vmatpush1.bf16.msra.mxu0 %v15933_v61  ;;  %v18421_v61 = vrot.slane %v75_v40, %v18268_v49 }
 0x193   :  { %7208 = vmatpush1.bf16.msra.mxu1 %v15936_v63  ;;  %7168 = vmatprep.subr.bf16.mxu0 %v15941_v6  ;;  %v18424_v63 = vrot.slane %v185_v47, %v18268_v49  ;;  %v15981_v6 = vld [vmem:[#allocation7 + $0x1500] ss:$16 sps:$4 sm:$0xff]  }
 0x194   :  { %7209 = vmatprep.subr.bf16.mxu1 %v15944_v7  ;;  %v15984_v7 = vld [vmem:[#allocation7 + $0x1700] ss:$16 sps:$4 sm:$0xff]  }
 0x196   :  { %7169 = vmatpush2.bf16.msra.mxu0 %v15939_v24  ;;  %v15990_v24 = vld [vmem:[#allocation7 + $0x18e4] ss:$16 sps:$4 sm:$0xff]  }
 0x197   :  { %7210 = vmatpush2.bf16.msra.mxu1 %v15942_v25  ;;  %7170 = vmatprep.subr.bf16.mxu0 %v15947_v8  ;;  %v15993_v25 = vld [vmem:[#allocation7 + $0x1ae4] ss:$16 sps:$4 sm:$0xff]   ;;  %v15988_v8 = vld [vmem:[#allocation7 + $0x18e0] ss:$16 sps:$4 sm:$0xff]  }
 0x198   :  { %7211 = vmatprep.subr.bf16.mxu1 %v15950_v9  ;;  %v15991_v9 = vld [vmem:[#allocation7 + $0x1ae0] ss:$16 sps:$4 sm:$0xff]  }
 0x19a   :  { %7171 = vmatpush2.bf16.msra.mxu0 %v15945_v44  ;;  %v200_v44 = vcombine.high %v18421_v61, %v18421_v61 }
 0x19b   :  { %7212 = vmatpush2.bf16.msra.mxu1 %v15948_v13  ;;  %7172 = vmatprep.subr.bf16.mxu0 %v15953_v14  ;;  %v201_v13 = vcombine.high %v18424_v63, %v18424_v63  ;;  %v18432_v14 = vpack.c.bf16 %v18389_v35, %v18389_v35 }
 0x19c   :  { %7213 = vmatprep.subr.bf16.mxu1 %v15956_v15  ;;  %v18436_v15 = vpack.c.bf16 %v18392_v36, %v18392_v36 }
 0x19e   :  { %7173 = vmatpush2.bf16.msra.mxu0 %v15951_v18  ;;  %v15996_v18 = vld [vmem:[#allocation7 + $0x18c4] ss:$16 sps:$4 sm:$0xff]  }
 0x19f   :  { %7214 = vmatpush2.bf16.msra.mxu1 %v15954_v1  ;;  %7174 = vmatprep.subr.bf16.mxu0 %v15959_v20  ;;  %v15999_v1 = vld [vmem:[#allocation7 + $0x1ac4] ss:$16 sps:$4 sm:$0xff]   ;;  %v15994_v20 = vld [vmem:[#allocation7 + $0x18c0] ss:$16 sps:$4 sm:$0xff]  }
 0x1a0   :  { %7215 = vmatprep.subr.bf16.mxu1 %v15962_v21  ;;  %v15997_v21 = vld [vmem:[#allocation7 + $0x1ac0] ss:$16 sps:$4 sm:$0xff]  }
 0x1a2   :  { %7175 = vmatpush2.bf16.msra.mxu0 %v15957_v22  ;;  %v18438_v22 = vpack.c.bf16 %v200_v44, %v200_v44  ;;  %v16018_v44 = vld [vmem:[#allocation7 + $0x1840] ss:$16 sps:$4 sm:$0xff]  }
 0x1a3   :  { %7216 = vmatpush2.bf16.msra.mxu1 %v15960_v23  ;;  %7176 = vmatprep.subr.bf16.mxu0 %v15965_v39  ;;  %v18440_v23 = vpack.c.bf16 %v201_v13, %v201_v13  ;;  %v16021_v13 = vld [vmem:[#allocation7 + $0x1a40] ss:$16 sps:$4 sm:$0xff]  }
 0x1a4   :  { %7217 = vmatprep.subr.bf16.mxu1 %v15968_v26 }
 0x1a6   :  { %7177 = vmatpush2.bf16.msra.mxu0 %v15963_v27 }
 0x1a7   :  { %7218 = vmatpush2.bf16.msra.mxu1 %v15966_v28  ;;  %7178 = vmatprep.subr.bf16.mxu0 %v15971_v30  ;;  %v16002_v28 = vld [vmem:[#allocation7 + $0x18a4] ss:$16 sps:$4 sm:$0xff]  }
 0x1a8   :  { %7219 = vmatprep.subr.bf16.mxu1 %v15974_v31  ;;  %v16005_v30 = vld [vmem:[#allocation7 + $0x1aa4] ss:$16 sps:$4 sm:$0xff]  }
 0x1aa   :  { %7179 = vmatpush2.bf16.msra.mxu0 %v15969_v41  ;;  %v16000_v41 = vld [vmem:[#allocation7 + $0x18a0] ss:$16 sps:$4 sm:$0xff]  }
 0x1ab   :  { %7220 = vmatpush2.bf16.msra.mxu1 %v15972_v42  ;;  %7180 = vmatprep.subr.bf16.mxu0 %v15977_v45  ;;  %v16003_v42 = vld [vmem:[#allocation7 + $0x1aa0] ss:$16 sps:$4 sm:$0xff]  }
 0x1ac   :  { %7221 = vmatprep.subr.bf16.mxu1 %v15980_v46 }
 0x1ae   :  { %7181 = vmatpush2.bf16.msra.mxu0 %v15975_v59 }
 0x1af   :  { %7222 = vmatpush2.bf16.msra.mxu1 %v15978_v51  ;;  %7182 = vmatprep.subr.bf16.mxu0 %v15983_v56  ;;  %v16008_v51 = vld [vmem:[#allocation7 + $0x1884] ss:$16 sps:$4 sm:$0xff]  }
 0x1b0   :  { %7223 = vmatprep.subr.bf16.mxu1 %v15986_v60  ;;  %v16011_v56 = vld [vmem:[#allocation7 + $0x1a84] ss:$16 sps:$4 sm:$0xff]   ;;  %v16009_v60 = vld [vmem:[#allocation7 + $0x1a80] ss:$16 sps:$4 sm:$0xff]  }
 0x1b2   :  { %7183 = vmatpush2.bf16.msra.mxu0 %v15981_v6  ;;  %v16014_v6 = vld [vmem:[#allocation7 + $0x1864] ss:$16 sps:$4 sm:$0xff]  }
 0x1b3   :  { %7224 = vmatpush2.bf16.msra.mxu1 %v15984_v7  ;;  %7234 = vmatprep.subr.bf16.mxu0 %v15990_v24  ;;  %v16017_v7 = vld [vmem:[#allocation7 + $0x1a64] ss:$16 sps:$4 sm:$0xff]   ;;  %v16012_v24 = vld [vmem:[#allocation7 + $0x1860] ss:$16 sps:$4 sm:$0xff]  }
 0x1b4   :  { %7275 = vmatprep.subr.bf16.mxu1 %v15993_v25  ;;  %v16015_v25 = vld [vmem:[#allocation7 + $0x1a60] ss:$16 sps:$4 sm:$0xff]  }
 0x1b5   :  { %v6940_v39 = vpop.f32.mrf.mxu0  ;;  %7185 = vmatmul.mubr.bf16.vlgmr.msra.gmra.mxu0 %v18432_v14 }
 0x1b6   :  { %v6981_v26 = vpop.f32.mrf.mxu1  ;;  %7226 = vmatmul.mubr.bf16.vlgmr.msra.gmra.mxu1 %v18436_v15  ;;  %v6941_v35 = vadd.f32 %v6940_v39, %v18413_v12  ;;  %7235 = vmatpush1.bf16.msra.mxu0 %v15988_v8  ;;  %v16020_v8 = vld [vmem:[#allocation7 + $0x1844] ss:$16 sps:$4 sm:$0xff]  }
 0x1b7   :  { %7276 = vmatpush1.bf16.msra.mxu1 %v15991_v9  ;;  %v6942_v36 = vpop.f32.mrf.mxu0  ;;  %7236 = vmatprep.subr.bf16.mxu0 %v15996_v18  ;;  %v16023_v9 = vld [vmem:[#allocation7 + $0x1a44] ss:$16 sps:$4 sm:$0xff]  }
 0x1b8   :  { %v6983_v27 = vpop.f32.mrf.mxu1  ;;  %7277 = vmatprep.subr.bf16.mxu1 %v15999_v1  ;;  %v18445_v31 = vadd.f32 %v6981_v26, %v6941_v35  ;;  %v6943_v40 = vadd.f32 %v6942_v36, %v18418_v19  ;;  %7266 = vmatprep.mubr.bf16.mxu0 %v18438_v22  ;;  %v16006_v19 = vld [vmem:[#allocation7 + $0x1880] ss:$16 sps:$4 sm:$0xff]   ;;  %v16026_v18 = vld [vmem:[#allocation7 + $0x1824] ss:$16 sps:$4 sm:$0xff]  }
 0x1b9   :  { %7307 = vmatprep.mubr.bf16.mxu1 %v18440_v23  ;;  %v6944_v45 = vpop.f32.mrf.mxu0  ;;  %v16029_v1 = vld [vmem:[#allocation7 + $0x1a24] ss:$16 sps:$4 sm:$0xff]   ;;  %v16030_v35 = vld [vmem:[#allocation7 + $0x1800] ss:$16 sps:$4 sm:$0xff]  }
 0x1ba   :  { %v6985_v12 = vpop.f32.mrf.mxu1  ;;  %v18450_v46 = vadd.f32 %v6983_v27, %v6943_v40  ;;  %7237 = vmatpush1.bf16.msra.mxu0 %v15994_v20  ;;  %v16024_v20 = vld [vmem:[#allocation7 + $0x1820] ss:$16 sps:$4 sm:$0xff]   ;;  %v16032_v39 = vld [vmem:[#allocation7 + $0x1804] ss:$16 sps:$4 sm:$0xff]  }
 0x1bb   :  { %7278 = vmatpush1.bf16.msra.mxu1 %v15997_v21  ;;  %v6945_v47 = vpop.f32.mrf.mxu0  ;;  %7238 = vmatprep.subr.bf16.mxu0 %v16002_v28  ;;  %v16027_v21 = vld [vmem:[#allocation7 + $0x1a20] ss:$16 sps:$4 sm:$0xff]   ;;  %v16035_v26 = vld [vmem:[#allocation7 + $0x1a04] ss:$16 sps:$4 sm:$0xff]  }
 0x1bc   :  { %v6986_v59 = vpop.f32.mrf.mxu1  ;;  %7279 = vmatprep.subr.bf16.mxu1 %v16005_v30  ;;  %v16033_v36 = vld [vmem:[#allocation7 + $0x1a00] ss:$16 sps:$4 sm:$0xff]   ;;  %v16038_v27 = vld [vmem:[#allocation7 + $0x19e4] ss:$16 sps:$4 sm:$0xff]  }
 0x1bd   :  { %v16041_v28 = vld [vmem:[#allocation7 + $0x1be4] ss:$16 sps:$4 sm:$0xff]   ;;  %v16036_v30 = vld [vmem:[#allocation7 + $0x19e0] ss:$16 sps:$4 sm:$0xff]  }
 0x1be   :  { %7239 = vmatpush1.bf16.msra.mxu0 %v16000_v41  ;;  %v16039_v40 = vld [vmem:[#allocation7 + $0x1be0] ss:$16 sps:$4 sm:$0xff]   ;;  %v16044_v41 = vld [vmem:[#allocation7 + $0x19c4] ss:$16 sps:$4 sm:$0xff]  }
 0x1bf   :  { %7280 = vmatpush1.bf16.msra.mxu1 %v16003_v42  ;;  %7240 = vmatprep.subr.bf16.mxu0 %v16008_v51  ;;  %v16047_v42 = vld [vmem:[#allocation7 + $0x1bc4] ss:$16 sps:$4 sm:$0xff]   ;;  %v16042_v45 = vld [vmem:[#allocation7 + $0x19c0] ss:$16 sps:$4 sm:$0xff]  }
 0x1c0   :  { %7281 = vmatprep.subr.bf16.mxu1 %v16011_v56  ;;  %v16045_v12 = vld [vmem:[#allocation7 + $0x1bc0] ss:$16 sps:$4 sm:$0xff]   ;;  %v16050_v47 = vld [vmem:[#allocation7 + $0x19a4] ss:$16 sps:$4 sm:$0xff]  }
 0x1c1   :  { %v16053_v59 = vld [vmem:[#allocation7 + $0x1ba4] ss:$16 sps:$4 sm:$0xff]   ;;  %v16048_v51 = vld [vmem:[#allocation7 + $0x19a0] ss:$16 sps:$4 sm:$0xff]  }
 0x1c2   :  { %7241 = vmatpush1.bf16.msra.mxu0 %v16006_v19  ;;  %v16051_v56 = vld [vmem:[#allocation7 + $0x1ba0] ss:$16 sps:$4 sm:$0xff]   ;;  %v16056_v19 = vld [vmem:[#allocation7 + $0x1984] ss:$16 sps:$4 sm:$0xff]  }
 0x1c3   :  { %7282 = vmatpush1.bf16.msra.mxu1 %v16009_v60  ;;  %7242 = vmatprep.subr.bf16.mxu0 %v16014_v6  ;;  %v16059_v60 = vld [vmem:[#allocation7 + $0x1b84] ss:$16 sps:$4 sm:$0xff]   ;;  %v16054_v6 = vld [vmem:[#allocation7 + $0x1980] ss:$16 sps:$4 sm:$0xff]  }
 0x1c4   :  { %7283 = vmatprep.subr.bf16.mxu1 %v16017_v7  ;;  %v16057_v7 = vld [vmem:[#allocation7 + $0x1b80] ss:$16 sps:$4 sm:$0xff]  }
 0x1c6   :  { %7243 = vmatpush1.bf16.msra.mxu0 %v16012_v24  ;;  %v16062_v24 = vld [vmem:[#allocation7 + $0x1964] ss:$16 sps:$4 sm:$0xff]  }
 0x1c7   :  { %7284 = vmatpush1.bf16.msra.mxu1 %v16015_v25  ;;  %7244 = vmatprep.subr.bf16.mxu0 %v16020_v8  ;;  %v16065_v25 = vld [vmem:[#allocation7 + $0x1b64] ss:$16 sps:$4 sm:$0xff]   ;;  %v16060_v8 = vld [vmem:[#allocation7 + $0x1960] ss:$16 sps:$4 sm:$0xff]  }
 0x1c8   :  { %7285 = vmatprep.subr.bf16.mxu1 %v16023_v9  ;;  %v16063_v9 = vld [vmem:[#allocation7 + $0x1b60] ss:$16 sps:$4 sm:$0xff]  }
 0x1ca   :  { %7245 = vmatpush1.bf16.msra.mxu0 %v16018_v44  ;;  %v16068_v44 = vld [vmem:[#allocation7 + $0x1944] ss:$16 sps:$4 sm:$0xff]  }
 0x1cb   :  { %7286 = vmatpush1.bf16.msra.mxu1 %v16021_v13  ;;  %7246 = vmatprep.subr.bf16.mxu0 %v16026_v18  ;;  %v16071_v13 = vld [vmem:[#allocation7 + $0x1b44] ss:$16 sps:$4 sm:$0xff]   ;;  %v16066_v18 = vld [vmem:[#allocation7 + $0x1940] ss:$16 sps:$4 sm:$0xff]  }
 0x1cc   :  { %7287 = vmatprep.subr.bf16.mxu1 %v16029_v1  ;;  %v16069_v1 = vld [vmem:[#allocation7 + $0x1b40] ss:$16 sps:$4 sm:$0xff]  }
 0x1ce   :  { %7247 = vmatpush1.bf16.msra.mxu0 %v16024_v20  ;;  %v16074_v20 = vld [vmem:[#allocation7 + $0x1924] ss:$16 sps:$4 sm:$0xff]  }
 0x1cf   :  { %7288 = vmatpush1.bf16.msra.mxu1 %v16027_v21  ;;  %7248 = vmatprep.subr.bf16.mxu0 %v16032_v39  ;;  %v16077_v21 = vld [vmem:[#allocation7 + $0x1b24] ss:$16 sps:$4 sm:$0xff]   ;;  %v16072_v39 = vld [vmem:[#allocation7 + $0x1920] ss:$16 sps:$4 sm:$0xff]  }
 0x1d0   :  { %7289 = vmatprep.subr.bf16.mxu1 %v16035_v26  ;;  %v16075_v26 = vld [vmem:[#allocation7 + $0x1b20] ss:$16 sps:$4 sm:$0xff]  }
 0x1d2   :  { %7249 = vmatpush1.bf16.msra.mxu0 %v16030_v35  ;;  %v16080_v35 = vld [vmem:[#allocation7 + $0x1904] ss:$16 sps:$4 sm:$0xff]  }
 0x1d3   :  { %7290 = vmatpush1.bf16.msra.mxu1 %v16033_v36  ;;  %7250 = vmatprep.subr.bf16.mxu0 %v16038_v27  ;;  %v16083_v36 = vld [vmem:[#allocation7 + $0x1b04] ss:$16 sps:$4 sm:$0xff]   ;;  %v16078_v27 = vld [vmem:[#allocation7 + $0x1900] ss:$16 sps:$4 sm:$0xff]  }
 0x1d4   :  { %7291 = vmatprep.subr.bf16.mxu1 %v16041_v28  ;;  %v16081_v28 = vld [vmem:[#allocation7 + $0x1b00] ss:$16 sps:$4 sm:$0xff]  }
 0x1d6   :  { %7251 = vmatpush2.bf16.msra.mxu0 %v16036_v30  ;;  %v16087_v30 = vld [vmem:[#allocation7 + $0xec] ss:$16 sps:$4 sm:$0xff]  }
 0x1d7   :  { %7292 = vmatpush2.bf16.msra.mxu1 %v16039_v40  ;;  %7252 = vmatprep.subr.bf16.mxu0 %v16044_v41  ;;  %v16090_v40 = vld [vmem:[#allocation7 + $0x2ec] ss:$16 sps:$4 sm:$0xff]   ;;  %v16085_v41 = vld [vmem:[#allocation7 + $0xe8] ss:$16 sps:$4 sm:$0xff]  }
 0x1d8   :  { %7293 = vmatprep.subr.bf16.mxu1 %v16047_v42  ;;  %v16088_v42 = vld [vmem:[#allocation7 + $0x2e8] ss:$16 sps:$4 sm:$0xff]  }
 0x1da   :  { %7253 = vmatpush2.bf16.msra.mxu0 %v16042_v45  ;;  %v18454_v45 = vpack.c.bf16 %v18421_v61, %v18421_v61 }
 0x1db   :  { %7294 = vmatpush2.bf16.msra.mxu1 %v16045_v12  ;;  %7254 = vmatprep.subr.bf16.mxu0 %v16050_v47  ;;  %v18458_v12 = vpack.c.bf16 %v18424_v63, %v18424_v63  ;;  %v16093_v47 = vld [vmem:[#allocation7 + $0xcc] ss:$16 sps:$4 sm:$0xff]  }
 0x1dc   :  { %7295 = vmatprep.subr.bf16.mxu1 %v16053_v59  ;;  %v16096_v59 = vld [vmem:[#allocation7 + $0x2cc] ss:$16 sps:$4 sm:$0xff]  }
 0x1de   :  { %7255 = vmatpush2.bf16.msra.mxu0 %v16048_v51  ;;  %v16091_v51 = vld [vmem:[#allocation7 + $0xc8] ss:$16 sps:$4 sm:$0xff]  }
 0x1df   :  { %7296 = vmatpush2.bf16.msra.mxu1 %v16051_v56  ;;  %7256 = vmatprep.subr.bf16.mxu0 %v16056_v19  ;;  %v16094_v56 = vld [vmem:[#allocation7 + $0x2c8] ss:$16 sps:$4 sm:$0xff]  }
 0x1e0   :  { %7297 = vmatprep.subr.bf16.mxu1 %v16059_v60 }
 0x1e2   :  { %7257 = vmatpush2.bf16.msra.mxu0 %v16054_v6 }
 0x1e3   :  { %7298 = vmatpush2.bf16.msra.mxu1 %v16057_v7  ;;  %7258 = vmatprep.subr.bf16.mxu0 %v16062_v24  ;;  %v16099_v7 = vld [vmem:[#allocation7 + $0xac] ss:$16 sps:$4 sm:$0xff]  }
 0x1e4   :  { %7299 = vmatprep.subr.bf16.mxu1 %v16065_v25  ;;  %v16102_v24 = vld [vmem:[#allocation7 + $0x2ac] ss:$16 sps:$4 sm:$0xff]  }
 0x1e6   :  { %7259 = vmatpush2.bf16.msra.mxu0 %v16060_v8 }
 0x1e7   :  { %7300 = vmatpush2.bf16.msra.mxu1 %v16063_v9  ;;  %7260 = vmatprep.subr.bf16.mxu0 %v16068_v44  ;;  %v16097_v9 = vld [vmem:[#allocation7 + $0xa8] ss:$16 sps:$4 sm:$0xff]  }
 0x1e8   :  { %7301 = vmatprep.subr.bf16.mxu1 %v16071_v13  ;;  %v16100_v44 = vld [vmem:[#allocation7 + $0x2a8] ss:$16 sps:$4 sm:$0xff]  }
 0x1ea   :  { %7261 = vmatpush2.bf16.msra.mxu0 %v16066_v18 }
 0x1eb   :  { %7302 = vmatpush2.bf16.msra.mxu1 %v16069_v1  ;;  %7262 = vmatprep.subr.bf16.mxu0 %v16074_v20 }
 0x1ec   :  { %7303 = vmatprep.subr.bf16.mxu1 %v16077_v21  ;;  %v16105_v21 = vld [vmem:[#allocation7 + $0x8c] ss:$16 sps:$4 sm:$0xff]  }
 0x1ee   :  { %7263 = vmatpush2.bf16.msra.mxu0 %v16072_v39  ;;  %v16108_v39 = vld [vmem:[#allocation7 + $0x28c] ss:$16 sps:$4 sm:$0xff]  }
 0x1ef   :  { %7304 = vmatpush2.bf16.msra.mxu1 %v16075_v26  ;;  %7264 = vmatprep.subr.bf16.mxu0 %v16080_v35  ;;  %v16106_v26 = vld [vmem:[#allocation7 + $0x288] ss:$16 sps:$4 sm:$0xff]  }
 0x1f0   :  { %7305 = vmatprep.subr.bf16.mxu1 %v16083_v36  ;;  %v16109_v35 = vld [vmem:[#allocation7 + $0x68] ss:$16 sps:$4 sm:$0xff]  }
 0x1f1   :  { %v16112_v36 = vld [vmem:[#allocation7 + $0x268] ss:$16 sps:$4 sm:$0xff]  }
 0x1f2   :  { %7265 = vmatpush2.bf16.msra.mxu0 %v16078_v27  ;;  %v16117_v27 = vld [vmem:[#allocation7 + $0x4c] ss:$16 sps:$4 sm:$0xff]  }
 0x1f3   :  { %7306 = vmatpush2.bf16.msra.mxu1 %v16081_v28  ;;  %7316 = vmatprep.subr.bf16.mxu0 %v16087_v30  ;;  %v16120_v28 = vld [vmem:[#allocation7 + $0x24c] ss:$16 sps:$4 sm:$0xff]   ;;  %v16115_v30 = vld [vmem:[#allocation7 + $0x48] ss:$16 sps:$4 sm:$0xff]  }
 0x1f4   :  { %7357 = vmatprep.subr.bf16.mxu1 %v16090_v40  ;;  %v16118_v40 = vld [vmem:[#allocation7 + $0x248] ss:$16 sps:$4 sm:$0xff]  }
 0x1f5   :  { %v7022_v19 = vpop.f32.mrf.mxu0  ;;  %7267 = vmatmul.mubr.bf16.vlgmr.msra.gmra.mxu0 %v18454_v45 }
 0x1f6   :  { %v7063_v60 = vpop.f32.mrf.mxu1  ;;  %7308 = vmatmul.mubr.bf16.vlgmr.msra.gmra.mxu1 %v18458_v12  ;;  %v7023_v61 = vadd.f32 %v7022_v19, %v18445_v31  ;;  %7317 = vmatpush1.bf16.msra.mxu0 %v16085_v41  ;;  %v16123_v41 = vld [vmem:[#allocation7 + $0x2c] ss:$16 sps:$4 sm:$0xff]   ;;  %v16127_v19 = vld [vmem:[#allocation7 + $0x8] ss:$16 sps:$4 sm:$0xff]  }
 0x1f7   :  { %7358 = vmatpush1.bf16.msra.mxu1 %v16088_v42  ;;  %v7024_v63 = vpop.f32.mrf.mxu0  ;;  %7318 = vmatprep.subr.bf16.mxu0 %v16093_v47  ;;  %v16126_v42 = vld [vmem:[#allocation7 + $0x22c] ss:$16 sps:$4 sm:$0xff]   ;;  %v16121_v47 = vld [vmem:[#allocation7 + $0x28] ss:$16 sps:$4 sm:$0xff]  }
 0x1f8   :  { %v7065_v6 = vpop.f32.mrf.mxu1  ;;  %7359 = vmatprep.subr.bf16.mxu1 %v16096_v59  ;;  %v18463_v25 = vadd.f32 %v7063_v60, %v7023_v61  ;;  %v7025_v8 = vadd.f32 %v7024_v63, %v18450_v46  ;;  %7348 = vmatprep.mubr.bf16.mxu0 %v18272_v62  ;;  %v16103_v46 = vld [vmem:[#allocation7 + $0x88] ss:$16 sps:$4 sm:$0xff]   ;;  %v16111_v62 = vld [vmem:[#allocation7 + $0x6c] ss:$16 sps:$4 sm:$0xff]  }
 0x1f9   :  { %7389 = vmatprep.mubr.bf16.mxu1 %v18274_v3  ;;  %v7026_v13 = vpop.f32.mrf.mxu0  ;;  %v16114_v3 = vld [vmem:[#allocation7 + $0x26c] ss:$16 sps:$4 sm:$0xff]   ;;  %v16124_v59 = vld [vmem:[#allocation7 + $0x228] ss:$16 sps:$4 sm:$0xff]  }
 0x1fa   :  { %v7067_v31 = vpop.f32.mrf.mxu1  ;;  %v18468_v18 = vadd.f32 %v7065_v6, %v7025_v8  ;;  %7319 = vmatpush1.bf16.msra.mxu0 %v16091_v51  ;;  %v16129_v51 = vld [vmem:[#allocation7 + $0xc] ss:$16 sps:$4 sm:$0xff]   ;;  %v16130_v60 = vld [vmem:[#allocation7 + $0x208] ss:$16 sps:$4 sm:$0xff]  }
 0x1fb   :  { %7360 = vmatpush1.bf16.msra.mxu1 %v16094_v56  ;;  %v7027_v1 = vpop.f32.mrf.mxu0  ;;  %7320 = vmatprep.subr.bf16.mxu0 %v16099_v7  ;;  %v16132_v56 = vld [vmem:[#allocation7 + $0x20c] ss:$16 sps:$4 sm:$0xff]   ;;  %v16133_v6 = vld [vmem:[#allocation7 + $0x1e8] ss:$16 sps:$4 sm:$0xff]  }
 0x1fc   :  { %v7068_v20 = vpop.f32.mrf.mxu1  ;;  %7361 = vmatprep.subr.bf16.mxu1 %v16102_v24  ;;  %v16135_v61 = vld [vmem:[#allocation7 + $0x1ec] ss:$16 sps:$4 sm:$0xff]   ;;  %v16136_v7 = vld [vmem:[#allocation7 + $0x3e8] ss:$16 sps:$4 sm:$0xff]  }
 0x1fd   :  { %v16138_v63 = vld [vmem:[#allocation7 + $0x3ec] ss:$16 sps:$4 sm:$0xff]   ;;  %v16145_v1 = vld [vmem:[#allocation7 + $0x1a8] ss:$16 sps:$4 sm:$0xff]  }
 0x1fe   :  { %7321 = vmatpush1.bf16.msra.mxu0 %v16097_v9  ;;  %v16141_v24 = vld [vmem:[#allocation7 + $0x1cc] ss:$16 sps:$4 sm:$0xff]   ;;  %v16139_v9 = vld [vmem:[#allocation7 + $0x1c8] ss:$16 sps:$4 sm:$0xff]  }
 0x1ff   :  { %7362 = vmatpush1.bf16.msra.mxu1 %v16100_v44  ;;  %7322 = vmatprep.subr.bf16.mxu0 %v16105_v21  ;;  %v16144_v8 = vld [vmem:[#allocation7 + $0x3cc] ss:$16 sps:$4 sm:$0xff]   ;;  %v16142_v44 = vld [vmem:[#allocation7 + $0x3c8] ss:$16 sps:$4 sm:$0xff]  }
 0x200   :  { %7363 = vmatprep.subr.bf16.mxu1 %v16108_v39  ;;  %v16147_v13 = vld [vmem:[#allocation7 + $0x1ac] ss:$16 sps:$4 sm:$0xff]   ;;  %v16148_v20 = vld [vmem:[#allocation7 + $0x3a8] ss:$16 sps:$4 sm:$0xff]  }
 0x201   :  { %v16150_v31 = vld [vmem:[#allocation7 + $0x3ac] ss:$16 sps:$4 sm:$0xff]  }
 0x202   :  { %7323 = vmatpush1.bf16.msra.mxu0 %v16103_v46  ;;  %v16153_v21 = vld [vmem:[#allocation7 + $0x18c] ss:$16 sps:$4 sm:$0xff]   ;;  %v16151_v46 = vld [vmem:[#allocation7 + $0x188] ss:$16 sps:$4 sm:$0xff]  }
 0x203   :  { %7364 = vmatpush1.bf16.msra.mxu1 %v16106_v26  ;;  %7324 = vmatprep.subr.bf16.mxu0 %v16111_v62  ;;  %v16156_v39 = vld [vmem:[#allocation7 + $0x38c] ss:$16 sps:$4 sm:$0xff]   ;;  %v16154_v26 = vld [vmem:[#allocation7 + $0x388] ss:$16 sps:$4 sm:$0xff]  }
 0x204   :  { %7365 = vmatprep.subr.bf16.mxu1 %v16114_v3  ;;  %v16159_v62 = vld [vmem:[#allocation7 + $0x16c] ss:$16 sps:$4 sm:$0xff]  }
 0x205   :  { %v16162_v3 = vld [vmem:[#allocation7 + $0x36c] ss:$16 sps:$4 sm:$0xff]  }
 0x206   :  { %7325 = vmatpush1.bf16.msra.mxu0 %v16109_v35  ;;  %v16157_v35 = vld [vmem:[#allocation7 + $0x168] ss:$16 sps:$4 sm:$0xff]  }
 0x207   :  { %7366 = vmatpush1.bf16.msra.mxu1 %v16112_v36  ;;  %7326 = vmatprep.subr.bf16.mxu0 %v16117_v27  ;;  %v16160_v36 = vld [vmem:[#allocation7 + $0x368] ss:$16 sps:$4 sm:$0xff]   ;;  %v16165_v27 = vld [vmem:[#allocation7 + $0x14c] ss:$16 sps:$4 sm:$0xff]  }
 0x208   :  { %7367 = vmatprep.subr.bf16.mxu1 %v16120_v28  ;;  %v16168_v28 = vld [vmem:[#allocation7 + $0x34c] ss:$16 sps:$4 sm:$0xff]  }
 0x20a   :  { %7327 = vmatpush1.bf16.msra.mxu0 %v16115_v30  ;;  %v16163_v30 = vld [vmem:[#allocation7 + $0x148] ss:$16 sps:$4 sm:$0xff]  }
 0x20b   :  { %7368 = vmatpush1.bf16.msra.mxu1 %v16118_v40  ;;  %7328 = vmatprep.subr.bf16.mxu0 %v16123_v41  ;;  %v16166_v40 = vld [vmem:[#allocation7 + $0x348] ss:$16 sps:$4 sm:$0xff]   ;;  %v16171_v41 = vld [vmem:[#allocation7 + $0x12c] ss:$16 sps:$4 sm:$0xff]  }
 0x20c   :  { %7369 = vmatprep.subr.bf16.mxu1 %v16126_v42  ;;  %v16174_v42 = vld [vmem:[#allocation7 + $0x32c] ss:$16 sps:$4 sm:$0xff]  }
 0x20e   :  { %7329 = vmatpush1.bf16.msra.mxu0 %v16121_v47  ;;  %v16169_v47 = vld [vmem:[#allocation7 + $0x128] ss:$16 sps:$4 sm:$0xff]  }
 0x20f   :  { %7370 = vmatpush1.bf16.msra.mxu1 %v16124_v59  ;;  %7330 = vmatprep.subr.bf16.mxu0 %v16129_v51  ;;  %v16172_v59 = vld [vmem:[#allocation7 + $0x328] ss:$16 sps:$4 sm:$0xff]   ;;  %v16177_v51 = vld [vmem:[#allocation7 + $0x10c] ss:$16 sps:$4 sm:$0xff]  }
 0x210   :  { %7371 = vmatprep.subr.bf16.mxu1 %v16132_v56  ;;  %v16180_v56 = vld [vmem:[#allocation7 + $0x30c] ss:$16 sps:$4 sm:$0xff]  }
 0x212   :  { %7331 = vmatpush1.bf16.msra.mxu0 %v16127_v19  ;;  %v16175_v19 = vld [vmem:[#allocation7 + $0x108] ss:$16 sps:$4 sm:$0xff]  }
 0x213   :  { %7372 = vmatpush1.bf16.msra.mxu1 %v16130_v60  ;;  %7332 = vmatprep.subr.bf16.mxu0 %v16135_v61  ;;  %v16178_v60 = vld [vmem:[#allocation7 + $0x308] ss:$16 sps:$4 sm:$0xff]   ;;  %v16183_v61 = vld [vmem:[#allocation7 + $0x4ec] ss:$16 sps:$4 sm:$0xff]  }
 0x214   :  { %7373 = vmatprep.subr.bf16.mxu1 %v16138_v63  ;;  %v16186_v63 = vld [vmem:[#allocation7 + $0x6ec] ss:$16 sps:$4 sm:$0xff]  }
 0x216   :  { %7333 = vmatpush2.bf16.msra.mxu0 %v16133_v6  ;;  %v16181_v6 = vld [vmem:[#allocation7 + $0x4e8] ss:$16 sps:$4 sm:$0xff]  }
 0x217   :  { %7374 = vmatpush2.bf16.msra.mxu1 %v16136_v7  ;;  %7334 = vmatprep.subr.bf16.mxu0 %v16141_v24  ;;  %v16184_v7 = vld [vmem:[#allocation7 + $0x6e8] ss:$16 sps:$4 sm:$0xff]   ;;  %v16189_v24 = vld [vmem:[#allocation7 + $0x4cc] ss:$16 sps:$4 sm:$0xff]  }
 0x218   :  { %7375 = vmatprep.subr.bf16.mxu1 %v16144_v8  ;;  %v16192_v8 = vld [vmem:[#allocation7 + $0x6cc] ss:$16 sps:$4 sm:$0xff]  }
 0x21a   :  { %7335 = vmatpush2.bf16.msra.mxu0 %v16139_v9  ;;  %v16187_v9 = vld [vmem:[#allocation7 + $0x4c8] ss:$16 sps:$4 sm:$0xff]  }
 0x21b   :  { %7376 = vmatpush2.bf16.msra.mxu1 %v16142_v44  ;;  %7336 = vmatprep.subr.bf16.mxu0 %v16147_v13  ;;  %v16190_v44 = vld [vmem:[#allocation7 + $0x6c8] ss:$16 sps:$4 sm:$0xff]  }
 0x21c   :  { %7377 = vmatprep.subr.bf16.mxu1 %v16150_v31 }
 0x21e   :  { %7337 = vmatpush2.bf16.msra.mxu0 %v16145_v1 }
 0x21f   :  { %7378 = vmatpush2.bf16.msra.mxu1 %v16148_v20  ;;  %7338 = vmatprep.subr.bf16.mxu0 %v16153_v21 }
 0x220   :  { %7379 = vmatprep.subr.bf16.mxu1 %v16156_v39  ;;  %v16195_v39 = vld [vmem:[#allocation7 + $0x4ac] ss:$16 sps:$4 sm:$0xff]  }
 0x222   :  { %7339 = vmatpush2.bf16.msra.mxu0 %v16151_v46  ;;  %v16198_v46 = vld [vmem:[#allocation7 + $0x6ac] ss:$16 sps:$4 sm:$0xff]  }
 0x223   :  { %7380 = vmatpush2.bf16.msra.mxu1 %v16154_v26  ;;  %7340 = vmatprep.subr.bf16.mxu0 %v16159_v62 }
 0x224   :  { %7381 = vmatprep.subr.bf16.mxu1 %v16162_v3  ;;  %v16193_v3 = vld [vmem:[#allocation7 + $0x4a8] ss:$16 sps:$4 sm:$0xff]  }
 0x226   :  { %7341 = vmatpush2.bf16.msra.mxu0 %v16157_v35  ;;  %v16196_v35 = vld [vmem:[#allocation7 + $0x6a8] ss:$16 sps:$4 sm:$0xff]  }
 0x227   :  { %7382 = vmatpush2.bf16.msra.mxu1 %v16160_v36  ;;  %7342 = vmatprep.subr.bf16.mxu0 %v16165_v27 }
 0x228   :  { %7383 = vmatprep.subr.bf16.mxu1 %v16168_v28  ;;  %v16201_v28 = vld [vmem:[#allocation7 + $0x48c] ss:$16 sps:$4 sm:$0xff]  }
 0x22a   :  { %7343 = vmatpush2.bf16.msra.mxu0 %v16163_v30  ;;  %v16204_v30 = vld [vmem:[#allocation7 + $0x68c] ss:$16 sps:$4 sm:$0xff]  }
 0x22b   :  { %7384 = vmatpush2.bf16.msra.mxu1 %v16166_v40  ;;  %7344 = vmatprep.subr.bf16.mxu0 %v16171_v41  ;;  %v16202_v40 = vld [vmem:[#allocation7 + $0x688] ss:$16 sps:$4 sm:$0xff]  }
 0x22c   :  { %7385 = vmatprep.subr.bf16.mxu1 %v16174_v42  ;;  %v16205_v41 = vld [vmem:[#allocation7 + $0x468] ss:$16 sps:$4 sm:$0xff]  }
 0x22d   :  { %v16208_v42 = vld [vmem:[#allocation7 + $0x668] ss:$16 sps:$4 sm:$0xff]  }
 0x22e   :  { %7345 = vmatpush2.bf16.msra.mxu0 %v16169_v47  ;;  %v16213_v47 = vld [vmem:[#allocation7 + $0x44c] ss:$16 sps:$4 sm:$0xff]  }
 0x22f   :  { %7386 = vmatpush2.bf16.msra.mxu1 %v16172_v59  ;;  %7346 = vmatprep.subr.bf16.mxu0 %v16177_v51  ;;  %v16216_v59 = vld [vmem:[#allocation7 + $0x64c] ss:$16 sps:$4 sm:$0xff]   ;;  %v16211_v51 = vld [vmem:[#allocation7 + $0x448] ss:$16 sps:$4 sm:$0xff]  }
 0x230   :  { %7387 = vmatprep.subr.bf16.mxu1 %v16180_v56  ;;  %v16214_v56 = vld [vmem:[#allocation7 + $0x648] ss:$16 sps:$4 sm:$0xff]  }
 0x232   :  { %7347 = vmatpush2.bf16.msra.mxu0 %v16175_v19  ;;  %v16219_v19 = vld [vmem:[#allocation7 + $0x42c] ss:$16 sps:$4 sm:$0xff]  }
 0x233   :  { %7388 = vmatpush2.bf16.msra.mxu1 %v16178_v60  ;;  %7398 = vmatprep.subr.bf16.mxu0 %v16183_v61  ;;  %v16222_v60 = vld [vmem:[#allocation7 + $0x62c] ss:$16 sps:$4 sm:$0xff]   ;;  %v16217_v61 = vld [vmem:[#allocation7 + $0x428] ss:$16 sps:$4 sm:$0xff]  }
 0x234   :  { %7439 = vmatprep.subr.bf16.mxu1 %v16186_v63  ;;  %v16220_v63 = vld [vmem:[#allocation7 + $0x628] ss:$16 sps:$4 sm:$0xff]  }
 0x235   :  { %v7104_v13 = vpop.f32.mrf.mxu0  ;;  %7349 = vmatmul.mubr.bf16.vlgmr.msra.gmra.mxu0 %v18278_v16 }
 0x236   :  { %v7145_v31 = vpop.f32.mrf.mxu1  ;;  %7390 = vmatmul.mubr.bf16.vlgmr.msra.gmra.mxu1 %v18280_v17  ;;  %v7105_v1 = vadd.f32 %v7104_v13, %v18463_v25  ;;  %7399 = vmatpush1.bf16.msra.mxu0 %v16181_v6  ;;  %v16225_v6 = vld [vmem:[#allocation7 + $0x40c] ss:$16 sps:$4 sm:$0xff]   ;;  %v16229_v13 = vld [vmem:[#allocation7 + $0x5e8] ss:$16 sps:$4 sm:$0xff]  }
 0x237   :  { %7440 = vmatpush1.bf16.msra.mxu1 %v16184_v7  ;;  %v7106_v20 = vpop.f32.mrf.mxu0  ;;  %7400 = vmatprep.subr.bf16.mxu0 %v16189_v24  ;;  %v16228_v7 = vld [vmem:[#allocation7 + $0x60c] ss:$16 sps:$4 sm:$0xff]   ;;  %v16223_v24 = vld [vmem:[#allocation7 + $0x408] ss:$16 sps:$4 sm:$0xff]  }
 0x238   :  { %v7147_v21 = vpop.f32.mrf.mxu1  ;;  %7441 = vmatprep.subr.bf16.mxu1 %v16192_v8  ;;  %v18473_v26 = vadd.f32 %v7145_v31, %v7105_v1  ;;  %v7107_v62 = vadd.f32 %v7106_v20, %v18468_v18  ;;  %7430 = vmatprep.mubr.bf16.mxu0 %v18292_v53  ;;  %v16199_v18 = vld [vmem:[#allocation7 + $0x488] ss:$16 sps:$4 sm:$0xff]   ;;  %v16207_v53 = vld [vmem:[#allocation7 + $0x46c] ss:$16 sps:$4 sm:$0xff]  }
 0x239   :  { %7471 = vmatprep.mubr.bf16.mxu1 %v18296_v57  ;;  %v7108_v16 = vpop.f32.mrf.mxu0  ;;  %v16210_v57 = vld [vmem:[#allocation7 + $0x66c] ss:$16 sps:$4 sm:$0xff]   ;;  %v16226_v8 = vld [vmem:[#allocation7 + $0x608] ss:$16 sps:$4 sm:$0xff]  }
 0x23a   :  { %v7149_v17 = vpop.f32.mrf.mxu1  ;;  %v18478_v25 = vadd.f32 %v7147_v21, %v7107_v62  ;;  %7401 = vmatpush1.bf16.msra.mxu0 %v16187_v9  ;;  %v16231_v9 = vld [vmem:[#allocation7 + $0x5ec] ss:$16 sps:$4 sm:$0xff]   ;;  %v16232_v31 = vld [vmem:[#allocation7 + $0x7e8] ss:$16 sps:$4 sm:$0xff]  }
 0x23b   :  { %7442 = vmatpush1.bf16.msra.mxu1 %v16190_v44  ;;  %v7109_v36 = vpop.f32.mrf.mxu0  ;;  %7402 = vmatprep.subr.bf16.mxu0 %v16195_v39  ;;  %v16234_v44 = vld [vmem:[#allocation7 + $0x7ec] ss:$16 sps:$4 sm:$0xff]   ;;  %v16235_v21 = vld [vmem:[#allocation7 + $0x5c8] ss:$16 sps:$4 sm:$0xff]  }
 0x23c   :  { %v7150_v27 = vpop.f32.mrf.mxu1  ;;  %7443 = vmatprep.subr.bf16.mxu1 %v16198_v46  ;;  %v16237_v1 = vld [vmem:[#allocation7 + $0x5cc] ss:$16 sps:$4 sm:$0xff]   ;;  %v16238_v39 = vld [vmem:[#allocation7 + $0x7c8] ss:$16 sps:$4 sm:$0xff]  }
 0x23d   :  { %v16240_v20 = vld [vmem:[#allocation7 + $0x7cc] ss:$16 sps:$4 sm:$0xff]   ;;  %v16247_v36 = vld [vmem:[#allocation7 + $0x588] ss:$16 sps:$4 sm:$0xff]  }
 0x23e   :  { %7403 = vmatpush1.bf16.msra.mxu0 %v16193_v3  ;;  %v16243_v46 = vld [vmem:[#allocation7 + $0x5ac] ss:$16 sps:$4 sm:$0xff]   ;;  %v16241_v3 = vld [vmem:[#allocation7 + $0x5a8] ss:$16 sps:$4 sm:$0xff]  }
 0x23f   :  { %7444 = vmatpush1.bf16.msra.mxu1 %v16196_v35  ;;  %7404 = vmatprep.subr.bf16.mxu0 %v16201_v28  ;;  %v16246_v62 = vld [vmem:[#allocation7 + $0x7ac] ss:$16 sps:$4 sm:$0xff]   ;;  %v16244_v35 = vld [vmem:[#allocation7 + $0x7a8] ss:$16 sps:$4 sm:$0xff]  }
 0x240   :  { %7445 = vmatprep.subr.bf16.mxu1 %v16204_v30  ;;  %v16249_v16 = vld [vmem:[#allocation7 + $0x58c] ss:$16 sps:$4 sm:$0xff]   ;;  %v16250_v27 = vld [vmem:[#allocation7 + $0x788] ss:$16 sps:$4 sm:$0xff]  }
 0x241   :  { %v16252_v17 = vld [vmem:[#allocation7 + $0x78c] ss:$16 sps:$4 sm:$0xff]  }
 0x242   :  { %7405 = vmatpush1.bf16.msra.mxu0 %v16199_v18  ;;  %v16255_v28 = vld [vmem:[#allocation7 + $0x56c] ss:$16 sps:$4 sm:$0xff]   ;;  %v16253_v18 = vld [vmem:[#allocation7 + $0x568] ss:$16 sps:$4 sm:$0xff]  }
 0x243   :  { %7446 = vmatpush1.bf16.msra.mxu1 %v16202_v40  ;;  %7406 = vmatprep.subr.bf16.mxu0 %v16207_v53  ;;  %v16258_v30 = vld [vmem:[#allocation7 + $0x76c] ss:$16 sps:$4 sm:$0xff]   ;;  %v16256_v40 = vld [vmem:[#allocation7 + $0x768] ss:$16 sps:$4 sm:$0xff]  }
 0x244   :  { %7447 = vmatprep.subr.bf16.mxu1 %v16210_v57  ;;  %v16261_v53 = vld [vmem:[#allocation7 + $0x54c] ss:$16 sps:$4 sm:$0xff]  }
 0x245   :  { %v16264_v57 = vld [vmem:[#allocation7 + $0x74c] ss:$16 sps:$4 sm:$0xff]  }
 0x246   :  { %7407 = vmatpush1.bf16.msra.mxu0 %v16205_v41  ;;  %v16259_v41 = vld [vmem:[#allocation7 + $0x548] ss:$16 sps:$4 sm:$0xff]  }
 0x247   :  { %7448 = vmatpush1.bf16.msra.mxu1 %v16208_v42  ;;  %7408 = vmatprep.subr.bf16.mxu0 %v16213_v47  ;;  %v16262_v42 = vld [vmem:[#allocation7 + $0x748] ss:$16 sps:$4 sm:$0xff]   ;;  %v16267_v47 = vld [vmem:[#allocation7 + $0x52c] ss:$16 sps:$4 sm:$0xff]  }
 0x248   :  { %7449 = vmatprep.subr.bf16.mxu1 %v16216_v59  ;;  %v16270_v59 = vld [vmem:[#allocation7 + $0x72c] ss:$16 sps:$4 sm:$0xff]  }
 0x24a   :  { %7409 = vmatpush1.bf16.msra.mxu0 %v16211_v51  ;;  %v16265_v51 = vld [vmem:[#allocation7 + $0x528] ss:$16 sps:$4 sm:$0xff]  }
 0x24b   :  { %7450 = vmatpush1.bf16.msra.mxu1 %v16214_v56  ;;  %7410 = vmatprep.subr.bf16.mxu0 %v16219_v19  ;;  %v16268_v56 = vld [vmem:[#allocation7 + $0x728] ss:$16 sps:$4 sm:$0xff]   ;;  %v16273_v19 = vld [vmem:[#allocation7 + $0x50c] ss:$16 sps:$4 sm:$0xff]  }
 0x24c   :  { %7451 = vmatprep.subr.bf16.mxu1 %v16222_v60  ;;  %v16276_v60 = vld [vmem:[#allocation7 + $0x70c] ss:$16 sps:$4 sm:$0xff]  }
 0x24e   :  { %7411 = vmatpush1.bf16.msra.mxu0 %v16217_v61  ;;  %v16271_v61 = vld [vmem:[#allocation7 + $0x508] ss:$16 sps:$4 sm:$0xff]  }
 0x24f   :  { %7452 = vmatpush1.bf16.msra.mxu1 %v16220_v63  ;;  %7412 = vmatprep.subr.bf16.mxu0 %v16225_v6  ;;  %v16274_v63 = vld [vmem:[#allocation7 + $0x708] ss:$16 sps:$4 sm:$0xff]   ;;  %v16279_v6 = vld [vmem:[#allocation7 + $0x8ec] ss:$16 sps:$4 sm:$0xff]  }
 0x250   :  { %7453 = vmatprep.subr.bf16.mxu1 %v16228_v7  ;;  %v16282_v7 = vld [vmem:[#allocation7 + $0xaec] ss:$16 sps:$4 sm:$0xff]  }
 0x252   :  { %7413 = vmatpush1.bf16.msra.mxu0 %v16223_v24  ;;  %v16277_v24 = vld [vmem:[#allocation7 + $0x8e8] ss:$16 sps:$4 sm:$0xff]  }
 0x253   :  { %7454 = vmatpush1.bf16.msra.mxu1 %v16226_v8  ;;  %7414 = vmatprep.subr.bf16.mxu0 %v16231_v9  ;;  %v16280_v8 = vld [vmem:[#allocation7 + $0xae8] ss:$16 sps:$4 sm:$0xff]   ;;  %v16285_v9 = vld [vmem:[#allocation7 + $0x8cc] ss:$16 sps:$4 sm:$0xff]  }
 0x254   :  { %7455 = vmatprep.subr.bf16.mxu1 %v16234_v44  ;;  %v16288_v44 = vld [vmem:[#allocation7 + $0xacc] ss:$16 sps:$4 sm:$0xff]  }
 0x256   :  { %7415 = vmatpush2.bf16.msra.mxu0 %v16229_v13  ;;  %v16283_v13 = vld [vmem:[#allocation7 + $0x8c8] ss:$16 sps:$4 sm:$0xff]  }
 0x257   :  { %7456 = vmatpush2.bf16.msra.mxu1 %v16232_v31  ;;  %7416 = vmatprep.subr.bf16.mxu0 %v16237_v1  ;;  %v16286_v31 = vld [vmem:[#allocation7 + $0xac8] ss:$16 sps:$4 sm:$0xff]  }
 0x258   :  { %7457 = vmatprep.subr.bf16.mxu1 %v16240_v20 }
 0x25a   :  { %7417 = vmatpush2.bf16.msra.mxu0 %v16235_v21 }
 0x25b   :  { %7458 = vmatpush2.bf16.msra.mxu1 %v16238_v39  ;;  %7418 = vmatprep.subr.bf16.mxu0 %v16243_v46 }
 0x25c   :  { %7459 = vmatprep.subr.bf16.mxu1 %v16246_v62  ;;  %v16291_v62 = vld [vmem:[#allocation7 + $0x8ac] ss:$16 sps:$4 sm:$0xff]  }
 0x25e   :  { %7419 = vmatpush2.bf16.msra.mxu0 %v16241_v3  ;;  %v16294_v3 = vld [vmem:[#allocation7 + $0xaac] ss:$16 sps:$4 sm:$0xff]  }
 0x25f   :  { %7460 = vmatpush2.bf16.msra.mxu1 %v16244_v35  ;;  %7420 = vmatprep.subr.bf16.mxu0 %v16249_v16 }
 0x260   :  { %7461 = vmatprep.subr.bf16.mxu1 %v16252_v17  ;;  %v16289_v17 = vld [vmem:[#allocation7 + $0x8a8] ss:$16 sps:$4 sm:$0xff]  }
 0x262   :  { %7421 = vmatpush2.bf16.msra.mxu0 %v16247_v36  ;;  %v16292_v36 = vld [vmem:[#allocation7 + $0xaa8] ss:$16 sps:$4 sm:$0xff]  }
 0x263   :  { %7462 = vmatpush2.bf16.msra.mxu1 %v16250_v27  ;;  %7422 = vmatprep.subr.bf16.mxu0 %v16255_v28 }
 0x264   :  { %7463 = vmatprep.subr.bf16.mxu1 %v16258_v30  ;;  %v16297_v30 = vld [vmem:[#allocation7 + $0x88c] ss:$16 sps:$4 sm:$0xff]  }
 0x266   :  { %7423 = vmatpush2.bf16.msra.mxu0 %v16253_v18  ;;  %v16300_v18 = vld [vmem:[#allocation7 + $0xa8c] ss:$16 sps:$4 sm:$0xff]  }
 0x267   :  { %7464 = vmatpush2.bf16.msra.mxu1 %v16256_v40  ;;  %7424 = vmatprep.subr.bf16.mxu0 %v16261_v53  ;;  %v16298_v40 = vld [vmem:[#allocation7 + $0xa88] ss:$16 sps:$4 sm:$0xff]  }
 0x268   :  { %7465 = vmatprep.subr.bf16.mxu1 %v16264_v57  ;;  %v16301_v53 = vld [vmem:[#allocation7 + $0x868] ss:$16 sps:$4 sm:$0xff]  }
 0x269   :  { %v16304_v57 = vld [vmem:[#allocation7 + $0xa68] ss:$16 sps:$4 sm:$0xff]  }
 0x26a   :  { %7425 = vmatpush2.bf16.msra.mxu0 %v16259_v41  ;;  %v16309_v41 = vld [vmem:[#allocation7 + $0x84c] ss:$16 sps:$4 sm:$0xff]  }
 0x26b   :  { %7466 = vmatpush2.bf16.msra.mxu1 %v16262_v42  ;;  %7426 = vmatprep.subr.bf16.mxu0 %v16267_v47  ;;  %v16312_v42 = vld [vmem:[#allocation7 + $0xa4c] ss:$16 sps:$4 sm:$0xff]   ;;  %v16307_v47 = vld [vmem:[#allocation7 + $0x848] ss:$16 sps:$4 sm:$0xff]  }
 0x26c   :  { %7467 = vmatprep.subr.bf16.mxu1 %v16270_v59  ;;  %v16310_v59 = vld [vmem:[#allocation7 + $0xa48] ss:$16 sps:$4 sm:$0xff]  }
 0x26e   :  { %7427 = vmatpush2.bf16.msra.mxu0 %v16265_v51  ;;  %v16315_v51 = vld [vmem:[#allocation7 + $0x82c] ss:$16 sps:$4 sm:$0xff]  }
 0x26f   :  { %7468 = vmatpush2.bf16.msra.mxu1 %v16268_v56  ;;  %7428 = vmatprep.subr.bf16.mxu0 %v16273_v19  ;;  %v16318_v56 = vld [vmem:[#allocation7 + $0xa2c] ss:$16 sps:$4 sm:$0xff]   ;;  %v16313_v19 = vld [vmem:[#allocation7 + $0x828] ss:$16 sps:$4 sm:$0xff]  }
 0x270   :  { %7469 = vmatprep.subr.bf16.mxu1 %v16276_v60  ;;  %v16316_v60 = vld [vmem:[#allocation7 + $0xa28] ss:$16 sps:$4 sm:$0xff]  }
 0x272   :  { %7429 = vmatpush2.bf16.msra.mxu0 %v16271_v61  ;;  %v16321_v61 = vld [vmem:[#allocation7 + $0x80c] ss:$16 sps:$4 sm:$0xff]  }
 0x273   :  { %7470 = vmatpush2.bf16.msra.mxu1 %v16274_v63  ;;  %7480 = vmatprep.subr.bf16.mxu0 %v16279_v6  ;;  %v16324_v63 = vld [vmem:[#allocation7 + $0xa0c] ss:$16 sps:$4 sm:$0xff]   ;;  %v16319_v6 = vld [vmem:[#allocation7 + $0x808] ss:$16 sps:$4 sm:$0xff]  }
 0x274   :  { %7521 = vmatprep.subr.bf16.mxu1 %v16282_v7  ;;  %v16322_v7 = vld [vmem:[#allocation7 + $0xa08] ss:$16 sps:$4 sm:$0xff]  }
 0x275   :  { %v7186_v1 = vpop.f32.mrf.mxu0  ;;  %7431 = vmatmul.mubr.bf16.vlgmr.msra.gmra.mxu0 %v18302_v32 }
 0x276   :  { %v7227_v20 = vpop.f32.mrf.mxu1  ;;  %7472 = vmatmul.mubr.bf16.vlgmr.msra.gmra.mxu1 %v18306_v33  ;;  %v7187_v21 = vadd.f32 %v7186_v1, %v18473_v26  ;;  %7481 = vmatpush1.bf16.msra.mxu0 %v16277_v24  ;;  %v16327_v24 = vld [vmem:[#allocation7 + $0x9ec] ss:$16 sps:$4 sm:$0xff]   ;;  %v16331_v1 = vld [vmem:[#allocation7 + $0x9c8] ss:$16 sps:$4 sm:$0xff]  }
 0x277   :  { %7522 = vmatpush1.bf16.msra.mxu1 %v16280_v8  ;;  %v7188_v39 = vpop.f32.mrf.mxu0  ;;  %7482 = vmatprep.subr.bf16.mxu0 %v16285_v9  ;;  %v16330_v8 = vld [vmem:[#allocation7 + $0xbec] ss:$16 sps:$4 sm:$0xff]   ;;  %v16325_v9 = vld [vmem:[#allocation7 + $0x9e8] ss:$16 sps:$4 sm:$0xff]  }
 0x278   :  { %v7229_v46 = vpop.f32.mrf.mxu1  ;;  %7523 = vmatprep.subr.bf16.mxu1 %v16288_v44  ;;  %v18483_v35 = vadd.f32 %v7227_v20, %v7187_v21  ;;  %v7189_v16 = vadd.f32 %v7188_v39, %v18478_v25  ;;  %7512 = vmatprep.mubr.bf16.mxu0 %v18318_v48  ;;  %v16295_v25 = vld [vmem:[#allocation7 + $0x888] ss:$16 sps:$4 sm:$0xff]   ;;  %v16303_v48 = vld [vmem:[#allocation7 + $0x86c] ss:$16 sps:$4 sm:$0xff]  }
 0x279   :  { %7553 = vmatprep.mubr.bf16.mxu1 %v18323_v52  ;;  %v7190_v32 = vpop.f32.mrf.mxu0  ;;  %v16306_v52 = vld [vmem:[#allocation7 + $0xa6c] ss:$16 sps:$4 sm:$0xff]   ;;  %v16328_v44 = vld [vmem:[#allocation7 + $0xbe8] ss:$16 sps:$4 sm:$0xff]  }
 0x27a   :  { %v7231_v33 = vpop.f32.mrf.mxu1  ;;  %v18488_v26 = vadd.f32 %v7229_v46, %v7189_v16  ;;  %7483 = vmatpush1.bf16.msra.mxu0 %v16283_v13  ;;  %v16333_v13 = vld [vmem:[#allocation7 + $0x9cc] ss:$16 sps:$4 sm:$0xff]   ;;  %v16334_v20 = vld [vmem:[#allocation7 + $0xbc8] ss:$16 sps:$4 sm:$0xff]  }
 0x27b   :  { %7524 = vmatpush1.bf16.msra.mxu1 %v16286_v31  ;;  %v7191_v27 = vpop.f32.mrf.mxu0  ;;  %7484 = vmatprep.subr.bf16.mxu0 %v16291_v62  ;;  %v16336_v31 = vld [vmem:[#allocation7 + $0xbcc] ss:$16 sps:$4 sm:$0xff]   ;;  %v16337_v46 = vld [vmem:[#allocation7 + $0x9a8] ss:$16 sps:$4 sm:$0xff]  }
 0x27c   :  { %v7232_v28 = vpop.f32.mrf.mxu1  ;;  %7525 = vmatprep.subr.bf16.mxu1 %v16294_v3  ;;  %v16339_v21 = vld [vmem:[#allocation7 + $0x9ac] ss:$16 sps:$4 sm:$0xff]   ;;  %v16340_v62 = vld [vmem:[#allocation7 + $0xba8] ss:$16 sps:$4 sm:$0xff]  }
 0x27d   :  { %v16342_v39 = vld [vmem:[#allocation7 + $0xbac] ss:$16 sps:$4 sm:$0xff]   ;;  %v16349_v27 = vld [vmem:[#allocation7 + $0x968] ss:$16 sps:$4 sm:$0xff]  }
 0x27e   :  { %7485 = vmatpush1.bf16.msra.mxu0 %v16289_v17  ;;  %v16345_v3 = vld [vmem:[#allocation7 + $0x98c] ss:$16 sps:$4 sm:$0xff]   ;;  %v16343_v17 = vld [vmem:[#allocation7 + $0x988] ss:$16 sps:$4 sm:$0xff]  }
 0x27f   :  { %7526 = vmatpush1.bf16.msra.mxu1 %v16292_v36  ;;  %7486 = vmatprep.subr.bf16.mxu0 %v16297_v30  ;;  %v16348_v16 = vld [vmem:[#allocation7 + $0xb8c] ss:$16 sps:$4 sm:$0xff]   ;;  %v16346_v36 = vld [vmem:[#allocation7 + $0xb88] ss:$16 sps:$4 sm:$0xff]  }
 0x280   :  { %7527 = vmatprep.subr.bf16.mxu1 %v16300_v18  ;;  %v16351_v32 = vld [vmem:[#allocation7 + $0x96c] ss:$16 sps:$4 sm:$0xff]   ;;  %v16352_v28 = vld [vmem:[#allocation7 + $0xb68] ss:$16 sps:$4 sm:$0xff]  }
 0x281   :  { %v16354_v33 = vld [vmem:[#allocation7 + $0xb6c] ss:$16 sps:$4 sm:$0xff]  }
 0x282   :  { %7487 = vmatpush1.bf16.msra.mxu0 %v16295_v25  ;;  %v16357_v30 = vld [vmem:[#allocation7 + $0x94c] ss:$16 sps:$4 sm:$0xff]   ;;  %v16355_v25 = vld [vmem:[#allocation7 + $0x948] ss:$16 sps:$4 sm:$0xff]  }
 0x283   :  { %7528 = vmatpush1.bf16.msra.mxu1 %v16298_v40  ;;  %7488 = vmatprep.subr.bf16.mxu0 %v16303_v48  ;;  %v16360_v18 = vld [vmem:[#allocation7 + $0xb4c] ss:$16 sps:$4 sm:$0xff]   ;;  %v16358_v40 = vld [vmem:[#allocation7 + $0xb48] ss:$16 sps:$4 sm:$0xff]  }
 0x284   :  { %7529 = vmatprep.subr.bf16.mxu1 %v16306_v52  ;;  %v16363_v48 = vld [vmem:[#allocation7 + $0x92c] ss:$16 sps:$4 sm:$0xff]  }
 0x285   :  { %v16366_v52 = vld [vmem:[#allocation7 + $0xb2c] ss:$16 sps:$4 sm:$0xff]  }
 0x286   :  { %7489 = vmatpush1.bf16.msra.mxu0 %v16301_v53  ;;  %v16361_v53 = vld [vmem:[#allocation7 + $0x928] ss:$16 sps:$4 sm:$0xff]  }
 0x287   :  { %7530 = vmatpush1.bf16.msra.mxu1 %v16304_v57  ;;  %7490 = vmatprep.subr.bf16.mxu0 %v16309_v41  ;;  %v16364_v57 = vld [vmem:[#allocation7 + $0xb28] ss:$16 sps:$4 sm:$0xff]   ;;  %v16369_v41 = vld [vmem:[#allocation7 + $0x90c] ss:$16 sps:$4 sm:$0xff]  }
 0x288   :  { %7531 = vmatprep.subr.bf16.mxu1 %v16312_v42  ;;  %v16372_v42 = vld [vmem:[#allocation7 + $0xb0c] ss:$16 sps:$4 sm:$0xff]  }
 0x28a   :  { %7491 = vmatpush1.bf16.msra.mxu0 %v16307_v47  ;;  %v16367_v47 = vld [vmem:[#allocation7 + $0x908] ss:$16 sps:$4 sm:$0xff]  }
 0x28b   :  { %7532 = vmatpush1.bf16.msra.mxu1 %v16310_v59  ;;  %7492 = vmatprep.subr.bf16.mxu0 %v16315_v51  ;;  %v16370_v59 = vld [vmem:[#allocation7 + $0xb08] ss:$16 sps:$4 sm:$0xff]   ;;  %v16375_v51 = vld [vmem:[#allocation7 + $0xcec] ss:$16 sps:$4 sm:$0xff]  }
 0x28c   :  { %7533 = vmatprep.subr.bf16.mxu1 %v16318_v56  ;;  %v16378_v56 = vld [vmem:[#allocation7 + $0xeec] ss:$16 sps:$4 sm:$0xff]  }
 0x28e   :  { %7493 = vmatpush1.bf16.msra.mxu0 %v16313_v19  ;;  %v16373_v19 = vld [vmem:[#allocation7 + $0xce8] ss:$16 sps:$4 sm:$0xff]  }
 0x28f   :  { %7534 = vmatpush1.bf16.msra.mxu1 %v16316_v60  ;;  %7494 = vmatprep.subr.bf16.mxu0 %v16321_v61  ;;  %v16376_v60 = vld [vmem:[#allocation7 + $0xee8] ss:$16 sps:$4 sm:$0xff]   ;;  %v16381_v61 = vld [vmem:[#allocation7 + $0xccc] ss:$16 sps:$4 sm:$0xff]  }
 0x290   :  { %7535 = vmatprep.subr.bf16.mxu1 %v16324_v63  ;;  %v16384_v63 = vld [vmem:[#allocation7 + $0xecc] ss:$16 sps:$4 sm:$0xff]  }
 0x292   :  { %7495 = vmatpush1.bf16.msra.mxu0 %v16319_v6  ;;  %v16379_v6 = vld [vmem:[#allocation7 + $0xcc8] ss:$16 sps:$4 sm:$0xff]  }
 0x293   :  { %7536 = vmatpush1.bf16.msra.mxu1 %v16322_v7  ;;  %7496 = vmatprep.subr.bf16.mxu0 %v16327_v24  ;;  %v16382_v7 = vld [vmem:[#allocation7 + $0xec8] ss:$16 sps:$4 sm:$0xff]  }
 0x294   :  { %7537 = vmatprep.subr.bf16.mxu1 %v16330_v8 }
 0x296   :  { %7497 = vmatpush2.bf16.msra.mxu0 %v16325_v9 }
 0x297   :  { %7538 = vmatpush2.bf16.msra.mxu1 %v16328_v44  ;;  %7498 = vmatprep.subr.bf16.mxu0 %v16333_v13 }
 0x298   :  { %7539 = vmatprep.subr.bf16.mxu1 %v16336_v31  ;;  %v16387_v31 = vld [vmem:[#allocation7 + $0xcac] ss:$16 sps:$4 sm:$0xff]  }
 0x29a   :  { %7499 = vmatpush2.bf16.msra.mxu0 %v16331_v1  ;;  %v16390_v1 = vld [vmem:[#allocation7 + $0xeac] ss:$16 sps:$4 sm:$0xff]  }
 0x29b   :  { %7540 = vmatpush2.bf16.msra.mxu1 %v16334_v20  ;;  %7500 = vmatprep.subr.bf16.mxu0 %v16339_v21 }
 0x29c   :  { %7541 = vmatprep.subr.bf16.mxu1 %v16342_v39  ;;  %v16385_v39 = vld [vmem:[#allocation7 + $0xca8] ss:$16 sps:$4 sm:$0xff]  }
 0x29e   :  { %7501 = vmatpush2.bf16.msra.mxu0 %v16337_v46  ;;  %v16388_v46 = vld [vmem:[#allocation7 + $0xea8] ss:$16 sps:$4 sm:$0xff]  }
 0x29f   :  { %7542 = vmatpush2.bf16.msra.mxu1 %v16340_v62  ;;  %7502 = vmatprep.subr.bf16.mxu0 %v16345_v3 }
 0x2a0   :  { %7543 = vmatprep.subr.bf16.mxu1 %v16348_v16  ;;  %v16393_v16 = vld [vmem:[#allocation7 + $0xc8c] ss:$16 sps:$4 sm:$0xff]  }
 0x2a2   :  { %7503 = vmatpush2.bf16.msra.mxu0 %v16343_v17  ;;  %v16396_v17 = vld [vmem:[#allocation7 + $0xe8c] ss:$16 sps:$4 sm:$0xff]  }
 0x2a3   :  { %7544 = vmatpush2.bf16.msra.mxu1 %v16346_v36  ;;  %7504 = vmatprep.subr.bf16.mxu0 %v16351_v32  ;;  %v16394_v36 = vld [vmem:[#allocation7 + $0xe88] ss:$16 sps:$4 sm:$0xff]   ;;  %v16402_v32 = vld [vmem:[#allocation7 + $0xe6c] ss:$16 sps:$4 sm:$0xff]  }
 0x2a4   :  { %7545 = vmatprep.subr.bf16.mxu1 %v16354_v33  ;;  %v16397_v33 = vld [vmem:[#allocation7 + $0xc68] ss:$16 sps:$4 sm:$0xff]  }
 0x2a6   :  { %7505 = vmatpush2.bf16.msra.mxu0 %v16349_v27  ;;  %v16400_v27 = vld [vmem:[#allocation7 + $0xe68] ss:$16 sps:$4 sm:$0xff]  }
 0x2a7   :  { %7546 = vmatpush2.bf16.msra.mxu1 %v16352_v28  ;;  %7506 = vmatprep.subr.bf16.mxu0 %v16357_v30  ;;  %v16405_v28 = vld [vmem:[#allocation7 + $0xc4c] ss:$16 sps:$4 sm:$0xff]  }
 0x2a8   :  { %7547 = vmatprep.subr.bf16.mxu1 %v16360_v18  ;;  %v16408_v30 = vld [vmem:[#allocation7 + $0xe4c] ss:$16 sps:$4 sm:$0xff]   ;;  %v16403_v18 = vld [vmem:[#allocation7 + $0xc48] ss:$16 sps:$4 sm:$0xff]  }
 0x2aa   :  { %7507 = vmatpush2.bf16.msra.mxu0 %v16355_v25  ;;  %v16406_v25 = vld [vmem:[#allocation7 + $0xe48] ss:$16 sps:$4 sm:$0xff]  }
 0x2ab   :  { %7548 = vmatpush2.bf16.msra.mxu1 %v16358_v40  ;;  %7508 = vmatprep.subr.bf16.mxu0 %v16363_v48  ;;  %v16411_v40 = vld [vmem:[#allocation7 + $0xc2c] ss:$16 sps:$4 sm:$0xff]  }
 0x2ac   :  { %7549 = vmatprep.subr.bf16.mxu1 %v16366_v52  ;;  %v16414_v48 = vld [vmem:[#allocation7 + $0xe2c] ss:$16 sps:$4 sm:$0xff]   ;;  %v16409_v52 = vld [vmem:[#allocation7 + $0xc28] ss:$16 sps:$4 sm:$0xff]  }
 0x2ae   :  { %7509 = vmatpush2.bf16.msra.mxu0 %v16361_v53  ;;  %v16412_v53 = vld [vmem:[#allocation7 + $0xe28] ss:$16 sps:$4 sm:$0xff]  }
 0x2af   :  { %7550 = vmatpush2.bf16.msra.mxu1 %v16364_v57  ;;  %7510 = vmatprep.subr.bf16.mxu0 %v16369_v41  ;;  %v16417_v57 = vld [vmem:[#allocation7 + $0xc0c] ss:$16 sps:$4 sm:$0xff]  }
 0x2b0   :  { %7551 = vmatprep.subr.bf16.mxu1 %v16372_v42  ;;  %v16420_v41 = vld [vmem:[#allocation7 + $0xe0c] ss:$16 sps:$4 sm:$0xff]   ;;  %v16415_v42 = vld [vmem:[#allocation7 + $0xc08] ss:$16 sps:$4 sm:$0xff]  }
 0x2b2   :  { %7511 = vmatpush2.bf16.msra.mxu0 %v16367_v47  ;;  %v16418_v47 = vld [vmem:[#allocation7 + $0xe08] ss:$16 sps:$4 sm:$0xff]  }
 0x2b3   :  { %7552 = vmatpush2.bf16.msra.mxu1 %v16370_v59  ;;  %7562 = vmatprep.subr.bf16.mxu0 %v16375_v51  ;;  %v16423_v59 = vld [vmem:[#allocation7 + $0xdec] ss:$16 sps:$4 sm:$0xff]  }
 0x2b4   :  { %7603 = vmatprep.subr.bf16.mxu1 %v16378_v56  ;;  %v16426_v51 = vld [vmem:[#allocation7 + $0xfec] ss:$16 sps:$4 sm:$0xff]   ;;  %v16421_v56 = vld [vmem:[#allocation7 + $0xde8] ss:$16 sps:$4 sm:$0xff]  }
 0x2b5   :  { %v7268_v24 = vpop.f32.mrf.mxu0  ;;  %7513 = vmatmul.mubr.bf16.vlgmr.msra.gmra.mxu0 %v18338_v4 }
 0x2b6   :  { %v7309_v8 = vpop.f32.mrf.mxu1  ;;  %7554 = vmatmul.mubr.bf16.vlgmr.msra.gmra.mxu1 %v18342_v5  ;;  %v7269_v9 = vadd.f32 %v7268_v24, %v18483_v35  ;;  %7563 = vmatpush1.bf16.msra.mxu0 %v16373_v19  ;;  %v16424_v19 = vld [vmem:[#allocation7 + $0xfe8] ss:$16 sps:$4 sm:$0xff]   ;;  %v16438_v24 = vld [vmem:[#allocation7 + $0xfac] ss:$16 sps:$4 sm:$0xff]  }
 0x2b7   :  { %7604 = vmatpush1.bf16.msra.mxu1 %v16376_v60  ;;  %v7270_v44 = vpop.f32.mrf.mxu0  ;;  %7564 = vmatprep.subr.bf16.mxu0 %v16381_v61  ;;  %v16429_v60 = vld [vmem:[#allocation7 + $0xdcc] ss:$16 sps:$4 sm:$0xff]  }
 0x2b8   :  { %v7311_v13 = vpop.f32.mrf.mxu1  ;;  %7605 = vmatprep.subr.bf16.mxu1 %v16384_v63  ;;  %v18493_v20 = vadd.f32 %v7309_v8, %v7269_v9  ;;  %v7271_v21 = vadd.f32 %v7270_v44, %v18488_v26  ;;  %7594 = vmatprep.mubr.bf16.mxu0 %v18344_v10  ;;  %v16391_v10 = vld [vmem:[#allocation7 + $0xc88] ss:$16 sps:$4 sm:$0xff]   ;;  %v16432_v61 = vld [vmem:[#allocation7 + $0xfcc] ss:$16 sps:$4 sm:$0xff]  }
 0x2b9   :  { %7635 = vmatprep.mubr.bf16.mxu1 %v18346_v11  ;;  %v7272_v4 = vpop.f32.mrf.mxu0  ;;  %v16399_v11 = vld [vmem:[#allocation7 + $0xc6c] ss:$16 sps:$4 sm:$0xff]   ;;  %v16427_v63 = vld [vmem:[#allocation7 + $0xdc8] ss:$16 sps:$4 sm:$0xff]  }
 0x2ba   :  { %v7313_v5 = vpop.f32.mrf.mxu1  ;;  %v18498_v35 = vadd.f32 %v7311_v13, %v7271_v21  ;;  %7565 = vmatpush1.bf16.msra.mxu0 %v16379_v6  ;;  %v16430_v6 = vld [vmem:[#allocation7 + $0xfc8] ss:$16 sps:$4 sm:$0xff]   ;;  %v16441_v44 = vld [vmem:[#allocation7 + $0xd8c] ss:$16 sps:$4 sm:$0xff]  }
 0x2bb   :  { %7606 = vmatpush1.bf16.msra.mxu1 %v16382_v7  ;;  %v7273_v62 = vpop.f32.mrf.mxu0  ;;  %7566 = vmatprep.subr.bf16.mxu0 %v16387_v31  ;;  %v16435_v7 = vld [vmem:[#allocation7 + $0xdac] ss:$16 sps:$4 sm:$0xff]   ;;  %v16433_v8 = vld [vmem:[#allocation7 + $0xda8] ss:$16 sps:$4 sm:$0xff]  }
 0x2bc   :  { %v7314_v3 = vpop.f32.mrf.mxu1  ;;  %7607 = vmatprep.subr.bf16.mxu1 %v16390_v1  ;;  %v7894_v26 = vcombine.low %v18493_v20, %v18498_v35  ;;  %v16436_v9 = vld [vmem:[#allocation7 + $0xfa8] ss:$16 sps:$4 sm:$0xff]   ;;  %v16444_v13 = vld [vmem:[#allocation7 + $0xf8c] ss:$16 sps:$4 sm:$0xff]   ;;  %v17080_v20 = vld [vmem:[#allocation7 + $0x2844] ss:$16 sps:$4 sm:$0xff]  }
 0x2bd   :  { %v16439_v31 = vld [vmem:[#allocation7 + $0xd88] ss:$16 sps:$4 sm:$0xff]   ;;  %v16447_v21 = vld [vmem:[#allocation7 + $0xd6c] ss:$16 sps:$4 sm:$0xff]   ;;  %v17083_v35 = vld [vmem:[#allocation7 + $0x2a44] ss:$16 sps:$4 sm:$0xff]  }
 0x2be   :  { %7567 = vmatpush1.bf16.msra.mxu0 %v16385_v39  ;;  %v16442_v1 = vld [vmem:[#allocation7 + $0xf88] ss:$16 sps:$4 sm:$0xff]   ;;  %v16450_v39 = vld [vmem:[#allocation7 + $0xf6c] ss:$16 sps:$4 sm:$0xff]  }
 0x2bf   :  { %7608 = vmatpush1.bf16.msra.mxu1 %v16388_v46  ;;  %7568 = vmatprep.subr.bf16.mxu0 %v16393_v16  ;;  %v16445_v46 = vld [vmem:[#allocation7 + $0xd68] ss:$16 sps:$4 sm:$0xff]   ;;  %v16453_v5 = vld [vmem:[#allocation7 + $0xd4c] ss:$16 sps:$4 sm:$0xff]  }
 0x2c0   :  { %7609 = vmatprep.subr.bf16.mxu1 %v16396_v17  ;;  %v16448_v4 = vld [vmem:[#allocation7 + $0xf68] ss:$16 sps:$4 sm:$0xff]   ;;  %v16456_v62 = vld [vmem:[#allocation7 + $0xf4c] ss:$16 sps:$4 sm:$0xff]  }
 0x2c1   :  { %v16451_v3 = vld [vmem:[#allocation7 + $0xd48] ss:$16 sps:$4 sm:$0xff]   ;;  %v16459_v17 = vld [vmem:[#allocation7 + $0xd2c] ss:$16 sps:$4 sm:$0xff]  }
 0x2c2   :  { %7569 = vmatpush1.bf16.msra.mxu0 %v16391_v10  ;;  %v16454_v16 = vld [vmem:[#allocation7 + $0xf48] ss:$16 sps:$4 sm:$0xff]   ;;  %v16462_v10 = vld [vmem:[#allocation7 + $0xf2c] ss:$16 sps:$4 sm:$0xff]  }
 0x2c3   :  { %7610 = vmatpush1.bf16.msra.mxu1 %v16394_v36  ;;  %7570 = vmatprep.subr.bf16.mxu0 %v16399_v11  ;;  %v16457_v36 = vld [vmem:[#allocation7 + $0xd28] ss:$16 sps:$4 sm:$0xff]  }
 0x2c4   :  { %7611 = vmatprep.subr.bf16.mxu1 %v16402_v32  ;;  %v16460_v11 = vld [vmem:[#allocation7 + $0xf28] ss:$16 sps:$4 sm:$0xff]   ;;  %v16465_v32 = vld [vmem:[#allocation7 + $0xd0c] ss:$16 sps:$4 sm:$0xff]  }
 0x2c6   :  { %7571 = vmatpush1.bf16.msra.mxu0 %v16397_v33  ;;  %v16468_v33 = vld [vmem:[#allocation7 + $0xf0c] ss:$16 sps:$4 sm:$0xff]  }
 0x2c7   :  { %7612 = vmatpush1.bf16.msra.mxu1 %v16400_v27  ;;  %7572 = vmatprep.subr.bf16.mxu0 %v16405_v28  ;;  %v16463_v27 = vld [vmem:[#allocation7 + $0xd08] ss:$16 sps:$4 sm:$0xff]  }
 0x2c8   :  { %7613 = vmatprep.subr.bf16.mxu1 %v16408_v30  ;;  %v16466_v28 = vld [vmem:[#allocation7 + $0xf08] ss:$16 sps:$4 sm:$0xff]   ;;  %v2252_v30 = vsub.s32 2, %v18265_v43 }
 0x2ca   :  { %7573 = vmatpush1.bf16.msra.mxu0 %v16403_v18  ;;  %v16471_v18 = vld [vmem:[#allocation7 + $0x10ec] ss:$16 sps:$4 sm:$0xff]  }
 0x2cb   :  { %7614 = vmatpush1.bf16.msra.mxu1 %v16406_v25  ;;  %7574 = vmatprep.subr.bf16.mxu0 %v16411_v40  ;;  %v16474_v25 = vld [vmem:[#allocation7 + $0x12ec] ss:$16 sps:$4 sm:$0xff]   ;;  %v16469_v40 = vld [vmem:[#allocation7 + $0x10e8] ss:$16 sps:$4 sm:$0xff]  }
 0x2cc   :  { %7615 = vmatprep.subr.bf16.mxu1 %v16414_v48  ;;  %v16472_v48 = vld [vmem:[#allocation7 + $0x12e8] ss:$16 sps:$4 sm:$0xff]  }
 0x2ce   :  { %7575 = vmatpush1.bf16.msra.mxu0 %v16409_v52  ;;  %v2256_v52 = vsub.s32 3, %v18265_v43 }
 0x2cf   :  { %7616 = vmatpush1.bf16.msra.mxu1 %v16412_v53  ;;  %7576 = vmatprep.subr.bf16.mxu0 %v16417_v57  ;;  %v18108_v53 = vld [vmem:[#allocation8] sm:$0xf] }
 0x2d0   :  { %7617 = vmatprep.subr.bf16.mxu1 %v16420_v41  ;;  %v2253_v57 = vrot.slane %v18108_v53, %v2252_v30  ;;  %v16477_v41 = vld [vmem:[#allocation7 + $0x10cc] ss:$16 sps:$4 sm:$0xff]  }
 0x2d2   :  { %7577 = vmatpush1.bf16.msra.mxu0 %v16415_v42  ;;  %v16480_v42 = vld [vmem:[#allocation7 + $0x12cc] ss:$16 sps:$4 sm:$0xff]  }
 0x2d3   :  { %7618 = vmatpush1.bf16.msra.mxu1 %v16418_v47  ;;  %7578 = vmatprep.subr.bf16.mxu0 %v16423_v59  ;;  %v2257_v47 = vrot.slane %v18108_v53, %v2256_v52  ;;  %v16475_v59 = vld [vmem:[#allocation7 + $0x10c8] ss:$16 sps:$4 sm:$0xff]  }
 0x2d4   :  { %7619 = vmatprep.subr.bf16.mxu1 %v16426_v51  ;;  %v16478_v51 = vld [vmem:[#allocation7 + $0x12c8] ss:$16 sps:$4 sm:$0xff]  }
 0x2d5   :  { %v16517_v53 = vld [vmem:[#allocation7 + $0x11e8] ss:$16 sps:$4 sm:$0xff]  }
 0x2d6   :  { %7579 = vmatpush2.bf16.msra.mxu0 %v16421_v56 }
 0x2d7   :  { %7620 = vmatpush2.bf16.msra.mxu1 %v16424_v19  ;;  %7580 = vmatprep.subr.bf16.mxu0 %v16429_v60 }
 0x2d8   :  { %7621 = vmatprep.subr.bf16.mxu1 %v16432_v61 }
 0x2da   :  { %7581 = vmatpush2.bf16.msra.mxu0 %v16427_v63 }
 0x2db   :  { %7622 = vmatpush2.bf16.msra.mxu1 %v16430_v6  ;;  %7582 = vmatprep.subr.bf16.mxu0 %v16435_v7  ;;  %v16483_v6 = vld [vmem:[#allocation7 + $0x10ac] ss:$16 sps:$4 sm:$0xff]  }
 0x2dc   :  { %7623 = vmatprep.subr.bf16.mxu1 %v16438_v24  ;;  %v16486_v7 = vld [vmem:[#allocation7 + $0x12ac] ss:$16 sps:$4 sm:$0xff]  }
 0x2de   :  { %7583 = vmatpush2.bf16.msra.mxu0 %v16433_v8 }
 0x2df   :  { %7624 = vmatpush2.bf16.msra.mxu1 %v16436_v9  ;;  %7584 = vmatprep.subr.bf16.mxu0 %v16441_v44  ;;  %v16481_v9 = vld [vmem:[#allocation7 + $0x10a8] ss:$16 sps:$4 sm:$0xff]  }
 0x2e0   :  { %7625 = vmatprep.subr.bf16.mxu1 %v16444_v13  ;;  %v16484_v44 = vld [vmem:[#allocation7 + $0x12a8] ss:$16 sps:$4 sm:$0xff]  }
 0x2e2   :  { %7585 = vmatpush2.bf16.msra.mxu0 %v16439_v31 }
 0x2e3   :  { %7626 = vmatpush2.bf16.msra.mxu1 %v16442_v1  ;;  %7586 = vmatprep.subr.bf16.mxu0 %v16447_v21  ;;  %v16489_v21 = vld [vmem:[#allocation7 + $0x108c] ss:$16 sps:$4 sm:$0xff]  }
 0x2e4   :  { %7627 = vmatprep.subr.bf16.mxu1 %v16450_v39  ;;  %v16492_v39 = vld [vmem:[#allocation7 + $0x128c] ss:$16 sps:$4 sm:$0xff]  }
 0x2e6   :  { %7587 = vmatpush2.bf16.msra.mxu0 %v16445_v46  ;;  %v16487_v46 = vld [vmem:[#allocation7 + $0x1088] ss:$16 sps:$4 sm:$0xff]  }
 0x2e7   :  { %7628 = vmatpush2.bf16.msra.mxu1 %v16448_v4  ;;  %7588 = vmatprep.subr.bf16.mxu0 %v16453_v5  ;;  %v16490_v4 = vld [vmem:[#allocation7 + $0x1288] ss:$16 sps:$4 sm:$0xff]  }
 0x2e8   :  { %7629 = vmatprep.subr.bf16.mxu1 %v16456_v62  ;;  %v16493_v5 = vld [vmem:[#allocation7 + $0x1068] ss:$16 sps:$4 sm:$0xff]  }
 0x2e9   :  { %v16496_v62 = vld [vmem:[#allocation7 + $0x1268] ss:$16 sps:$4 sm:$0xff]  }
 0x2ea   :  { %7589 = vmatpush2.bf16.msra.mxu0 %v16451_v3  ;;  %v16501_v3 = vld [vmem:[#allocation7 + $0x104c] ss:$16 sps:$4 sm:$0xff]  }
 0x2eb   :  { %7630 = vmatpush2.bf16.msra.mxu1 %v16454_v16  ;;  %7590 = vmatprep.subr.bf16.mxu0 %v16459_v17  ;;  %v16504_v16 = vld [vmem:[#allocation7 + $0x124c] ss:$16 sps:$4 sm:$0xff]   ;;  %v16499_v17 = vld [vmem:[#allocation7 + $0x1048] ss:$16 sps:$4 sm:$0xff]  }
 0x2ec   :  { %7631 = vmatprep.subr.bf16.mxu1 %v16462_v10  ;;  %v16502_v10 = vld [vmem:[#allocation7 + $0x1248] ss:$16 sps:$4 sm:$0xff]  }
 0x2ee   :  { %7591 = vmatpush2.bf16.msra.mxu0 %v16457_v36  ;;  %v16507_v36 = vld [vmem:[#allocation7 + $0x102c] ss:$16 sps:$4 sm:$0xff]  }
 0x2ef   :  { %7632 = vmatpush2.bf16.msra.mxu1 %v16460_v11  ;;  %7592 = vmatprep.subr.bf16.mxu0 %v16465_v32  ;;  %v16510_v11 = vld [vmem:[#allocation7 + $0x122c] ss:$16 sps:$4 sm:$0xff]   ;;  %v16505_v32 = vld [vmem:[#allocation7 + $0x1028] ss:$16 sps:$4 sm:$0xff]  }
 0x2f0   :  { %7633 = vmatprep.subr.bf16.mxu1 %v16468_v33  ;;  %v16508_v33 = vld [vmem:[#allocation7 + $0x1228] ss:$16 sps:$4 sm:$0xff]  }
 0x2f2   :  { %7593 = vmatpush2.bf16.msra.mxu0 %v16463_v27  ;;  %v16513_v27 = vld [vmem:[#allocation7 + $0x100c] ss:$16 sps:$4 sm:$0xff]  }
 0x2f3   :  { %7634 = vmatpush2.bf16.msra.mxu1 %v16466_v28  ;;  %7644 = vmatprep.subr.bf16.mxu0 %v16471_v18  ;;  %v16516_v28 = vld [vmem:[#allocation7 + $0x120c] ss:$16 sps:$4 sm:$0xff]   ;;  %v16511_v18 = vld [vmem:[#allocation7 + $0x1008] ss:$16 sps:$4 sm:$0xff]  }
 0x2f4   :  { %7685 = vmatprep.subr.bf16.mxu1 %v16474_v25  ;;  %v16514_v25 = vld [vmem:[#allocation7 + $0x1208] ss:$16 sps:$4 sm:$0xff]  }
 0x2f5   :  { %v7350_v56 = vpop.f32.mrf.mxu0  ;;  %7595 = vmatmul.mubr.bf16.vlgmr.msra.gmra.mxu0 %v18366_v37 }
 0x2f6   :  { %v7391_v19 = vpop.f32.mrf.mxu1  ;;  %7636 = vmatmul.mubr.bf16.vlgmr.msra.gmra.mxu1 %v18370_v38  ;;  %v7351_v60 = vadd.f32 %v7350_v56, %v2253_v57  ;;  %7645 = vmatpush1.bf16.msra.mxu0 %v16469_v40  ;;  %v16519_v40 = vld [vmem:[#allocation7 + $0x11ec] ss:$16 sps:$4 sm:$0xff]   ;;  %v16520_v57 = vld [vmem:[#allocation7 + $0x13e8] ss:$16 sps:$4 sm:$0xff]  }
 0x2f7   :  { %7686 = vmatpush1.bf16.msra.mxu1 %v16472_v48  ;;  %v7352_v61 = vpop.f32.mrf.mxu0  ;;  %7646 = vmatprep.subr.bf16.mxu0 %v16477_v41  ;;  %v16522_v48 = vld [vmem:[#allocation7 + $0x13ec] ss:$16 sps:$4 sm:$0xff]  }
 0x2f8   :  { %v7393_v63 = vpop.f32.mrf.mxu1  ;;  %7687 = vmatprep.subr.bf16.mxu1 %v16480_v42  ;;  %v18510_v24 = vadd.f32 %v7391_v19, %v7351_v60  ;;  %v7353_v8 = vadd.f32 %v7352_v61, %v2257_v47  ;;  %7676 = vmatprep.mubr.bf16.mxu0 %v18376_v58  ;;  %v16495_v58 = vld [vmem:[#allocation7 + $0x106c] ss:$16 sps:$4 sm:$0xff]   ;;  %v16523_v47 = vld [vmem:[#allocation7 + $0x11c8] ss:$16 sps:$4 sm:$0xff]  }
 0x2f9   :  { %7717 = vmatprep.mubr.bf16.mxu1 %v18378_v50  ;;  %v7354_v37 = vpop.f32.mrf.mxu0  ;;  %v16498_v50 = vld [vmem:[#allocation7 + $0x126c] ss:$16 sps:$4 sm:$0xff]   ;;  %v16529_v19 = vld [vmem:[#allocation7 + $0x11a8] ss:$16 sps:$4 sm:$0xff]  }
 0x2fa   :  { %v7395_v38 = vpop.f32.mrf.mxu1  ;;  %v18514_v13 = vadd.f32 %v7393_v63, %v7353_v8  ;;  %7647 = vmatpush1.bf16.msra.mxu0 %v16475_v59  ;;  %v16525_v41 = vld [vmem:[#allocation7 + $0x11cc] ss:$16 sps:$4 sm:$0xff]   ;;  %v16526_v59 = vld [vmem:[#allocation7 + $0x13c8] ss:$16 sps:$4 sm:$0xff]  }
 0x2fb   :  { %7688 = vmatpush1.bf16.msra.mxu1 %v16478_v51  ;;  %v7355_v31 = vpop.f32.mrf.mxu0  ;;  %7648 = vmatprep.subr.bf16.mxu0 %v16483_v6  ;;  %v16528_v42 = vld [vmem:[#allocation7 + $0x13cc] ss:$16 sps:$4 sm:$0xff]   ;;  %v16532_v60 = vld [vmem:[#allocation7 + $0x13a8] ss:$16 sps:$4 sm:$0xff]  }
 0x2fc   :  { %v7396_v1 = vpop.f32.mrf.mxu1  ;;  %7689 = vmatprep.subr.bf16.mxu1 %v16486_v7  ;;  %v16531_v51 = vld [vmem:[#allocation7 + $0x11ac] ss:$16 sps:$4 sm:$0xff]   ;;  %v16535_v6 = vld [vmem:[#allocation7 + $0x1188] ss:$16 sps:$4 sm:$0xff]  }
 0x2fd   :  { %v16534_v56 = vld [vmem:[#allocation7 + $0x13ac] ss:$16 sps:$4 sm:$0xff]   ;;  %v16538_v7 = vld [vmem:[#allocation7 + $0x1388] ss:$16 sps:$4 sm:$0xff]  }
 0x2fe   :  { %7649 = vmatpush1.bf16.msra.mxu0 %v16481_v9  ;;  %v16537_v61 = vld [vmem:[#allocation7 + $0x118c] ss:$16 sps:$4 sm:$0xff]   ;;  %v16544_v37 = vld [vmem:[#allocation7 + $0x1368] ss:$16 sps:$4 sm:$0xff]  }
 0x2ff   :  { %7690 = vmatpush1.bf16.msra.mxu1 %v16484_v44  ;;  %7650 = vmatprep.subr.bf16.mxu0 %v16489_v21  ;;  %v16540_v63 = vld [vmem:[#allocation7 + $0x138c] ss:$16 sps:$4 sm:$0xff]   ;;  %v16541_v44 = vld [vmem:[#allocation7 + $0x1168] ss:$16 sps:$4 sm:$0xff]  }
 0x300   :  { %7691 = vmatprep.subr.bf16.mxu1 %v16492_v39  ;;  %v16543_v8 = vld [vmem:[#allocation7 + $0x116c] ss:$16 sps:$4 sm:$0xff]   ;;  %v16547_v1 = vld [vmem:[#allocation7 + $0x1148] ss:$16 sps:$4 sm:$0xff]  }
 0x301   :  { %v16546_v9 = vld [vmem:[#allocation7 + $0x136c] ss:$16 sps:$4 sm:$0xff]   ;;  %v16550_v21 = vld [vmem:[#allocation7 + $0x1348] ss:$16 sps:$4 sm:$0xff]  }
 0x302   :  { %7651 = vmatpush1.bf16.msra.mxu0 %v16487_v46  ;;  %v16549_v38 = vld [vmem:[#allocation7 + $0x114c] ss:$16 sps:$4 sm:$0xff]  }
 0x303   :  { %7692 = vmatpush1.bf16.msra.mxu1 %v16490_v4  ;;  %7652 = vmatprep.subr.bf16.mxu0 %v16495_v58  ;;  %v16552_v31 = vld [vmem:[#allocation7 + $0x134c] ss:$16 sps:$4 sm:$0xff]   ;;  %v16553_v4 = vld [vmem:[#allocation7 + $0x1128] ss:$16 sps:$4 sm:$0xff]  }
 0x304   :  { %7693 = vmatprep.subr.bf16.mxu1 %v16498_v50  ;;  %v16555_v39 = vld [vmem:[#allocation7 + $0x112c] ss:$16 sps:$4 sm:$0xff]   ;;  %v16556_v58 = vld [vmem:[#allocation7 + $0x1328] ss:$16 sps:$4 sm:$0xff]  }
 0x305   :  { %v16558_v46 = vld [vmem:[#allocation7 + $0x132c] ss:$16 sps:$4 sm:$0xff]  }
 0x306   :  { %7653 = vmatpush1.bf16.msra.mxu0 %v16493_v5  ;;  %v16561_v50 = vld [vmem:[#allocation7 + $0x110c] ss:$16 sps:$4 sm:$0xff]  }
 0x307   :  { %7694 = vmatpush1.bf16.msra.mxu1 %v16496_v62  ;;  %7654 = vmatprep.subr.bf16.mxu0 %v16501_v3  ;;  %v16564_v5 = vld [vmem:[#allocation7 + $0x130c] ss:$16 sps:$4 sm:$0xff]   ;;  %v16559_v62 = vld [vmem:[#allocation7 + $0x1108] ss:$16 sps:$4 sm:$0xff]  }
 0x308   :  { %7695 = vmatprep.subr.bf16.mxu1 %v16504_v16  ;;  %v16562_v3 = vld [vmem:[#allocation7 + $0x1308] ss:$16 sps:$4 sm:$0xff]   ;;  %v16567_v16 = vld [vmem:[#allocation7 + $0x14ec] ss:$16 sps:$4 sm:$0xff]  }
 0x30a   :  { %7655 = vmatpush1.bf16.msra.mxu0 %v16499_v17  ;;  %v16570_v17 = vld [vmem:[#allocation7 + $0x16ec] ss:$16 sps:$4 sm:$0xff]  }
 0x30b   :  { %7696 = vmatpush1.bf16.msra.mxu1 %v16502_v10  ;;  %7656 = vmatprep.subr.bf16.mxu0 %v16507_v36  ;;  %v16565_v10 = vld [vmem:[#allocation7 + $0x14e8] ss:$16 sps:$4 sm:$0xff]  }
 0x30c   :  { %7697 = vmatprep.subr.bf16.mxu1 %v16510_v11  ;;  %v16568_v36 = vld [vmem:[#allocation7 + $0x16e8] ss:$16 sps:$4 sm:$0xff]   ;;  %v16573_v11 = vld [vmem:[#allocation7 + $0x14cc] ss:$16 sps:$4 sm:$0xff]  }
 0x30e   :  { %7657 = vmatpush1.bf16.msra.mxu0 %v16505_v32  ;;  %v16576_v32 = vld [vmem:[#allocation7 + $0x16cc] ss:$16 sps:$4 sm:$0xff]  }
 0x30f   :  { %7698 = vmatpush1.bf16.msra.mxu1 %v16508_v33  ;;  %7658 = vmatprep.subr.bf16.mxu0 %v16513_v27  ;;  %v16571_v33 = vld [vmem:[#allocation7 + $0x14c8] ss:$16 sps:$4 sm:$0xff]  }
 0x310   :  { %7699 = vmatprep.subr.bf16.mxu1 %v16516_v28  ;;  %v16574_v27 = vld [vmem:[#allocation7 + $0x16c8] ss:$16 sps:$4 sm:$0xff]  }
 0x312   :  { %7659 = vmatpush1.bf16.msra.mxu0 %v16511_v18 }
 0x313   :  { %7700 = vmatpush1.bf16.msra.mxu1 %v16514_v25  ;;  %7660 = vmatprep.subr.bf16.mxu0 %v16519_v40 }
 0x314   :  { %7701 = vmatprep.subr.bf16.mxu1 %v16522_v48 }
 0x316   :  { %7661 = vmatpush2.bf16.msra.mxu0 %v16517_v53  ;;  %v16579_v53 = vld [vmem:[#allocation7 + $0x14ac] ss:$16 sps:$4 sm:$0xff]  }
 0x317   :  { %7702 = vmatpush2.bf16.msra.mxu1 %v16520_v57  ;;  %7662 = vmatprep.subr.bf16.mxu0 %v16525_v41  ;;  %v16582_v57 = vld [vmem:[#allocation7 + $0x16ac] ss:$16 sps:$4 sm:$0xff]  }
 0x318   :  { %7703 = vmatprep.subr.bf16.mxu1 %v16528_v42 }
 0x31a   :  { %7663 = vmatpush2.bf16.msra.mxu0 %v16523_v47  ;;  %v16577_v47 = vld [vmem:[#allocation7 + $0x14a8] ss:$16 sps:$4 sm:$0xff]  }
 0x31b   :  { %7704 = vmatpush2.bf16.msra.mxu1 %v16526_v59  ;;  %7664 = vmatprep.subr.bf16.mxu0 %v16531_v51  ;;  %v16580_v59 = vld [vmem:[#allocation7 + $0x16a8] ss:$16 sps:$4 sm:$0xff]  }
 0x31c   :  { %7705 = vmatprep.subr.bf16.mxu1 %v16534_v56 }
 0x31e   :  { %7665 = vmatpush2.bf16.msra.mxu0 %v16529_v19  ;;  %v16585_v19 = vld [vmem:[#allocation7 + $0x148c] ss:$16 sps:$4 sm:$0xff]  }
 0x31f   :  { %7706 = vmatpush2.bf16.msra.mxu1 %v16532_v60  ;;  %7666 = vmatprep.subr.bf16.mxu0 %v16537_v61  ;;  %v16588_v60 = vld [vmem:[#allocation7 + $0x168c] ss:$16 sps:$4 sm:$0xff]   ;;  %v16586_v61 = vld [vmem:[#allocation7 + $0x1688] ss:$16 sps:$4 sm:$0xff]  }
 0x320   :  { %7707 = vmatprep.subr.bf16.mxu1 %v16540_v63  ;;  %v16589_v63 = vld [vmem:[#allocation7 + $0x1468] ss:$16 sps:$4 sm:$0xff]  }
 0x322   :  { %7667 = vmatpush2.bf16.msra.mxu0 %v16535_v6  ;;  %v16592_v6 = vld [vmem:[#allocation7 + $0x1668] ss:$16 sps:$4 sm:$0xff]  }
 0x323   :  { %7708 = vmatpush2.bf16.msra.mxu1 %v16538_v7  ;;  %7668 = vmatprep.subr.bf16.mxu0 %v16543_v8  ;;  %v16597_v7 = vld [vmem:[#allocation7 + $0x144c] ss:$16 sps:$4 sm:$0xff]  }
 0x324   :  { %7709 = vmatprep.subr.bf16.mxu1 %v16546_v9  ;;  %v16600_v8 = vld [vmem:[#allocation7 + $0x164c] ss:$16 sps:$4 sm:$0xff]   ;;  %v16595_v9 = vld [vmem:[#allocation7 + $0x1448] ss:$16 sps:$4 sm:$0xff]  }
 0x326   :  { %7669 = vmatpush2.bf16.msra.mxu0 %v16541_v44  ;;  %v16598_v44 = vld [vmem:[#allocation7 + $0x1648] ss:$16 sps:$4 sm:$0xff]  }
 0x327   :  { %7710 = vmatpush2.bf16.msra.mxu1 %v16544_v37  ;;  %7670 = vmatprep.subr.bf16.mxu0 %v16549_v38  ;;  %v16603_v37 = vld [vmem:[#allocation7 + $0x142c] ss:$16 sps:$4 sm:$0xff]  }
 0x328   :  { %7711 = vmatprep.subr.bf16.mxu1 %v16552_v31  ;;  %v16606_v38 = vld [vmem:[#allocation7 + $0x162c] ss:$16 sps:$4 sm:$0xff]   ;;  %v16601_v31 = vld [vmem:[#allocation7 + $0x1428] ss:$16 sps:$4 sm:$0xff]  }
 0x32a   :  { %7671 = vmatpush2.bf16.msra.mxu0 %v16547_v1  ;;  %v16604_v1 = vld [vmem:[#allocation7 + $0x1628] ss:$16 sps:$4 sm:$0xff]  }
 0x32b   :  { %7712 = vmatpush2.bf16.msra.mxu1 %v16550_v21  ;;  %7672 = vmatprep.subr.bf16.mxu0 %v16555_v39  ;;  %v16609_v21 = vld [vmem:[#allocation7 + $0x140c] ss:$16 sps:$4 sm:$0xff]  }
 0x32c   :  { %7713 = vmatprep.subr.bf16.mxu1 %v16558_v46  ;;  %v16612_v39 = vld [vmem:[#allocation7 + $0x160c] ss:$16 sps:$4 sm:$0xff]   ;;  %v16607_v46 = vld [vmem:[#allocation7 + $0x1408] ss:$16 sps:$4 sm:$0xff]  }
 0x32e   :  { %7673 = vmatpush2.bf16.msra.mxu0 %v16553_v4  ;;  %v16610_v4 = vld [vmem:[#allocation7 + $0x1608] ss:$16 sps:$4 sm:$0xff]  }
 0x32f   :  { %7714 = vmatpush2.bf16.msra.mxu1 %v16556_v58  ;;  %7674 = vmatprep.subr.bf16.mxu0 %v16561_v50  ;;  %v16615_v58 = vld [vmem:[#allocation7 + $0x15ec] ss:$16 sps:$4 sm:$0xff]  }
 0x330   :  { %7715 = vmatprep.subr.bf16.mxu1 %v16564_v5  ;;  %v16618_v50 = vld [vmem:[#allocation7 + $0x17ec] ss:$16 sps:$4 sm:$0xff]   ;;  %v16613_v5 = vld [vmem:[#allocation7 + $0x15e8] ss:$16 sps:$4 sm:$0xff]  }
 0x332   :  { %7675 = vmatpush2.bf16.msra.mxu0 %v16559_v62  ;;  %v16616_v62 = vld [vmem:[#allocation7 + $0x17e8] ss:$16 sps:$4 sm:$0xff]  }
 0x333   :  { %7716 = vmatpush2.bf16.msra.mxu1 %v16562_v3  ;;  %7726 = vmatprep.subr.bf16.mxu0 %v16567_v16  ;;  %v16621_v3 = vld [vmem:[#allocation7 + $0x15cc] ss:$16 sps:$4 sm:$0xff]  }
 0x334   :  { %7767 = vmatprep.subr.bf16.mxu1 %v16570_v17  ;;  %v16624_v16 = vld [vmem:[#allocation7 + $0x17cc] ss:$16 sps:$4 sm:$0xff]   ;;  %v16619_v17 = vld [vmem:[#allocation7 + $0x15c8] ss:$16 sps:$4 sm:$0xff]  }
 0x335   :  { %v7432_v28 = vpop.f32.mrf.mxu0  ;;  %7677 = vmatmul.mubr.bf16.vlgmr.msra.gmra.mxu0 %v18400_v54 }
 0x336   :  { %v7473_v18 = vpop.f32.mrf.mxu1  ;;  %7718 = vmatmul.mubr.bf16.vlgmr.msra.gmra.mxu1 %v18404_v55  ;;  %v7433_v25 = vadd.f32 %v7432_v28, %v18510_v24  ;;  %7727 = vmatpush1.bf16.msra.mxu0 %v16565_v10  ;;  %v16622_v10 = vld [vmem:[#allocation7 + $0x17c8] ss:$16 sps:$4 sm:$0xff]   ;;  %v16636_v28 = vld [vmem:[#allocation7 + $0x178c] ss:$16 sps:$4 sm:$0xff]  }
 0x337   :  { %7768 = vmatpush1.bf16.msra.mxu1 %v16568_v36  ;;  %v7434_v40 = vpop.f32.mrf.mxu0  ;;  %7728 = vmatprep.subr.bf16.mxu0 %v16573_v11  ;;  %v16627_v36 = vld [vmem:[#allocation7 + $0x15ac] ss:$16 sps:$4 sm:$0xff]  }
 0x338   :  { %v7475_v48 = vpop.f32.mrf.mxu1  ;;  %7769 = vmatprep.subr.bf16.mxu1 %v16576_v32  ;;  %v18519_v41 = vadd.f32 %v7473_v18, %v7433_v25  ;;  %v7435_v42 = vadd.f32 %v7434_v40, %v18514_v13  ;;  %7758 = vmatprep.mubr.bf16.mxu0 %v18406_v0  ;;  %v16583_v13 = vld [vmem:[#allocation7 + $0x1488] ss:$16 sps:$4 sm:$0xff]   ;;  %v16591_v0 = vld [vmem:[#allocation7 + $0x146c] ss:$16 sps:$4 sm:$0xff]  }
 0x339   :  { %7799 = vmatprep.mubr.bf16.mxu1 %v18408_v2  ;;  %v7436_v54 = vpop.f32.mrf.mxu0  ;;  %v16594_v2 = vld [vmem:[#allocation7 + $0x166c] ss:$16 sps:$4 sm:$0xff]   ;;  %v16625_v32 = vld [vmem:[#allocation7 + $0x15a8] ss:$16 sps:$4 sm:$0xff]  }
 0x33a   :  { %v7477_v55 = vpop.f32.mrf.mxu1  ;;  %v18524_v24 = vadd.f32 %v7475_v48, %v7435_v42  ;;  %7729 = vmatpush1.bf16.msra.mxu0 %v16571_v33  ;;  %v16630_v11 = vld [vmem:[#allocation7 + $0x17ac] ss:$16 sps:$4 sm:$0xff]   ;;  %v16628_v33 = vld [vmem:[#allocation7 + $0x17a8] ss:$16 sps:$4 sm:$0xff]  }
 0x33b   :  { %7770 = vmatpush1.bf16.msra.mxu1 %v16574_v27  ;;  %v7437_v51 = vpop.f32.mrf.mxu0  ;;  %7730 = vmatprep.subr.bf16.mxu0 %v16579_v53  ;;  %v16633_v27 = vld [vmem:[#allocation7 + $0x158c] ss:$16 sps:$4 sm:$0xff]   ;;  %v16631_v18 = vld [vmem:[#allocation7 + $0x1588] ss:$16 sps:$4 sm:$0xff]  }
 0x33c   :  { %v7478_v56 = vpop.f32.mrf.mxu1  ;;  %7771 = vmatprep.subr.bf16.mxu1 %v16582_v57  ;;  %v16634_v25 = vld [vmem:[#allocation7 + $0x1788] ss:$16 sps:$4 sm:$0xff]   ;;  %v16639_v40 = vld [vmem:[#allocation7 + $0x156c] ss:$16 sps:$4 sm:$0xff]  }
 0x33d   :  { %v16642_v48 = vld [vmem:[#allocation7 + $0x176c] ss:$16 sps:$4 sm:$0xff]   ;;  %v16637_v53 = vld [vmem:[#allocation7 + $0x1568] ss:$16 sps:$4 sm:$0xff]  }
 0x33e   :  { %7731 = vmatpush1.bf16.msra.mxu0 %v16577_v47  ;;  %v16640_v57 = vld [vmem:[#allocation7 + $0x1768] ss:$16 sps:$4 sm:$0xff]   ;;  %v16645_v42 = vld [vmem:[#allocation7 + $0x154c] ss:$16 sps:$4 sm:$0xff]  }
 0x33f   :  { %7772 = vmatpush1.bf16.msra.mxu1 %v16580_v59  ;;  %7732 = vmatprep.subr.bf16.mxu0 %v16585_v19  ;;  %v16648_v47 = vld [vmem:[#allocation7 + $0x174c] ss:$16 sps:$4 sm:$0xff]   ;;  %v16643_v59 = vld [vmem:[#allocation7 + $0x1548] ss:$16 sps:$4 sm:$0xff]  }
 0x340   :  { %7773 = vmatprep.subr.bf16.mxu1 %v16588_v60  ;;  %v16646_v54 = vld [vmem:[#allocation7 + $0x1748] ss:$16 sps:$4 sm:$0xff]   ;;  %v16651_v55 = vld [vmem:[#allocation7 + $0x152c] ss:$16 sps:$4 sm:$0xff]  }
 0x341   :  { %v16654_v51 = vld [vmem:[#allocation7 + $0x172c] ss:$16 sps:$4 sm:$0xff]   ;;  %v16649_v56 = vld [vmem:[#allocation7 + $0x1528] ss:$16 sps:$4 sm:$0xff]  }
 0x342   :  { %7733 = vmatpush1.bf16.msra.mxu0 %v16583_v13  ;;  %v16652_v19 = vld [vmem:[#allocation7 + $0x1728] ss:$16 sps:$4 sm:$0xff]   ;;  %v16657_v60 = vld [vmem:[#allocation7 + $0x150c] ss:$16 sps:$4 sm:$0xff]  }
 0x343   :  { %7774 = vmatpush1.bf16.msra.mxu1 %v16586_v61  ;;  %7734 = vmatprep.subr.bf16.mxu0 %v16591_v0  ;;  %v16660_v13 = vld [vmem:[#allocation7 + $0x170c] ss:$16 sps:$4 sm:$0xff]   ;;  %v16655_v61 = vld [vmem:[#allocation7 + $0x1508] ss:$16 sps:$4 sm:$0xff]  }
 0x344   :  { %7775 = vmatprep.subr.bf16.mxu1 %v16594_v2  ;;  %v16658_v0 = vld [vmem:[#allocation7 + $0x1708] ss:$16 sps:$4 sm:$0xff]   ;;  %v16663_v2 = vld [vmem:[#allocation7 + $0x18ec] ss:$16 sps:$4 sm:$0xff]  }
 0x346   :  { %7735 = vmatpush1.bf16.msra.mxu0 %v16589_v63  ;;  %v16666_v63 = vld [vmem:[#allocation7 + $0x1aec] ss:$16 sps:$4 sm:$0xff]  }
 0x347   :  { %7776 = vmatpush1.bf16.msra.mxu1 %v16592_v6  ;;  %7736 = vmatprep.subr.bf16.mxu0 %v16597_v7  ;;  %v16661_v6 = vld [vmem:[#allocation7 + $0x18e8] ss:$16 sps:$4 sm:$0xff]  }
 0x348   :  { %7777 = vmatprep.subr.bf16.mxu1 %v16600_v8  ;;  %v16664_v7 = vld [vmem:[#allocation7 + $0x1ae8] ss:$16 sps:$4 sm:$0xff]   ;;  %v16669_v8 = vld [vmem:[#allocation7 + $0x18cc] ss:$16 sps:$4 sm:$0xff]  }
 0x34a   :  { %7737 = vmatpush1.bf16.msra.mxu0 %v16595_v9  ;;  %v16672_v9 = vld [vmem:[#allocation7 + $0x1acc] ss:$16 sps:$4 sm:$0xff]  }
 0x34b   :  { %7778 = vmatpush1.bf16.msra.mxu1 %v16598_v44  ;;  %7738 = vmatprep.subr.bf16.mxu0 %v16603_v37  ;;  %v16667_v44 = vld [vmem:[#allocation7 + $0x18c8] ss:$16 sps:$4 sm:$0xff]  }
 0x34c   :  { %7779 = vmatprep.subr.bf16.mxu1 %v16606_v38  ;;  %v16670_v37 = vld [vmem:[#allocation7 + $0x1ac8] ss:$16 sps:$4 sm:$0xff]  }
 0x34e   :  { %7739 = vmatpush1.bf16.msra.mxu0 %v16601_v31 }
 0x34f   :  { %7780 = vmatpush1.bf16.msra.mxu1 %v16604_v1  ;;  %7740 = vmatprep.subr.bf16.mxu0 %v16609_v21 }
 0x350   :  { %7781 = vmatprep.subr.bf16.mxu1 %v16612_v39 }
 0x352   :  { %7741 = vmatpush1.bf16.msra.mxu0 %v16607_v46  ;;  %v16675_v46 = vld [vmem:[#allocation7 + $0x18ac] ss:$16 sps:$4 sm:$0xff]  }
 0x353   :  { %7782 = vmatpush1.bf16.msra.mxu1 %v16610_v4  ;;  %7742 = vmatprep.subr.bf16.mxu0 %v16615_v58  ;;  %v16678_v4 = vld [vmem:[#allocation7 + $0x1aac] ss:$16 sps:$4 sm:$0xff]  }
 0x354   :  { %7783 = vmatprep.subr.bf16.mxu1 %v16618_v50 }
 0x356   :  { %7743 = vmatpush2.bf16.msra.mxu0 %v16613_v5  ;;  %v16673_v5 = vld [vmem:[#allocation7 + $0x18a8] ss:$16 sps:$4 sm:$0xff]  }
 0x357   :  { %7784 = vmatpush2.bf16.msra.mxu1 %v16616_v62  ;;  %7744 = vmatprep.subr.bf16.mxu0 %v16621_v3  ;;  %v16676_v62 = vld [vmem:[#allocation7 + $0x1aa8] ss:$16 sps:$4 sm:$0xff]  }
 0x358   :  { %7785 = vmatprep.subr.bf16.mxu1 %v16624_v16 }
 0x35a   :  { %7745 = vmatpush2.bf16.msra.mxu0 %v16619_v17  ;;  %v16681_v17 = vld [vmem:[#allocation7 + $0x188c] ss:$16 sps:$4 sm:$0xff]  }
 0x35b   :  { %7786 = vmatpush2.bf16.msra.mxu1 %v16622_v10  ;;  %7746 = vmatprep.subr.bf16.mxu0 %v16627_v36  ;;  %v16684_v10 = vld [vmem:[#allocation7 + $0x1a8c] ss:$16 sps:$4 sm:$0xff]   ;;  %v16682_v36 = vld [vmem:[#allocation7 + $0x1a88] ss:$16 sps:$4 sm:$0xff]  }
 0x35c   :  { %7787 = vmatprep.subr.bf16.mxu1 %v16630_v11  ;;  %v16685_v11 = vld [vmem:[#allocation7 + $0x1868] ss:$16 sps:$4 sm:$0xff]  }
 0x35e   :  { %7747 = vmatpush2.bf16.msra.mxu0 %v16625_v32  ;;  %v16688_v32 = vld [vmem:[#allocation7 + $0x1a68] ss:$16 sps:$4 sm:$0xff]  }
 0x35f   :  { %7788 = vmatpush2.bf16.msra.mxu1 %v16628_v33  ;;  %7748 = vmatprep.subr.bf16.mxu0 %v16633_v27  ;;  %v16693_v33 = vld [vmem:[#allocation7 + $0x184c] ss:$16 sps:$4 sm:$0xff]  }
 0x360   :  { %7789 = vmatprep.subr.bf16.mxu1 %v16636_v28  ;;  %v16696_v27 = vld [vmem:[#allocation7 + $0x1a4c] ss:$16 sps:$4 sm:$0xff]   ;;  %v16691_v28 = vld [vmem:[#allocation7 + $0x1848] ss:$16 sps:$4 sm:$0xff]  }
 0x362   :  { %7749 = vmatpush2.bf16.msra.mxu0 %v16631_v18  ;;  %v16694_v18 = vld [vmem:[#allocation7 + $0x1a48] ss:$16 sps:$4 sm:$0xff]  }
 0x363   :  { %7790 = vmatpush2.bf16.msra.mxu1 %v16634_v25  ;;  %7750 = vmatprep.subr.bf16.mxu0 %v16639_v40  ;;  %v16699_v25 = vld [vmem:[#allocation7 + $0x182c] ss:$16 sps:$4 sm:$0xff]  }
 0x364   :  { %7791 = vmatprep.subr.bf16.mxu1 %v16642_v48  ;;  %v16702_v40 = vld [vmem:[#allocation7 + $0x1a2c] ss:$16 sps:$4 sm:$0xff]   ;;  %v16697_v48 = vld [vmem:[#allocation7 + $0x1828] ss:$16 sps:$4 sm:$0xff]  }
 0x366   :  { %7751 = vmatpush2.bf16.msra.mxu0 %v16637_v53  ;;  %v16700_v53 = vld [vmem:[#allocation7 + $0x1a28] ss:$16 sps:$4 sm:$0xff]  }
 0x367   :  { %7792 = vmatpush2.bf16.msra.mxu1 %v16640_v57  ;;  %7752 = vmatprep.subr.bf16.mxu0 %v16645_v42  ;;  %v16705_v57 = vld [vmem:[#allocation7 + $0x180c] ss:$16 sps:$4 sm:$0xff]  }
 0x368   :  { %7793 = vmatprep.subr.bf16.mxu1 %v16648_v47  ;;  %v16708_v42 = vld [vmem:[#allocation7 + $0x1a0c] ss:$16 sps:$4 sm:$0xff]   ;;  %v16703_v47 = vld [vmem:[#allocation7 + $0x1808] ss:$16 sps:$4 sm:$0xff]  }
 0x36a   :  { %7753 = vmatpush2.bf16.msra.mxu0 %v16643_v59  ;;  %v16706_v59 = vld [vmem:[#allocation7 + $0x1a08] ss:$16 sps:$4 sm:$0xff]  }
 0x36b   :  { %7794 = vmatpush2.bf16.msra.mxu1 %v16646_v54  ;;  %7754 = vmatprep.subr.bf16.mxu0 %v16651_v55  ;;  %v16711_v54 = vld [vmem:[#allocation7 + $0x19ec] ss:$16 sps:$4 sm:$0xff]  }
 0x36c   :  { %7795 = vmatprep.subr.bf16.mxu1 %v16654_v51  ;;  %v16714_v55 = vld [vmem:[#allocation7 + $0x1bec] ss:$16 sps:$4 sm:$0xff]   ;;  %v16709_v51 = vld [vmem:[#allocation7 + $0x19e8] ss:$16 sps:$4 sm:$0xff]  }
 0x36e   :  { %7755 = vmatpush2.bf16.msra.mxu0 %v16649_v56  ;;  %v16712_v56 = vld [vmem:[#allocation7 + $0x1be8] ss:$16 sps:$4 sm:$0xff]  }
 0x36f   :  { %7796 = vmatpush2.bf16.msra.mxu1 %v16652_v19  ;;  %7756 = vmatprep.subr.bf16.mxu0 %v16657_v60  ;;  %v16717_v19 = vld [vmem:[#allocation7 + $0x19cc] ss:$16 sps:$4 sm:$0xff]  }
 0x370   :  { %7797 = vmatprep.subr.bf16.mxu1 %v16660_v13  ;;  %v16720_v60 = vld [vmem:[#allocation7 + $0x1bcc] ss:$16 sps:$4 sm:$0xff]   ;;  %v16715_v13 = vld [vmem:[#allocation7 + $0x19c8] ss:$16 sps:$4 sm:$0xff]  }
 0x372   :  { %7757 = vmatpush2.bf16.msra.mxu0 %v16655_v61  ;;  %v16718_v61 = vld [vmem:[#allocation7 + $0x1bc8] ss:$16 sps:$4 sm:$0xff]  }
 0x373   :  { %7798 = vmatpush2.bf16.msra.mxu1 %v16658_v0  ;;  %7808 = vmatprep.subr.bf16.mxu0 %v16663_v2  ;;  %v16723_v0 = vld [vmem:[#allocation7 + $0x19ac] ss:$16 sps:$4 sm:$0xff]  }
 0x374   :  { %7849 = vmatprep.subr.bf16.mxu1 %v16666_v63  ;;  %v16726_v2 = vld [vmem:[#allocation7 + $0x1bac] ss:$16 sps:$4 sm:$0xff]   ;;  %v16721_v63 = vld [vmem:[#allocation7 + $0x19a8] ss:$16 sps:$4 sm:$0xff]  }
 0x375   :  { %v7514_v38 = vpop.f32.mrf.mxu0  ;;  %7759 = vmatmul.mubr.bf16.vlgmr.msra.gmra.mxu0 %v18432_v14 }
 0x376   :  { %v7555_v31 = vpop.f32.mrf.mxu1  ;;  %7800 = vmatmul.mubr.bf16.vlgmr.msra.gmra.mxu1 %v18436_v15  ;;  %v7515_v1 = vadd.f32 %v7514_v38, %v18519_v41  ;;  %7809 = vmatpush1.bf16.msra.mxu0 %v16661_v6  ;;  %v16724_v6 = vld [vmem:[#allocation7 + $0x1ba8] ss:$16 sps:$4 sm:$0xff]   ;;  %v16738_v38 = vld [vmem:[#allocation7 + $0x1b6c] ss:$16 sps:$4 sm:$0xff]  }
 0x377   :  { %7850 = vmatpush1.bf16.msra.mxu1 %v16664_v7  ;;  %v7516_v21 = vpop.f32.mrf.mxu0  ;;  %7810 = vmatprep.subr.bf16.mxu0 %v16669_v8  ;;  %v16729_v7 = vld [vmem:[#allocation7 + $0x198c] ss:$16 sps:$4 sm:$0xff]  }
 0x378   :  { %v7557_v39 = vpop.f32.mrf.mxu1  ;;  %7851 = vmatprep.subr.bf16.mxu1 %v16672_v9  ;;  %v18529_v58 = vadd.f32 %v7555_v31, %v7515_v1  ;;  %v7517_v50 = vadd.f32 %v7516_v21, %v18524_v24  ;;  %7840 = vmatprep.mubr.bf16.mxu0 %v18438_v22  ;;  %v16679_v24 = vld [vmem:[#allocation7 + $0x1888] ss:$16 sps:$4 sm:$0xff]   ;;  %v16687_v22 = vld [vmem:[#allocation7 + $0x186c] ss:$16 sps:$4 sm:$0xff]  }
 0x379   :  { %7881 = vmatprep.mubr.bf16.mxu1 %v18440_v23  ;;  %v7518_v14 = vpop.f32.mrf.mxu0  ;;  %v16690_v23 = vld [vmem:[#allocation7 + $0x1a6c] ss:$16 sps:$4 sm:$0xff]   ;;  %v16727_v9 = vld [vmem:[#allocation7 + $0x1988] ss:$16 sps:$4 sm:$0xff]  }
 0x37a   :  { %v7559_v15 = vpop.f32.mrf.mxu1  ;;  %v18534_v41 = vadd.f32 %v7557_v39, %v7517_v50  ;;  %7811 = vmatpush1.bf16.msra.mxu0 %v16667_v44  ;;  %v16732_v8 = vld [vmem:[#allocation7 + $0x1b8c] ss:$16 sps:$4 sm:$0xff]   ;;  %v16730_v44 = vld [vmem:[#allocation7 + $0x1b88] ss:$16 sps:$4 sm:$0xff]  }
 0x37b   :  { %7852 = vmatpush1.bf16.msra.mxu1 %v16670_v37  ;;  %v7519_v3 = vpop.f32.mrf.mxu0  ;;  %7812 = vmatprep.subr.bf16.mxu0 %v16675_v46  ;;  %v16735_v37 = vld [vmem:[#allocation7 + $0x196c] ss:$16 sps:$4 sm:$0xff]   ;;  %v16733_v31 = vld [vmem:[#allocation7 + $0x1968] ss:$16 sps:$4 sm:$0xff]  }
 0x37c   :  { %v7560_v16 = vpop.f32.mrf.mxu1  ;;  %7853 = vmatprep.subr.bf16.mxu1 %v16678_v4  ;;  %v16736_v1 = vld [vmem:[#allocation7 + $0x1b68] ss:$16 sps:$4 sm:$0xff]   ;;  %v16741_v21 = vld [vmem:[#allocation7 + $0x194c] ss:$16 sps:$4 sm:$0xff]  }
 0x37d   :  { %v16744_v39 = vld [vmem:[#allocation7 + $0x1b4c] ss:$16 sps:$4 sm:$0xff]   ;;  %v16739_v4 = vld [vmem:[#allocation7 + $0x1948] ss:$16 sps:$4 sm:$0xff]  }
 0x37e   :  { %7813 = vmatpush1.bf16.msra.mxu0 %v16673_v5  ;;  %v258_v46 = vld [vmem:[#allocation5] sm:$0xff] }
 0x37f   :  { %7854 = vmatpush1.bf16.msra.mxu1 %v16676_v62  ;;  %7814 = vmatprep.subr.bf16.mxu0 %v16681_v17  ;;  %v16742_v50 = vld [vmem:[#allocation7 + $0x1b48] ss:$16 sps:$4 sm:$0xff]   ;;  %v16747_v5 = vld [vmem:[#allocation7 + $0x192c] ss:$16 sps:$4 sm:$0xff]   ;;  %v272_v14 = vcombine.high %v258_v46, %v258_v46 }
 0x380   :  { %7855 = vmatprep.subr.bf16.mxu1 %v16684_v10  ;;  %v16750_v62 = vld [vmem:[#allocation7 + $0x1b2c] ss:$16 sps:$4 sm:$0xff]   ;;  %v16745_v15 = vld [vmem:[#allocation7 + $0x1928] ss:$16 sps:$4 sm:$0xff]   ;;  %v18537_v10 = vrot.slane %v258_v46, %v18268_v49  ;;  %v16798_v46 = vld [vmem:[#allocation7 + $0x1e24] ss:$16 sps:$4 sm:$0xff]  }
 0x381   :  { %v16748_v3 = vld [vmem:[#allocation7 + $0x1b28] ss:$16 sps:$4 sm:$0xff]   ;;  %v16753_v16 = vld [vmem:[#allocation7 + $0x190c] ss:$16 sps:$4 sm:$0xff]  }
 0x382   :  { %7815 = vmatpush1.bf16.msra.mxu0 %v16679_v24  ;;  %v16756_v17 = vld [vmem:[#allocation7 + $0x1b0c] ss:$16 sps:$4 sm:$0xff]   ;;  %v18540_v24 = vrot.slane %v272_v14, %v18268_v49  ;;  %v16799_v14 = vld [vmem:[#allocation7 + $0x1c00] ss:$16 sps:$4 sm:$0xff]  }
 0x383   :  { %7856 = vmatpush1.bf16.msra.mxu1 %v16682_v36  ;;  %7816 = vmatprep.subr.bf16.mxu0 %v16687_v22  ;;  %v16751_v36 = vld [vmem:[#allocation7 + $0x1908] ss:$16 sps:$4 sm:$0xff]  }
 0x384   :  { %7857 = vmatprep.subr.bf16.mxu1 %v16690_v23  ;;  %v16754_v22 = vld [vmem:[#allocation7 + $0x1b08] ss:$16 sps:$4 sm:$0xff]   ;;  %v16759_v23 = vld [vmem:[#allocation7 + $0x1ce4] ss:$16 sps:$4 sm:$0xff]  }
 0x386   :  { %7817 = vmatpush1.bf16.msra.mxu0 %v16685_v11  ;;  %v16762_v11 = vld [vmem:[#allocation7 + $0x1ee4] ss:$16 sps:$4 sm:$0xff]  }
 0x387   :  { %7858 = vmatpush1.bf16.msra.mxu1 %v16688_v32  ;;  %7818 = vmatprep.subr.bf16.mxu0 %v16693_v33  ;;  %v16757_v32 = vld [vmem:[#allocation7 + $0x1ce0] ss:$16 sps:$4 sm:$0xff]  }
 0x388   :  { %7859 = vmatprep.subr.bf16.mxu1 %v16696_v27  ;;  %v16760_v33 = vld [vmem:[#allocation7 + $0x1ee0] ss:$16 sps:$4 sm:$0xff]   ;;  %v287_v27 = vcombine.high %v18537_v10, %v18537_v10 }
 0x38a   :  { %7819 = vmatpush1.bf16.msra.mxu0 %v16691_v28  ;;  %v288_v28 = vcombine.high %v18540_v24, %v18540_v24 }
 0x38b   :  { %7860 = vmatpush1.bf16.msra.mxu1 %v16694_v18  ;;  %7820 = vmatprep.subr.bf16.mxu0 %v16699_v25  ;;  %v16765_v18 = vld [vmem:[#allocation7 + $0x1cc4] ss:$16 sps:$4 sm:$0xff]  }
 0x38c   :  { %7861 = vmatprep.subr.bf16.mxu1 %v16702_v40  ;;  %v16768_v25 = vld [vmem:[#allocation7 + $0x1ec4] ss:$16 sps:$4 sm:$0xff]   ;;  %v16763_v40 = vld [vmem:[#allocation7 + $0x1cc0] ss:$16 sps:$4 sm:$0xff]  }
 0x38e   :  { %7821 = vmatpush1.bf16.msra.mxu0 %v16697_v48  ;;  %v16766_v48 = vld [vmem:[#allocation7 + $0x1ec0] ss:$16 sps:$4 sm:$0xff]  }
 0x38f   :  { %7862 = vmatpush1.bf16.msra.mxu1 %v16700_v53  ;;  %7822 = vmatprep.subr.bf16.mxu0 %v16705_v57  ;;  %v18546_v53 = vpack.c.bf16 %v287_v27, %v287_v27  ;;  %v18548_v57 = vpack.c.bf16 %v288_v28, %v288_v28  ;;  %v16822_v27 = vld [vmem:[#allocation7 + $0x1fa4] ss:$16 sps:$4 sm:$0xff]   ;;  %v16817_v28 = vld [vmem:[#allocation7 + $0x1da0] ss:$16 sps:$4 sm:$0xff]  }
 0x390   :  { %7863 = vmatprep.subr.bf16.mxu1 %v16708_v42 }
 0x392   :  { %7823 = vmatpush1.bf16.msra.mxu0 %v16703_v47 }
 0x393   :  { %7864 = vmatpush1.bf16.msra.mxu1 %v16706_v59  ;;  %7824 = vmatprep.subr.bf16.mxu0 %v16711_v54 }
 0x394   :  { %7865 = vmatprep.subr.bf16.mxu1 %v16714_v55 }
 0x396   :  { %7825 = vmatpush2.bf16.msra.mxu0 %v16709_v51  ;;  %v16771_v51 = vld [vmem:[#allocation7 + $0x1ca4] ss:$16 sps:$4 sm:$0xff]  }
 0x397   :  { %7866 = vmatpush2.bf16.msra.mxu1 %v16712_v56  ;;  %7826 = vmatprep.subr.bf16.mxu0 %v16717_v19  ;;  %v16774_v56 = vld [vmem:[#allocation7 + $0x1ea4] ss:$16 sps:$4 sm:$0xff]  }
 0x398   :  { %7867 = vmatprep.subr.bf16.mxu1 %v16720_v60 }
 0x39a   :  { %7827 = vmatpush2.bf16.msra.mxu0 %v16715_v13  ;;  %v16769_v13 = vld [vmem:[#allocation7 + $0x1ca0] ss:$16 sps:$4 sm:$0xff]  }
 0x39b   :  { %7868 = vmatpush2.bf16.msra.mxu1 %v16718_v61  ;;  %7828 = vmatprep.subr.bf16.mxu0 %v16723_v0  ;;  %v16772_v61 = vld [vmem:[#allocation7 + $0x1ea0] ss:$16 sps:$4 sm:$0xff]  }
 0x39c   :  { %7869 = vmatprep.subr.bf16.mxu1 %v16726_v2 }
 0x39e   :  { %7829 = vmatpush2.bf16.msra.mxu0 %v16721_v63  ;;  %v16777_v63 = vld [vmem:[#allocation7 + $0x1c84] ss:$16 sps:$4 sm:$0xff]  }
 0x39f   :  { %7870 = vmatpush2.bf16.msra.mxu1 %v16724_v6  ;;  %7830 = vmatprep.subr.bf16.mxu0 %v16729_v7  ;;  %v16780_v6 = vld [vmem:[#allocation7 + $0x1e84] ss:$16 sps:$4 sm:$0xff]   ;;  %v16778_v7 = vld [vmem:[#allocation7 + $0x1e80] ss:$16 sps:$4 sm:$0xff]  }
 0x3a0   :  { %7871 = vmatprep.subr.bf16.mxu1 %v16732_v8  ;;  %v16783_v8 = vld [vmem:[#allocation7 + $0x1c64] ss:$16 sps:$4 sm:$0xff]  }
 0x3a2   :  { %7831 = vmatpush2.bf16.msra.mxu0 %v16727_v9  ;;  %v16786_v9 = vld [vmem:[#allocation7 + $0x1e64] ss:$16 sps:$4 sm:$0xff]  }
 0x3a3   :  { %7872 = vmatpush2.bf16.msra.mxu1 %v16730_v44  ;;  %7832 = vmatprep.subr.bf16.mxu0 %v16735_v37  ;;  %v16781_v44 = vld [vmem:[#allocation7 + $0x1c60] ss:$16 sps:$4 sm:$0xff]  }
 0x3a4   :  { %7873 = vmatprep.subr.bf16.mxu1 %v16738_v38  ;;  %v16784_v37 = vld [vmem:[#allocation7 + $0x1e60] ss:$16 sps:$4 sm:$0xff]   ;;  %v16789_v38 = vld [vmem:[#allocation7 + $0x1c44] ss:$16 sps:$4 sm:$0xff]  }
 0x3a6   :  { %7833 = vmatpush2.bf16.msra.mxu0 %v16733_v31  ;;  %v16792_v31 = vld [vmem:[#allocation7 + $0x1e44] ss:$16 sps:$4 sm:$0xff]  }
 0x3a7   :  { %7874 = vmatpush2.bf16.msra.mxu1 %v16736_v1  ;;  %7834 = vmatprep.subr.bf16.mxu0 %v16741_v21  ;;  %v16787_v1 = vld [vmem:[#allocation7 + $0x1c40] ss:$16 sps:$4 sm:$0xff]  }
 0x3a8   :  { %7875 = vmatprep.subr.bf16.mxu1 %v16744_v39  ;;  %v16790_v21 = vld [vmem:[#allocation7 + $0x1e40] ss:$16 sps:$4 sm:$0xff]   ;;  %v16795_v39 = vld [vmem:[#allocation7 + $0x1c24] ss:$16 sps:$4 sm:$0xff]  }
 0x3aa   :  { %7835 = vmatpush2.bf16.msra.mxu0 %v16739_v4  ;;  %v16793_v4 = vld [vmem:[#allocation7 + $0x1c20] ss:$16 sps:$4 sm:$0xff]  }
 0x3ab   :  { %7876 = vmatpush2.bf16.msra.mxu1 %v16742_v50  ;;  %7836 = vmatprep.subr.bf16.mxu0 %v16747_v5  ;;  %v16796_v50 = vld [vmem:[#allocation7 + $0x1e20] ss:$16 sps:$4 sm:$0xff]   ;;  %v16801_v5 = vld [vmem:[#allocation7 + $0x1c04] ss:$16 sps:$4 sm:$0xff]  }
 0x3ac   :  { %7877 = vmatprep.subr.bf16.mxu1 %v16750_v62  ;;  %v16804_v62 = vld [vmem:[#allocation7 + $0x1e04] ss:$16 sps:$4 sm:$0xff]  }
 0x3ae   :  { %7837 = vmatpush2.bf16.msra.mxu0 %v16745_v15  ;;  %v16802_v15 = vld [vmem:[#allocation7 + $0x1e00] ss:$16 sps:$4 sm:$0xff]  }
 0x3af   :  { %7878 = vmatpush2.bf16.msra.mxu1 %v16748_v3  ;;  %7838 = vmatprep.subr.bf16.mxu0 %v16753_v16  ;;  %v16807_v3 = vld [vmem:[#allocation7 + $0x1de4] ss:$16 sps:$4 sm:$0xff]  }
 0x3b0   :  { %7879 = vmatprep.subr.bf16.mxu1 %v16756_v17  ;;  %v16810_v16 = vld [vmem:[#allocation7 + $0x1fe4] ss:$16 sps:$4 sm:$0xff]   ;;  %v16805_v17 = vld [vmem:[#allocation7 + $0x1de0] ss:$16 sps:$4 sm:$0xff]  }
 0x3b2   :  { %7839 = vmatpush2.bf16.msra.mxu0 %v16751_v36  ;;  %v16808_v36 = vld [vmem:[#allocation7 + $0x1fe0] ss:$16 sps:$4 sm:$0xff]  }
 0x3b3   :  { %7880 = vmatpush2.bf16.msra.mxu1 %v16754_v22  ;;  %12416 = vmatprep.subr.bf16.mxu0 %v16759_v23  ;;  %v16813_v22 = vld [vmem:[#allocation7 + $0x1dc4] ss:$16 sps:$4 sm:$0xff]  }
 0x3b4   :  { %12457 = vmatprep.subr.bf16.mxu1 %v16762_v11  ;;  %v16816_v23 = vld [vmem:[#allocation7 + $0x1fc4] ss:$16 sps:$4 sm:$0xff]   ;;  %v16811_v11 = vld [vmem:[#allocation7 + $0x1dc0] ss:$16 sps:$4 sm:$0xff]  }
 0x3b5   :  { %v7596_v42 = vpop.f32.mrf.mxu0  ;;  %7841 = vmatmul.mubr.bf16.vlgmr.msra.gmra.mxu0 %v18454_v45 }
 0x3b6   :  { %v7637_v47 = vpop.f32.mrf.mxu1  ;;  %7882 = vmatmul.mubr.bf16.vlgmr.msra.gmra.mxu1 %v18458_v12  ;;  %v7597_v59 = vadd.f32 %v7596_v42, %v18529_v58  ;;  %12417 = vmatpush1.bf16.msra.mxu0 %v16757_v32  ;;  %v16814_v32 = vld [vmem:[#allocation7 + $0x1fc0] ss:$16 sps:$4 sm:$0xff]  }
 0x3b7   :  { %12458 = vmatpush1.bf16.msra.mxu1 %v16760_v33  ;;  %v7598_v54 = vpop.f32.mrf.mxu0  ;;  %12418 = vmatprep.subr.bf16.mxu0 %v16765_v18  ;;  %v16819_v33 = vld [vmem:[#allocation7 + $0x1da4] ss:$16 sps:$4 sm:$0xff]   ;;  %v16820_v18 = vld [vmem:[#allocation7 + $0x1fa0] ss:$16 sps:$4 sm:$0xff]  }
 0x3b8   :  { %v7639_v55 = vpop.f32.mrf.mxu1  ;;  %12459 = vmatprep.subr.bf16.mxu1 %v16768_v25  ;;  %v18553_v19 = vadd.f32 %v7637_v47, %v7597_v59  ;;  %v7599_v60 = vadd.f32 %v7598_v54, %v18534_v41  ;;  %12448 = vmatprep.mubr.bf16.mxu0 %v18546_v53  ;;  %v16775_v41 = vld [vmem:[#allocation7 + $0x1c80] ss:$16 sps:$4 sm:$0xff]   ;;  %v16825_v25 = vld [vmem:[#allocation7 + $0x1d84] ss:$16 sps:$4 sm:$0xff]  }
 0x3b9   :  { %12489 = vmatprep.mubr.bf16.mxu1 %v18548_v57  ;;  %v7600_v45 = vpop.f32.mrf.mxu0  ;;  %v16826_v42 = vld [vmem:[#allocation7 + $0x1f80] ss:$16 sps:$4 sm:$0xff]   ;;  %v16831_v47 = vld [vmem:[#allocation7 + $0x1d64] ss:$16 sps:$4 sm:$0xff]  }
 0x3ba   :  { %v7641_v12 = vpop.f32.mrf.mxu1  ;;  %v18558_v58 = vadd.f32 %v7639_v55, %v7599_v60  ;;  %12419 = vmatpush1.bf16.msra.mxu0 %v16763_v40  ;;  %v16828_v40 = vld [vmem:[#allocation7 + $0x1f84] ss:$16 sps:$4 sm:$0xff]   ;;  %v16829_v54 = vld [vmem:[#allocation7 + $0x1d60] ss:$16 sps:$4 sm:$0xff]  }
 0x3bb   :  { %12460 = vmatpush1.bf16.msra.mxu1 %v16766_v48  ;;  %v7601_v0 = vpop.f32.mrf.mxu0  ;;  %12420 = vmatprep.subr.bf16.mxu0 %v16771_v51  ;;  %v16823_v48 = vld [vmem:[#allocation7 + $0x1d80] ss:$16 sps:$4 sm:$0xff]   ;;  %v16834_v59 = vld [vmem:[#allocation7 + $0x1f64] ss:$16 sps:$4 sm:$0xff]  }
 0x3bc   :  { %v7642_v2 = vpop.f32.mrf.mxu1  ;;  %12461 = vmatprep.subr.bf16.mxu1 %v16774_v56  ;;  %v16832_v55 = vld [vmem:[#allocation7 + $0x1f60] ss:$16 sps:$4 sm:$0xff]   ;;  %v16837_v51 = vld [vmem:[#allocation7 + $0x1d44] ss:$16 sps:$4 sm:$0xff]  }
 0x3bd   :  { %v16840_v56 = vld [vmem:[#allocation7 + $0x1f44] ss:$16 sps:$4 sm:$0xff]   ;;  %v16841_v2 = vld [vmem:[#allocation7 + $0x1d20] ss:$16 sps:$4 sm:$0xff]  }
 0x3be   :  { %12421 = vmatpush1.bf16.msra.mxu0 %v16769_v13  ;;  %v259_v60 = vld [vmem:[#allocation5 + $0x8] sm:$0xff] }
 0x3bf   :  { %12462 = vmatpush1.bf16.msra.mxu1 %v16772_v61  ;;  %12422 = vmatprep.subr.bf16.mxu0 %v16777_v63  ;;  %v16835_v13 = vld [vmem:[#allocation7 + $0x1d40] ss:$16 sps:$4 sm:$0xff]   ;;  %v16843_v45 = vld [vmem:[#allocation7 + $0x1d24] ss:$16 sps:$4 sm:$0xff]   ;;  %v289_v0 = vcombine.high %v259_v60, %v259_v60 }
 0x3c0   :  { %12463 = vmatprep.subr.bf16.mxu1 %v16780_v6  ;;  %v16838_v61 = vld [vmem:[#allocation7 + $0x1f40] ss:$16 sps:$4 sm:$0xff]   ;;  %v16846_v12 = vld [vmem:[#allocation7 + $0x1f24] ss:$16 sps:$4 sm:$0xff]  }
 0x3c1   :  { %v16844_v63 = vld [vmem:[#allocation7 + $0x1f20] ss:$16 sps:$4 sm:$0xff]   ;;  %v16849_v6 = vld [vmem:[#allocation7 + $0x1d04] ss:$16 sps:$4 sm:$0xff]  }
 0x3c2   :  { %12423 = vmatpush1.bf16.msra.mxu0 %v16775_v41  ;;  %v16852_v41 = vld [vmem:[#allocation7 + $0x1f04] ss:$16 sps:$4 sm:$0xff]  }
 0x3c3   :  { %12464 = vmatpush1.bf16.msra.mxu1 %v16778_v7  ;;  %12424 = vmatprep.subr.bf16.mxu0 %v16783_v8  ;;  %v18561_v7 = vrot.slane %v259_v60, %v18268_v49  ;;  %v18564_v8 = vrot.slane %v289_v0, %v18268_v49  ;;  %v16889_v60 = vld [vmem:[#allocation7 + $0x2244] ss:$16 sps:$4 sm:$0xff]   ;;  %v16890_v0 = vld [vmem:[#allocation7 + $0x2020] ss:$16 sps:$4 sm:$0xff]  }
 0x3c4   :  { %12465 = vmatprep.subr.bf16.mxu1 %v16786_v9  ;;  %v16847_v9 = vld [vmem:[#allocation7 + $0x1d00] ss:$16 sps:$4 sm:$0xff]  }
 0x3c6   :  { %12425 = vmatpush1.bf16.msra.mxu0 %v16781_v44  ;;  %v16850_v44 = vld [vmem:[#allocation7 + $0x1f00] ss:$16 sps:$4 sm:$0xff]  }
 0x3c7   :  { %12466 = vmatpush1.bf16.msra.mxu1 %v16784_v37  ;;  %12426 = vmatprep.subr.bf16.mxu0 %v16789_v38  ;;  %v16856_v37 = vld [vmem:[#allocation7 + $0x20e4] ss:$16 sps:$4 sm:$0xff]  }
 0x3c8   :  { %12467 = vmatprep.subr.bf16.mxu1 %v16792_v31  ;;  %v16859_v38 = vld [vmem:[#allocation7 + $0x22e4] ss:$16 sps:$4 sm:$0xff]   ;;  %v16854_v31 = vld [vmem:[#allocation7 + $0x20e0] ss:$16 sps:$4 sm:$0xff]  }
 0x3ca   :  { %12427 = vmatpush1.bf16.msra.mxu0 %v16787_v1  ;;  %v16857_v1 = vld [vmem:[#allocation7 + $0x22e0] ss:$16 sps:$4 sm:$0xff]  }
 0x3cb   :  { %12468 = vmatpush1.bf16.msra.mxu1 %v16790_v21  ;;  %12428 = vmatprep.subr.bf16.mxu0 %v16795_v39  ;;  %v304_v21 = vcombine.high %v18561_v7, %v18561_v7  ;;  %v305_v39 = vcombine.high %v18564_v8, %v18564_v8 }
 0x3cc   :  { %12469 = vmatprep.subr.bf16.mxu1 %v16798_v46  ;;  %v18572_v46 = vpack.c.bf16 %v18537_v10, %v18537_v10 }
 0x3ce   :  { %12429 = vmatpush1.bf16.msra.mxu0 %v16793_v4  ;;  %v18576_v4 = vpack.c.bf16 %v18540_v24, %v18540_v24 }
 0x3cf   :  { %12470 = vmatpush1.bf16.msra.mxu1 %v16796_v50  ;;  %12430 = vmatprep.subr.bf16.mxu0 %v16801_v5  ;;  %v16862_v50 = vld [vmem:[#allocation7 + $0x20c4] ss:$16 sps:$4 sm:$0xff]  }
 0x3d0   :  { %12471 = vmatprep.subr.bf16.mxu1 %v16804_v62  ;;  %v16865_v5 = vld [vmem:[#allocation7 + $0x22c4] ss:$16 sps:$4 sm:$0xff]   ;;  %v16860_v62 = vld [vmem:[#allocation7 + $0x20c0] ss:$16 sps:$4 sm:$0xff]  }
 0x3d2   :  { %12431 = vmatpush1.bf16.msra.mxu0 %v16799_v14  ;;  %v16863_v14 = vld [vmem:[#allocation7 + $0x22c0] ss:$16 sps:$4 sm:$0xff]  }
 0x3d3   :  { %12472 = vmatpush1.bf16.msra.mxu1 %v16802_v15  ;;  %12432 = vmatprep.subr.bf16.mxu0 %v16807_v3  ;;  %v18578_v15 = vpack.c.bf16 %v304_v21, %v304_v21  ;;  %v18580_v3 = vpack.c.bf16 %v305_v39, %v305_v39  ;;  %v16913_v21 = vld [vmem:[#allocation7 + $0x23c4] ss:$16 sps:$4 sm:$0xff]   ;;  %v16908_v39 = vld [vmem:[#allocation7 + $0x21c0] ss:$16 sps:$4 sm:$0xff]  }
 0x3d4   :  { %12473 = vmatprep.subr.bf16.mxu1 %v16810_v16 }
 0x3d6   :  { %12433 = vmatpush2.bf16.msra.mxu0 %v16805_v17 }
 0x3d7   :  { %12474 = vmatpush2.bf16.msra.mxu1 %v16808_v36  ;;  %12434 = vmatprep.subr.bf16.mxu0 %v16813_v22  ;;  %v16868_v22 = vld [vmem:[#allocation7 + $0x20a4] ss:$16 sps:$4 sm:$0xff]  }
 0x3d8   :  { %12475 = vmatprep.subr.bf16.mxu1 %v16816_v23  ;;  %v16871_v23 = vld [vmem:[#allocation7 + $0x22a4] ss:$16 sps:$4 sm:$0xff]  }
 0x3da   :  { %12435 = vmatpush2.bf16.msra.mxu0 %v16811_v11 }
 0x3db   :  { %12476 = vmatpush2.bf16.msra.mxu1 %v16814_v32  ;;  %12436 = vmatprep.subr.bf16.mxu0 %v16819_v33 }
 0x3dc   :  { %12477 = vmatprep.subr.bf16.mxu1 %v16822_v27 }
 0x3de   :  { %12437 = vmatpush2.bf16.msra.mxu0 %v16817_v28 }
 0x3df   :  { %12478 = vmatpush2.bf16.msra.mxu1 %v16820_v18  ;;  %12438 = vmatprep.subr.bf16.mxu0 %v16825_v25  ;;  %v16869_v18 = vld [vmem:[#allocation7 + $0x22a0] ss:$16 sps:$4 sm:$0xff]  }
 0x3e0   :  { %12479 = vmatprep.subr.bf16.mxu1 %v16828_v40 }
 0x3e2   :  { %12439 = vmatpush2.bf16.msra.mxu0 %v16823_v48  ;;  %v16874_v48 = vld [vmem:[#allocation7 + $0x2084] ss:$16 sps:$4 sm:$0xff]  }
 0x3e3   :  { %12480 = vmatpush2.bf16.msra.mxu1 %v16826_v42  ;;  %12440 = vmatprep.subr.bf16.mxu0 %v16831_v47  ;;  %v16877_v42 = vld [vmem:[#allocation7 + $0x2284] ss:$16 sps:$4 sm:$0xff]   ;;  %v16875_v47 = vld [vmem:[#allocation7 + $0x2280] ss:$16 sps:$4 sm:$0xff]  }
 0x3e4   :  { %12481 = vmatprep.subr.bf16.mxu1 %v16834_v59  ;;  %v16880_v59 = vld [vmem:[#allocation7 + $0x2064] ss:$16 sps:$4 sm:$0xff]  }
 0x3e6   :  { %12441 = vmatpush2.bf16.msra.mxu0 %v16829_v54  ;;  %v16883_v54 = vld [vmem:[#allocation7 + $0x2264] ss:$16 sps:$4 sm:$0xff]  }
 0x3e7   :  { %12482 = vmatpush2.bf16.msra.mxu1 %v16832_v55  ;;  %12442 = vmatprep.subr.bf16.mxu0 %v16837_v51  ;;  %v16878_v55 = vld [vmem:[#allocation7 + $0x2060] ss:$16 sps:$4 sm:$0xff]  }
 0x3e8   :  { %12483 = vmatprep.subr.bf16.mxu1 %v16840_v56  ;;  %v16881_v51 = vld [vmem:[#allocation7 + $0x2260] ss:$16 sps:$4 sm:$0xff]   ;;  %v16886_v56 = vld [vmem:[#allocation7 + $0x2044] ss:$16 sps:$4 sm:$0xff]  }
 0x3ea   :  { %12443 = vmatpush2.bf16.msra.mxu0 %v16835_v13  ;;  %v16884_v13 = vld [vmem:[#allocation7 + $0x2040] ss:$16 sps:$4 sm:$0xff]  }
 0x3eb   :  { %12484 = vmatpush2.bf16.msra.mxu1 %v16838_v61  ;;  %12444 = vmatprep.subr.bf16.mxu0 %v16843_v45  ;;  %v16887_v61 = vld [vmem:[#allocation7 + $0x2240] ss:$16 sps:$4 sm:$0xff]   ;;  %v16892_v45 = vld [vmem:[#allocation7 + $0x2024] ss:$16 sps:$4 sm:$0xff]  }
 0x3ec   :  { %12485 = vmatprep.subr.bf16.mxu1 %v16846_v12  ;;  %v16895_v12 = vld [vmem:[#allocation7 + $0x2224] ss:$16 sps:$4 sm:$0xff]  }
 0x3ee   :  { %12445 = vmatpush2.bf16.msra.mxu0 %v16841_v2  ;;  %v16893_v2 = vld [vmem:[#allocation7 + $0x2220] ss:$16 sps:$4 sm:$0xff]  }
 0x3ef   :  { %12486 = vmatpush2.bf16.msra.mxu1 %v16844_v63  ;;  %12446 = vmatprep.subr.bf16.mxu0 %v16849_v6  ;;  %v16898_v63 = vld [vmem:[#allocation7 + $0x2004] ss:$16 sps:$4 sm:$0xff]  }
 0x3f0   :  { %12487 = vmatprep.subr.bf16.mxu1 %v16852_v41  ;;  %v16901_v6 = vld [vmem:[#allocation7 + $0x2204] ss:$16 sps:$4 sm:$0xff]   ;;  %v16896_v41 = vld [vmem:[#allocation7 + $0x2000] ss:$16 sps:$4 sm:$0xff]  }
 0x3f2   :  { %12447 = vmatpush2.bf16.msra.mxu0 %v16847_v9  ;;  %v16899_v9 = vld [vmem:[#allocation7 + $0x2200] ss:$16 sps:$4 sm:$0xff]  }
 0x3f3   :  { %12488 = vmatpush2.bf16.msra.mxu1 %v16850_v44  ;;  %12498 = vmatprep.subr.bf16.mxu0 %v16856_v37  ;;  %v16904_v44 = vld [vmem:[#allocation7 + $0x21e4] ss:$16 sps:$4 sm:$0xff]  }
 0x3f4   :  { %12539 = vmatprep.subr.bf16.mxu1 %v16859_v38  ;;  %v16907_v37 = vld [vmem:[#allocation7 + $0x23e4] ss:$16 sps:$4 sm:$0xff]   ;;  %v16902_v38 = vld [vmem:[#allocation7 + $0x21e0] ss:$16 sps:$4 sm:$0xff]  }
 0x3f5   :  { %v7678_v16 = vpop.f32.mrf.mxu0  ;;  %12449 = vmatmul.mubr.bf16.vlgmr.msra.gmra.mxu0 %v18572_v46 }
 0x3f6   :  { %v7719_v17 = vpop.f32.mrf.mxu1  ;;  %12490 = vmatmul.mubr.bf16.vlgmr.msra.gmra.mxu1 %v18576_v4  ;;  %v7679_v10 = vadd.f32 %v7678_v16, %v18553_v19  ;;  %12499 = vmatpush1.bf16.msra.mxu0 %v16854_v31  ;;  %v16866_v19 = vld [vmem:[#allocation7 + $0x20a0] ss:$16 sps:$4 sm:$0xff]  }
 0x3f7   :  { %12540 = vmatpush1.bf16.msra.mxu1 %v16857_v1  ;;  %v7680_v24 = vpop.f32.mrf.mxu0  ;;  %12500 = vmatprep.subr.bf16.mxu0 %v16862_v50  ;;  %v16905_v31 = vld [vmem:[#allocation7 + $0x23e0] ss:$16 sps:$4 sm:$0xff]   ;;  %v16910_v1 = vld [vmem:[#allocation7 + $0x21c4] ss:$16 sps:$4 sm:$0xff]  }
 0x3f8   :  { %v7721_v36 = vpop.f32.mrf.mxu1  ;;  %12541 = vmatprep.subr.bf16.mxu1 %v16865_v5  ;;  %v18585_v11 = vadd.f32 %v7719_v17, %v7679_v10  ;;  %v7681_v32 = vadd.f32 %v7680_v24, %v18558_v58  ;;  %12530 = vmatprep.mubr.bf16.mxu0 %v18578_v15  ;;  %v16872_v58 = vld [vmem:[#allocation7 + $0x2080] ss:$16 sps:$4 sm:$0xff]   ;;  %v16916_v5 = vld [vmem:[#allocation7 + $0x21a4] ss:$16 sps:$4 sm:$0xff]  }
 0x3f9   :  { %12571 = vmatprep.mubr.bf16.mxu1 %v18580_v3  ;;  %v7682_v33 = vpop.f32.mrf.mxu0  ;;  %v16911_v50 = vld [vmem:[#allocation7 + $0x23c0] ss:$16 sps:$4 sm:$0xff]   ;;  %v16922_v17 = vld [vmem:[#allocation7 + $0x2184] ss:$16 sps:$4 sm:$0xff]  }
 0x3fa   :  { %v7723_v27 = vpop.f32.mrf.mxu1  ;;  %v18590_v28 = vadd.f32 %v7721_v36, %v7681_v32  ;;  %12501 = vmatpush1.bf16.msra.mxu0 %v16860_v62  ;;  %v16919_v62 = vld [vmem:[#allocation7 + $0x23a4] ss:$16 sps:$4 sm:$0xff]   ;;  %v16917_v16 = vld [vmem:[#allocation7 + $0x23a0] ss:$16 sps:$4 sm:$0xff]  }
 0x3fb   :  { %12542 = vmatpush1.bf16.msra.mxu1 %v16863_v14  ;;  %v7683_v25 = vpop.f32.mrf.mxu0  ;;  %12502 = vmatprep.subr.bf16.mxu0 %v16868_v22  ;;  %v16914_v14 = vld [vmem:[#allocation7 + $0x21a0] ss:$16 sps:$4 sm:$0xff]   ;;  %v16925_v10 = vld [vmem:[#allocation7 + $0x2384] ss:$16 sps:$4 sm:$0xff]  }
 0x3fc   :  { %v7724_v40 = vpop.f32.mrf.mxu1  ;;  %12543 = vmatprep.subr.bf16.mxu1 %v16871_v23  ;;  %v16920_v24 = vld [vmem:[#allocation7 + $0x2180] ss:$16 sps:$4 sm:$0xff]   ;;  %v16928_v22 = vld [vmem:[#allocation7 + $0x2164] ss:$16 sps:$4 sm:$0xff]  }
 0x3fd   :  { %v16923_v36 = vld [vmem:[#allocation7 + $0x2380] ss:$16 sps:$4 sm:$0xff]   ;;  %v16931_v23 = vld [vmem:[#allocation7 + $0x2364] ss:$16 sps:$4 sm:$0xff]  }
 0x3fe   :  { %12503 = vmatpush1.bf16.msra.mxu0 %v16866_v19  ;;  %v16926_v32 = vld [vmem:[#allocation7 + $0x2160] ss:$16 sps:$4 sm:$0xff]   ;;  %v16934_v27 = vld [vmem:[#allocation7 + $0x2144] ss:$16 sps:$4 sm:$0xff]  }
 0x3ff   :  { %12544 = vmatpush1.bf16.msra.mxu1 %v16869_v18  ;;  %12504 = vmatprep.subr.bf16.mxu0 %v16874_v48  ;;  %v16929_v33 = vld [vmem:[#allocation7 + $0x2360] ss:$16 sps:$4 sm:$0xff]   ;;  %v16937_v19 = vld [vmem:[#allocation7 + $0x2344] ss:$16 sps:$4 sm:$0xff]   ;;  %v260_v18 = vld [vmem:[#allocation5 + $0x10] sm:$0xff] }
 0x400   :  { %12545 = vmatprep.subr.bf16.mxu1 %v16877_v42  ;;  %v16932_v25 = vld [vmem:[#allocation7 + $0x2140] ss:$16 sps:$4 sm:$0xff]   ;;  %v16940_v48 = vld [vmem:[#allocation7 + $0x2124] ss:$16 sps:$4 sm:$0xff]  }
 0x401   :  { %v16935_v40 = vld [vmem:[#allocation7 + $0x2340] ss:$16 sps:$4 sm:$0xff]   ;;  %v16943_v42 = vld [vmem:[#allocation7 + $0x2324] ss:$16 sps:$4 sm:$0xff]  }
 0x402   :  { %12505 = vmatpush1.bf16.msra.mxu0 %v16872_v58  ;;  %v306_v58 = vcombine.high %v260_v18, %v260_v18 }
 0x403   :  { %12546 = vmatpush1.bf16.msra.mxu1 %v16875_v47  ;;  %12506 = vmatprep.subr.bf16.mxu0 %v16880_v59  ;;  %v16938_v47 = vld [vmem:[#allocation7 + $0x2120] ss:$16 sps:$4 sm:$0xff]  }
 0x404   :  { %12547 = vmatprep.subr.bf16.mxu1 %v16883_v54  ;;  %v16941_v59 = vld [vmem:[#allocation7 + $0x2320] ss:$16 sps:$4 sm:$0xff]   ;;  %v16946_v54 = vld [vmem:[#allocation7 + $0x2104] ss:$16 sps:$4 sm:$0xff]  }
 0x406   :  { %12507 = vmatpush1.bf16.msra.mxu0 %v16878_v55  ;;  %v16949_v55 = vld [vmem:[#allocation7 + $0x2304] ss:$16 sps:$4 sm:$0xff]  }
 0x407   :  { %12548 = vmatpush1.bf16.msra.mxu1 %v16881_v51  ;;  %12508 = vmatprep.subr.bf16.mxu0 %v16886_v56  ;;  %v18593_v51 = vrot.slane %v260_v18, %v18268_v49  ;;  %v18596_v56 = vrot.slane %v306_v58, %v18268_v49  ;;  %v16975_v18 = vld [vmem:[#allocation7 + $0x2460] ss:$16 sps:$4 sm:$0xff]  }
 0x408   :  { %12549 = vmatprep.subr.bf16.mxu1 %v16889_v60  ;;  %v16944_v60 = vld [vmem:[#allocation7 + $0x2100] ss:$16 sps:$4 sm:$0xff]  }
 0x409   :  { %v16984_v58 = vld [vmem:[#allocation7 + $0x2640] ss:$16 sps:$4 sm:$0xff]  }
 0x40a   :  { %12509 = vmatpush1.bf16.msra.mxu0 %v16884_v13  ;;  %v16947_v13 = vld [vmem:[#allocation7 + $0x2300] ss:$16 sps:$4 sm:$0xff]  }
 0x40b   :  { %12550 = vmatpush1.bf16.msra.mxu1 %v16887_v61  ;;  %12510 = vmatprep.subr.bf16.mxu0 %v16892_v45  ;;  %v16953_v61 = vld [vmem:[#allocation7 + $0x24e4] ss:$16 sps:$4 sm:$0xff]  }
 0x40c   :  { %12551 = vmatprep.subr.bf16.mxu1 %v16895_v12  ;;  %v16956_v45 = vld [vmem:[#allocation7 + $0x26e4] ss:$16 sps:$4 sm:$0xff]   ;;  %v321_v12 = vcombine.high %v18593_v51, %v18593_v51 }
 0x40e   :  { %12511 = vmatpush1.bf16.msra.mxu0 %v16890_v0  ;;  %v322_v0 = vcombine.high %v18596_v56, %v18596_v56 }
 0x40f   :  { %12552 = vmatpush1.bf16.msra.mxu1 %v16893_v2  ;;  %12512 = vmatprep.subr.bf16.mxu0 %v16898_v63  ;;  %v18604_v2 = vpack.c.bf16 %v18561_v7, %v18561_v7  ;;  %v18608_v63 = vpack.c.bf16 %v18564_v8, %v18564_v8  ;;  %v16957_v8 = vld [vmem:[#allocation7 + $0x24c0] ss:$16 sps:$4 sm:$0xff]  }
 0x410   :  { %12553 = vmatprep.subr.bf16.mxu1 %v16901_v6  ;;  %v16951_v6 = vld [vmem:[#allocation7 + $0x24e0] ss:$16 sps:$4 sm:$0xff]  }
 0x412   :  { %12513 = vmatpush1.bf16.msra.mxu0 %v16896_v41  ;;  %v16954_v41 = vld [vmem:[#allocation7 + $0x26e0] ss:$16 sps:$4 sm:$0xff]  }
 0x413   :  { %12554 = vmatpush1.bf16.msra.mxu1 %v16899_v9  ;;  %12514 = vmatprep.subr.bf16.mxu0 %v16904_v44  ;;  %v16959_v9 = vld [vmem:[#allocation7 + $0x24c4] ss:$16 sps:$4 sm:$0xff]  }
 0x414   :  { %12555 = vmatprep.subr.bf16.mxu1 %v16907_v37  ;;  %v16962_v44 = vld [vmem:[#allocation7 + $0x26c4] ss:$16 sps:$4 sm:$0xff]   ;;  %v18610_v37 = vpack.c.bf16 %v321_v12, %v321_v12 }
 0x415   :  { %v17001_v12 = vld [vmem:[#allocation7 + $0x25e4] ss:$16 sps:$4 sm:$0xff]  }
 0x416   :  { %12515 = vmatpush2.bf16.msra.mxu0 %v16902_v38  ;;  %v18612_v38 = vpack.c.bf16 %v322_v0, %v322_v0  ;;  %v17004_v0 = vld [vmem:[#allocation7 + $0x27e4] ss:$16 sps:$4 sm:$0xff]  }
 0x417   :  { %12556 = vmatpush2.bf16.msra.mxu1 %v16905_v31  ;;  %12516 = vmatprep.subr.bf16.mxu0 %v16910_v1 }
 0x418   :  { %12557 = vmatprep.subr.bf16.mxu1 %v16913_v21  ;;  %v16960_v21 = vld [vmem:[#allocation7 + $0x26c0] ss:$16 sps:$4 sm:$0xff]  }
 0x41a   :  { %12517 = vmatpush2.bf16.msra.mxu0 %v16908_v39 }
 0x41b   :  { %12558 = vmatpush2.bf16.msra.mxu1 %v16911_v50  ;;  %12518 = vmatprep.subr.bf16.mxu0 %v16916_v5  ;;  %v16965_v5 = vld [vmem:[#allocation7 + $0x24a4] ss:$16 sps:$4 sm:$0xff]  }
 0x41c   :  { %12559 = vmatprep.subr.bf16.mxu1 %v16919_v62  ;;  %v16968_v62 = vld [vmem:[#allocation7 + $0x26a4] ss:$16 sps:$4 sm:$0xff]  }
 0x41e   :  { %12519 = vmatpush2.bf16.msra.mxu0 %v16914_v14 }
 0x41f   :  { %12560 = vmatpush2.bf16.msra.mxu1 %v16917_v16  ;;  %12520 = vmatprep.subr.bf16.mxu0 %v16922_v17  ;;  %v16963_v17 = vld [vmem:[#allocation7 + $0x24a0] ss:$16 sps:$4 sm:$0xff]  }
 0x420   :  { %12561 = vmatprep.subr.bf16.mxu1 %v16925_v10  ;;  %v16966_v10 = vld [vmem:[#allocation7 + $0x26a0] ss:$16 sps:$4 sm:$0xff]  }
 0x422   :  { %12521 = vmatpush2.bf16.msra.mxu0 %v16920_v24 }
 0x423   :  { %12562 = vmatpush2.bf16.msra.mxu1 %v16923_v36  ;;  %12522 = vmatprep.subr.bf16.mxu0 %v16928_v22  ;;  %v16971_v22 = vld [vmem:[#allocation7 + $0x2484] ss:$16 sps:$4 sm:$0xff]  }
 0x424   :  { %12563 = vmatprep.subr.bf16.mxu1 %v16931_v23  ;;  %v16974_v23 = vld [vmem:[#allocation7 + $0x2684] ss:$16 sps:$4 sm:$0xff]  }
 0x426   :  { %12523 = vmatpush2.bf16.msra.mxu0 %v16926_v32  ;;  %v16969_v32 = vld [vmem:[#allocation7 + $0x2480] ss:$16 sps:$4 sm:$0xff]  }
 0x427   :  { %12564 = vmatpush2.bf16.msra.mxu1 %v16929_v33  ;;  %12524 = vmatprep.subr.bf16.mxu0 %v16934_v27  ;;  %v16972_v33 = vld [vmem:[#allocation7 + $0x2680] ss:$16 sps:$4 sm:$0xff]   ;;  %v16977_v27 = vld [vmem:[#allocation7 + $0x2464] ss:$16 sps:$4 sm:$0xff]  }
 0x428   :  { %12565 = vmatprep.subr.bf16.mxu1 %v16937_v19  ;;  %v16980_v19 = vld [vmem:[#allocation7 + $0x2664] ss:$16 sps:$4 sm:$0xff]  }
 0x42a   :  { %12525 = vmatpush2.bf16.msra.mxu0 %v16932_v25  ;;  %v16978_v25 = vld [vmem:[#allocation7 + $0x2660] ss:$16 sps:$4 sm:$0xff]  }
 0x42b   :  { %12566 = vmatpush2.bf16.msra.mxu1 %v16935_v40  ;;  %12526 = vmatprep.subr.bf16.mxu0 %v16940_v48  ;;  %v16983_v40 = vld [vmem:[#allocation7 + $0x2444] ss:$16 sps:$4 sm:$0xff]  }
 0x42c   :  { %12567 = vmatprep.subr.bf16.mxu1 %v16943_v42  ;;  %v16986_v48 = vld [vmem:[#allocation7 + $0x2644] ss:$16 sps:$4 sm:$0xff]   ;;  %v16981_v42 = vld [vmem:[#allocation7 + $0x2440] ss:$16 sps:$4 sm:$0xff]  }
 0x42e   :  { %12527 = vmatpush2.bf16.msra.mxu0 %v16938_v47  ;;  %v16989_v47 = vld [vmem:[#allocation7 + $0x2424] ss:$16 sps:$4 sm:$0xff]  }
 0x42f   :  { %12568 = vmatpush2.bf16.msra.mxu1 %v16941_v59  ;;  %12528 = vmatprep.subr.bf16.mxu0 %v16946_v54  ;;  %v16992_v59 = vld [vmem:[#allocation7 + $0x2624] ss:$16 sps:$4 sm:$0xff]   ;;  %v16987_v54 = vld [vmem:[#allocation7 + $0x2420] ss:$16 sps:$4 sm:$0xff]  }
 0x430   :  { %12569 = vmatprep.subr.bf16.mxu1 %v16949_v55  ;;  %v16990_v55 = vld [vmem:[#allocation7 + $0x2620] ss:$16 sps:$4 sm:$0xff]  }
 0x432   :  { %12529 = vmatpush2.bf16.msra.mxu0 %v16944_v60  ;;  %v16995_v60 = vld [vmem:[#allocation7 + $0x2404] ss:$16 sps:$4 sm:$0xff]  }
 0x433   :  { %12570 = vmatpush2.bf16.msra.mxu1 %v16947_v13  ;;  %12580 = vmatprep.subr.bf16.mxu0 %v16953_v61  ;;  %v16998_v13 = vld [vmem:[#allocation7 + $0x2604] ss:$16 sps:$4 sm:$0xff]   ;;  %v16993_v61 = vld [vmem:[#allocation7 + $0x2400] ss:$16 sps:$4 sm:$0xff]  }
 0x434   :  { %12621 = vmatprep.subr.bf16.mxu1 %v16956_v45  ;;  %v16996_v45 = vld [vmem:[#allocation7 + $0x2600] ss:$16 sps:$4 sm:$0xff]  }
 0x435   :  { %v7760_v31 = vpop.f32.mrf.mxu0  ;;  %12531 = vmatmul.mubr.bf16.vlgmr.msra.gmra.mxu0 %v18604_v2 }
 0x436   :  { %v7801_v1 = vpop.f32.mrf.mxu1  ;;  %12572 = vmatmul.mubr.bf16.vlgmr.msra.gmra.mxu1 %v18608_v63  ;;  %v7761_v7 = vadd.f32 %v7760_v31, %v18585_v11  ;;  %12581 = vmatpush1.bf16.msra.mxu0 %v16951_v6  ;;  %v16999_v6 = vld [vmem:[#allocation7 + $0x25e0] ss:$16 sps:$4 sm:$0xff]  }
 0x437   :  { %12622 = vmatpush1.bf16.msra.mxu1 %v16954_v41  ;;  %v18617_v39 = vpop.f32.mrf.mxu0  ;;  %12582 = vmatprep.subr.bf16.mxu0 %v16959_v9  ;;  %v17002_v41 = vld [vmem:[#allocation7 + $0x27e0] ss:$16 sps:$4 sm:$0xff]   ;;  %v17007_v9 = vld [vmem:[#allocation7 + $0x25c4] ss:$16 sps:$4 sm:$0xff]  }
 0x438   :  { %v18619_v50 = vpop.f32.mrf.mxu1  ;;  %12623 = vmatprep.subr.bf16.mxu1 %v16962_v44  ;;  %v18621_v14 = vadd.f32 %v7801_v1, %v7761_v7  ;;  %12612 = vmatprep.mubr.bf16.mxu0 %v18610_v37  ;;  %v17010_v44 = vld [vmem:[#allocation7 + $0x27c4] ss:$16 sps:$4 sm:$0xff]   ;;  %v17005_v31 = vld [vmem:[#allocation7 + $0x25c0] ss:$16 sps:$4 sm:$0xff]  }
 0x439   :  { %12653 = vmatprep.mubr.bf16.mxu1 %v18612_v38  ;;  %v7764_v16 = vpop.f32.mrf.mxu0  ;;  %v17008_v1 = vld [vmem:[#allocation7 + $0x27c0] ss:$16 sps:$4 sm:$0xff]   ;;  %v17013_v7 = vld [vmem:[#allocation7 + $0x25a4] ss:$16 sps:$4 sm:$0xff]  }
 0x43a   :  { %v7805_v11 = vpop.f32.mrf.mxu1  ;;  %12583 = vmatpush1.bf16.msra.mxu0 %v16957_v8  ;;  %v17016_v8 = vld [vmem:[#allocation7 + $0x27a4] ss:$16 sps:$4 sm:$0xff]  }
 0x43b   :  { %12624 = vmatpush1.bf16.msra.mxu1 %v16960_v21  ;;  %v7765_v24 = vpop.f32.mrf.mxu0  ;;  %12584 = vmatprep.subr.bf16.mxu0 %v16965_v5  ;;  %v17011_v21 = vld [vmem:[#allocation7 + $0x25a0] ss:$16 sps:$4 sm:$0xff]   ;;  %v17022_v16 = vld [vmem:[#allocation7 + $0x2784] ss:$16 sps:$4 sm:$0xff]  }
 0x43c   :  { %v7806_v36 = vpop.f32.mrf.mxu1  ;;  %12625 = vmatprep.subr.bf16.mxu1 %v16968_v62  ;;  %v17014_v5 = vld [vmem:[#allocation7 + $0x27a0] ss:$16 sps:$4 sm:$0xff]   ;;  %v17019_v62 = vld [vmem:[#allocation7 + $0x2584] ss:$16 sps:$4 sm:$0xff]  }
 0x43d   :  { %v17017_v11 = vld [vmem:[#allocation7 + $0x2580] ss:$16 sps:$4 sm:$0xff]   ;;  %v17028_v24 = vld [vmem:[#allocation7 + $0x2764] ss:$16 sps:$4 sm:$0xff]  }
 0x43e   :  { %12585 = vmatpush1.bf16.msra.mxu0 %v16963_v17  ;;  %v17020_v17 = vld [vmem:[#allocation7 + $0x2780] ss:$16 sps:$4 sm:$0xff]  }
 0x43f   :  { %12626 = vmatpush1.bf16.msra.mxu1 %v16966_v10  ;;  %12586 = vmatprep.subr.bf16.mxu0 %v16971_v22  ;;  %v17025_v10 = vld [vmem:[#allocation7 + $0x2564] ss:$16 sps:$4 sm:$0xff]   ;;  %v17023_v36 = vld [vmem:[#allocation7 + $0x2560] ss:$16 sps:$4 sm:$0xff]  }
 0x440   :  { %12627 = vmatprep.subr.bf16.mxu1 %v16974_v23  ;;  %v17026_v22 = vld [vmem:[#allocation7 + $0x2760] ss:$16 sps:$4 sm:$0xff]   ;;  %v17031_v23 = vld [vmem:[#allocation7 + $0x2544] ss:$16 sps:$4 sm:$0xff]  }
 0x442   :  { %12587 = vmatpush1.bf16.msra.mxu0 %v16969_v32  ;;  %v17034_v32 = vld [vmem:[#allocation7 + $0x2744] ss:$16 sps:$4 sm:$0xff]  }
 0x443   :  { %12628 = vmatpush1.bf16.msra.mxu1 %v16972_v33  ;;  %12588 = vmatprep.subr.bf16.mxu0 %v16977_v27  ;;  %v261_v33 = vld [vmem:[#allocation5 + $0x18] sm:$0xff] }
 0x444   :  { %12629 = vmatprep.subr.bf16.mxu1 %v16980_v19  ;;  %v17029_v27 = vld [vmem:[#allocation7 + $0x2540] ss:$16 sps:$4 sm:$0xff]  }
 0x445   :  { %v17032_v19 = vld [vmem:[#allocation7 + $0x2740] ss:$16 sps:$4 sm:$0xff]  }
 0x446   :  { %12589 = vmatpush1.bf16.msra.mxu0 %v16975_v18  ;;  %v17037_v18 = vld [vmem:[#allocation7 + $0x2524] ss:$16 sps:$4 sm:$0xff]  }
 0x447   :  { %12630 = vmatpush1.bf16.msra.mxu1 %v16978_v25  ;;  %12590 = vmatprep.subr.bf16.mxu0 %v16983_v40  ;;  %v17040_v25 = vld [vmem:[#allocation7 + $0x2724] ss:$16 sps:$4 sm:$0xff]   ;;  %v323_v40 = vcombine.high %v261_v33, %v261_v33 }
 0x448   :  { %12631 = vmatprep.subr.bf16.mxu1 %v16986_v48  ;;  %v17035_v48 = vld [vmem:[#allocation7 + $0x2520] ss:$16 sps:$4 sm:$0xff]  }
 0x44a   :  { %12591 = vmatpush1.bf16.msra.mxu0 %v16981_v42  ;;  %v17038_v42 = vld [vmem:[#allocation7 + $0x2720] ss:$16 sps:$4 sm:$0xff]  }
 0x44b   :  { %12632 = vmatpush1.bf16.msra.mxu1 %v16984_v58  ;;  %12592 = vmatprep.subr.bf16.mxu0 %v16989_v47  ;;  %v17043_v58 = vld [vmem:[#allocation7 + $0x2504] ss:$16 sps:$4 sm:$0xff]  }
 0x44c   :  { %12633 = vmatprep.subr.bf16.mxu1 %v16992_v59  ;;  %v17046_v47 = vld [vmem:[#allocation7 + $0x2704] ss:$16 sps:$4 sm:$0xff]   ;;  %v18626_v59 = vrot.slane %v261_v33, %v18268_v49 }
 0x44e   :  { %12593 = vmatpush1.bf16.msra.mxu0 %v16987_v54  ;;  %v18629_v54 = vrot.slane %v323_v40, %v18268_v49 }
 0x44f   :  { %12634 = vmatpush1.bf16.msra.mxu1 %v16990_v55  ;;  %12594 = vmatprep.subr.bf16.mxu0 %v16995_v60  ;;  %v17041_v55 = vld [vmem:[#allocation7 + $0x2500] ss:$16 sps:$4 sm:$0xff]  }
 0x450   :  { %12635 = vmatprep.subr.bf16.mxu1 %v16998_v13  ;;  %v17044_v60 = vld [vmem:[#allocation7 + $0x2700] ss:$16 sps:$4 sm:$0xff]   ;;  %v17050_v13 = vld [vmem:[#allocation7 + $0x28e4] ss:$16 sps:$4 sm:$0xff]  }
 0x452   :  { %12595 = vmatpush1.bf16.msra.mxu0 %v16993_v61  ;;  %v17053_v61 = vld [vmem:[#allocation7 + $0x2ae4] ss:$16 sps:$4 sm:$0xff]  }
 0x453   :  { %12636 = vmatpush1.bf16.msra.mxu1 %v16996_v45  ;;  %12596 = vmatprep.subr.bf16.mxu0 %v17001_v12  ;;  %v338_v45 = vcombine.high %v18626_v59, %v18626_v59  ;;  %v339_v12 = vcombine.high %v18629_v54, %v18629_v54 }
 0x454   :  { %12637 = vmatprep.subr.bf16.mxu1 %v17004_v0  ;;  %v18637_v0 = vpack.c.bf16 %v18593_v51, %v18593_v51 }
 0x456   :  { %12597 = vmatpush2.bf16.msra.mxu0 %v16999_v6  ;;  %v18641_v6 = vpack.c.bf16 %v18596_v56, %v18596_v56 }
 0x457   :  { %12638 = vmatpush2.bf16.msra.mxu1 %v17002_v41  ;;  %12598 = vmatprep.subr.bf16.mxu0 %v17007_v9  ;;  %v7763_v41 = vadd.f32 %v18617_v39, %v18590_v28  ;;  %v17048_v9 = vld [vmem:[#allocation7 + $0x28e0] ss:$16 sps:$4 sm:$0xff]  }
 0x458   :  { %12639 = vmatprep.subr.bf16.mxu1 %v17010_v44  ;;  %v17051_v44 = vld [vmem:[#allocation7 + $0x2ae0] ss:$16 sps:$4 sm:$0xff]  }
 0x459   :  { %v7804_v28 = vadd.f32 %v18619_v50, %v7763_v41  ;;  %v17054_v39 = vld [vmem:[#allocation7 + $0x28c0] ss:$16 sps:$4 sm:$0xff]  }
 0x45a   :  { %12599 = vmatpush2.bf16.msra.mxu0 %v17005_v31  ;;  %v17056_v31 = vld [vmem:[#allocation7 + $0x28c4] ss:$16 sps:$4 sm:$0xff]   ;;  %v17084_v41 = vld [vmem:[#allocation7 + $0x2820] ss:$16 sps:$4 sm:$0xff]  }
 0x45b   :  { %12640 = vmatpush2.bf16.msra.mxu1 %v17008_v1  ;;  %12600 = vmatprep.subr.bf16.mxu0 %v17013_v7  ;;  %v17059_v1 = vld [vmem:[#allocation7 + $0x2ac4] ss:$16 sps:$4 sm:$0xff]   ;;  %v18645_v7 = vpack.c.bf16 %v338_v45, %v338_v45 }
 0x45c   :  { %12641 = vmatprep.subr.bf16.mxu1 %v17016_v8  ;;  %v18647_v8 = vpack.c.bf16 %v339_v12, %v339_v12  ;;  %v17086_v45 = vld [vmem:[#allocation7 + $0x2824] ss:$16 sps:$4 sm:$0xff]  }
 0x45d   :  { %v17089_v12 = vld [vmem:[#allocation7 + $0x2a24] ss:$16 sps:$4 sm:$0xff]  }
 0x45e   :  { %12601 = vmatpush2.bf16.msra.mxu0 %v17011_v21 }
 0x45f   :  { %12642 = vmatpush2.bf16.msra.mxu1 %v17014_v5  ;;  %12602 = vmatprep.subr.bf16.mxu0 %v17019_v62  ;;  %v17057_v5 = vld [vmem:[#allocation7 + $0x2ac0] ss:$16 sps:$4 sm:$0xff]  }
 0x460   :  { %12643 = vmatprep.subr.bf16.mxu1 %v17022_v16 }
 0x462   :  { %12603 = vmatpush2.bf16.msra.mxu0 %v17017_v11  ;;  %v17062_v11 = vld [vmem:[#allocation7 + $0x28a4] ss:$16 sps:$4 sm:$0xff]  }
 0x463   :  { %12644 = vmatpush2.bf16.msra.mxu1 %v17020_v17  ;;  %12604 = vmatprep.subr.bf16.mxu0 %v17025_v10  ;;  %v17065_v17 = vld [vmem:[#allocation7 + $0x2aa4] ss:$16 sps:$4 sm:$0xff]  }
 0x464   :  { %12645 = vmatprep.subr.bf16.mxu1 %v17028_v24 }
 0x466   :  { %12605 = vmatpush2.bf16.msra.mxu0 %v17023_v36 }
 0x467   :  { %12646 = vmatpush2.bf16.msra.mxu1 %v17026_v22  ;;  %12606 = vmatprep.subr.bf16.mxu0 %v17031_v23  ;;  %v17063_v23 = vld [vmem:[#allocation7 + $0x2aa0] ss:$16 sps:$4 sm:$0xff]  }
 0x468   :  { %12647 = vmatprep.subr.bf16.mxu1 %v17034_v32 }
 0x46a   :  { %12607 = vmatpush2.bf16.msra.mxu0 %v17029_v27  ;;  %v17068_v27 = vld [vmem:[#allocation7 + $0x2884] ss:$16 sps:$4 sm:$0xff]  }
 0x46b   :  { %12648 = vmatpush2.bf16.msra.mxu1 %v17032_v19  ;;  %12608 = vmatprep.subr.bf16.mxu0 %v17037_v18  ;;  %v17071_v19 = vld [vmem:[#allocation7 + $0x2a84] ss:$16 sps:$4 sm:$0xff]  }
 0x46c   :  { %12649 = vmatprep.subr.bf16.mxu1 %v17040_v25  ;;  %v7902_v25 = vrot.slane %v7894_v26, %v18268_v49  ;;  %v17078_v26 = vld [vmem:[#allocation7 + $0x2840] ss:$16 sps:$4 sm:$0xff]  }
 0x46e   :  { %12609 = vmatpush2.bf16.msra.mxu0 %v17035_v48  ;;  %v17066_v48 = vld [vmem:[#allocation7 + $0x2880] ss:$16 sps:$4 sm:$0xff]  }
 0x46f   :  { %12650 = vmatpush2.bf16.msra.mxu1 %v17038_v42  ;;  %12610 = vmatprep.subr.bf16.mxu0 %v17043_v58  ;;  %v17069_v42 = vld [vmem:[#allocation7 + $0x2a80] ss:$16 sps:$4 sm:$0xff]   ;;  %v17074_v58 = vld [vmem:[#allocation7 + $0x2864] ss:$16 sps:$4 sm:$0xff]  }
 0x470   :  { %12651 = vmatprep.subr.bf16.mxu1 %v17046_v47  ;;  %v17077_v47 = vld [vmem:[#allocation7 + $0x2a64] ss:$16 sps:$4 sm:$0xff]  }
 0x472   :  { %12611 = vmatpush2.bf16.msra.mxu0 %v17041_v55 }
 0x473   :  { %12652 = vmatpush2.bf16.msra.mxu1 %v17044_v60  ;;  %12662 = vmatprep.subr.bf16.mxu0 %v17050_v13  ;;  %v17072_v60 = vld [vmem:[#allocation7 + $0x2860] ss:$16 sps:$4 sm:$0xff]  }
 0x474   :  { %12703 = vmatprep.subr.bf16.mxu1 %v17053_v61  ;;  %v17075_v13 = vld [vmem:[#allocation7 + $0x2a60] ss:$16 sps:$4 sm:$0xff]  }
 0x475   :  { %v7842_v51 = vpop.f32.mrf.mxu0  ;;  %12613 = vmatmul.mubr.bf16.vlgmr.msra.gmra.mxu0 %v18637_v0  ;;  %v17081_v61 = vld [vmem:[#allocation7 + $0x2a40] ss:$16 sps:$4 sm:$0xff]  }
 0x476   :  { %v7883_v21 = vpop.f32.mrf.mxu1  ;;  %12654 = vmatmul.mubr.bf16.vlgmr.msra.gmra.mxu1 %v18641_v6  ;;  %v7843_v56 = vadd.f32 %v7842_v51, %v18621_v14  ;;  %12663 = vmatpush1.bf16.msra.mxu0 %v17048_v9  ;;  %v17060_v14 = vld [vmem:[#allocation7 + $0x28a0] ss:$16 sps:$4 sm:$0xff]  }
 0x477   :  { %12704 = vmatpush1.bf16.msra.mxu1 %v17051_v44  ;;  %v7844_v62 = vpop.f32.mrf.mxu0  ;;  %12664 = vmatprep.subr.bf16.mxu0 %v17056_v31  ;;  %v17087_v9 = vld [vmem:[#allocation7 + $0x2a20] ss:$16 sps:$4 sm:$0xff]   ;;  %v17092_v44 = vld [vmem:[#allocation7 + $0x2804] ss:$16 sps:$4 sm:$0xff]  }
 0x478   :  { %v7885_v16 = vpop.f32.mrf.mxu1  ;;  %12705 = vmatprep.subr.bf16.mxu1 %v17059_v1  ;;  %v7845_v10 = vadd.f32 %v7844_v62, %v7804_v28  ;;  %12694 = vmatprep.mubr.bf16.mxu0 %v18645_v7  ;;  %v7884_v50 = vadd.f32 %v7883_v21, %v7843_v56  ;;  %v17095_v31 = vld [vmem:[#allocation7 + $0x2a04] ss:$16 sps:$4 sm:$0xff]   ;;  %v17090_v1 = vld [vmem:[#allocation7 + $0x2800] ss:$16 sps:$4 sm:$0xff]  }
 0x479   :  { %12735 = vmatprep.mubr.bf16.mxu1 %v18647_v8  ;;  %v7846_v24 = vpop.f32.mrf.mxu0  ;;  %v17093_v51 = vld [vmem:[#allocation7 + $0x2a00] ss:$16 sps:$4 sm:$0xff]   ;;  %v17098_v21 = vld [vmem:[#allocation7 + $0x29e4] ss:$16 sps:$4 sm:$0xff]  }
 0x47a   :  { %v7887_v36 = vpop.f32.mrf.mxu1  ;;  %v7886_v22 = vadd.f32 %v7885_v16, %v7845_v10  ;;  %12665 = vmatpush1.bf16.msra.mxu0 %v17054_v39  ;;  %v17101_v28 = vld [vmem:[#allocation7 + $0x2be4] ss:$16 sps:$4 sm:$0xff]   ;;  %v17096_v56 = vld [vmem:[#allocation7 + $0x29e0] ss:$16 sps:$4 sm:$0xff]  }
 0x47b   :  { %12706 = vmatpush1.bf16.msra.mxu1 %v17057_v5  ;;  %v7847_v32 = vpop.f32.mrf.mxu0  ;;  %12666 = vmatprep.subr.bf16.mxu0 %v17062_v11  ;;  %v17099_v39 = vld [vmem:[#allocation7 + $0x2be0] ss:$16 sps:$4 sm:$0xff]   ;;  %v17104_v5 = vld [vmem:[#allocation7 + $0x29c4] ss:$16 sps:$4 sm:$0xff]  }
 0x47c   :  { %v7888_v33 = vpop.f32.mrf.mxu1  ;;  %12707 = vmatprep.subr.bf16.mxu1 %v17065_v17  ;;  %v7895_v18 = vcombine.low %v7884_v50, %v7886_v22  ;;  %v17107_v62 = vld [vmem:[#allocation7 + $0x2bc4] ss:$16 sps:$4 sm:$0xff]   ;;  %v17102_v16 = vld [vmem:[#allocation7 + $0x29c0] ss:$16 sps:$4 sm:$0xff]  }
 0x47d   :  { %v17105_v11 = vld [vmem:[#allocation7 + $0x2bc0] ss:$16 sps:$4 sm:$0xff]   ;;  %v17110_v17 = vld [vmem:[#allocation7 + $0x29a4] ss:$16 sps:$4 sm:$0xff]  }
 0x47e   :  { %v7909_v40 = vrot.slane %v7895_v18, %v18268_v49  ;;  %12667 = vmatpush1.bf16.msra.mxu0 %v17060_v14  ;;  %v17113_v10 = vld [vmem:[#allocation7 + $0x2ba4] ss:$16 sps:$4 sm:$0xff]   ;;  %v17108_v24 = vld [vmem:[#allocation7 + $0x29a0] ss:$16 sps:$4 sm:$0xff]  }
 0x47f   :  { %12708 = vmatpush1.bf16.msra.mxu1 %v17063_v23  ;;  %12668 = vmatprep.subr.bf16.mxu0 %v17068_v27  ;;  %v17111_v36 = vld [vmem:[#allocation7 + $0x2ba0] ss:$16 sps:$4 sm:$0xff]   ;;  %v17116_v50 = vld [vmem:[#allocation7 + $0x2984] ss:$16 sps:$4 sm:$0xff]  }
 0x480   :  { %12709 = vmatprep.subr.bf16.mxu1 %v17071_v19  ;;  %v7910_v55 = vcombine.low %v7902_v25, %v7909_v40  ;;  %v17119_v22 = vld [vmem:[#allocation7 + $0x2b84] ss:$16 sps:$4 sm:$0xff]   ;;  %v17114_v14 = vld [vmem:[#allocation7 + $0x2980] ss:$16 sps:$4 sm:$0xff]   ;;  %v262_v40 = vld [vmem:[#allocation5 + $0x20] sm:$0xff] }
 0x481   :  { %v17117_v23 = vld [vmem:[#allocation7 + $0x2b80] ss:$16 sps:$4 sm:$0xff]   ;;  %v17122_v32 = vld [vmem:[#allocation7 + $0x2964] ss:$16 sps:$4 sm:$0xff]  }
 0x482   :  { %12669 = vmatpush1.bf16.msra.mxu0 %v17066_v48  ;;  %7912 = vst [vmem:[#allocation10] sm:$0xff] %v7910_v55  ;;  %v17125_v33 = vld [vmem:[#allocation7 + $0x2b64] ss:$16 sps:$4 sm:$0xff]   ;;  %v17120_v27 = vld [vmem:[#allocation7 + $0x2960] ss:$16 sps:$4 sm:$0xff]   ;;  %v340_v55 = vcombine.high %v262_v40, %v262_v40 }
 0x483   :  { %12710 = vmatpush1.bf16.msra.mxu1 %v17069_v42  ;;  %12670 = vmatprep.subr.bf16.mxu0 %v17074_v58  ;;  %v17123_v19 = vld [vmem:[#allocation7 + $0x2b60] ss:$16 sps:$4 sm:$0xff]   ;;  %v17128_v18 = vld [vmem:[#allocation7 + $0x2944] ss:$16 sps:$4 sm:$0xff]  }
 0x484   :  { %12711 = vmatprep.subr.bf16.mxu1 %v17077_v47  ;;  %v17131_v25 = vld [vmem:[#allocation7 + $0x2b44] ss:$16 sps:$4 sm:$0xff]   ;;  %v17126_v48 = vld [vmem:[#allocation7 + $0x2940] ss:$16 sps:$4 sm:$0xff]  }
 0x485   :  { %v17129_v42 = vld [vmem:[#allocation7 + $0x2b40] ss:$16 sps:$4 sm:$0xff]   ;;  %v17134_v58 = vld [vmem:[#allocation7 + $0x2924] ss:$16 sps:$4 sm:$0xff]  }
 0x486   :  { %12671 = vmatpush1.bf16.msra.mxu0 %v17072_v60  ;;  %v17137_v47 = vld [vmem:[#allocation7 + $0x2b24] ss:$16 sps:$4 sm:$0xff]   ;;  %v17132_v60 = vld [vmem:[#allocation7 + $0x2920] ss:$16 sps:$4 sm:$0xff]  }
 0x487   :  { %12712 = vmatpush1.bf16.msra.mxu1 %v17075_v13  ;;  %12672 = vmatprep.subr.bf16.mxu0 %v17080_v20  ;;  %v17135_v13 = vld [vmem:[#allocation7 + $0x2b20] ss:$16 sps:$4 sm:$0xff]   ;;  %v17140_v20 = vld [vmem:[#allocation7 + $0x2904] ss:$16 sps:$4 sm:$0xff]  }
 0x488   :  { %12713 = vmatprep.subr.bf16.mxu1 %v17083_v35  ;;  %v17143_v35 = vld [vmem:[#allocation7 + $0x2b04] ss:$16 sps:$4 sm:$0xff]  }
 0x48a   :  { %12673 = vmatpush1.bf16.msra.mxu0 %v17078_v26  ;;  %v18661_v26 = vrot.slane %v262_v40, %v18268_v49 }
 0x48b   :  { %12714 = vmatpush1.bf16.msra.mxu1 %v17081_v61  ;;  %12674 = vmatprep.subr.bf16.mxu0 %v17086_v45  ;;  %v18664_v61 = vrot.slane %v340_v55, %v18268_v49  ;;  %v17138_v45 = vld [vmem:[#allocation7 + $0x2900] ss:$16 sps:$4 sm:$0xff]   ;;  %v17171_v55 = vld [vmem:[#allocation7 + $0x2c64] ss:$16 sps:$4 sm:$0xff]  }
 0x48c   :  { %12715 = vmatprep.subr.bf16.mxu1 %v17089_v12  ;;  %v17141_v12 = vld [vmem:[#allocation7 + $0x2b00] ss:$16 sps:$4 sm:$0xff]  }
 0x48e   :  { %12675 = vmatpush1.bf16.msra.mxu0 %v17084_v41  ;;  %v7914_v41 = vld [vmem:[#allocation8 + $0x4] sm:$0xf] }
 0x48f   :  { %12716 = vmatpush1.bf16.msra.mxu1 %v17087_v9  ;;  %12676 = vmatprep.subr.bf16.mxu0 %v17092_v44  ;;  %v17147_v9 = vld [vmem:[#allocation7 + $0x2ce4] ss:$16 sps:$4 sm:$0xff]  }
 0x490   :  { %12717 = vmatprep.subr.bf16.mxu1 %v17095_v31  ;;  %v17150_v44 = vld [vmem:[#allocation7 + $0x2ee4] ss:$16 sps:$4 sm:$0xff]   ;;  %v355_v31 = vcombine.high %v18661_v26, %v18661_v26 }
 0x492   :  { %12677 = vmatpush1.bf16.msra.mxu0 %v17090_v1  ;;  %v356_v1 = vcombine.high %v18664_v61, %v18664_v61 }
 0x493   :  { %12718 = vmatpush1.bf16.msra.mxu1 %v17093_v51  ;;  %12678 = vmatprep.subr.bf16.mxu0 %v17098_v21  ;;  %v18672_v51 = vpack.c.bf16 %v18626_v59, %v18626_v59  ;;  %v18676_v21 = vpack.c.bf16 %v18629_v54, %v18629_v54  ;;  %v18682_v59 = vpack.c.bf16 %v355_v31, %v355_v31  ;;  %v17181_v31 = vld [vmem:[#allocation7 + $0x2c20] ss:$16 sps:$4 sm:$0xff]  }
 0x494   :  { %12719 = vmatprep.subr.bf16.mxu1 %v17101_v28  ;;  %v7919_v28 = vrot.slane %v7914_v41, %v2244_v29 }
 0x496   :  { %12679 = vmatpush2.bf16.msra.mxu0 %v17096_v56  ;;  %v17145_v56 = vld [vmem:[#allocation7 + $0x2ce0] ss:$16 sps:$4 sm:$0xff]  }
 0x497   :  { %12720 = vmatpush2.bf16.msra.mxu1 %v17099_v39  ;;  %12680 = vmatprep.subr.bf16.mxu0 %v17104_v5  ;;  %v17148_v39 = vld [vmem:[#allocation7 + $0x2ee0] ss:$16 sps:$4 sm:$0xff]   ;;  %v17153_v5 = vld [vmem:[#allocation7 + $0x2cc4] ss:$16 sps:$4 sm:$0xff]  }
 0x498   :  { %12721 = vmatprep.subr.bf16.mxu1 %v17107_v62  ;;  %v17156_v62 = vld [vmem:[#allocation7 + $0x2ec4] ss:$16 sps:$4 sm:$0xff]  }
 0x49a   :  { %12681 = vmatpush2.bf16.msra.mxu0 %v17102_v16  ;;  %v7923_v16 = vrot.slane %v7914_v41, %v2248_v34  ;;  %v17159_v34 = vld [vmem:[#allocation7 + $0x2ca4] ss:$16 sps:$4 sm:$0xff]   ;;  %v17178_v41 = vld [vmem:[#allocation7 + $0x2e40] ss:$16 sps:$4 sm:$0xff]  }
 0x49b   :  { %12722 = vmatpush2.bf16.msra.mxu1 %v17105_v11  ;;  %12682 = vmatprep.subr.bf16.mxu0 %v17110_v17  ;;  %v18684_v11 = vpack.c.bf16 %v356_v1, %v356_v1  ;;  %v17184_v1 = vld [vmem:[#allocation7 + $0x2e20] ss:$16 sps:$4 sm:$0xff]  }
 0x49c   :  { %12723 = vmatprep.subr.bf16.mxu1 %v17113_v10  ;;  %v17151_v10 = vld [vmem:[#allocation7 + $0x2cc0] ss:$16 sps:$4 sm:$0xff]  }
 0x49e   :  { %12683 = vmatpush2.bf16.msra.mxu0 %v17108_v24  ;;  %v17154_v24 = vld [vmem:[#allocation7 + $0x2ec0] ss:$16 sps:$4 sm:$0xff]  }
 0x49f   :  { %12724 = vmatpush2.bf16.msra.mxu1 %v17111_v36  ;;  %12684 = vmatprep.subr.bf16.mxu0 %v17116_v50 }
 0x4a0   :  { %12725 = vmatprep.subr.bf16.mxu1 %v17119_v22  ;;  %v17162_v22 = vld [vmem:[#allocation7 + $0x2ea4] ss:$16 sps:$4 sm:$0xff]  }
 0x4a2   :  { %12685 = vmatpush2.bf16.msra.mxu0 %v17114_v14 }
 0x4a3   :  { %12726 = vmatpush2.bf16.msra.mxu1 %v17117_v23  ;;  %12686 = vmatprep.subr.bf16.mxu0 %v17122_v32 }
 0x4a4   :  { %12727 = vmatprep.subr.bf16.mxu1 %v17125_v33 }
 0x4a6   :  { %12687 = vmatpush2.bf16.msra.mxu0 %v17120_v27 }
 0x4a7   :  { %12728 = vmatpush2.bf16.msra.mxu1 %v17123_v19  ;;  %12688 = vmatprep.subr.bf16.mxu0 %v17128_v18  ;;  %v17157_v19 = vld [vmem:[#allocation7 + $0x2ca0] ss:$16 sps:$4 sm:$0xff]  }
 0x4a8   :  { %12729 = vmatprep.subr.bf16.mxu1 %v17131_v25  ;;  %v17160_v18 = vld [vmem:[#allocation7 + $0x2ea0] ss:$16 sps:$4 sm:$0xff]  }
 0x4aa   :  { %12689 = vmatpush2.bf16.msra.mxu0 %v17126_v48  ;;  %v17165_v48 = vld [vmem:[#allocation7 + $0x2c84] ss:$16 sps:$4 sm:$0xff]  }
 0x4ab   :  { %12730 = vmatpush2.bf16.msra.mxu1 %v17129_v42  ;;  %12690 = vmatprep.subr.bf16.mxu0 %v17134_v58  ;;  %v17168_v42 = vld [vmem:[#allocation7 + $0x2e84] ss:$16 sps:$4 sm:$0xff]   ;;  %v17163_v58 = vld [vmem:[#allocation7 + $0x2c80] ss:$16 sps:$4 sm:$0xff]  }
 0x4ac   :  { %12731 = vmatprep.subr.bf16.mxu1 %v17137_v47  ;;  %v17166_v47 = vld [vmem:[#allocation7 + $0x2e80] ss:$16 sps:$4 sm:$0xff]  }
 0x4ae   :  { %12691 = vmatpush2.bf16.msra.mxu0 %v17132_v60  ;;  %v17174_v60 = vld [vmem:[#allocation7 + $0x2e64] ss:$16 sps:$4 sm:$0xff]  }
 0x4af   :  { %12732 = vmatpush2.bf16.msra.mxu1 %v17135_v13  ;;  %12692 = vmatprep.subr.bf16.mxu0 %v17140_v20  ;;  %v17169_v13 = vld [vmem:[#allocation7 + $0x2c60] ss:$16 sps:$4 sm:$0xff]  }
 0x4b0   :  { %12733 = vmatprep.subr.bf16.mxu1 %v17143_v35  ;;  %v17172_v20 = vld [vmem:[#allocation7 + $0x2e60] ss:$16 sps:$4 sm:$0xff]   ;;  %v17177_v35 = vld [vmem:[#allocation7 + $0x2c44] ss:$16 sps:$4 sm:$0xff]  }
 0x4b2   :  { %12693 = vmatpush2.bf16.msra.mxu0 %v17138_v45  ;;  %v17180_v45 = vld [vmem:[#allocation7 + $0x2e44] ss:$16 sps:$4 sm:$0xff]  }
 0x4b3   :  { %12734 = vmatpush2.bf16.msra.mxu1 %v17141_v12  ;;  %12744 = vmatprep.subr.bf16.mxu0 %v17147_v9  ;;  %v17175_v12 = vld [vmem:[#allocation7 + $0x2c40] ss:$16 sps:$4 sm:$0xff]   ;;  %v17183_v9 = vld [vmem:[#allocation7 + $0x2c24] ss:$16 sps:$4 sm:$0xff]  }
 0x4b4   :  { %12785 = vmatprep.subr.bf16.mxu1 %v17150_v44  ;;  %v17186_v44 = vld [vmem:[#allocation7 + $0x2e24] ss:$16 sps:$4 sm:$0xff]  }
 0x4b5   :  { %v12450_v54 = vpop.f32.mrf.mxu0  ;;  %12695 = vmatmul.mubr.bf16.vlgmr.msra.gmra.mxu0 %v18672_v51 }
 0x4b6   :  { %v12491_v17 = vpop.f32.mrf.mxu1  ;;  %12736 = vmatmul.mubr.bf16.vlgmr.msra.gmra.mxu1 %v18676_v21  ;;  %v12451_v29 = vadd.f32 %v12450_v54, %v7919_v28  ;;  %12745 = vmatpush1.bf16.msra.mxu0 %v17145_v56  ;;  %v17189_v28 = vld [vmem:[#allocation7 + $0x2c04] ss:$16 sps:$4 sm:$0xff]   ;;  %v17193_v54 = vld [vmem:[#allocation7 + $0x2de0] ss:$16 sps:$4 sm:$0xff]  }
 0x4b7   :  { %12786 = vmatpush1.bf16.msra.mxu1 %v17148_v39  ;;  %v12452_v36 = vpop.f32.mrf.mxu0  ;;  %12746 = vmatprep.subr.bf16.mxu0 %v17153_v5  ;;  %v17192_v56 = vld [vmem:[#allocation7 + $0x2e04] ss:$16 sps:$4 sm:$0xff]   ;;  %v17187_v39 = vld [vmem:[#allocation7 + $0x2c00] ss:$16 sps:$4 sm:$0xff]  }
 0x4b8   :  { %v12493_v50 = vpop.f32.mrf.mxu1  ;;  %12787 = vmatprep.subr.bf16.mxu1 %v17156_v62  ;;  %v18688_v14 = vadd.f32 %v12491_v17, %v12451_v29  ;;  %v12453_v23 = vadd.f32 %v12452_v36, %v7923_v16  ;;  %12776 = vmatprep.mubr.bf16.mxu0 %v18682_v59  ;;  %v17190_v5 = vld [vmem:[#allocation7 + $0x2e00] ss:$16 sps:$4 sm:$0xff]   ;;  %v17195_v62 = vld [vmem:[#allocation7 + $0x2de4] ss:$16 sps:$4 sm:$0xff]  }
 0x4b9   :  { %12817 = vmatprep.mubr.bf16.mxu1 %v18684_v11  ;;  %v12454_v32 = vpop.f32.mrf.mxu0  ;;  %v17198_v16 = vld [vmem:[#allocation7 + $0x2fe4] ss:$16 sps:$4 sm:$0xff]   ;;  %v17196_v17 = vld [vmem:[#allocation7 + $0x2fe0] ss:$16 sps:$4 sm:$0xff]  }
 0x4ba   :  { %v12495_v33 = vpop.f32.mrf.mxu1  ;;  %v18692_v27 = vadd.f32 %v12493_v50, %v12453_v23  ;;  %12747 = vmatpush1.bf16.msra.mxu0 %v17151_v10  ;;  %v17201_v29 = vld [vmem:[#allocation7 + $0x2dc4] ss:$16 sps:$4 sm:$0xff]   ;;  %v17202_v36 = vld [vmem:[#allocation7 + $0x2fc0] ss:$16 sps:$4 sm:$0xff]  }
 0x4bb   :  { %12788 = vmatpush1.bf16.msra.mxu1 %v17154_v24  ;;  %v12455_v25 = vpop.f32.mrf.mxu0  ;;  %12748 = vmatprep.subr.bf16.mxu0 %v17159_v34  ;;  %v17204_v10 = vld [vmem:[#allocation7 + $0x2fc4] ss:$16 sps:$4 sm:$0xff]   ;;  %v17199_v24 = vld [vmem:[#allocation7 + $0x2dc0] ss:$16 sps:$4 sm:$0xff]  }
 0x4bc   :  { %v12496_v40 = vpop.f32.mrf.mxu1  ;;  %12789 = vmatprep.subr.bf16.mxu1 %v17162_v22  ;;  %v17207_v50 = vld [vmem:[#allocation7 + $0x2da4] ss:$16 sps:$4 sm:$0xff]   ;;  %v17205_v22 = vld [vmem:[#allocation7 + $0x2da0] ss:$16 sps:$4 sm:$0xff]  }
 0x4bd   :  { %v17210_v34 = vld [vmem:[#allocation7 + $0x2fa4] ss:$16 sps:$4 sm:$0xff]   ;;  %v17208_v23 = vld [vmem:[#allocation7 + $0x2fa0] ss:$16 sps:$4 sm:$0xff]  }
 0x4be   :  { %12749 = vmatpush1.bf16.msra.mxu0 %v17157_v19  ;;  %v17213_v32 = vld [vmem:[#allocation7 + $0x2d84] ss:$16 sps:$4 sm:$0xff]   ;;  %v17211_v19 = vld [vmem:[#allocation7 + $0x2d80] ss:$16 sps:$4 sm:$0xff]  }
 0x4bf   :  { %12790 = vmatpush1.bf16.msra.mxu1 %v17160_v18  ;;  %12750 = vmatprep.subr.bf16.mxu0 %v17165_v48  ;;  %v17216_v33 = vld [vmem:[#allocation7 + $0x2f84] ss:$16 sps:$4 sm:$0xff]   ;;  %v17214_v18 = vld [vmem:[#allocation7 + $0x2f80] ss:$16 sps:$4 sm:$0xff]  }
 0x4c0   :  { %12791 = vmatprep.subr.bf16.mxu1 %v17168_v42  ;;  %v17219_v25 = vld [vmem:[#allocation7 + $0x2d64] ss:$16 sps:$4 sm:$0xff]   ;;  %v17217_v48 = vld [vmem:[#allocation7 + $0x2d60] ss:$16 sps:$4 sm:$0xff]  }
 0x4c1   :  { %v17222_v40 = vld [vmem:[#allocation7 + $0x2f64] ss:$16 sps:$4 sm:$0xff]   ;;  %v17220_v42 = vld [vmem:[#allocation7 + $0x2f60] ss:$16 sps:$4 sm:$0xff]  }
 0x4c2   :  { %12751 = vmatpush1.bf16.msra.mxu0 %v17163_v58  ;;  %v17225_v58 = vld [vmem:[#allocation7 + $0x2d44] ss:$16 sps:$4 sm:$0xff]  }
 0x4c3   :  { %12792 = vmatpush1.bf16.msra.mxu1 %v17166_v47  ;;  %12752 = vmatprep.subr.bf16.mxu0 %v17171_v55  ;;  %v17228_v47 = vld [vmem:[#allocation7 + $0x2f44] ss:$16 sps:$4 sm:$0xff]  }
 0x4c4   :  { %12793 = vmatprep.subr.bf16.mxu1 %v17174_v60  ;;  %v263_v55 = vld [vmem:[#allocation5 + $0x28] sm:$0xff] }
 0x4c5   :  { %v17223_v60 = vld [vmem:[#allocation7 + $0x2d40] ss:$16 sps:$4 sm:$0xff]  }
 0x4c6   :  { %12753 = vmatpush1.bf16.msra.mxu0 %v17169_v13  ;;  %v17226_v13 = vld [vmem:[#allocation7 + $0x2f40] ss:$16 sps:$4 sm:$0xff]  }
 0x4c7   :  { %12794 = vmatpush1.bf16.msra.mxu1 %v17172_v20  ;;  %12754 = vmatprep.subr.bf16.mxu0 %v17177_v35  ;;  %v17231_v20 = vld [vmem:[#allocation7 + $0x2d24] ss:$16 sps:$4 sm:$0xff]  }
 0x4c8   :  { %12795 = vmatprep.subr.bf16.mxu1 %v17180_v45  ;;  %v17234_v35 = vld [vmem:[#allocation7 + $0x2f24] ss:$16 sps:$4 sm:$0xff]   ;;  %v357_v45 = vcombine.high %v263_v55, %v263_v55 }
 0x4ca   :  { %12755 = vmatpush1.bf16.msra.mxu0 %v17175_v12  ;;  %v17229_v12 = vld [vmem:[#allocation7 + $0x2d20] ss:$16 sps:$4 sm:$0xff]  }
 0x4cb   :  { %12796 = vmatpush1.bf16.msra.mxu1 %v17178_v41  ;;  %12756 = vmatprep.subr.bf16.mxu0 %v17183_v9  ;;  %v17232_v41 = vld [vmem:[#allocation7 + $0x2f20] ss:$16 sps:$4 sm:$0xff]   ;;  %v17237_v9 = vld [vmem:[#allocation7 + $0x2d04] ss:$16 sps:$4 sm:$0xff]  }
 0x4cc   :  { %12797 = vmatprep.subr.bf16.mxu1 %v17186_v44  ;;  %v17240_v44 = vld [vmem:[#allocation7 + $0x2f04] ss:$16 sps:$4 sm:$0xff]  }
 0x4ce   :  { %12757 = vmatpush1.bf16.msra.mxu0 %v17181_v31  ;;  %v18695_v31 = vrot.slane %v263_v55, %v18268_v49  ;;  %v17257_v55 = vld [vmem:[#allocation7 + $0x32a0] ss:$16 sps:$4 sm:$0xff]  }
 0x4cf   :  { %12798 = vmatpush1.bf16.msra.mxu1 %v17184_v1  ;;  %12758 = vmatprep.subr.bf16.mxu0 %v17189_v28  ;;  %v18698_v1 = vrot.slane %v357_v45, %v18268_v49  ;;  %v17235_v28 = vld [vmem:[#allocation7 + $0x2d00] ss:$16 sps:$4 sm:$0xff]  }
 0x4d0   :  { %12799 = vmatprep.subr.bf16.mxu1 %v17192_v56  ;;  %v17238_v56 = vld [vmem:[#allocation7 + $0x2f00] ss:$16 sps:$4 sm:$0xff]  }
 0x4d1   :  { %v17263_v45 = vld [vmem:[#allocation7 + $0x3280] ss:$16 sps:$4 sm:$0xff]  }
 0x4d2   :  { %12759 = vmatpush1.bf16.msra.mxu0 %v17187_v39  ;;  %v17244_v39 = vld [vmem:[#allocation7 + $0x30e4] ss:$16 sps:$4 sm:$0xff]  }
 0x4d3   :  { %12800 = vmatpush1.bf16.msra.mxu1 %v17190_v5  ;;  %12760 = vmatprep.subr.bf16.mxu0 %v17195_v62  ;;  %v17247_v5 = vld [vmem:[#allocation7 + $0x32e4] ss:$16 sps:$4 sm:$0xff]   ;;  %v372_v62 = vcombine.high %v18695_v31, %v18695_v31 }
 0x4d4   :  { %12801 = vmatprep.subr.bf16.mxu1 %v17198_v16  ;;  %v373_v16 = vcombine.high %v18698_v1, %v18698_v1 }
 0x4d6   :  { %12761 = vmatpush2.bf16.msra.mxu0 %v17193_v54  ;;  %v18706_v54 = vpack.c.bf16 %v18661_v26, %v18661_v26 }
 0x4d7   :  { %12802 = vmatpush2.bf16.msra.mxu1 %v17196_v17  ;;  %12762 = vmatprep.subr.bf16.mxu0 %v17201_v29  ;;  %v18710_v17 = vpack.c.bf16 %v18664_v61, %v18664_v61  ;;  %v17242_v29 = vld [vmem:[#allocation7 + $0x30e0] ss:$16 sps:$4 sm:$0xff]  }
 0x4d8   :  { %12803 = vmatprep.subr.bf16.mxu1 %v17204_v10  ;;  %v17245_v10 = vld [vmem:[#allocation7 + $0x32e0] ss:$16 sps:$4 sm:$0xff]  }
 0x4d9   :  { %v17248_v61 = vld [vmem:[#allocation7 + $0x30c0] ss:$16 sps:$4 sm:$0xff]  }
 0x4da   :  { %12763 = vmatpush2.bf16.msra.mxu0 %v17199_v24  ;;  %v17250_v24 = vld [vmem:[#allocation7 + $0x30c4] ss:$16 sps:$4 sm:$0xff]  }
 0x4db   :  { %12804 = vmatpush2.bf16.msra.mxu1 %v17202_v36  ;;  %12764 = vmatprep.subr.bf16.mxu0 %v17207_v50  ;;  %v17253_v36 = vld [vmem:[#allocation7 + $0x32c4] ss:$16 sps:$4 sm:$0xff]   ;;  %v18712_v50 = vpack.c.bf16 %v372_v62, %v372_v62 }
 0x4dc   :  { %12805 = vmatprep.subr.bf16.mxu1 %v17210_v34  ;;  %v18714_v34 = vpack.c.bf16 %v373_v16, %v373_v16  ;;  %v17280_v62 = vld [vmem:[#allocation7 + $0x3024] ss:$16 sps:$4 sm:$0xff]  }
 0x4dd   :  { %v17283_v16 = vld [vmem:[#allocation7 + $0x3224] ss:$16 sps:$4 sm:$0xff]  }
 0x4de   :  { %12765 = vmatpush2.bf16.msra.mxu0 %v17205_v22 }
 0x4df   :  { %12806 = vmatpush2.bf16.msra.mxu1 %v17208_v23  ;;  %12766 = vmatprep.subr.bf16.mxu0 %v17213_v32  ;;  %v17251_v32 = vld [vmem:[#allocation7 + $0x32c0] ss:$16 sps:$4 sm:$0xff]  }
 0x4e0   :  { %12807 = vmatprep.subr.bf16.mxu1 %v17216_v33 }
 0x4e2   :  { %12767 = vmatpush2.bf16.msra.mxu0 %v17211_v19 }
 0x4e3   :  { %12808 = vmatpush2.bf16.msra.mxu1 %v17214_v18  ;;  %12768 = vmatprep.subr.bf16.mxu0 %v17219_v25  ;;  %v17256_v18 = vld [vmem:[#allocation7 + $0x30a4] ss:$16 sps:$4 sm:$0xff]  }
 0x4e4   :  { %12809 = vmatprep.subr.bf16.mxu1 %v17222_v40  ;;  %v17259_v25 = vld [vmem:[#allocation7 + $0x32a4] ss:$16 sps:$4 sm:$0xff]  }
 0x4e6   :  { %12769 = vmatpush2.bf16.msra.mxu0 %v17217_v48 }
 0x4e7   :  { %12810 = vmatpush2.bf16.msra.mxu1 %v17220_v42  ;;  %12770 = vmatprep.subr.bf16.mxu0 %v17225_v58 }
 0x4e8   :  { %12811 = vmatprep.subr.bf16.mxu1 %v17228_v47  ;;  %v17254_v47 = vld [vmem:[#allocation7 + $0x30a0] ss:$16 sps:$4 sm:$0xff]  }
 0x4ea   :  { %12771 = vmatpush2.bf16.msra.mxu0 %v17223_v60 }
 0x4eb   :  { %12812 = vmatpush2.bf16.msra.mxu1 %v17226_v13  ;;  %12772 = vmatprep.subr.bf16.mxu0 %v17231_v20  ;;  %v17262_v20 = vld [vmem:[#allocation7 + $0x3084] ss:$16 sps:$4 sm:$0xff]  }
 0x4ec   :  { %12813 = vmatprep.subr.bf16.mxu1 %v17234_v35  ;;  %v17265_v35 = vld [vmem:[#allocation7 + $0x3284] ss:$16 sps:$4 sm:$0xff]  }
 0x4ee   :  { %12773 = vmatpush2.bf16.msra.mxu0 %v17229_v12  ;;  %v17268_v12 = vld [vmem:[#allocation7 + $0x3064] ss:$16 sps:$4 sm:$0xff]  }
 0x4ef   :  { %12814 = vmatpush2.bf16.msra.mxu1 %v17232_v41  ;;  %12774 = vmatprep.subr.bf16.mxu0 %v17237_v9  ;;  %v17271_v41 = vld [vmem:[#allocation7 + $0x3264] ss:$16 sps:$4 sm:$0xff]   ;;  %v17266_v9 = vld [vmem:[#allocation7 + $0x3060] ss:$16 sps:$4 sm:$0xff]  }
 0x4f0   :  { %12815 = vmatprep.subr.bf16.mxu1 %v17240_v44  ;;  %v17269_v44 = vld [vmem:[#allocation7 + $0x3260] ss:$16 sps:$4 sm:$0xff]  }
 0x4f2   :  { %12775 = vmatpush2.bf16.msra.mxu0 %v17235_v28  ;;  %v17274_v28 = vld [vmem:[#allocation7 + $0x3044] ss:$16 sps:$4 sm:$0xff]  }
 0x4f3   :  { %12816 = vmatpush2.bf16.msra.mxu1 %v17238_v56  ;;  %12826 = vmatprep.subr.bf16.mxu0 %v17244_v39  ;;  %v17277_v56 = vld [vmem:[#allocation7 + $0x3244] ss:$16 sps:$4 sm:$0xff]   ;;  %v17272_v39 = vld [vmem:[#allocation7 + $0x3040] ss:$16 sps:$4 sm:$0xff]  }
 0x4f4   :  { %12867 = vmatprep.subr.bf16.mxu1 %v17247_v5  ;;  %v17275_v5 = vld [vmem:[#allocation7 + $0x3240] ss:$16 sps:$4 sm:$0xff]  }
 0x4f5   :  { %v12532_v22 = vpop.f32.mrf.mxu0  ;;  %12777 = vmatmul.mubr.bf16.vlgmr.msra.gmra.mxu0 %v18706_v54 }
 0x4f6   :  { %v12573_v23 = vpop.f32.mrf.mxu1  ;;  %12818 = vmatmul.mubr.bf16.vlgmr.msra.gmra.mxu1 %v18710_v17  ;;  %v12533_v26 = vadd.f32 %v12532_v22, %v18688_v14  ;;  %12827 = vmatpush1.bf16.msra.mxu0 %v17242_v29  ;;  %v17278_v29 = vld [vmem:[#allocation7 + $0x3020] ss:$16 sps:$4 sm:$0xff]  }
 0x4f7   :  { %12868 = vmatpush1.bf16.msra.mxu1 %v17245_v10  ;;  %v12534_v33 = vpop.f32.mrf.mxu0  ;;  %12828 = vmatprep.subr.bf16.mxu0 %v17250_v24  ;;  %v17281_v10 = vld [vmem:[#allocation7 + $0x3220] ss:$16 sps:$4 sm:$0xff]   ;;  %v17286_v24 = vld [vmem:[#allocation7 + $0x3004] ss:$16 sps:$4 sm:$0xff]  }
 0x4f8   :  { %v12575_v19 = vpop.f32.mrf.mxu1  ;;  %12869 = vmatprep.subr.bf16.mxu1 %v17253_v36  ;;  %v18719_v40 = vadd.f32 %v12573_v23, %v12533_v26  ;;  %v12535_v48 = vadd.f32 %v12534_v33, %v18692_v27  ;;  %12858 = vmatprep.mubr.bf16.mxu0 %v18712_v50  ;;  %v17260_v27 = vld [vmem:[#allocation7 + $0x3080] ss:$16 sps:$4 sm:$0xff]   ;;  %v17289_v36 = vld [vmem:[#allocation7 + $0x3204] ss:$16 sps:$4 sm:$0xff]  }
 0x4f9   :  { %12899 = vmatprep.mubr.bf16.mxu1 %v18714_v34  ;;  %v12536_v42 = vpop.f32.mrf.mxu0  ;;  %v17284_v22 = vld [vmem:[#allocation7 + $0x3000] ss:$16 sps:$4 sm:$0xff]   ;;  %v17292_v26 = vld [vmem:[#allocation7 + $0x31e4] ss:$16 sps:$4 sm:$0xff]  }
 0x4fa   :  { %v12577_v14 = vpop.f32.mrf.mxu1  ;;  %v18724_v58 = vadd.f32 %v12575_v19, %v12535_v48  ;;  %12829 = vmatpush1.bf16.msra.mxu0 %v17248_v61  ;;  %v17287_v23 = vld [vmem:[#allocation7 + $0x3200] ss:$16 sps:$4 sm:$0xff]   ;;  %v17295_v61 = vld [vmem:[#allocation7 + $0x33e4] ss:$16 sps:$4 sm:$0xff]  }
 0x4fb   :  { %12870 = vmatpush1.bf16.msra.mxu1 %v17251_v32  ;;  %v12537_v60 = vpop.f32.mrf.mxu0  ;;  %12830 = vmatprep.subr.bf16.mxu0 %v17256_v18  ;;  %v17290_v32 = vld [vmem:[#allocation7 + $0x31e0] ss:$16 sps:$4 sm:$0xff]   ;;  %v17298_v19 = vld [vmem:[#allocation7 + $0x31c4] ss:$16 sps:$4 sm:$0xff]  }
 0x4fc   :  { %v12578_v13 = vpop.f32.mrf.mxu1  ;;  %12871 = vmatprep.subr.bf16.mxu1 %v17259_v25  ;;  %v17293_v33 = vld [vmem:[#allocation7 + $0x33e0] ss:$16 sps:$4 sm:$0xff]   ;;  %v17301_v18 = vld [vmem:[#allocation7 + $0x33c4] ss:$16 sps:$4 sm:$0xff]  }
 0x4fd   :  { %v17296_v25 = vld [vmem:[#allocation7 + $0x31c0] ss:$16 sps:$4 sm:$0xff]   ;;  %v17304_v42 = vld [vmem:[#allocation7 + $0x31a4] ss:$16 sps:$4 sm:$0xff]  }
 0x4fe   :  { %12831 = vmatpush1.bf16.msra.mxu0 %v17254_v47  ;;  %v17299_v48 = vld [vmem:[#allocation7 + $0x33c0] ss:$16 sps:$4 sm:$0xff]   ;;  %v17307_v14 = vld [vmem:[#allocation7 + $0x33a4] ss:$16 sps:$4 sm:$0xff]  }
 0x4ff   :  { %12872 = vmatpush1.bf16.msra.mxu1 %v17257_v55  ;;  %12832 = vmatprep.subr.bf16.mxu0 %v17262_v20  ;;  %v17302_v47 = vld [vmem:[#allocation7 + $0x31a0] ss:$16 sps:$4 sm:$0xff]   ;;  %v17310_v60 = vld [vmem:[#allocation7 + $0x3184] ss:$16 sps:$4 sm:$0xff]  }
 0x500   :  { %12873 = vmatprep.subr.bf16.mxu1 %v17265_v35  ;;  %v17305_v55 = vld [vmem:[#allocation7 + $0x33a0] ss:$16 sps:$4 sm:$0xff]   ;;  %v17313_v13 = vld [vmem:[#allocation7 + $0x3384] ss:$16 sps:$4 sm:$0xff]  }
 0x501   :  { %v17308_v20 = vld [vmem:[#allocation7 + $0x3180] ss:$16 sps:$4 sm:$0xff]  }
 0x502   :  { %12833 = vmatpush1.bf16.msra.mxu0 %v17260_v27  ;;  %v17311_v35 = vld [vmem:[#allocation7 + $0x3380] ss:$16 sps:$4 sm:$0xff]   ;;  %v17316_v27 = vld [vmem:[#allocation7 + $0x3164] ss:$16 sps:$4 sm:$0xff]  }
 0x503   :  { %12874 = vmatpush1.bf16.msra.mxu1 %v17263_v45  ;;  %12834 = vmatprep.subr.bf16.mxu0 %v17268_v12  ;;  %v17319_v45 = vld [vmem:[#allocation7 + $0x3364] ss:$16 sps:$4 sm:$0xff]   ;;  %v17314_v12 = vld [vmem:[#allocation7 + $0x3160] ss:$16 sps:$4 sm:$0xff]  }
 0x504   :  { %12875 = vmatprep.subr.bf16.mxu1 %v17271_v41  ;;  %v17317_v41 = vld [vmem:[#allocation7 + $0x3360] ss:$16 sps:$4 sm:$0xff]  }
 0x506   :  { %12835 = vmatpush1.bf16.msra.mxu0 %v17266_v9  ;;  %v17322_v9 = vld [vmem:[#allocation7 + $0x3144] ss:$16 sps:$4 sm:$0xff]  }
 0x507   :  { %12876 = vmatpush1.bf16.msra.mxu1 %v17269_v44  ;;  %12836 = vmatprep.subr.bf16.mxu0 %v17274_v28  ;;  %v17325_v44 = vld [vmem:[#allocation7 + $0x3344] ss:$16 sps:$4 sm:$0xff]   ;;  %v264_v28 = vld [vmem:[#allocation5 + $0x30] sm:$0xff] }
 0x508   :  { %12877 = vmatprep.subr.bf16.mxu1 %v17277_v56  ;;  %v17320_v56 = vld [vmem:[#allocation7 + $0x3140] ss:$16 sps:$4 sm:$0xff]  }
 0x50a   :  { %12837 = vmatpush1.bf16.msra.mxu0 %v17272_v39  ;;  %v17323_v39 = vld [vmem:[#allocation7 + $0x3340] ss:$16 sps:$4 sm:$0xff]  }
 0x50b   :  { %12878 = vmatpush1.bf16.msra.mxu1 %v17275_v5  ;;  %12838 = vmatprep.subr.bf16.mxu0 %v17280_v62  ;;  %v17328_v5 = vld [vmem:[#allocation7 + $0x3124] ss:$16 sps:$4 sm:$0xff]  }
 0x50c   :  { %12879 = vmatprep.subr.bf16.mxu1 %v17283_v16  ;;  %v17331_v62 = vld [vmem:[#allocation7 + $0x3324] ss:$16 sps:$4 sm:$0xff]   ;;  %v374_v16 = vcombine.high %v264_v28, %v264_v28 }
 0x50e   :  { %12839 = vmatpush1.bf16.msra.mxu0 %v17278_v29  ;;  %v17326_v29 = vld [vmem:[#allocation7 + $0x3120] ss:$16 sps:$4 sm:$0xff]  }
 0x50f   :  { %12880 = vmatpush1.bf16.msra.mxu1 %v17281_v10  ;;  %12840 = vmatprep.subr.bf16.mxu0 %v17286_v24  ;;  %v17329_v10 = vld [vmem:[#allocation7 + $0x3320] ss:$16 sps:$4 sm:$0xff]   ;;  %v17334_v24 = vld [vmem:[#allocation7 + $0x3104] ss:$16 sps:$4 sm:$0xff]  }
 0x510   :  { %12881 = vmatprep.subr.bf16.mxu1 %v17289_v36  ;;  %v17337_v36 = vld [vmem:[#allocation7 + $0x3304] ss:$16 sps:$4 sm:$0xff]  }
 0x512   :  { %12841 = vmatpush1.bf16.msra.mxu0 %v17284_v22  ;;  %v18727_v22 = vrot.slane %v264_v28, %v18268_v49 }
 0x513   :  { %12882 = vmatpush1.bf16.msra.mxu1 %v17287_v23  ;;  %12842 = vmatprep.subr.bf16.mxu0 %v17292_v26  ;;  %v18730_v23 = vrot.slane %v374_v16, %v18268_v49  ;;  %v17332_v26 = vld [vmem:[#allocation7 + $0x3100] ss:$16 sps:$4 sm:$0xff]  }
 0x514   :  { %12883 = vmatprep.subr.bf16.mxu1 %v17295_v61  ;;  %v17335_v61 = vld [vmem:[#allocation7 + $0x3300] ss:$16 sps:$4 sm:$0xff]  }
 0x516   :  { %12843 = vmatpush2.bf16.msra.mxu0 %v17290_v32  ;;  %v17341_v32 = vld [vmem:[#allocation7 + $0x34e4] ss:$16 sps:$4 sm:$0xff]  }
 0x517   :  { %12884 = vmatpush2.bf16.msra.mxu1 %v17293_v33  ;;  %12844 = vmatprep.subr.bf16.mxu0 %v17298_v19  ;;  %v17344_v33 = vld [vmem:[#allocation7 + $0x36e4] ss:$16 sps:$4 sm:$0xff]   ;;  %v389_v19 = vcombine.high %v18727_v22, %v18727_v22 }
 0x518   :  { %12885 = vmatprep.subr.bf16.mxu1 %v17301_v18  ;;  %v390_v18 = vcombine.high %v18730_v23, %v18730_v23 }
 0x51a   :  { %12845 = vmatpush2.bf16.msra.mxu0 %v17296_v25  ;;  %v18738_v25 = vpack.c.bf16 %v18695_v31, %v18695_v31 }
 0x51b   :  { %12886 = vmatpush2.bf16.msra.mxu1 %v17299_v48  ;;  %12846 = vmatprep.subr.bf16.mxu0 %v17304_v42  ;;  %v18742_v48 = vpack.c.bf16 %v18698_v1, %v18698_v1  ;;  %v17339_v42 = vld [vmem:[#allocation7 + $0x34e0] ss:$16 sps:$4 sm:$0xff]  }
 0x51c   :  { %12887 = vmatprep.subr.bf16.mxu1 %v17307_v14  ;;  %v17342_v14 = vld [vmem:[#allocation7 + $0x36e0] ss:$16 sps:$4 sm:$0xff]  }
 0x51d   :  { %v17345_v1 = vld [vmem:[#allocation7 + $0x34c0] ss:$16 sps:$4 sm:$0xff]  }
 0x51e   :  { %12847 = vmatpush2.bf16.msra.mxu0 %v17302_v47  ;;  %v17347_v47 = vld [vmem:[#allocation7 + $0x34c4] ss:$16 sps:$4 sm:$0xff]  }
 0x51f   :  { %12888 = vmatpush2.bf16.msra.mxu1 %v17305_v55  ;;  %12848 = vmatprep.subr.bf16.mxu0 %v17310_v60  ;;  %v17350_v55 = vld [vmem:[#allocation7 + $0x36c4] ss:$16 sps:$4 sm:$0xff]   ;;  %v18744_v60 = vpack.c.bf16 %v389_v19, %v389_v19 }
 0x520   :  { %12889 = vmatprep.subr.bf16.mxu1 %v17313_v13  ;;  %v18746_v13 = vpack.c.bf16 %v390_v18, %v390_v18  ;;  %v17371_v19 = vld [vmem:[#allocation7 + $0x3444] ss:$16 sps:$4 sm:$0xff]  }
 0x521   :  { %v17374_v18 = vld [vmem:[#allocation7 + $0x3644] ss:$16 sps:$4 sm:$0xff]  }
 0x522   :  { %12849 = vmatpush2.bf16.msra.mxu0 %v17308_v20 }
 0x523   :  { %12890 = vmatpush2.bf16.msra.mxu1 %v17311_v35  ;;  %12850 = vmatprep.subr.bf16.mxu0 %v17316_v27  ;;  %v17348_v27 = vld [vmem:[#allocation7 + $0x36c0] ss:$16 sps:$4 sm:$0xff]  }
 0x524   :  { %12891 = vmatprep.subr.bf16.mxu1 %v17319_v45 }
 0x526   :  { %12851 = vmatpush2.bf16.msra.mxu0 %v17314_v12 }
 0x527   :  { %12892 = vmatpush2.bf16.msra.mxu1 %v17317_v41  ;;  %12852 = vmatprep.subr.bf16.mxu0 %v17322_v9  ;;  %v17353_v41 = vld [vmem:[#allocation7 + $0x34a4] ss:$16 sps:$4 sm:$0xff]  }
 0x528   :  { %12893 = vmatprep.subr.bf16.mxu1 %v17325_v44  ;;  %v17356_v9 = vld [vmem:[#allocation7 + $0x36a4] ss:$16 sps:$4 sm:$0xff]  }
 0x52a   :  { %12853 = vmatpush2.bf16.msra.mxu0 %v17320_v56 }
 0x52b   :  { %12894 = vmatpush2.bf16.msra.mxu1 %v17323_v39  ;;  %12854 = vmatprep.subr.bf16.mxu0 %v17328_v5  ;;  %v17351_v5 = vld [vmem:[#allocation7 + $0x34a0] ss:$16 sps:$4 sm:$0xff]  }
 0x52c   :  { %12895 = vmatprep.subr.bf16.mxu1 %v17331_v62  ;;  %v17354_v62 = vld [vmem:[#allocation7 + $0x36a0] ss:$16 sps:$4 sm:$0xff]  }
 0x52e   :  { %12855 = vmatpush2.bf16.msra.mxu0 %v17326_v29 }
 0x52f   :  { %12896 = vmatpush2.bf16.msra.mxu1 %v17329_v10  ;;  %12856 = vmatprep.subr.bf16.mxu0 %v17334_v24  ;;  %v17359_v10 = vld [vmem:[#allocation7 + $0x3484] ss:$16 sps:$4 sm:$0xff]  }
 0x530   :  { %12897 = vmatprep.subr.bf16.mxu1 %v17337_v36  ;;  %v17362_v24 = vld [vmem:[#allocation7 + $0x3684] ss:$16 sps:$4 sm:$0xff]   ;;  %v17360_v36 = vld [vmem:[#allocation7 + $0x3680] ss:$16 sps:$4 sm:$0xff]  }
 0x532   :  { %12857 = vmatpush2.bf16.msra.mxu0 %v17332_v26  ;;  %v17365_v26 = vld [vmem:[#allocation7 + $0x3464] ss:$16 sps:$4 sm:$0xff]  }
 0x533   :  { %12898 = vmatpush2.bf16.msra.mxu1 %v17335_v61  ;;  %12908 = vmatprep.subr.bf16.mxu0 %v17341_v32  ;;  %v17368_v61 = vld [vmem:[#allocation7 + $0x3664] ss:$16 sps:$4 sm:$0xff]   ;;  %v17363_v32 = vld [vmem:[#allocation7 + $0x3460] ss:$16 sps:$4 sm:$0xff]  }
 0x534   :  { %12949 = vmatprep.subr.bf16.mxu1 %v17344_v33  ;;  %v17366_v33 = vld [vmem:[#allocation7 + $0x3660] ss:$16 sps:$4 sm:$0xff]  }
 0x535   :  { %v12614_v20 = vpop.f32.mrf.mxu0  ;;  %12859 = vmatmul.mubr.bf16.vlgmr.msra.gmra.mxu0 %v18738_v25 }
 0x536   :  { %v12655_v35 = vpop.f32.mrf.mxu1  ;;  %12900 = vmatmul.mubr.bf16.vlgmr.msra.gmra.mxu1 %v18742_v48  ;;  %v12615_v31 = vadd.f32 %v12614_v20, %v18719_v40  ;;  %12909 = vmatpush1.bf16.msra.mxu0 %v17339_v42  ;;  %v17369_v42 = vld [vmem:[#allocation7 + $0x3440] ss:$16 sps:$4 sm:$0xff]  }
 0x537   :  { %12950 = vmatpush1.bf16.msra.mxu1 %v17342_v14  ;;  %v12616_v45 = vpop.f32.mrf.mxu0  ;;  %12910 = vmatprep.subr.bf16.mxu0 %v17347_v47  ;;  %v17372_v14 = vld [vmem:[#allocation7 + $0x3640] ss:$16 sps:$4 sm:$0xff]   ;;  %v17377_v47 = vld [vmem:[#allocation7 + $0x3424] ss:$16 sps:$4 sm:$0xff]  }
 0x538   :  { %v12657_v12 = vpop.f32.mrf.mxu1  ;;  %12951 = vmatprep.subr.bf16.mxu1 %v17350_v55  ;;  %v18751_v44 = vadd.f32 %v12655_v35, %v12615_v31  ;;  %v12617_v28 = vadd.f32 %v12616_v45, %v18724_v58  ;;  %12940 = vmatprep.mubr.bf16.mxu0 %v18744_v60  ;;  %v17357_v58 = vld [vmem:[#allocation7 + $0x3480] ss:$16 sps:$4 sm:$0xff]   ;;  %v17380_v55 = vld [vmem:[#allocation7 + $0x3624] ss:$16 sps:$4 sm:$0xff]  }
 0x539   :  { %12981 = vmatprep.mubr.bf16.mxu1 %v18746_v13  ;;  %v12618_v56 = vpop.f32.mrf.mxu0  ;;  %v17375_v20 = vld [vmem:[#allocation7 + $0x3420] ss:$16 sps:$4 sm:$0xff]   ;;  %v17383_v31 = vld [vmem:[#allocation7 + $0x3404] ss:$16 sps:$4 sm:$0xff]  }
 0x53a   :  { %v12659_v40 = vpop.f32.mrf.mxu1  ;;  %v18756_v39 = vadd.f32 %v12657_v12, %v12617_v28  ;;  %12911 = vmatpush1.bf16.msra.mxu0 %v17345_v1  ;;  %v17378_v35 = vld [vmem:[#allocation7 + $0x3620] ss:$16 sps:$4 sm:$0xff]   ;;  %v17386_v1 = vld [vmem:[#allocation7 + $0x3604] ss:$16 sps:$4 sm:$0xff]  }
 0x53b   :  { %12952 = vmatpush1.bf16.msra.mxu1 %v17348_v27  ;;  %v12619_v16 = vpop.f32.mrf.mxu0  ;;  %12912 = vmatprep.subr.bf16.mxu0 %v17353_v41  ;;  %v17381_v27 = vld [vmem:[#allocation7 + $0x3400] ss:$16 sps:$4 sm:$0xff]   ;;  %v17389_v12 = vld [vmem:[#allocation7 + $0x35e4] ss:$16 sps:$4 sm:$0xff]  }
 0x53c   :  { %v12660_v29 = vpop.f32.mrf.mxu1  ;;  %12953 = vmatprep.subr.bf16.mxu1 %v17356_v9  ;;  %v17384_v45 = vld [vmem:[#allocation7 + $0x3600] ss:$16 sps:$4 sm:$0xff]   ;;  %v17392_v41 = vld [vmem:[#allocation7 + $0x37e4] ss:$16 sps:$4 sm:$0xff]  }
 0x53d   :  { %v17387_v9 = vld [vmem:[#allocation7 + $0x35e0] ss:$16 sps:$4 sm:$0xff]   ;;  %v17395_v56 = vld [vmem:[#allocation7 + $0x35c4] ss:$16 sps:$4 sm:$0xff]  }
 0x53e   :  { %12913 = vmatpush1.bf16.msra.mxu0 %v17351_v5  ;;  %v17390_v28 = vld [vmem:[#allocation7 + $0x37e0] ss:$16 sps:$4 sm:$0xff]   ;;  %v17398_v40 = vld [vmem:[#allocation7 + $0x37c4] ss:$16 sps:$4 sm:$0xff]  }
 0x53f   :  { %12954 = vmatpush1.bf16.msra.mxu1 %v17354_v62  ;;  %12914 = vmatprep.subr.bf16.mxu0 %v17359_v10  ;;  %v17393_v5 = vld [vmem:[#allocation7 + $0x35c0] ss:$16 sps:$4 sm:$0xff]   ;;  %v17401_v16 = vld [vmem:[#allocation7 + $0x35a4] ss:$16 sps:$4 sm:$0xff]  }
 0x540   :  { %12955 = vmatprep.subr.bf16.mxu1 %v17362_v24  ;;  %v17396_v62 = vld [vmem:[#allocation7 + $0x37c0] ss:$16 sps:$4 sm:$0xff]   ;;  %v17404_v29 = vld [vmem:[#allocation7 + $0x37a4] ss:$16 sps:$4 sm:$0xff]  }
 0x541   :  { %v17399_v10 = vld [vmem:[#allocation7 + $0x35a0] ss:$16 sps:$4 sm:$0xff]  }
 0x542   :  { %12915 = vmatpush1.bf16.msra.mxu0 %v17357_v58  ;;  %v17402_v24 = vld [vmem:[#allocation7 + $0x37a0] ss:$16 sps:$4 sm:$0xff]   ;;  %v17407_v58 = vld [vmem:[#allocation7 + $0x3584] ss:$16 sps:$4 sm:$0xff]  }
 0x543   :  { %12956 = vmatpush1.bf16.msra.mxu1 %v17360_v36  ;;  %12916 = vmatprep.subr.bf16.mxu0 %v17365_v26  ;;  %v17410_v36 = vld [vmem:[#allocation7 + $0x3784] ss:$16 sps:$4 sm:$0xff]   ;;  %v17405_v26 = vld [vmem:[#allocation7 + $0x3580] ss:$16 sps:$4 sm:$0xff]  }
 0x544   :  { %12957 = vmatprep.subr.bf16.mxu1 %v17368_v61  ;;  %v17408_v61 = vld [vmem:[#allocation7 + $0x3780] ss:$16 sps:$4 sm:$0xff]  }
 0x546   :  { %12917 = vmatpush1.bf16.msra.mxu0 %v17363_v32  ;;  %v17413_v32 = vld [vmem:[#allocation7 + $0x3564] ss:$16 sps:$4 sm:$0xff]  }
 0x547   :  { %12958 = vmatpush1.bf16.msra.mxu1 %v17366_v33  ;;  %12918 = vmatprep.subr.bf16.mxu0 %v17371_v19  ;;  %v17416_v33 = vld [vmem:[#allocation7 + $0x3764] ss:$16 sps:$4 sm:$0xff]   ;;  %v17411_v19 = vld [vmem:[#allocation7 + $0x3560] ss:$16 sps:$4 sm:$0xff]  }
 0x548   :  { %12959 = vmatprep.subr.bf16.mxu1 %v17374_v18  ;;  %v17414_v18 = vld [vmem:[#allocation7 + $0x3760] ss:$16 sps:$4 sm:$0xff]  }
 0x54a   :  { %12919 = vmatpush1.bf16.msra.mxu0 %v17369_v42  ;;  %v17419_v42 = vld [vmem:[#allocation7 + $0x3544] ss:$16 sps:$4 sm:$0xff]  }
 0x54b   :  { %12960 = vmatpush1.bf16.msra.mxu1 %v17372_v14  ;;  %12920 = vmatprep.subr.bf16.mxu0 %v17377_v47  ;;  %v17422_v14 = vld [vmem:[#allocation7 + $0x3744] ss:$16 sps:$4 sm:$0xff]   ;;  %v17417_v47 = vld [vmem:[#allocation7 + $0x3540] ss:$16 sps:$4 sm:$0xff]  }
 0x54c   :  { %12961 = vmatprep.subr.bf16.mxu1 %v17380_v55  ;;  %v17420_v55 = vld [vmem:[#allocation7 + $0x3740] ss:$16 sps:$4 sm:$0xff]  }
 0x54e   :  { %12921 = vmatpush1.bf16.msra.mxu0 %v17375_v20  ;;  %v17425_v20 = vld [vmem:[#allocation7 + $0x3524] ss:$16 sps:$4 sm:$0xff]  }
 0x54f   :  { %12962 = vmatpush1.bf16.msra.mxu1 %v17378_v35  ;;  %12922 = vmatprep.subr.bf16.mxu0 %v17383_v31  ;;  %v17428_v35 = vld [vmem:[#allocation7 + $0x3724] ss:$16 sps:$4 sm:$0xff]   ;;  %v17423_v31 = vld [vmem:[#allocation7 + $0x3520] ss:$16 sps:$4 sm:$0xff]  }
 0x550   :  { %12963 = vmatprep.subr.bf16.mxu1 %v17386_v1  ;;  %v17426_v1 = vld [vmem:[#allocation7 + $0x3720] ss:$16 sps:$4 sm:$0xff]  }
 0x552   :  { %12923 = vmatpush1.bf16.msra.mxu0 %v17381_v27  ;;  %v17431_v27 = vld [vmem:[#allocation7 + $0x3504] ss:$16 sps:$4 sm:$0xff]  }
 0x553   :  { %12964 = vmatpush1.bf16.msra.mxu1 %v17384_v45  ;;  %12924 = vmatprep.subr.bf16.mxu0 %v17389_v12  ;;  %v17434_v45 = vld [vmem:[#allocation7 + $0x3704] ss:$16 sps:$4 sm:$0xff]   ;;  %v17429_v12 = vld [vmem:[#allocation7 + $0x3500] ss:$16 sps:$4 sm:$0xff]  }
 0x554   :  { %12965 = vmatprep.subr.bf16.mxu1 %v17392_v41  ;;  %v17432_v41 = vld [vmem:[#allocation7 + $0x3700] ss:$16 sps:$4 sm:$0xff]  }
 0x556   :  { %12925 = vmatpush2.bf16.msra.mxu0 %v17387_v9  ;;  %v17438_v9 = vld [vmem:[#allocation7 + $0x1cec] ss:$16 sps:$4 sm:$0xff]  }
 0x557   :  { %12966 = vmatpush2.bf16.msra.mxu1 %v17390_v28  ;;  %12926 = vmatprep.subr.bf16.mxu0 %v17395_v56  ;;  %v17441_v28 = vld [vmem:[#allocation7 + $0x1eec] ss:$16 sps:$4 sm:$0xff]   ;;  %v18760_v56 = vpack.c.bf16 %v18727_v22, %v18727_v22 }
 0x558   :  { %12967 = vmatprep.subr.bf16.mxu1 %v17398_v40  ;;  %v18764_v40 = vpack.c.bf16 %v18730_v23, %v18730_v23  ;;  %v17442_v23 = vld [vmem:[#allocation7 + $0x1cc8] ss:$16 sps:$4 sm:$0xff]  }
 0x55a   :  { %12927 = vmatpush2.bf16.msra.mxu0 %v17393_v5  ;;  %v17436_v5 = vld [vmem:[#allocation7 + $0x1ce8] ss:$16 sps:$4 sm:$0xff]  }
 0x55b   :  { %12968 = vmatpush2.bf16.msra.mxu1 %v17396_v62  ;;  %12928 = vmatprep.subr.bf16.mxu0 %v17401_v16  ;;  %v17439_v62 = vld [vmem:[#allocation7 + $0x1ee8] ss:$16 sps:$4 sm:$0xff]   ;;  %v17444_v16 = vld [vmem:[#allocation7 + $0x1ccc] ss:$16 sps:$4 sm:$0xff]  }
 0x55c   :  { %12969 = vmatprep.subr.bf16.mxu1 %v17404_v29  ;;  %v17447_v29 = vld [vmem:[#allocation7 + $0x1ecc] ss:$16 sps:$4 sm:$0xff]  }
 0x55e   :  { %12929 = vmatpush2.bf16.msra.mxu0 %v17399_v10 }
 0x55f   :  { %12970 = vmatpush2.bf16.msra.mxu1 %v17402_v24  ;;  %12930 = vmatprep.subr.bf16.mxu0 %v17407_v58  ;;  %v17445_v58 = vld [vmem:[#allocation7 + $0x1ec8] ss:$16 sps:$4 sm:$0xff]  }
 0x560   :  { %12971 = vmatprep.subr.bf16.mxu1 %v17410_v36 }
 0x562   :  { %12931 = vmatpush2.bf16.msra.mxu0 %v17405_v26 }
 0x563   :  { %12972 = vmatpush2.bf16.msra.mxu1 %v17408_v61  ;;  %12932 = vmatprep.subr.bf16.mxu0 %v17413_v32  ;;  %v17450_v61 = vld [vmem:[#allocation7 + $0x1cac] ss:$16 sps:$4 sm:$0xff]  }
 0x564   :  { %12973 = vmatprep.subr.bf16.mxu1 %v17416_v33  ;;  %v17453_v32 = vld [vmem:[#allocation7 + $0x1eac] ss:$16 sps:$4 sm:$0xff]  }
 0x566   :  { %12933 = vmatpush2.bf16.msra.mxu0 %v17411_v19 }
 0x567   :  { %12974 = vmatpush2.bf16.msra.mxu1 %v17414_v18  ;;  %12934 = vmatprep.subr.bf16.mxu0 %v17419_v42 }
 0x568   :  { %12975 = vmatprep.subr.bf16.mxu1 %v17422_v14  ;;  %v17448_v14 = vld [vmem:[#allocation7 + $0x1ca8] ss:$16 sps:$4 sm:$0xff]  }
 0x56a   :  { %12935 = vmatpush2.bf16.msra.mxu0 %v17417_v47  ;;  %v17451_v47 = vld [vmem:[#allocation7 + $0x1ea8] ss:$16 sps:$4 sm:$0xff]  }
 0x56b   :  { %12976 = vmatpush2.bf16.msra.mxu1 %v17420_v55  ;;  %12936 = vmatprep.subr.bf16.mxu0 %v17425_v20 }
 0x56c   :  { %12977 = vmatprep.subr.bf16.mxu1 %v17428_v35  ;;  %v17456_v35 = vld [vmem:[#allocation7 + $0x1c8c] ss:$16 sps:$4 sm:$0xff]  }
 0x56e   :  { %12937 = vmatpush2.bf16.msra.mxu0 %v17423_v31  ;;  %v17459_v31 = vld [vmem:[#allocation7 + $0x1e8c] ss:$16 sps:$4 sm:$0xff]  }
 0x56f   :  { %12978 = vmatpush2.bf16.msra.mxu1 %v17426_v1  ;;  %12938 = vmatprep.subr.bf16.mxu0 %v17431_v27  ;;  %v17465_v1 = vld [vmem:[#allocation7 + $0x1e6c] ss:$16 sps:$4 sm:$0xff]   ;;  %v17460_v27 = vld [vmem:[#allocation7 + $0x1c68] ss:$16 sps:$4 sm:$0xff]  }
 0x570   :  { %12979 = vmatprep.subr.bf16.mxu1 %v17434_v45  ;;  %v17463_v45 = vld [vmem:[#allocation7 + $0x1e68] ss:$16 sps:$4 sm:$0xff]  }
 0x572   :  { %12939 = vmatpush2.bf16.msra.mxu0 %v17429_v12  ;;  %v17468_v12 = vld [vmem:[#allocation7 + $0x1c4c] ss:$16 sps:$4 sm:$0xff]  }
 0x573   :  { %12980 = vmatpush2.bf16.msra.mxu1 %v17432_v41  ;;  %12990 = vmatprep.subr.bf16.mxu0 %v17438_v9  ;;  %v17471_v41 = vld [vmem:[#allocation7 + $0x1e4c] ss:$16 sps:$4 sm:$0xff]   ;;  %v17466_v9 = vld [vmem:[#allocation7 + $0x1c48] ss:$16 sps:$4 sm:$0xff]  }
 0x574   :  { %13031 = vmatprep.subr.bf16.mxu1 %v17441_v28  ;;  %v17469_v28 = vld [vmem:[#allocation7 + $0x1e48] ss:$16 sps:$4 sm:$0xff]  }
 0x575   :  { %v12696_v10 = vpop.f32.mrf.mxu0  ;;  %12941 = vmatmul.mubr.bf16.vlgmr.msra.gmra.mxu0 %v18760_v56 }
 0x576   :  { %v12737_v24 = vpop.f32.mrf.mxu1  ;;  %12982 = vmatmul.mubr.bf16.vlgmr.msra.gmra.mxu1 %v18764_v40  ;;  %v12697_v22 = vadd.f32 %v12696_v10, %v18751_v44  ;;  %12991 = vmatpush1.bf16.msra.mxu0 %v17436_v5  ;;  %v17474_v5 = vld [vmem:[#allocation7 + $0x1c2c] ss:$16 sps:$4 sm:$0xff]  }
 0x577   :  { %13032 = vmatpush1.bf16.msra.mxu1 %v17439_v62  ;;  %v12698_v36 = vpop.f32.mrf.mxu0  ;;  %12992 = vmatprep.subr.bf16.mxu0 %v17444_v16  ;;  %v17477_v62 = vld [vmem:[#allocation7 + $0x1e2c] ss:$16 sps:$4 sm:$0xff]   ;;  %v17472_v16 = vld [vmem:[#allocation7 + $0x1c28] ss:$16 sps:$4 sm:$0xff]  }
 0x578   :  { %v12739_v26 = vpop.f32.mrf.mxu1  ;;  %13033 = vmatprep.subr.bf16.mxu1 %v17447_v29  ;;  %v18769_v33 = vadd.f32 %v12737_v24, %v12697_v22  ;;  %v12699_v19 = vadd.f32 %v12698_v36, %v18756_v39  ;;  %13022 = vmatprep.mubr.bf16.mxu0 %v18546_v53  ;;  %v17454_v39 = vld [vmem:[#allocation7 + $0x1c88] ss:$16 sps:$4 sm:$0xff]   ;;  %v17480_v10 = vld [vmem:[#allocation7 + $0x1c0c] ss:$16 sps:$4 sm:$0xff]  }
 0x579   :  { %13063 = vmatprep.mubr.bf16.mxu1 %v18548_v57  ;;  %v12700_v18 = vpop.f32.mrf.mxu0  ;;  %v17457_v53 = vld [vmem:[#allocation7 + $0x1e88] ss:$16 sps:$4 sm:$0xff]   ;;  %v17462_v57 = vld [vmem:[#allocation7 + $0x1c6c] ss:$16 sps:$4 sm:$0xff]  }
 0x57a   :  { %v12741_v44 = vpop.f32.mrf.mxu1  ;;  %v18774_v42 = vadd.f32 %v12739_v26, %v12699_v19  ;;  %12993 = vmatpush1.bf16.msra.mxu0 %v17442_v23  ;;  %v17475_v29 = vld [vmem:[#allocation7 + $0x1e28] ss:$16 sps:$4 sm:$0xff]   ;;  %v17483_v24 = vld [vmem:[#allocation7 + $0x1e0c] ss:$16 sps:$4 sm:$0xff]  }
 0x57b   :  { %13034 = vmatpush1.bf16.msra.mxu1 %v17445_v58  ;;  %v12701_v55 = vpop.f32.mrf.mxu0  ;;  %12994 = vmatprep.subr.bf16.mxu0 %v17450_v61  ;;  %v17478_v22 = vld [vmem:[#allocation7 + $0x1c08] ss:$16 sps:$4 sm:$0xff]   ;;  %v17486_v58 = vld [vmem:[#allocation7 + $0x1dec] ss:$16 sps:$4 sm:$0xff]  }
 0x57c   :  { %v12742_v20 = vpop.f32.mrf.mxu1  ;;  %13035 = vmatprep.subr.bf16.mxu1 %v17453_v32  ;;  %v17481_v23 = vld [vmem:[#allocation7 + $0x1e08] ss:$16 sps:$4 sm:$0xff]   ;;  %v17489_v36 = vld [vmem:[#allocation7 + $0x1fec] ss:$16 sps:$4 sm:$0xff]  }
 0x57d   :  { %v17484_v26 = vld [vmem:[#allocation7 + $0x1de8] ss:$16 sps:$4 sm:$0xff]   ;;  %v17492_v32 = vld [vmem:[#allocation7 + $0x1dcc] ss:$16 sps:$4 sm:$0xff]  }
 0x57e   :  { %12995 = vmatpush1.bf16.msra.mxu0 %v17448_v14  ;;  %v17487_v61 = vld [vmem:[#allocation7 + $0x1fe8] ss:$16 sps:$4 sm:$0xff]   ;;  %v17495_v19 = vld [vmem:[#allocation7 + $0x1fcc] ss:$16 sps:$4 sm:$0xff]  }
 0x57f   :  { %13036 = vmatpush1.bf16.msra.mxu1 %v17451_v47  ;;  %12996 = vmatprep.subr.bf16.mxu0 %v17456_v35  ;;  %v17490_v18 = vld [vmem:[#allocation7 + $0x1dc8] ss:$16 sps:$4 sm:$0xff]   ;;  %v17498_v14 = vld [vmem:[#allocation7 + $0x1dac] ss:$16 sps:$4 sm:$0xff]  }
 0x580   :  { %13037 = vmatprep.subr.bf16.mxu1 %v17459_v31  ;;  %v17493_v44 = vld [vmem:[#allocation7 + $0x1fc8] ss:$16 sps:$4 sm:$0xff]   ;;  %v17501_v47 = vld [vmem:[#allocation7 + $0x1fac] ss:$16 sps:$4 sm:$0xff]  }
 0x581   :  { %v17496_v55 = vld [vmem:[#allocation7 + $0x1da8] ss:$16 sps:$4 sm:$0xff]   ;;  %v17504_v35 = vld [vmem:[#allocation7 + $0x1d8c] ss:$16 sps:$4 sm:$0xff]  }
 0x582   :  { %12997 = vmatpush1.bf16.msra.mxu0 %v17454_v39  ;;  %v17499_v20 = vld [vmem:[#allocation7 + $0x1fa8] ss:$16 sps:$4 sm:$0xff]   ;;  %v17507_v31 = vld [vmem:[#allocation7 + $0x1f8c] ss:$16 sps:$4 sm:$0xff]  }
 0x583   :  { %13038 = vmatpush1.bf16.msra.mxu1 %v17457_v53  ;;  %12998 = vmatprep.subr.bf16.mxu0 %v17462_v57  ;;  %v17502_v39 = vld [vmem:[#allocation7 + $0x1d88] ss:$16 sps:$4 sm:$0xff]   ;;  %v17510_v57 = vld [vmem:[#allocation7 + $0x1d6c] ss:$16 sps:$4 sm:$0xff]  }
 0x584   :  { %13039 = vmatprep.subr.bf16.mxu1 %v17465_v1  ;;  %v17505_v53 = vld [vmem:[#allocation7 + $0x1f88] ss:$16 sps:$4 sm:$0xff]   ;;  %v17513_v1 = vld [vmem:[#allocation7 + $0x1f6c] ss:$16 sps:$4 sm:$0xff]  }
 0x586   :  { %12999 = vmatpush1.bf16.msra.mxu0 %v17460_v27  ;;  %v17508_v27 = vld [vmem:[#allocation7 + $0x1d68] ss:$16 sps:$4 sm:$0xff]  }
 0x587   :  { %13040 = vmatpush1.bf16.msra.mxu1 %v17463_v45  ;;  %13000 = vmatprep.subr.bf16.mxu0 %v17468_v12  ;;  %v17511_v45 = vld [vmem:[#allocation7 + $0x1f68] ss:$16 sps:$4 sm:$0xff]   ;;  %v17516_v12 = vld [vmem:[#allocation7 + $0x1d4c] ss:$16 sps:$4 sm:$0xff]  }
 0x588   :  { %13041 = vmatprep.subr.bf16.mxu1 %v17471_v41  ;;  %v17519_v41 = vld [vmem:[#allocation7 + $0x1f4c] ss:$16 sps:$4 sm:$0xff]  }
 0x58a   :  { %13001 = vmatpush1.bf16.msra.mxu0 %v17466_v9  ;;  %v17514_v9 = vld [vmem:[#allocation7 + $0x1d48] ss:$16 sps:$4 sm:$0xff]  }
 0x58b   :  { %13042 = vmatpush1.bf16.msra.mxu1 %v17469_v28  ;;  %13002 = vmatprep.subr.bf16.mxu0 %v17474_v5  ;;  %v17517_v28 = vld [vmem:[#allocation7 + $0x1f48] ss:$16 sps:$4 sm:$0xff]   ;;  %v17522_v5 = vld [vmem:[#allocation7 + $0x1d2c] ss:$16 sps:$4 sm:$0xff]  }
 0x58c   :  { %13043 = vmatprep.subr.bf16.mxu1 %v17477_v62  ;;  %v17525_v62 = vld [vmem:[#allocation7 + $0x1f2c] ss:$16 sps:$4 sm:$0xff]  }
 0x58e   :  { %13003 = vmatpush1.bf16.msra.mxu0 %v17472_v16  ;;  %v17520_v16 = vld [vmem:[#allocation7 + $0x1d28] ss:$16 sps:$4 sm:$0xff]  }
 0x58f   :  { %13044 = vmatpush1.bf16.msra.mxu1 %v17475_v29  ;;  %13004 = vmatprep.subr.bf16.mxu0 %v17480_v10  ;;  %v17523_v29 = vld [vmem:[#allocation7 + $0x1f28] ss:$16 sps:$4 sm:$0xff]   ;;  %v17528_v10 = vld [vmem:[#allocation7 + $0x1d0c] ss:$16 sps:$4 sm:$0xff]  }
 0x590   :  { %13045 = vmatprep.subr.bf16.mxu1 %v17483_v24  ;;  %v17531_v24 = vld [vmem:[#allocation7 + $0x1f0c] ss:$16 sps:$4 sm:$0xff]  }
 0x592   :  { %13005 = vmatpush1.bf16.msra.mxu0 %v17478_v22  ;;  %v17526_v22 = vld [vmem:[#allocation7 + $0x1d08] ss:$16 sps:$4 sm:$0xff]  }
 0x593   :  { %13046 = vmatpush1.bf16.msra.mxu1 %v17481_v23  ;;  %13006 = vmatprep.subr.bf16.mxu0 %v17486_v58  ;;  %v17529_v23 = vld [vmem:[#allocation7 + $0x1f08] ss:$16 sps:$4 sm:$0xff]   ;;  %v17534_v58 = vld [vmem:[#allocation7 + $0x20ec] ss:$16 sps:$4 sm:$0xff]  }
 0x594   :  { %13047 = vmatprep.subr.bf16.mxu1 %v17489_v36  ;;  %v17537_v36 = vld [vmem:[#allocation7 + $0x22ec] ss:$16 sps:$4 sm:$0xff]  }
 0x596   :  { %13007 = vmatpush2.bf16.msra.mxu0 %v17484_v26  ;;  %v17532_v26 = vld [vmem:[#allocation7 + $0x20e8] ss:$16 sps:$4 sm:$0xff]  }
 0x597   :  { %13048 = vmatpush2.bf16.msra.mxu1 %v17487_v61  ;;  %13008 = vmatprep.subr.bf16.mxu0 %v17492_v32  ;;  %v17535_v61 = vld [vmem:[#allocation7 + $0x22e8] ss:$16 sps:$4 sm:$0xff]   ;;  %v17540_v32 = vld [vmem:[#allocation7 + $0x20cc] ss:$16 sps:$4 sm:$0xff]  }
 0x598   :  { %13049 = vmatprep.subr.bf16.mxu1 %v17495_v19  ;;  %v17543_v19 = vld [vmem:[#allocation7 + $0x22cc] ss:$16 sps:$4 sm:$0xff]  }
 0x59a   :  { %13009 = vmatpush2.bf16.msra.mxu0 %v17490_v18 }
 0x59b   :  { %13050 = vmatpush2.bf16.msra.mxu1 %v17493_v44  ;;  %13010 = vmatprep.subr.bf16.mxu0 %v17498_v14 }
 0x59c   :  { %13051 = vmatprep.subr.bf16.mxu1 %v17501_v47  ;;  %v17538_v47 = vld [vmem:[#allocation7 + $0x20c8] ss:$16 sps:$4 sm:$0xff]  }
 0x59e   :  { %13011 = vmatpush2.bf16.msra.mxu0 %v17496_v55  ;;  %v17541_v55 = vld [vmem:[#allocation7 + $0x22c8] ss:$16 sps:$4 sm:$0xff]  }
 0x59f   :  { %13052 = vmatpush2.bf16.msra.mxu1 %v17499_v20  ;;  %13012 = vmatprep.subr.bf16.mxu0 %v17504_v35 }
 0x5a0   :  { %13053 = vmatprep.subr.bf16.mxu1 %v17507_v31  ;;  %v17546_v31 = vld [vmem:[#allocation7 + $0x20ac] ss:$16 sps:$4 sm:$0xff]  }
 0x5a2   :  { %13013 = vmatpush2.bf16.msra.mxu0 %v17502_v39  ;;  %v17549_v39 = vld [vmem:[#allocation7 + $0x22ac] ss:$16 sps:$4 sm:$0xff]  }
 0x5a3   :  { %13054 = vmatpush2.bf16.msra.mxu1 %v17505_v53  ;;  %13014 = vmatprep.subr.bf16.mxu0 %v17510_v57 }
 0x5a4   :  { %13055 = vmatprep.subr.bf16.mxu1 %v17513_v1  ;;  %v17544_v1 = vld [vmem:[#allocation7 + $0x20a8] ss:$16 sps:$4 sm:$0xff]  }
 0x5a6   :  { %13015 = vmatpush2.bf16.msra.mxu0 %v17508_v27  ;;  %v17547_v27 = vld [vmem:[#allocation7 + $0x22a8] ss:$16 sps:$4 sm:$0xff]  }
 0x5a7   :  { %13056 = vmatpush2.bf16.msra.mxu1 %v17511_v45  ;;  %13016 = vmatprep.subr.bf16.mxu0 %v17516_v12 }
 0x5a8   :  { %13057 = vmatprep.subr.bf16.mxu1 %v17519_v41  ;;  %v17552_v41 = vld [vmem:[#allocation7 + $0x208c] ss:$16 sps:$4 sm:$0xff]  }
 0x5aa   :  { %13017 = vmatpush2.bf16.msra.mxu0 %v17514_v9  ;;  %v17555_v9 = vld [vmem:[#allocation7 + $0x228c] ss:$16 sps:$4 sm:$0xff]  }
 0x5ab   :  { %13058 = vmatpush2.bf16.msra.mxu1 %v17517_v28  ;;  %13018 = vmatprep.subr.bf16.mxu0 %v17522_v5  ;;  %v17561_v28 = vld [vmem:[#allocation7 + $0x226c] ss:$16 sps:$4 sm:$0xff]   ;;  %v17556_v5 = vld [vmem:[#allocation7 + $0x2068] ss:$16 sps:$4 sm:$0xff]  }
 0x5ac   :  { %13059 = vmatprep.subr.bf16.mxu1 %v17525_v62  ;;  %v17559_v62 = vld [vmem:[#allocation7 + $0x2268] ss:$16 sps:$4 sm:$0xff]  }
 0x5ae   :  { %13019 = vmatpush2.bf16.msra.mxu0 %v17520_v16  ;;  %v17564_v16 = vld [vmem:[#allocation7 + $0x204c] ss:$16 sps:$4 sm:$0xff]  }
 0x5af   :  { %13060 = vmatpush2.bf16.msra.mxu1 %v17523_v29  ;;  %13020 = vmatprep.subr.bf16.mxu0 %v17528_v10  ;;  %v17567_v29 = vld [vmem:[#allocation7 + $0x224c] ss:$16 sps:$4 sm:$0xff]   ;;  %v17562_v10 = vld [vmem:[#allocation7 + $0x2048] ss:$16 sps:$4 sm:$0xff]  }
 0x5b0   :  { %13061 = vmatprep.subr.bf16.mxu1 %v17531_v24  ;;  %v17565_v24 = vld [vmem:[#allocation7 + $0x2248] ss:$16 sps:$4 sm:$0xff]  }
 0x5b2   :  { %13021 = vmatpush2.bf16.msra.mxu0 %v17526_v22  ;;  %v17570_v22 = vld [vmem:[#allocation7 + $0x202c] ss:$16 sps:$4 sm:$0xff]  }
 0x5b3   :  { %13062 = vmatpush2.bf16.msra.mxu1 %v17529_v23  ;;  %13072 = vmatprep.subr.bf16.mxu0 %v17534_v58  ;;  %v17573_v23 = vld [vmem:[#allocation7 + $0x222c] ss:$16 sps:$4 sm:$0xff]   ;;  %v17568_v58 = vld [vmem:[#allocation7 + $0x2028] ss:$16 sps:$4 sm:$0xff]  }
 0x5b4   :  { %13113 = vmatprep.subr.bf16.mxu1 %v17537_v36  ;;  %v17571_v36 = vld [vmem:[#allocation7 + $0x2228] ss:$16 sps:$4 sm:$0xff]  }
 0x5b5   :  { %v12778_v18 = vpop.f32.mrf.mxu0  ;;  %13023 = vmatmul.mubr.bf16.vlgmr.msra.gmra.mxu0 %v18572_v46 }
 0x5b6   :  { %v12819_v44 = vpop.f32.mrf.mxu1  ;;  %13064 = vmatmul.mubr.bf16.vlgmr.msra.gmra.mxu1 %v18576_v4  ;;  %v12779_v14 = vadd.f32 %v12778_v18, %v18769_v33  ;;  %13073 = vmatpush1.bf16.msra.mxu0 %v17532_v26  ;;  %v17576_v26 = vld [vmem:[#allocation7 + $0x200c] ss:$16 sps:$4 sm:$0xff]  }
 0x5b7   :  { %13114 = vmatpush1.bf16.msra.mxu1 %v17535_v61  ;;  %v12780_v20 = vpop.f32.mrf.mxu0  ;;  %13074 = vmatprep.subr.bf16.mxu0 %v17540_v32  ;;  %v17579_v61 = vld [vmem:[#allocation7 + $0x220c] ss:$16 sps:$4 sm:$0xff]   ;;  %v17574_v32 = vld [vmem:[#allocation7 + $0x2008] ss:$16 sps:$4 sm:$0xff]  }
 0x5b8   :  { %v12821_v35 = vpop.f32.mrf.mxu1  ;;  %13115 = vmatprep.subr.bf16.mxu1 %v17543_v19  ;;  %v18779_v53 = vadd.f32 %v12819_v44, %v12779_v14  ;;  %v12781_v57 = vadd.f32 %v12780_v20, %v18774_v42  ;;  %13104 = vmatprep.mubr.bf16.mxu0 %v18578_v15  ;;  %v17550_v42 = vld [vmem:[#allocation7 + $0x2088] ss:$16 sps:$4 sm:$0xff]   ;;  %v17582_v18 = vld [vmem:[#allocation7 + $0x21ec] ss:$16 sps:$4 sm:$0xff]  }
 0x5b9   :  { %13145 = vmatprep.mubr.bf16.mxu1 %v18580_v3  ;;  %v12782_v46 = vpop.f32.mrf.mxu0  ;;  %v17553_v15 = vld [vmem:[#allocation7 + $0x2288] ss:$16 sps:$4 sm:$0xff]   ;;  %v17558_v3 = vld [vmem:[#allocation7 + $0x206c] ss:$16 sps:$4 sm:$0xff]  }
 0x5ba   :  { %v12823_v4 = vpop.f32.mrf.mxu1  ;;  %v18784_v33 = vadd.f32 %v12821_v35, %v12781_v57  ;;  %13075 = vmatpush1.bf16.msra.mxu0 %v17538_v47  ;;  %v17577_v19 = vld [vmem:[#allocation7 + $0x2208] ss:$16 sps:$4 sm:$0xff]   ;;  %v17585_v44 = vld [vmem:[#allocation7 + $0x23ec] ss:$16 sps:$4 sm:$0xff]  }
 0x5bb   :  { %13116 = vmatpush1.bf16.msra.mxu1 %v17541_v55  ;;  %v12783_v45 = vpop.f32.mrf.mxu0  ;;  %13076 = vmatprep.subr.bf16.mxu0 %v17546_v31  ;;  %v17580_v14 = vld [vmem:[#allocation7 + $0x21e8] ss:$16 sps:$4 sm:$0xff]   ;;  %v17588_v55 = vld [vmem:[#allocation7 + $0x21cc] ss:$16 sps:$4 sm:$0xff]  }
 0x5bc   :  { %v12824_v12 = vpop.f32.mrf.mxu1  ;;  %13117 = vmatprep.subr.bf16.mxu1 %v17549_v39  ;;  %v17583_v47 = vld [vmem:[#allocation7 + $0x23e8] ss:$16 sps:$4 sm:$0xff]   ;;  %v17591_v20 = vld [vmem:[#allocation7 + $0x23cc] ss:$16 sps:$4 sm:$0xff]  }
 0x5bd   :  { %v17586_v35 = vld [vmem:[#allocation7 + $0x21c8] ss:$16 sps:$4 sm:$0xff]   ;;  %v17594_v39 = vld [vmem:[#allocation7 + $0x21ac] ss:$16 sps:$4 sm:$0xff]  }
 0x5be   :  { %13077 = vmatpush1.bf16.msra.mxu0 %v17544_v1  ;;  %v17589_v31 = vld [vmem:[#allocation7 + $0x23c8] ss:$16 sps:$4 sm:$0xff]   ;;  %v17597_v57 = vld [vmem:[#allocation7 + $0x23ac] ss:$16 sps:$4 sm:$0xff]  }
 0x5bf   :  { %13118 = vmatpush1.bf16.msra.mxu1 %v17547_v27  ;;  %13078 = vmatprep.subr.bf16.mxu0 %v17552_v41  ;;  %v17592_v46 = vld [vmem:[#allocation7 + $0x21a8] ss:$16 sps:$4 sm:$0xff]   ;;  %v17600_v1 = vld [vmem:[#allocation7 + $0x218c] ss:$16 sps:$4 sm:$0xff]  }
 0x5c0   :  { %13119 = vmatprep.subr.bf16.mxu1 %v17555_v9  ;;  %v17595_v4 = vld [vmem:[#allocation7 + $0x23a8] ss:$16 sps:$4 sm:$0xff]   ;;  %v17603_v27 = vld [vmem:[#allocation7 + $0x238c] ss:$16 sps:$4 sm:$0xff]  }
 0x5c1   :  { %v17598_v45 = vld [vmem:[#allocation7 + $0x2188] ss:$16 sps:$4 sm:$0xff]   ;;  %v17606_v41 = vld [vmem:[#allocation7 + $0x216c] ss:$16 sps:$4 sm:$0xff]  }
 0x5c2   :  { %13079 = vmatpush1.bf16.msra.mxu0 %v17550_v42  ;;  %v17601_v12 = vld [vmem:[#allocation7 + $0x2388] ss:$16 sps:$4 sm:$0xff]   ;;  %v17609_v9 = vld [vmem:[#allocation7 + $0x236c] ss:$16 sps:$4 sm:$0xff]  }
 0x5c3   :  { %13120 = vmatpush1.bf16.msra.mxu1 %v17553_v15  ;;  %13080 = vmatprep.subr.bf16.mxu0 %v17558_v3  ;;  %v17604_v42 = vld [vmem:[#allocation7 + $0x2168] ss:$16 sps:$4 sm:$0xff]   ;;  %v17612_v3 = vld [vmem:[#allocation7 + $0x214c] ss:$16 sps:$4 sm:$0xff]  }
 0x5c4   :  { %13121 = vmatprep.subr.bf16.mxu1 %v17561_v28  ;;  %v17607_v15 = vld [vmem:[#allocation7 + $0x2368] ss:$16 sps:$4 sm:$0xff]   ;;  %v17615_v28 = vld [vmem:[#allocation7 + $0x234c] ss:$16 sps:$4 sm:$0xff]  }
 0x5c6   :  { %13081 = vmatpush1.bf16.msra.mxu0 %v17556_v5  ;;  %v17610_v5 = vld [vmem:[#allocation7 + $0x2148] ss:$16 sps:$4 sm:$0xff]  }
 0x5c7   :  { %13122 = vmatpush1.bf16.msra.mxu1 %v17559_v62  ;;  %13082 = vmatprep.subr.bf16.mxu0 %v17564_v16  ;;  %v17613_v62 = vld [vmem:[#allocation7 + $0x2348] ss:$16 sps:$4 sm:$0xff]   ;;  %v17618_v16 = vld [vmem:[#allocation7 + $0x212c] ss:$16 sps:$4 sm:$0xff]  }
 0x5c8   :  { %13123 = vmatprep.subr.bf16.mxu1 %v17567_v29  ;;  %v17621_v29 = vld [vmem:[#allocation7 + $0x232c] ss:$16 sps:$4 sm:$0xff]  }
 0x5ca   :  { %13083 = vmatpush1.bf16.msra.mxu0 %v17562_v10  ;;  %v17616_v10 = vld [vmem:[#allocation7 + $0x2128] ss:$16 sps:$4 sm:$0xff]  }
 0x5cb   :  { %13124 = vmatpush1.bf16.msra.mxu1 %v17565_v24  ;;  %13084 = vmatprep.subr.bf16.mxu0 %v17570_v22  ;;  %v17619_v24 = vld [vmem:[#allocation7 + $0x2328] ss:$16 sps:$4 sm:$0xff]   ;;  %v17624_v22 = vld [vmem:[#allocation7 + $0x210c] ss:$16 sps:$4 sm:$0xff]  }
 0x5cc   :  { %13125 = vmatprep.subr.bf16.mxu1 %v17573_v23  ;;  %v17627_v23 = vld [vmem:[#allocation7 + $0x230c] ss:$16 sps:$4 sm:$0xff]  }
 0x5ce   :  { %13085 = vmatpush1.bf16.msra.mxu0 %v17568_v58  ;;  %v17622_v58 = vld [vmem:[#allocation7 + $0x2108] ss:$16 sps:$4 sm:$0xff]  }
 0x5cf   :  { %13126 = vmatpush1.bf16.msra.mxu1 %v17571_v36  ;;  %13086 = vmatprep.subr.bf16.mxu0 %v17576_v26  ;;  %v17625_v36 = vld [vmem:[#allocation7 + $0x2308] ss:$16 sps:$4 sm:$0xff]   ;;  %v17630_v26 = vld [vmem:[#allocation7 + $0x24ec] ss:$16 sps:$4 sm:$0xff]  }
 0x5d0   :  { %13127 = vmatprep.subr.bf16.mxu1 %v17579_v61  ;;  %v17633_v61 = vld [vmem:[#allocation7 + $0x26ec] ss:$16 sps:$4 sm:$0xff]  }
 0x5d2   :  { %13087 = vmatpush1.bf16.msra.mxu0 %v17574_v32  ;;  %v17628_v32 = vld [vmem:[#allocation7 + $0x24e8] ss:$16 sps:$4 sm:$0xff]  }
 0x5d3   :  { %13128 = vmatpush1.bf16.msra.mxu1 %v17577_v19  ;;  %13088 = vmatprep.subr.bf16.mxu0 %v17582_v18  ;;  %v17631_v19 = vld [vmem:[#allocation7 + $0x26e8] ss:$16 sps:$4 sm:$0xff]   ;;  %v17636_v18 = vld [vmem:[#allocation7 + $0x24cc] ss:$16 sps:$4 sm:$0xff]  }
 0x5d4   :  { %13129 = vmatprep.subr.bf16.mxu1 %v17585_v44  ;;  %v17639_v44 = vld [vmem:[#allocation7 + $0x26cc] ss:$16 sps:$4 sm:$0xff]  }
 0x5d6   :  { %13089 = vmatpush2.bf16.msra.mxu0 %v17580_v14 }
 0x5d7   :  { %13130 = vmatpush2.bf16.msra.mxu1 %v17583_v47  ;;  %13090 = vmatprep.subr.bf16.mxu0 %v17588_v55 }
 0x5d8   :  { %13131 = vmatprep.subr.bf16.mxu1 %v17591_v20  ;;  %v17634_v20 = vld [vmem:[#allocation7 + $0x24c8] ss:$16 sps:$4 sm:$0xff]  }
 0x5da   :  { %13091 = vmatpush2.bf16.msra.mxu0 %v17586_v35  ;;  %v17637_v35 = vld [vmem:[#allocation7 + $0x26c8] ss:$16 sps:$4 sm:$0xff]  }
 0x5db   :  { %13132 = vmatpush2.bf16.msra.mxu1 %v17589_v31  ;;  %13092 = vmatprep.subr.bf16.mxu0 %v17594_v39 }
 0x5dc   :  { %13133 = vmatprep.subr.bf16.mxu1 %v17597_v57  ;;  %v17642_v57 = vld [vmem:[#allocation7 + $0x24ac] ss:$16 sps:$4 sm:$0xff]  }
 0x5de   :  { %13093 = vmatpush2.bf16.msra.mxu0 %v17592_v46  ;;  %v17645_v46 = vld [vmem:[#allocation7 + $0x26ac] ss:$16 sps:$4 sm:$0xff]  }
 0x5df   :  { %13134 = vmatpush2.bf16.msra.mxu1 %v17595_v4  ;;  %13094 = vmatprep.subr.bf16.mxu0 %v17600_v1 }
 0x5e0   :  { %13135 = vmatprep.subr.bf16.mxu1 %v17603_v27  ;;  %v17640_v27 = vld [vmem:[#allocation7 + $0x24a8] ss:$16 sps:$4 sm:$0xff]  }
 0x5e2   :  { %13095 = vmatpush2.bf16.msra.mxu0 %v17598_v45  ;;  %v17643_v45 = vld [vmem:[#allocation7 + $0x26a8] ss:$16 sps:$4 sm:$0xff]  }
 0x5e3   :  { %13136 = vmatpush2.bf16.msra.mxu1 %v17601_v12  ;;  %13096 = vmatprep.subr.bf16.mxu0 %v17606_v41 }
 0x5e4   :  { %13137 = vmatprep.subr.bf16.mxu1 %v17609_v9  ;;  %v17648_v9 = vld [vmem:[#allocation7 + $0x248c] ss:$16 sps:$4 sm:$0xff]  }
 0x5e6   :  { %13097 = vmatpush2.bf16.msra.mxu0 %v17604_v42  ;;  %v17651_v42 = vld [vmem:[#allocation7 + $0x268c] ss:$16 sps:$4 sm:$0xff]  }
 0x5e7   :  { %13138 = vmatpush2.bf16.msra.mxu1 %v17607_v15  ;;  %13098 = vmatprep.subr.bf16.mxu0 %v17612_v3  ;;  %v17657_v15 = vld [vmem:[#allocation7 + $0x266c] ss:$16 sps:$4 sm:$0xff]   ;;  %v17652_v3 = vld [vmem:[#allocation7 + $0x2468] ss:$16 sps:$4 sm:$0xff]  }
 0x5e8   :  { %13139 = vmatprep.subr.bf16.mxu1 %v17615_v28  ;;  %v17655_v28 = vld [vmem:[#allocation7 + $0x2668] ss:$16 sps:$4 sm:$0xff]  }
 0x5ea   :  { %13099 = vmatpush2.bf16.msra.mxu0 %v17610_v5  ;;  %v17660_v5 = vld [vmem:[#allocation7 + $0x244c] ss:$16 sps:$4 sm:$0xff]  }
 0x5eb   :  { %13140 = vmatpush2.bf16.msra.mxu1 %v17613_v62  ;;  %13100 = vmatprep.subr.bf16.mxu0 %v17618_v16  ;;  %v17663_v62 = vld [vmem:[#allocation7 + $0x264c] ss:$16 sps:$4 sm:$0xff]   ;;  %v17658_v16 = vld [vmem:[#allocation7 + $0x2448] ss:$16 sps:$4 sm:$0xff]  }
 0x5ec   :  { %13141 = vmatprep.subr.bf16.mxu1 %v17621_v29  ;;  %v17661_v29 = vld [vmem:[#allocation7 + $0x2648] ss:$16 sps:$4 sm:$0xff]  }
 0x5ee   :  { %13101 = vmatpush2.bf16.msra.mxu0 %v17616_v10  ;;  %v17666_v10 = vld [vmem:[#allocation7 + $0x242c] ss:$16 sps:$4 sm:$0xff]  }
 0x5ef   :  { %13142 = vmatpush2.bf16.msra.mxu1 %v17619_v24  ;;  %13102 = vmatprep.subr.bf16.mxu0 %v17624_v22  ;;  %v17669_v24 = vld [vmem:[#allocation7 + $0x262c] ss:$16 sps:$4 sm:$0xff]   ;;  %v17664_v22 = vld [vmem:[#allocation7 + $0x2428] ss:$16 sps:$4 sm:$0xff]  }
 0x5f0   :  { %13143 = vmatprep.subr.bf16.mxu1 %v17627_v23  ;;  %v17667_v23 = vld [vmem:[#allocation7 + $0x2628] ss:$16 sps:$4 sm:$0xff]  }
 0x5f2   :  { %13103 = vmatpush2.bf16.msra.mxu0 %v17622_v58  ;;  %v17672_v58 = vld [vmem:[#allocation7 + $0x240c] ss:$16 sps:$4 sm:$0xff]  }
 0x5f3   :  { %13144 = vmatpush2.bf16.msra.mxu1 %v17625_v36  ;;  %13154 = vmatprep.subr.bf16.mxu0 %v17630_v26  ;;  %v17675_v36 = vld [vmem:[#allocation7 + $0x260c] ss:$16 sps:$4 sm:$0xff]   ;;  %v17670_v26 = vld [vmem:[#allocation7 + $0x2408] ss:$16 sps:$4 sm:$0xff]  }
 0x5f4   :  { %13195 = vmatprep.subr.bf16.mxu1 %v17633_v61  ;;  %v17673_v61 = vld [vmem:[#allocation7 + $0x2608] ss:$16 sps:$4 sm:$0xff]  }
 0x5f5   :  { %v12860_v14 = vpop.f32.mrf.mxu0  ;;  %13105 = vmatmul.mubr.bf16.vlgmr.msra.gmra.mxu0 %v18604_v2 }
 0x5f6   :  { %v12901_v47 = vpop.f32.mrf.mxu1  ;;  %13146 = vmatmul.mubr.bf16.vlgmr.msra.gmra.mxu1 %v18608_v63  ;;  %v12861_v55 = vadd.f32 %v12860_v14, %v18779_v53  ;;  %13155 = vmatpush1.bf16.msra.mxu0 %v17628_v32  ;;  %v17678_v32 = vld [vmem:[#allocation7 + $0x25ec] ss:$16 sps:$4 sm:$0xff]  }
 0x5f7   :  { %13196 = vmatpush1.bf16.msra.mxu1 %v17631_v19  ;;  %v12862_v31 = vpop.f32.mrf.mxu0  ;;  %13156 = vmatprep.subr.bf16.mxu0 %v17636_v18  ;;  %v17681_v19 = vld [vmem:[#allocation7 + $0x27ec] ss:$16 sps:$4 sm:$0xff]   ;;  %v17676_v18 = vld [vmem:[#allocation7 + $0x25e8] ss:$16 sps:$4 sm:$0xff]  }
 0x5f8   :  { %v12903_v39 = vpop.f32.mrf.mxu1  ;;  %13197 = vmatprep.subr.bf16.mxu1 %v17639_v44  ;;  %v18789_v4 = vadd.f32 %v12901_v47, %v12861_v55  ;;  %v12863_v1 = vadd.f32 %v12862_v31, %v18784_v33  ;;  %13186 = vmatprep.mubr.bf16.mxu0 %v18610_v37  ;;  %v17646_v33 = vld [vmem:[#allocation7 + $0x2488] ss:$16 sps:$4 sm:$0xff]   ;;  %v17684_v14 = vld [vmem:[#allocation7 + $0x25cc] ss:$16 sps:$4 sm:$0xff]  }
 0x5f9   :  { %13227 = vmatprep.mubr.bf16.mxu1 %v18612_v38  ;;  %v12864_v2 = vpop.f32.mrf.mxu0  ;;  %v17649_v37 = vld [vmem:[#allocation7 + $0x2688] ss:$16 sps:$4 sm:$0xff]   ;;  %v17654_v38 = vld [vmem:[#allocation7 + $0x246c] ss:$16 sps:$4 sm:$0xff]  }
 0x5fa   :  { %v12905_v63 = vpop.f32.mrf.mxu1  ;;  %v18794_v53 = vadd.f32 %v12903_v39, %v12863_v1  ;;  %13157 = vmatpush1.bf16.msra.mxu0 %v17634_v20  ;;  %v17679_v44 = vld [vmem:[#allocation7 + $0x27e8] ss:$16 sps:$4 sm:$0xff]   ;;  %v17687_v47 = vld [vmem:[#allocation7 + $0x27cc] ss:$16 sps:$4 sm:$0xff]  }
 0x5fb   :  { %13198 = vmatpush1.bf16.msra.mxu1 %v17637_v35  ;;  %v12865_v12 = vpop.f32.mrf.mxu0  ;;  %13158 = vmatprep.subr.bf16.mxu0 %v17642_v57  ;;  %v17682_v55 = vld [vmem:[#allocation7 + $0x25c8] ss:$16 sps:$4 sm:$0xff]   ;;  %v17690_v35 = vld [vmem:[#allocation7 + $0x25ac] ss:$16 sps:$4 sm:$0xff]  }
 0x5fc   :  { %v12906_v41 = vpop.f32.mrf.mxu1  ;;  %13199 = vmatprep.subr.bf16.mxu1 %v17645_v46  ;;  %v17685_v20 = vld [vmem:[#allocation7 + $0x27c8] ss:$16 sps:$4 sm:$0xff]   ;;  %v17693_v31 = vld [vmem:[#allocation7 + $0x27ac] ss:$16 sps:$4 sm:$0xff]  }
 0x5fd   :  { %v17688_v39 = vld [vmem:[#allocation7 + $0x25a8] ss:$16 sps:$4 sm:$0xff]   ;;  %v17696_v46 = vld [vmem:[#allocation7 + $0x258c] ss:$16 sps:$4 sm:$0xff]  }
 0x5fe   :  { %13159 = vmatpush1.bf16.msra.mxu0 %v17640_v27  ;;  %v17691_v57 = vld [vmem:[#allocation7 + $0x27a8] ss:$16 sps:$4 sm:$0xff]   ;;  %v17699_v1 = vld [vmem:[#allocation7 + $0x278c] ss:$16 sps:$4 sm:$0xff]  }
 0x5ff   :  { %13200 = vmatpush1.bf16.msra.mxu1 %v17643_v45  ;;  %13160 = vmatprep.subr.bf16.mxu0 %v17648_v9  ;;  %v17694_v2 = vld [vmem:[#allocation7 + $0x2588] ss:$16 sps:$4 sm:$0xff]   ;;  %v17702_v27 = vld [vmem:[#allocation7 + $0x256c] ss:$16 sps:$4 sm:$0xff]  }
 0x600   :  { %13201 = vmatprep.subr.bf16.mxu1 %v17651_v42  ;;  %v17697_v63 = vld [vmem:[#allocation7 + $0x2788] ss:$16 sps:$4 sm:$0xff]   ;;  %v17705_v45 = vld [vmem:[#allocation7 + $0x276c] ss:$16 sps:$4 sm:$0xff]  }
 0x601   :  { %v17700_v12 = vld [vmem:[#allocation7 + $0x2568] ss:$16 sps:$4 sm:$0xff]   ;;  %v17708_v9 = vld [vmem:[#allocation7 + $0x254c] ss:$16 sps:$4 sm:$0xff]  }
 0x602   :  { %13161 = vmatpush1.bf16.msra.mxu0 %v17646_v33  ;;  %v17703_v41 = vld [vmem:[#allocation7 + $0x2768] ss:$16 sps:$4 sm:$0xff]   ;;  %v17711_v42 = vld [vmem:[#allocation7 + $0x274c] ss:$16 sps:$4 sm:$0xff]  }
 0x603   :  { %13202 = vmatpush1.bf16.msra.mxu1 %v17649_v37  ;;  %13162 = vmatprep.subr.bf16.mxu0 %v17654_v38  ;;  %v17706_v33 = vld [vmem:[#allocation7 + $0x2548] ss:$16 sps:$4 sm:$0xff]   ;;  %v17714_v38 = vld [vmem:[#allocation7 + $0x252c] ss:$16 sps:$4 sm:$0xff]  }
 0x604   :  { %13203 = vmatprep.subr.bf16.mxu1 %v17657_v15  ;;  %v17709_v37 = vld [vmem:[#allocation7 + $0x2748] ss:$16 sps:$4 sm:$0xff]   ;;  %v17717_v15 = vld [vmem:[#allocation7 + $0x272c] ss:$16 sps:$4 sm:$0xff]  }
 0x606   :  { %13163 = vmatpush1.bf16.msra.mxu0 %v17652_v3  ;;  %v17712_v3 = vld [vmem:[#allocation7 + $0x2528] ss:$16 sps:$4 sm:$0xff]  }
 0x607   :  { %13204 = vmatpush1.bf16.msra.mxu1 %v17655_v28  ;;  %13164 = vmatprep.subr.bf16.mxu0 %v17660_v5  ;;  %v17715_v28 = vld [vmem:[#allocation7 + $0x2728] ss:$16 sps:$4 sm:$0xff]   ;;  %v17720_v5 = vld [vmem:[#allocation7 + $0x250c] ss:$16 sps:$4 sm:$0xff]  }
 0x608   :  { %13205 = vmatprep.subr.bf16.mxu1 %v17663_v62  ;;  %v17723_v62 = vld [vmem:[#allocation7 + $0x270c] ss:$16 sps:$4 sm:$0xff]  }
 0x60a   :  { %13165 = vmatpush1.bf16.msra.mxu0 %v17658_v16  ;;  %v17718_v16 = vld [vmem:[#allocation7 + $0x2508] ss:$16 sps:$4 sm:$0xff]  }
 0x60b   :  { %13206 = vmatpush1.bf16.msra.mxu1 %v17661_v29  ;;  %13166 = vmatprep.subr.bf16.mxu0 %v17666_v10  ;;  %v17721_v29 = vld [vmem:[#allocation7 + $0x2708] ss:$16 sps:$4 sm:$0xff]   ;;  %v17726_v10 = vld [vmem:[#allocation7 + $0x28ec] ss:$16 sps:$4 sm:$0xff]  }
 0x60c   :  { %13207 = vmatprep.subr.bf16.mxu1 %v17669_v24  ;;  %v17729_v24 = vld [vmem:[#allocation7 + $0x2aec] ss:$16 sps:$4 sm:$0xff]  }
 0x60e   :  { %13167 = vmatpush1.bf16.msra.mxu0 %v17664_v22  ;;  %v17724_v22 = vld [vmem:[#allocation7 + $0x28e8] ss:$16 sps:$4 sm:$0xff]  }
 0x60f   :  { %13208 = vmatpush1.bf16.msra.mxu1 %v17667_v23  ;;  %13168 = vmatprep.subr.bf16.mxu0 %v17672_v58  ;;  %v17727_v23 = vld [vmem:[#allocation7 + $0x2ae8] ss:$16 sps:$4 sm:$0xff]   ;;  %v17732_v58 = vld [vmem:[#allocation7 + $0x28cc] ss:$16 sps:$4 sm:$0xff]  }
 0x610   :  { %13209 = vmatprep.subr.bf16.mxu1 %v17675_v36  ;;  %v17735_v36 = vld [vmem:[#allocation7 + $0x2acc] ss:$16 sps:$4 sm:$0xff]  }
 0x612   :  { %13169 = vmatpush1.bf16.msra.mxu0 %v17670_v26 }
 0x613   :  { %13210 = vmatpush1.bf16.msra.mxu1 %v17673_v61  ;;  %13170 = vmatprep.subr.bf16.mxu0 %v17678_v32 }
 0x614   :  { %13211 = vmatprep.subr.bf16.mxu1 %v17681_v19  ;;  %v17730_v19 = vld [vmem:[#allocation7 + $0x28c8] ss:$16 sps:$4 sm:$0xff]  }
 0x616   :  { %13171 = vmatpush2.bf16.msra.mxu0 %v17676_v18  ;;  %v17733_v18 = vld [vmem:[#allocation7 + $0x2ac8] ss:$16 sps:$4 sm:$0xff]  }
 0x617   :  { %13212 = vmatpush2.bf16.msra.mxu1 %v17679_v44  ;;  %13172 = vmatprep.subr.bf16.mxu0 %v17684_v14 }
 0x618   :  { %13213 = vmatprep.subr.bf16.mxu1 %v17687_v47  ;;  %v17738_v47 = vld [vmem:[#allocation7 + $0x28ac] ss:$16 sps:$4 sm:$0xff]  }
 0x61a   :  { %13173 = vmatpush2.bf16.msra.mxu0 %v17682_v55  ;;  %v17741_v55 = vld [vmem:[#allocation7 + $0x2aac] ss:$16 sps:$4 sm:$0xff]  }
 0x61b   :  { %13214 = vmatpush2.bf16.msra.mxu1 %v17685_v20  ;;  %13174 = vmatprep.subr.bf16.mxu0 %v17690_v35 }
 0x61c   :  { %13215 = vmatprep.subr.bf16.mxu1 %v17693_v31  ;;  %v17736_v31 = vld [vmem:[#allocation7 + $0x28a8] ss:$16 sps:$4 sm:$0xff]  }
 0x61e   :  { %13175 = vmatpush2.bf16.msra.mxu0 %v17688_v39  ;;  %v17739_v39 = vld [vmem:[#allocation7 + $0x2aa8] ss:$16 sps:$4 sm:$0xff]  }
 0x61f   :  { %13216 = vmatpush2.bf16.msra.mxu1 %v17691_v57  ;;  %13176 = vmatprep.subr.bf16.mxu0 %v17696_v46 }
 0x620   :  { %13217 = vmatprep.subr.bf16.mxu1 %v17699_v1  ;;  %v17744_v1 = vld [vmem:[#allocation7 + $0x288c] ss:$16 sps:$4 sm:$0xff]  }
 0x622   :  { %13177 = vmatpush2.bf16.msra.mxu0 %v17694_v2  ;;  %v17747_v2 = vld [vmem:[#allocation7 + $0x2a8c] ss:$16 sps:$4 sm:$0xff]  }
 0x623   :  { %13218 = vmatpush2.bf16.msra.mxu1 %v17697_v63  ;;  %13178 = vmatprep.subr.bf16.mxu0 %v17702_v27  ;;  %v17750_v63 = vld [vmem:[#allocation7 + $0x286c] ss:$16 sps:$4 sm:$0xff]  }
 0x624   :  { %13219 = vmatprep.subr.bf16.mxu1 %v17705_v45  ;;  %v17753_v27 = vld [vmem:[#allocation7 + $0x2a6c] ss:$16 sps:$4 sm:$0xff]   ;;  %v17748_v45 = vld [vmem:[#allocation7 + $0x2868] ss:$16 sps:$4 sm:$0xff]  }
 0x626   :  { %13179 = vmatpush2.bf16.msra.mxu0 %v17700_v12  ;;  %v17751_v12 = vld [vmem:[#allocation7 + $0x2a68] ss:$16 sps:$4 sm:$0xff]  }
 0x627   :  { %13220 = vmatpush2.bf16.msra.mxu1 %v17703_v41  ;;  %13180 = vmatprep.subr.bf16.mxu0 %v17708_v9  ;;  %v17756_v41 = vld [vmem:[#allocation7 + $0x284c] ss:$16 sps:$4 sm:$0xff]  }
 0x628   :  { %13221 = vmatprep.subr.bf16.mxu1 %v17711_v42  ;;  %v17759_v9 = vld [vmem:[#allocation7 + $0x2a4c] ss:$16 sps:$4 sm:$0xff]   ;;  %v17754_v42 = vld [vmem:[#allocation7 + $0x2848] ss:$16 sps:$4 sm:$0xff]  }
 0x62a   :  { %13181 = vmatpush2.bf16.msra.mxu0 %v17706_v33  ;;  %v17757_v33 = vld [vmem:[#allocation7 + $0x2a48] ss:$16 sps:$4 sm:$0xff]  }
 0x62b   :  { %13222 = vmatpush2.bf16.msra.mxu1 %v17709_v37  ;;  %13182 = vmatprep.subr.bf16.mxu0 %v17714_v38  ;;  %v17762_v37 = vld [vmem:[#allocation7 + $0x282c] ss:$16 sps:$4 sm:$0xff]  }
 0x62c   :  { %13223 = vmatprep.subr.bf16.mxu1 %v17717_v15  ;;  %v17765_v38 = vld [vmem:[#allocation7 + $0x2a2c] ss:$16 sps:$4 sm:$0xff]   ;;  %v17760_v15 = vld [vmem:[#allocation7 + $0x2828] ss:$16 sps:$4 sm:$0xff]  }
 0x62e   :  { %13183 = vmatpush2.bf16.msra.mxu0 %v17712_v3  ;;  %v17763_v3 = vld [vmem:[#allocation7 + $0x2a28] ss:$16 sps:$4 sm:$0xff]  }
 0x62f   :  { %13224 = vmatpush2.bf16.msra.mxu1 %v17715_v28  ;;  %13184 = vmatprep.subr.bf16.mxu0 %v17720_v5  ;;  %v17768_v28 = vld [vmem:[#allocation7 + $0x280c] ss:$16 sps:$4 sm:$0xff]  }
 0x630   :  { %13225 = vmatprep.subr.bf16.mxu1 %v17723_v62  ;;  %v17771_v5 = vld [vmem:[#allocation7 + $0x2a0c] ss:$16 sps:$4 sm:$0xff]   ;;  %v17766_v62 = vld [vmem:[#allocation7 + $0x2808] ss:$16 sps:$4 sm:$0xff]  }
 0x632   :  { %13185 = vmatpush2.bf16.msra.mxu0 %v17718_v16  ;;  %v17769_v16 = vld [vmem:[#allocation7 + $0x2a08] ss:$16 sps:$4 sm:$0xff]  }
 0x633   :  { %13226 = vmatpush2.bf16.msra.mxu1 %v17721_v29  ;;  %13236 = vmatprep.subr.bf16.mxu0 %v17726_v10  ;;  %v17774_v29 = vld [vmem:[#allocation7 + $0x29ec] ss:$16 sps:$4 sm:$0xff]  }
 0x634   :  { %13277 = vmatprep.subr.bf16.mxu1 %v17729_v24  ;;  %v17777_v10 = vld [vmem:[#allocation7 + $0x2bec] ss:$16 sps:$4 sm:$0xff]   ;;  %v17772_v24 = vld [vmem:[#allocation7 + $0x29e8] ss:$16 sps:$4 sm:$0xff]  }
 0x635   :  { %v12942_v26 = vpop.f32.mrf.mxu0  ;;  %13187 = vmatmul.mubr.bf16.vlgmr.msra.gmra.mxu0 %v18637_v0 }
 0x636   :  { %v12983_v61 = vpop.f32.mrf.mxu1  ;;  %13228 = vmatmul.mubr.bf16.vlgmr.msra.gmra.mxu1 %v18641_v6  ;;  %v12943_v32 = vadd.f32 %v12942_v26, %v18789_v4  ;;  %13237 = vmatpush1.bf16.msra.mxu0 %v17724_v22  ;;  %v17775_v22 = vld [vmem:[#allocation7 + $0x2be8] ss:$16 sps:$4 sm:$0xff]  }
 0x637   :  { %13278 = vmatpush1.bf16.msra.mxu1 %v17727_v23  ;;  %v12944_v44 = vpop.f32.mrf.mxu0  ;;  %13238 = vmatprep.subr.bf16.mxu0 %v17732_v58  ;;  %v17780_v23 = vld [vmem:[#allocation7 + $0x29cc] ss:$16 sps:$4 sm:$0xff]   ;;  %v17781_v26 = vld [vmem:[#allocation7 + $0x2bc8] ss:$16 sps:$4 sm:$0xff]  }
 0x638   :  { %v12985_v14 = vpop.f32.mrf.mxu1  ;;  %13279 = vmatprep.subr.bf16.mxu1 %v17735_v36  ;;  %v18799_v20 = vadd.f32 %v12983_v61, %v12943_v32  ;;  %v12945_v35 = vadd.f32 %v12944_v44, %v18794_v53  ;;  %13268 = vmatprep.mubr.bf16.mxu0 %v18645_v7  ;;  %v17742_v7 = vld [vmem:[#allocation7 + $0x2888] ss:$16 sps:$4 sm:$0xff]   ;;  %v17783_v58 = vld [vmem:[#allocation7 + $0x2bcc] ss:$16 sps:$4 sm:$0xff]  }
 0x639   :  { %13309 = vmatprep.mubr.bf16.mxu1 %v18647_v8  ;;  %v12946_v0 = vpop.f32.mrf.mxu0  ;;  %v17745_v8 = vld [vmem:[#allocation7 + $0x2a88] ss:$16 sps:$4 sm:$0xff]   ;;  %v17786_v61 = vld [vmem:[#allocation7 + $0x29ac] ss:$16 sps:$4 sm:$0xff]  }
 0x63a   :  { %v12987_v6 = vpop.f32.mrf.mxu1  ;;  %v18804_v4 = vadd.f32 %v12985_v14, %v12945_v35  ;;  %13239 = vmatpush1.bf16.msra.mxu0 %v17730_v19  ;;  %v17778_v36 = vld [vmem:[#allocation7 + $0x29c8] ss:$16 sps:$4 sm:$0xff]   ;;  %v17789_v32 = vld [vmem:[#allocation7 + $0x2bac] ss:$16 sps:$4 sm:$0xff]  }
 0x63b   :  { %13280 = vmatpush1.bf16.msra.mxu1 %v17733_v18  ;;  %v12947_v57 = vpop.f32.mrf.mxu0  ;;  %13240 = vmatprep.subr.bf16.mxu0 %v17738_v47  ;;  %v17784_v19 = vld [vmem:[#allocation7 + $0x29a8] ss:$16 sps:$4 sm:$0xff]   ;;  %v17792_v44 = vld [vmem:[#allocation7 + $0x298c] ss:$16 sps:$4 sm:$0xff]  }
 0x63c   :  { %v12988_v46 = vpop.f32.mrf.mxu1  ;;  %13281 = vmatprep.subr.bf16.mxu1 %v17741_v55  ;;  %v13568_v53 = vcombine.low %v18799_v20, %v18804_v4  ;;  %v17787_v18 = vld [vmem:[#allocation7 + $0x2ba8] ss:$16 sps:$4 sm:$0xff]   ;;  %v17795_v14 = vld [vmem:[#allocation7 + $0x2b8c] ss:$16 sps:$4 sm:$0xff]  }
 0x63d   :  { %v17790_v47 = vld [vmem:[#allocation7 + $0x2988] ss:$16 sps:$4 sm:$0xff]   ;;  %v17798_v35 = vld [vmem:[#allocation7 + $0x296c] ss:$16 sps:$4 sm:$0xff]  }
 0x63e   :  { %13241 = vmatpush1.bf16.msra.mxu0 %v17736_v31  ;;  %v17793_v55 = vld [vmem:[#allocation7 + $0x2b88] ss:$16 sps:$4 sm:$0xff]   ;;  %v17801_v0 = vld [vmem:[#allocation7 + $0x2b6c] ss:$16 sps:$4 sm:$0xff]  }
 0x63f   :  { %13282 = vmatpush1.bf16.msra.mxu1 %v17739_v39  ;;  %13242 = vmatprep.subr.bf16.mxu0 %v17744_v1  ;;  %v17796_v6 = vld [vmem:[#allocation7 + $0x2968] ss:$16 sps:$4 sm:$0xff]   ;;  %v17804_v39 = vld [vmem:[#allocation7 + $0x294c] ss:$16 sps:$4 sm:$0xff]  }
 0x640   :  { %13283 = vmatprep.subr.bf16.mxu1 %v17747_v2  ;;  %v17799_v31 = vld [vmem:[#allocation7 + $0x2b68] ss:$16 sps:$4 sm:$0xff]   ;;  %v17807_v57 = vld [vmem:[#allocation7 + $0x2b4c] ss:$16 sps:$4 sm:$0xff]  }
 0x641   :  { %v17802_v46 = vld [vmem:[#allocation7 + $0x2948] ss:$16 sps:$4 sm:$0xff]   ;;  %v17810_v2 = vld [vmem:[#allocation7 + $0x292c] ss:$16 sps:$4 sm:$0xff]  }
 0x642   :  { %13243 = vmatpush1.bf16.msra.mxu0 %v17742_v7  ;;  %v17805_v1 = vld [vmem:[#allocation7 + $0x2b48] ss:$16 sps:$4 sm:$0xff]   ;;  %v17813_v7 = vld [vmem:[#allocation7 + $0x2b2c] ss:$16 sps:$4 sm:$0xff]  }
 0x643   :  { %13284 = vmatpush1.bf16.msra.mxu1 %v17745_v8  ;;  %13244 = vmatprep.subr.bf16.mxu0 %v17750_v63  ;;  %v17808_v8 = vld [vmem:[#allocation7 + $0x2928] ss:$16 sps:$4 sm:$0xff]  }
 0x644   :  { %13285 = vmatprep.subr.bf16.mxu1 %v17753_v27  ;;  %v17811_v63 = vld [vmem:[#allocation7 + $0x2b28] ss:$16 sps:$4 sm:$0xff]   ;;  %v17816_v27 = vld [vmem:[#allocation7 + $0x290c] ss:$16 sps:$4 sm:$0xff]  }
 0x646   :  { %13245 = vmatpush1.bf16.msra.mxu0 %v17748_v45  ;;  %v17819_v45 = vld [vmem:[#allocation7 + $0x2b0c] ss:$16 sps:$4 sm:$0xff]  }
 0x647   :  { %13286 = vmatpush1.bf16.msra.mxu1 %v17751_v12  ;;  %13246 = vmatprep.subr.bf16.mxu0 %v17756_v41  ;;  %v17814_v12 = vld [vmem:[#allocation7 + $0x2908] ss:$16 sps:$4 sm:$0xff]  }
 0x648   :  { %13287 = vmatprep.subr.bf16.mxu1 %v17759_v9  ;;  %v17817_v41 = vld [vmem:[#allocation7 + $0x2b08] ss:$16 sps:$4 sm:$0xff]   ;;  %v17822_v9 = vld [vmem:[#allocation7 + $0x2cec] ss:$16 sps:$4 sm:$0xff]  }
 0x64a   :  { %13247 = vmatpush1.bf16.msra.mxu0 %v17754_v42  ;;  %v17825_v42 = vld [vmem:[#allocation7 + $0x2eec] ss:$16 sps:$4 sm:$0xff]  }
 0x64b   :  { %13288 = vmatpush1.bf16.msra.mxu1 %v17757_v33  ;;  %13248 = vmatprep.subr.bf16.mxu0 %v17762_v37  ;;  %v18109_v33 = vld [vmem:[#allocation8 + $0x4] sm:$0xf] }
 0x64c   :  { %13289 = vmatprep.subr.bf16.mxu1 %v17765_v38  ;;  %v7927_v37 = vrot.slane %v18109_v33, %v2252_v30  ;;  %v17820_v38 = vld [vmem:[#allocation7 + $0x2ce8] ss:$16 sps:$4 sm:$0xff]  }
 0x64d   :  { %v17829_v30 = vld [vmem:[#allocation7 + $0x2ec8] ss:$16 sps:$4 sm:$0xff]  }
 0x64e   :  { %13249 = vmatpush1.bf16.msra.mxu0 %v17760_v15  ;;  %v17823_v15 = vld [vmem:[#allocation7 + $0x2ee8] ss:$16 sps:$4 sm:$0xff]  }
 0x64f   :  { %13290 = vmatpush1.bf16.msra.mxu1 %v17763_v3  ;;  %13250 = vmatprep.subr.bf16.mxu0 %v17768_v28  ;;  %v17828_v3 = vld [vmem:[#allocation7 + $0x2ccc] ss:$16 sps:$4 sm:$0xff]  }
 0x650   :  { %13291 = vmatprep.subr.bf16.mxu1 %v17771_v5  ;;  %v17831_v28 = vld [vmem:[#allocation7 + $0x2ecc] ss:$16 sps:$4 sm:$0xff]   ;;  %v7931_v5 = vrot.slane %v18109_v33, %v2256_v52 }
 0x651   :  { %v17879_v33 = vld [vmem:[#allocation7 + $0x2fcc] ss:$16 sps:$4 sm:$0xff]  }
 0x652   :  { %13251 = vmatpush1.bf16.msra.mxu0 %v17766_v62 }
 0x653   :  { %13292 = vmatpush1.bf16.msra.mxu1 %v17769_v16  ;;  %13252 = vmatprep.subr.bf16.mxu0 %v17774_v29 }
 0x654   :  { %13293 = vmatprep.subr.bf16.mxu1 %v17777_v10  ;;  %v17826_v10 = vld [vmem:[#allocation7 + $0x2cc8] ss:$16 sps:$4 sm:$0xff]  }
 0x656   :  { %13253 = vmatpush2.bf16.msra.mxu0 %v17772_v24 }
 0x657   :  { %13294 = vmatpush2.bf16.msra.mxu1 %v17775_v22  ;;  %13254 = vmatprep.subr.bf16.mxu0 %v17780_v23  ;;  %v17834_v23 = vld [vmem:[#allocation7 + $0x2cac] ss:$16 sps:$4 sm:$0xff]  }
 0x658   :  { %13295 = vmatprep.subr.bf16.mxu1 %v17783_v58  ;;  %v17837_v58 = vld [vmem:[#allocation7 + $0x2eac] ss:$16 sps:$4 sm:$0xff]  }
 0x65a   :  { %13255 = vmatpush2.bf16.msra.mxu0 %v17778_v36 }
 0x65b   :  { %13296 = vmatpush2.bf16.msra.mxu1 %v17781_v26  ;;  %13256 = vmatprep.subr.bf16.mxu0 %v17786_v61  ;;  %v17832_v26 = vld [vmem:[#allocation7 + $0x2ca8] ss:$16 sps:$4 sm:$0xff]  }
 0x65c   :  { %13297 = vmatprep.subr.bf16.mxu1 %v17789_v32  ;;  %v17835_v61 = vld [vmem:[#allocation7 + $0x2ea8] ss:$16 sps:$4 sm:$0xff]  }
 0x65e   :  { %13257 = vmatpush2.bf16.msra.mxu0 %v17784_v19 }
 0x65f   :  { %13298 = vmatpush2.bf16.msra.mxu1 %v17787_v18  ;;  %13258 = vmatprep.subr.bf16.mxu0 %v17792_v44  ;;  %v17840_v18 = vld [vmem:[#allocation7 + $0x2c8c] ss:$16 sps:$4 sm:$0xff]  }
 0x660   :  { %13299 = vmatprep.subr.bf16.mxu1 %v17795_v14  ;;  %v17843_v44 = vld [vmem:[#allocation7 + $0x2e8c] ss:$16 sps:$4 sm:$0xff]   ;;  %v17838_v14 = vld [vmem:[#allocation7 + $0x2c88] ss:$16 sps:$4 sm:$0xff]  }
 0x662   :  { %13259 = vmatpush2.bf16.msra.mxu0 %v17790_v47  ;;  %v17849_v47 = vld [vmem:[#allocation7 + $0x2e6c] ss:$16 sps:$4 sm:$0xff]  }
 0x663   :  { %13300 = vmatpush2.bf16.msra.mxu1 %v17793_v55  ;;  %13260 = vmatprep.subr.bf16.mxu0 %v17798_v35  ;;  %v17844_v55 = vld [vmem:[#allocation7 + $0x2c68] ss:$16 sps:$4 sm:$0xff]  }
 0x664   :  { %13301 = vmatprep.subr.bf16.mxu1 %v17801_v0  ;;  %v17847_v35 = vld [vmem:[#allocation7 + $0x2e68] ss:$16 sps:$4 sm:$0xff]   ;;  %v17852_v0 = vld [vmem:[#allocation7 + $0x2c4c] ss:$16 sps:$4 sm:$0xff]  }
 0x666   :  { %13261 = vmatpush2.bf16.msra.mxu0 %v17796_v6  ;;  %v17855_v6 = vld [vmem:[#allocation7 + $0x2e4c] ss:$16 sps:$4 sm:$0xff]  }
 0x667   :  { %13302 = vmatpush2.bf16.msra.mxu1 %v17799_v31  ;;  %13262 = vmatprep.subr.bf16.mxu0 %v17804_v39  ;;  %v17850_v31 = vld [vmem:[#allocation7 + $0x2c48] ss:$16 sps:$4 sm:$0xff]  }
 0x668   :  { %13303 = vmatprep.subr.bf16.mxu1 %v17807_v57  ;;  %v17853_v39 = vld [vmem:[#allocation7 + $0x2e48] ss:$16 sps:$4 sm:$0xff]   ;;  %v17858_v57 = vld [vmem:[#allocation7 + $0x2c2c] ss:$16 sps:$4 sm:$0xff]  }
 0x66a   :  { %13263 = vmatpush2.bf16.msra.mxu0 %v17802_v46  ;;  %v17861_v46 = vld [vmem:[#allocation7 + $0x2e2c] ss:$16 sps:$4 sm:$0xff]  }
 0x66b   :  { %13304 = vmatpush2.bf16.msra.mxu1 %v17805_v1  ;;  %13264 = vmatprep.subr.bf16.mxu0 %v17810_v2  ;;  %v17856_v1 = vld [vmem:[#allocation7 + $0x2c28] ss:$16 sps:$4 sm:$0xff]  }
 0x66c   :  { %13305 = vmatprep.subr.bf16.mxu1 %v17813_v7  ;;  %v17859_v2 = vld [vmem:[#allocation7 + $0x2e28] ss:$16 sps:$4 sm:$0xff]   ;;  %v17864_v7 = vld [vmem:[#allocation7 + $0x2c0c] ss:$16 sps:$4 sm:$0xff]  }
 0x66e   :  { %13265 = vmatpush2.bf16.msra.mxu0 %v17808_v8  ;;  %v17867_v8 = vld [vmem:[#allocation7 + $0x2e0c] ss:$16 sps:$4 sm:$0xff]  }
 0x66f   :  { %13306 = vmatpush2.bf16.msra.mxu1 %v17811_v63  ;;  %13266 = vmatprep.subr.bf16.mxu0 %v17816_v27  ;;  %v17862_v63 = vld [vmem:[#allocation7 + $0x2c08] ss:$16 sps:$4 sm:$0xff]  }
 0x670   :  { %13307 = vmatprep.subr.bf16.mxu1 %v17819_v45  ;;  %v17865_v27 = vld [vmem:[#allocation7 + $0x2e08] ss:$16 sps:$4 sm:$0xff]   ;;  %v17870_v45 = vld [vmem:[#allocation7 + $0x2dec] ss:$16 sps:$4 sm:$0xff]  }
 0x672   :  { %13267 = vmatpush2.bf16.msra.mxu0 %v17814_v12  ;;  %v17873_v12 = vld [vmem:[#allocation7 + $0x2fec] ss:$16 sps:$4 sm:$0xff]  }
 0x673   :  { %13308 = vmatpush2.bf16.msra.mxu1 %v17817_v41  ;;  %13318 = vmatprep.subr.bf16.mxu0 %v17822_v9  ;;  %v17868_v41 = vld [vmem:[#allocation7 + $0x2de8] ss:$16 sps:$4 sm:$0xff]  }
 0x674   :  { %13359 = vmatprep.subr.bf16.mxu1 %v17825_v42  ;;  %v17871_v9 = vld [vmem:[#allocation7 + $0x2fe8] ss:$16 sps:$4 sm:$0xff]   ;;  %v17876_v42 = vld [vmem:[#allocation7 + $0x2dcc] ss:$16 sps:$4 sm:$0xff]  }
 0x675   :  { %v13024_v62 = vpop.f32.mrf.mxu0  ;;  %13269 = vmatmul.mubr.bf16.vlgmr.msra.gmra.mxu0 %v18672_v51 }
 0x676   :  { %v13065_v16 = vpop.f32.mrf.mxu1  ;;  %13310 = vmatmul.mubr.bf16.vlgmr.msra.gmra.mxu1 %v18676_v21  ;;  %v13025_v29 = vadd.f32 %v13024_v62, %v7927_v37  ;;  %13319 = vmatpush1.bf16.msra.mxu0 %v17820_v38  ;;  %v17874_v37 = vld [vmem:[#allocation7 + $0x2dc8] ss:$16 sps:$4 sm:$0xff]   ;;  %v17888_v62 = vld [vmem:[#allocation7 + $0x2d8c] ss:$16 sps:$4 sm:$0xff]  }
 0x677   :  { %13360 = vmatpush1.bf16.msra.mxu1 %v17823_v15  ;;  %v13026_v24 = vpop.f32.mrf.mxu0  ;;  %13320 = vmatprep.subr.bf16.mxu0 %v17828_v3  ;;  %v17877_v38 = vld [vmem:[#allocation7 + $0x2fc8] ss:$16 sps:$4 sm:$0xff]   ;;  %v17882_v15 = vld [vmem:[#allocation7 + $0x2dac] ss:$16 sps:$4 sm:$0xff]  }
 0x678   :  { %v13067_v22 = vpop.f32.mrf.mxu1  ;;  %13361 = vmatprep.subr.bf16.mxu1 %v17831_v28  ;;  %v18814_v36 = vadd.f32 %v13065_v16, %v13025_v29  ;;  %v13027_v43 = vadd.f32 %v13026_v24, %v7931_v5  ;;  %13350 = vmatprep.mubr.bf16.mxu0 %v18682_v59  ;;  %v17841_v59 = vld [vmem:[#allocation7 + $0x2e88] ss:$16 sps:$4 sm:$0xff]   ;;  %v17885_v3 = vld [vmem:[#allocation7 + $0x2fac] ss:$16 sps:$4 sm:$0xff]  }
 0x679   :  { %13391 = vmatprep.mubr.bf16.mxu1 %v18684_v11  ;;  %v13028_v52 = vpop.f32.mrf.mxu0  ;;  %v17846_v11 = vld [vmem:[#allocation7 + $0x2c6c] ss:$16 sps:$4 sm:$0xff]   ;;  %v17880_v28 = vld [vmem:[#allocation7 + $0x2da8] ss:$16 sps:$4 sm:$0xff]  }
 0x67a   :  { %v13069_v51 = vpop.f32.mrf.mxu1  ;;  %v18818_v21 = vadd.f32 %v13067_v22, %v13027_v43  ;;  %13321 = vmatpush1.bf16.msra.mxu0 %v17826_v10  ;;  %v17883_v5 = vld [vmem:[#allocation7 + $0x2fa8] ss:$16 sps:$4 sm:$0xff]   ;;  %v17891_v16 = vld [vmem:[#allocation7 + $0x2f8c] ss:$16 sps:$4 sm:$0xff]  }
 0x67b   :  { %13362 = vmatpush1.bf16.msra.mxu1 %v17829_v30  ;;  %v13029_v32 = vpop.f32.mrf.mxu0  ;;  %13322 = vmatprep.subr.bf16.mxu0 %v17834_v23  ;;  %v17886_v29 = vld [vmem:[#allocation7 + $0x2d88] ss:$16 sps:$4 sm:$0xff]   ;;  %v17894_v30 = vld [vmem:[#allocation7 + $0x2d6c] ss:$16 sps:$4 sm:$0xff]  }
 0x67c   :  { %v13070_v19 = vpop.f32.mrf.mxu1  ;;  %13363 = vmatprep.subr.bf16.mxu1 %v17837_v58  ;;  %v17889_v10 = vld [vmem:[#allocation7 + $0x2f88] ss:$16 sps:$4 sm:$0xff]   ;;  %v17897_v24 = vld [vmem:[#allocation7 + $0x2f6c] ss:$16 sps:$4 sm:$0xff]  }
 0x67d   :  { %v17892_v22 = vld [vmem:[#allocation7 + $0x2d68] ss:$16 sps:$4 sm:$0xff]   ;;  %v17900_v58 = vld [vmem:[#allocation7 + $0x2d4c] ss:$16 sps:$4 sm:$0xff]  }
 0x67e   :  { %13323 = vmatpush1.bf16.msra.mxu0 %v17832_v26  ;;  %v17895_v23 = vld [vmem:[#allocation7 + $0x2f68] ss:$16 sps:$4 sm:$0xff]   ;;  %v17903_v43 = vld [vmem:[#allocation7 + $0x2f4c] ss:$16 sps:$4 sm:$0xff]  }
 0x67f   :  { %13364 = vmatpush1.bf16.msra.mxu1 %v17835_v61  ;;  %13324 = vmatprep.subr.bf16.mxu0 %v17840_v18  ;;  %v17898_v52 = vld [vmem:[#allocation7 + $0x2d48] ss:$16 sps:$4 sm:$0xff]   ;;  %v17906_v26 = vld [vmem:[#allocation7 + $0x2d2c] ss:$16 sps:$4 sm:$0xff]  }
 0x680   :  { %13365 = vmatprep.subr.bf16.mxu1 %v17843_v44  ;;  %v17901_v51 = vld [vmem:[#allocation7 + $0x2f48] ss:$16 sps:$4 sm:$0xff]   ;;  %v17909_v61 = vld [vmem:[#allocation7 + $0x2f2c] ss:$16 sps:$4 sm:$0xff]  }
 0x681   :  { %v17904_v32 = vld [vmem:[#allocation7 + $0x2d28] ss:$16 sps:$4 sm:$0xff]   ;;  %v17912_v18 = vld [vmem:[#allocation7 + $0x2d0c] ss:$16 sps:$4 sm:$0xff]  }
 0x682   :  { %13325 = vmatpush1.bf16.msra.mxu0 %v17838_v14  ;;  %v17907_v19 = vld [vmem:[#allocation7 + $0x2f28] ss:$16 sps:$4 sm:$0xff]   ;;  %v17915_v44 = vld [vmem:[#allocation7 + $0x2f0c] ss:$16 sps:$4 sm:$0xff]  }
 0x683   :  { %13366 = vmatpush1.bf16.msra.mxu1 %v17841_v59  ;;  %13326 = vmatprep.subr.bf16.mxu0 %v17846_v11  ;;  %v17910_v14 = vld [vmem:[#allocation7 + $0x2d08] ss:$16 sps:$4 sm:$0xff]   ;;  %v17918_v11 = vld [vmem:[#allocation7 + $0x30ec] ss:$16 sps:$4 sm:$0xff]  }
 0x684   :  { %13367 = vmatprep.subr.bf16.mxu1 %v17849_v47  ;;  %v17913_v59 = vld [vmem:[#allocation7 + $0x2f08] ss:$16 sps:$4 sm:$0xff]   ;;  %v17921_v47 = vld [vmem:[#allocation7 + $0x32ec] ss:$16 sps:$4 sm:$0xff]  }
 0x686   :  { %13327 = vmatpush1.bf16.msra.mxu0 %v17844_v55  ;;  %v17916_v55 = vld [vmem:[#allocation7 + $0x30e8] ss:$16 sps:$4 sm:$0xff]  }
 0x687   :  { %13368 = vmatpush1.bf16.msra.mxu1 %v17847_v35  ;;  %13328 = vmatprep.subr.bf16.mxu0 %v17852_v0  ;;  %v17919_v35 = vld [vmem:[#allocation7 + $0x32e8] ss:$16 sps:$4 sm:$0xff]   ;;  %v17924_v0 = vld [vmem:[#allocation7 + $0x30cc] ss:$16 sps:$4 sm:$0xff]  }
 0x688   :  { %13369 = vmatprep.subr.bf16.mxu1 %v17855_v6  ;;  %v17927_v6 = vld [vmem:[#allocation7 + $0x32cc] ss:$16 sps:$4 sm:$0xff]  }
 0x68a   :  { %13329 = vmatpush1.bf16.msra.mxu0 %v17850_v31 }
 0x68b   :  { %13370 = vmatpush1.bf16.msra.mxu1 %v17853_v39  ;;  %13330 = vmatprep.subr.bf16.mxu0 %v17858_v57 }
 0x68c   :  { %13371 = vmatprep.subr.bf16.mxu1 %v17861_v46  ;;  %v17922_v46 = vld [vmem:[#allocation7 + $0x30c8] ss:$16 sps:$4 sm:$0xff]  }
 0x68e   :  { %13331 = vmatpush1.bf16.msra.mxu0 %v17856_v1  ;;  %v17925_v1 = vld [vmem:[#allocation7 + $0x32c8] ss:$16 sps:$4 sm:$0xff]  }
 0x68f   :  { %13372 = vmatpush1.bf16.msra.mxu1 %v17859_v2  ;;  %13332 = vmatprep.subr.bf16.mxu0 %v17864_v7 }
 0x690   :  { %13373 = vmatprep.subr.bf16.mxu1 %v17867_v8  ;;  %v17930_v8 = vld [vmem:[#allocation7 + $0x30ac] ss:$16 sps:$4 sm:$0xff]  }
 0x692   :  { %13333 = vmatpush1.bf16.msra.mxu0 %v17862_v63  ;;  %v17933_v63 = vld [vmem:[#allocation7 + $0x32ac] ss:$16 sps:$4 sm:$0xff]  }
 0x693   :  { %13374 = vmatpush1.bf16.msra.mxu1 %v17865_v27  ;;  %13334 = vmatprep.subr.bf16.mxu0 %v17870_v45 }
 0x694   :  { %13375 = vmatprep.subr.bf16.mxu1 %v17873_v12  ;;  %v17928_v12 = vld [vmem:[#allocation7 + $0x30a8] ss:$16 sps:$4 sm:$0xff]  }
 0x696   :  { %13335 = vmatpush2.bf16.msra.mxu0 %v17868_v41  ;;  %v17931_v41 = vld [vmem:[#allocation7 + $0x32a8] ss:$16 sps:$4 sm:$0xff]  }
 0x697   :  { %13376 = vmatpush2.bf16.msra.mxu1 %v17871_v9  ;;  %13336 = vmatprep.subr.bf16.mxu0 %v17876_v42 }
 0x698   :  { %13377 = vmatprep.subr.bf16.mxu1 %v17879_v33  ;;  %v17936_v33 = vld [vmem:[#allocation7 + $0x308c] ss:$16 sps:$4 sm:$0xff]  }
 0x69a   :  { %13337 = vmatpush2.bf16.msra.mxu0 %v17874_v37  ;;  %v17939_v37 = vld [vmem:[#allocation7 + $0x328c] ss:$16 sps:$4 sm:$0xff]  }
 0x69b   :  { %13378 = vmatpush2.bf16.msra.mxu1 %v17877_v38  ;;  %13338 = vmatprep.subr.bf16.mxu0 %v17882_v15  ;;  %v17945_v38 = vld [vmem:[#allocation7 + $0x326c] ss:$16 sps:$4 sm:$0xff]   ;;  %v17940_v15 = vld [vmem:[#allocation7 + $0x3068] ss:$16 sps:$4 sm:$0xff]  }
 0x69c   :  { %13379 = vmatprep.subr.bf16.mxu1 %v17885_v3  ;;  %v17943_v3 = vld [vmem:[#allocation7 + $0x3268] ss:$16 sps:$4 sm:$0xff]  }
 0x69e   :  { %13339 = vmatpush2.bf16.msra.mxu0 %v17880_v28  ;;  %v17948_v28 = vld [vmem:[#allocation7 + $0x304c] ss:$16 sps:$4 sm:$0xff]  }
 0x69f   :  { %13380 = vmatpush2.bf16.msra.mxu1 %v17883_v5  ;;  %13340 = vmatprep.subr.bf16.mxu0 %v17888_v62  ;;  %v17951_v5 = vld [vmem:[#allocation7 + $0x324c] ss:$16 sps:$4 sm:$0xff]   ;;  %v17946_v62 = vld [vmem:[#allocation7 + $0x3048] ss:$16 sps:$4 sm:$0xff]  }
 0x6a0   :  { %13381 = vmatprep.subr.bf16.mxu1 %v17891_v16  ;;  %v17949_v16 = vld [vmem:[#allocation7 + $0x3248] ss:$16 sps:$4 sm:$0xff]  }
 0x6a2   :  { %13341 = vmatpush2.bf16.msra.mxu0 %v17886_v29  ;;  %v17954_v29 = vld [vmem:[#allocation7 + $0x302c] ss:$16 sps:$4 sm:$0xff]  }
 0x6a3   :  { %13382 = vmatpush2.bf16.msra.mxu1 %v17889_v10  ;;  %13342 = vmatprep.subr.bf16.mxu0 %v17894_v30  ;;  %v17957_v10 = vld [vmem:[#allocation7 + $0x322c] ss:$16 sps:$4 sm:$0xff]   ;;  %v17952_v30 = vld [vmem:[#allocation7 + $0x3028] ss:$16 sps:$4 sm:$0xff]  }
 0x6a4   :  { %13383 = vmatprep.subr.bf16.mxu1 %v17897_v24  ;;  %v17955_v24 = vld [vmem:[#allocation7 + $0x3228] ss:$16 sps:$4 sm:$0xff]  }
 0x6a6   :  { %13343 = vmatpush2.bf16.msra.mxu0 %v17892_v22  ;;  %v17960_v22 = vld [vmem:[#allocation7 + $0x300c] ss:$16 sps:$4 sm:$0xff]  }
 0x6a7   :  { %13384 = vmatpush2.bf16.msra.mxu1 %v17895_v23  ;;  %13344 = vmatprep.subr.bf16.mxu0 %v17900_v58  ;;  %v17963_v23 = vld [vmem:[#allocation7 + $0x320c] ss:$16 sps:$4 sm:$0xff]   ;;  %v17958_v58 = vld [vmem:[#allocation7 + $0x3008] ss:$16 sps:$4 sm:$0xff]  }
 0x6a8   :  { %13385 = vmatprep.subr.bf16.mxu1 %v17903_v43  ;;  %v17961_v43 = vld [vmem:[#allocation7 + $0x3208] ss:$16 sps:$4 sm:$0xff]  }
 0x6aa   :  { %13345 = vmatpush2.bf16.msra.mxu0 %v17898_v52  ;;  %v17966_v52 = vld [vmem:[#allocation7 + $0x31ec] ss:$16 sps:$4 sm:$0xff]  }
 0x6ab   :  { %13386 = vmatpush2.bf16.msra.mxu1 %v17901_v51  ;;  %13346 = vmatprep.subr.bf16.mxu0 %v17906_v26  ;;  %v17969_v51 = vld [vmem:[#allocation7 + $0x33ec] ss:$16 sps:$4 sm:$0xff]   ;;  %v17964_v26 = vld [vmem:[#allocation7 + $0x31e8] ss:$16 sps:$4 sm:$0xff]  }
 0x6ac   :  { %13387 = vmatprep.subr.bf16.mxu1 %v17909_v61  ;;  %v17967_v61 = vld [vmem:[#allocation7 + $0x33e8] ss:$16 sps:$4 sm:$0xff]  }
 0x6ae   :  { %13347 = vmatpush2.bf16.msra.mxu0 %v17904_v32  ;;  %v17972_v32 = vld [vmem:[#allocation7 + $0x31cc] ss:$16 sps:$4 sm:$0xff]  }
 0x6af   :  { %13388 = vmatpush2.bf16.msra.mxu1 %v17907_v19  ;;  %13348 = vmatprep.subr.bf16.mxu0 %v17912_v18  ;;  %v17975_v19 = vld [vmem:[#allocation7 + $0x33cc] ss:$16 sps:$4 sm:$0xff]   ;;  %v17970_v18 = vld [vmem:[#allocation7 + $0x31c8] ss:$16 sps:$4 sm:$0xff]  }
 0x6b0   :  { %13389 = vmatprep.subr.bf16.mxu1 %v17915_v44  ;;  %v17973_v44 = vld [vmem:[#allocation7 + $0x33c8] ss:$16 sps:$4 sm:$0xff]  }
 0x6b2   :  { %13349 = vmatpush2.bf16.msra.mxu0 %v17910_v14  ;;  %v17978_v14 = vld [vmem:[#allocation7 + $0x31ac] ss:$16 sps:$4 sm:$0xff]  }
 0x6b3   :  { %13390 = vmatpush2.bf16.msra.mxu1 %v17913_v59  ;;  %13400 = vmatprep.subr.bf16.mxu0 %v17918_v11  ;;  %v17981_v59 = vld [vmem:[#allocation7 + $0x33ac] ss:$16 sps:$4 sm:$0xff]   ;;  %v17976_v11 = vld [vmem:[#allocation7 + $0x31a8] ss:$16 sps:$4 sm:$0xff]  }
 0x6b4   :  { %13441 = vmatprep.subr.bf16.mxu1 %v17921_v47  ;;  %v17979_v47 = vld [vmem:[#allocation7 + $0x33a8] ss:$16 sps:$4 sm:$0xff]  }
 0x6b5   :  { %v13106_v31 = vpop.f32.mrf.mxu0  ;;  %13351 = vmatmul.mubr.bf16.vlgmr.msra.gmra.mxu0 %v18706_v54 }
 0x6b6   :  { %v13147_v39 = vpop.f32.mrf.mxu1  ;;  %13392 = vmatmul.mubr.bf16.vlgmr.msra.gmra.mxu1 %v18710_v17  ;;  %v13107_v57 = vadd.f32 %v13106_v31, %v18814_v36  ;;  %13401 = vmatpush1.bf16.msra.mxu0 %v17916_v55  ;;  %v17984_v55 = vld [vmem:[#allocation7 + $0x318c] ss:$16 sps:$4 sm:$0xff]  }
 0x6b7   :  { %13442 = vmatpush1.bf16.msra.mxu1 %v17919_v35  ;;  %v13108_v2 = vpop.f32.mrf.mxu0  ;;  %13402 = vmatprep.subr.bf16.mxu0 %v17924_v0  ;;  %v17987_v35 = vld [vmem:[#allocation7 + $0x338c] ss:$16 sps:$4 sm:$0xff]   ;;  %v17982_v0 = vld [vmem:[#allocation7 + $0x3188] ss:$16 sps:$4 sm:$0xff]  }
 0x6b8   :  { %v13149_v7 = vpop.f32.mrf.mxu1  ;;  %13443 = vmatprep.subr.bf16.mxu1 %v17927_v6  ;;  %v18823_v27 = vadd.f32 %v13147_v39, %v13107_v57  ;;  %v13109_v45 = vadd.f32 %v13108_v2, %v18818_v21  ;;  %13432 = vmatprep.mubr.bf16.mxu0 %v18712_v50  ;;  %v17934_v21 = vld [vmem:[#allocation7 + $0x3088] ss:$16 sps:$4 sm:$0xff]   ;;  %v17990_v31 = vld [vmem:[#allocation7 + $0x316c] ss:$16 sps:$4 sm:$0xff]  }
 0x6b9   :  { %13473 = vmatprep.mubr.bf16.mxu1 %v18714_v34  ;;  %v13110_v54 = vpop.f32.mrf.mxu0  ;;  %v17937_v50 = vld [vmem:[#allocation7 + $0x3288] ss:$16 sps:$4 sm:$0xff]   ;;  %v17942_v34 = vld [vmem:[#allocation7 + $0x306c] ss:$16 sps:$4 sm:$0xff]  }
 0x6ba   :  { %v13151_v17 = vpop.f32.mrf.mxu1  ;;  %v18828_v36 = vadd.f32 %v13149_v7, %v13109_v45  ;;  %13403 = vmatpush1.bf16.msra.mxu0 %v17922_v46  ;;  %v17985_v6 = vld [vmem:[#allocation7 + $0x3388] ss:$16 sps:$4 sm:$0xff]   ;;  %v17993_v39 = vld [vmem:[#allocation7 + $0x336c] ss:$16 sps:$4 sm:$0xff]  }
 0x6bb   :  { %13444 = vmatpush1.bf16.msra.mxu1 %v17925_v1  ;;  %v13111_v9 = vpop.f32.mrf.mxu0  ;;  %13404 = vmatprep.subr.bf16.mxu0 %v17930_v8  ;;  %v17988_v57 = vld [vmem:[#allocation7 + $0x3168] ss:$16 sps:$4 sm:$0xff]   ;;  %v17996_v1 = vld [vmem:[#allocation7 + $0x314c] ss:$16 sps:$4 sm:$0xff]  }
 0x6bc   :  { %v13152_v42 = vpop.f32.mrf.mxu1  ;;  %13445 = vmatprep.subr.bf16.mxu1 %v17933_v63  ;;  %v17991_v46 = vld [vmem:[#allocation7 + $0x3368] ss:$16 sps:$4 sm:$0xff]   ;;  %v17999_v2 = vld [vmem:[#allocation7 + $0x334c] ss:$16 sps:$4 sm:$0xff]  }
 0x6bd   :  { %v17994_v7 = vld [vmem:[#allocation7 + $0x3148] ss:$16 sps:$4 sm:$0xff]   ;;  %v18002_v63 = vld [vmem:[#allocation7 + $0x312c] ss:$16 sps:$4 sm:$0xff]  }
 0x6be   :  { %13405 = vmatpush1.bf16.msra.mxu0 %v17928_v12  ;;  %v17997_v8 = vld [vmem:[#allocation7 + $0x3348] ss:$16 sps:$4 sm:$0xff]   ;;  %v18005_v45 = vld [vmem:[#allocation7 + $0x332c] ss:$16 sps:$4 sm:$0xff]  }
 0x6bf   :  { %13446 = vmatpush1.bf16.msra.mxu1 %v17931_v41  ;;  %13406 = vmatprep.subr.bf16.mxu0 %v17936_v33  ;;  %v18000_v54 = vld [vmem:[#allocation7 + $0x3128] ss:$16 sps:$4 sm:$0xff]   ;;  %v18008_v12 = vld [vmem:[#allocation7 + $0x310c] ss:$16 sps:$4 sm:$0xff]  }
 0x6c0   :  { %13447 = vmatprep.subr.bf16.mxu1 %v17939_v37  ;;  %v18003_v17 = vld [vmem:[#allocation7 + $0x3328] ss:$16 sps:$4 sm:$0xff]   ;;  %v18011_v41 = vld [vmem:[#allocation7 + $0x330c] ss:$16 sps:$4 sm:$0xff]  }
 0x6c1   :  { %v18006_v9 = vld [vmem:[#allocation7 + $0x3108] ss:$16 sps:$4 sm:$0xff]   ;;  %v18014_v33 = vld [vmem:[#allocation7 + $0x34ec] ss:$16 sps:$4 sm:$0xff]  }
 0x6c2   :  { %13407 = vmatpush1.bf16.msra.mxu0 %v17934_v21  ;;  %v18009_v42 = vld [vmem:[#allocation7 + $0x3308] ss:$16 sps:$4 sm:$0xff]   ;;  %v18017_v37 = vld [vmem:[#allocation7 + $0x36ec] ss:$16 sps:$4 sm:$0xff]  }
 0x6c3   :  { %13448 = vmatpush1.bf16.msra.mxu1 %v17937_v50  ;;  %13408 = vmatprep.subr.bf16.mxu0 %v17942_v34  ;;  %v18012_v21 = vld [vmem:[#allocation7 + $0x34e8] ss:$16 sps:$4 sm:$0xff]   ;;  %v18020_v34 = vld [vmem:[#allocation7 + $0x34cc] ss:$16 sps:$4 sm:$0xff]  }
 0x6c4   :  { %13449 = vmatprep.subr.bf16.mxu1 %v17945_v38  ;;  %v18015_v50 = vld [vmem:[#allocation7 + $0x36e8] ss:$16 sps:$4 sm:$0xff]   ;;  %v18023_v38 = vld [vmem:[#allocation7 + $0x36cc] ss:$16 sps:$4 sm:$0xff]  }
 0x6c6   :  { %13409 = vmatpush1.bf16.msra.mxu0 %v17940_v15 }
 0x6c7   :  { %13450 = vmatpush1.bf16.msra.mxu1 %v17943_v3  ;;  %13410 = vmatprep.subr.bf16.mxu0 %v17948_v28 }
 0x6c8   :  { %13451 = vmatprep.subr.bf16.mxu1 %v17951_v5  ;;  %v18018_v5 = vld [vmem:[#allocation7 + $0x34c8] ss:$16 sps:$4 sm:$0xff]  }
 0x6ca   :  { %13411 = vmatpush1.bf16.msra.mxu0 %v17946_v62  ;;  %v18021_v62 = vld [vmem:[#allocation7 + $0x36c8] ss:$16 sps:$4 sm:$0xff]  }
 0x6cb   :  { %13452 = vmatpush1.bf16.msra.mxu1 %v17949_v16  ;;  %13412 = vmatprep.subr.bf16.mxu0 %v17954_v29 }
 0x6cc   :  { %13453 = vmatprep.subr.bf16.mxu1 %v17957_v10  ;;  %v18026_v10 = vld [vmem:[#allocation7 + $0x34ac] ss:$16 sps:$4 sm:$0xff]  }
 0x6ce   :  { %13413 = vmatpush1.bf16.msra.mxu0 %v17952_v30  ;;  %v18029_v30 = vld [vmem:[#allocation7 + $0x36ac] ss:$16 sps:$4 sm:$0xff]  }
 0x6cf   :  { %13454 = vmatpush1.bf16.msra.mxu1 %v17955_v24  ;;  %13414 = vmatprep.subr.bf16.mxu0 %v17960_v22 }
 0x6d0   :  { %13455 = vmatprep.subr.bf16.mxu1 %v17963_v23  ;;  %v18024_v23 = vld [vmem:[#allocation7 + $0x34a8] ss:$16 sps:$4 sm:$0xff]  }
 0x6d2   :  { %13415 = vmatpush1.bf16.msra.mxu0 %v17958_v58  ;;  %v18027_v58 = vld [vmem:[#allocation7 + $0x36a8] ss:$16 sps:$4 sm:$0xff]  }
 0x6d3   :  { %13456 = vmatpush1.bf16.msra.mxu1 %v17961_v43  ;;  %13416 = vmatprep.subr.bf16.mxu0 %v17966_v52 }
 0x6d4   :  { %13457 = vmatprep.subr.bf16.mxu1 %v17969_v51  ;;  %v18032_v51 = vld [vmem:[#allocation7 + $0x348c] ss:$16 sps:$4 sm:$0xff]  }
 0x6d6   :  { %13417 = vmatpush2.bf16.msra.mxu0 %v17964_v26  ;;  %v18035_v26 = vld [vmem:[#allocation7 + $0x368c] ss:$16 sps:$4 sm:$0xff]  }
 0x6d7   :  { %13458 = vmatpush2.bf16.msra.mxu1 %v17967_v61  ;;  %13418 = vmatprep.subr.bf16.mxu0 %v17972_v32  ;;  %v18041_v61 = vld [vmem:[#allocation7 + $0x366c] ss:$16 sps:$4 sm:$0xff]   ;;  %v18036_v32 = vld [vmem:[#allocation7 + $0x3468] ss:$16 sps:$4 sm:$0xff]  }
 0x6d8   :  { %13459 = vmatprep.subr.bf16.mxu1 %v17975_v19  ;;  %v18039_v19 = vld [vmem:[#allocation7 + $0x3668] ss:$16 sps:$4 sm:$0xff]  }
 0x6da   :  { %13419 = vmatpush2.bf16.msra.mxu0 %v17970_v18  ;;  %v18044_v18 = vld [vmem:[#allocation7 + $0x344c] ss:$16 sps:$4 sm:$0xff]  }
 0x6db   :  { %13460 = vmatpush2.bf16.msra.mxu1 %v17973_v44  ;;  %13420 = vmatprep.subr.bf16.mxu0 %v17978_v14  ;;  %v18047_v44 = vld [vmem:[#allocation7 + $0x364c] ss:$16 sps:$4 sm:$0xff]   ;;  %v18042_v14 = vld [vmem:[#allocation7 + $0x3448] ss:$16 sps:$4 sm:$0xff]  }
 0x6dc   :  { %13461 = vmatprep.subr.bf16.mxu1 %v17981_v59  ;;  %v18045_v59 = vld [vmem:[#allocation7 + $0x3648] ss:$16 sps:$4 sm:$0xff]  }
 0x6de   :  { %13421 = vmatpush2.bf16.msra.mxu0 %v17976_v11  ;;  %v18050_v11 = vld [vmem:[#allocation7 + $0x342c] ss:$16 sps:$4 sm:$0xff]  }
 0x6df   :  { %13462 = vmatpush2.bf16.msra.mxu1 %v17979_v47  ;;  %13422 = vmatprep.subr.bf16.mxu0 %v17984_v55  ;;  %v18053_v47 = vld [vmem:[#allocation7 + $0x362c] ss:$16 sps:$4 sm:$0xff]   ;;  %v18048_v55 = vld [vmem:[#allocation7 + $0x3428] ss:$16 sps:$4 sm:$0xff]  }
 0x6e0   :  { %13463 = vmatprep.subr.bf16.mxu1 %v17987_v35  ;;  %v18051_v35 = vld [vmem:[#allocation7 + $0x3628] ss:$16 sps:$4 sm:$0xff]  }
 0x6e2   :  { %13423 = vmatpush2.bf16.msra.mxu0 %v17982_v0  ;;  %v18056_v0 = vld [vmem:[#allocation7 + $0x340c] ss:$16 sps:$4 sm:$0xff]  }
 0x6e3   :  { %13464 = vmatpush2.bf16.msra.mxu1 %v17985_v6  ;;  %13424 = vmatprep.subr.bf16.mxu0 %v17990_v31  ;;  %v18059_v6 = vld [vmem:[#allocation7 + $0x360c] ss:$16 sps:$4 sm:$0xff]   ;;  %v18054_v31 = vld [vmem:[#allocation7 + $0x3408] ss:$16 sps:$4 sm:$0xff]  }
 0x6e4   :  { %13465 = vmatprep.subr.bf16.mxu1 %v17993_v39  ;;  %v18057_v39 = vld [vmem:[#allocation7 + $0x3608] ss:$16 sps:$4 sm:$0xff]  }
 0x6e6   :  { %13425 = vmatpush2.bf16.msra.mxu0 %v17988_v57  ;;  %v18062_v57 = vld [vmem:[#allocation7 + $0x35ec] ss:$16 sps:$4 sm:$0xff]  }
 0x6e7   :  { %13466 = vmatpush2.bf16.msra.mxu1 %v17991_v46  ;;  %13426 = vmatprep.subr.bf16.mxu0 %v17996_v1  ;;  %v18065_v46 = vld [vmem:[#allocation7 + $0x37ec] ss:$16 sps:$4 sm:$0xff]   ;;  %v18060_v1 = vld [vmem:[#allocation7 + $0x35e8] ss:$16 sps:$4 sm:$0xff]  }
 0x6e8   :  { %13467 = vmatprep.subr.bf16.mxu1 %v17999_v2  ;;  %v18063_v2 = vld [vmem:[#allocation7 + $0x37e8] ss:$16 sps:$4 sm:$0xff]  }
 0x6ea   :  { %13427 = vmatpush2.bf16.msra.mxu0 %v17994_v7  ;;  %v18068_v7 = vld [vmem:[#allocation7 + $0x35cc] ss:$16 sps:$4 sm:$0xff]  }
 0x6eb   :  { %13468 = vmatpush2.bf16.msra.mxu1 %v17997_v8  ;;  %13428 = vmatprep.subr.bf16.mxu0 %v18002_v63  ;;  %v18071_v8 = vld [vmem:[#allocation7 + $0x37cc] ss:$16 sps:$4 sm:$0xff]   ;;  %v18066_v63 = vld [vmem:[#allocation7 + $0x35c8] ss:$16 sps:$4 sm:$0xff]  }
 0x6ec   :  { %13469 = vmatprep.subr.bf16.mxu1 %v18005_v45  ;;  %v18069_v45 = vld [vmem:[#allocation7 + $0x37c8] ss:$16 sps:$4 sm:$0xff]  }
 0x6ee   :  { %13429 = vmatpush2.bf16.msra.mxu0 %v18000_v54  ;;  %v18074_v54 = vld [vmem:[#allocation7 + $0x35ac] ss:$16 sps:$4 sm:$0xff]  }
 0x6ef   :  { %13470 = vmatpush2.bf16.msra.mxu1 %v18003_v17  ;;  %13430 = vmatprep.subr.bf16.mxu0 %v18008_v12  ;;  %v18077_v17 = vld [vmem:[#allocation7 + $0x37ac] ss:$16 sps:$4 sm:$0xff]   ;;  %v18072_v12 = vld [vmem:[#allocation7 + $0x35a8] ss:$16 sps:$4 sm:$0xff]  }
 0x6f0   :  { %13471 = vmatprep.subr.bf16.mxu1 %v18011_v41  ;;  %v18075_v41 = vld [vmem:[#allocation7 + $0x37a8] ss:$16 sps:$4 sm:$0xff]  }
 0x6f2   :  { %13431 = vmatpush2.bf16.msra.mxu0 %v18006_v9  ;;  %v18080_v9 = vld [vmem:[#allocation7 + $0x358c] ss:$16 sps:$4 sm:$0xff]  }
 0x6f3   :  { %13472 = vmatpush2.bf16.msra.mxu1 %v18009_v42  ;;  %13482 = vmatprep.subr.bf16.mxu0 %v18014_v33  ;;  %v18083_v42 = vld [vmem:[#allocation7 + $0x378c] ss:$16 sps:$4 sm:$0xff]   ;;  %v18078_v33 = vld [vmem:[#allocation7 + $0x3588] ss:$16 sps:$4 sm:$0xff]  }
 0x6f4   :  { %13523 = vmatprep.subr.bf16.mxu1 %v18017_v37  ;;  %v18081_v37 = vld [vmem:[#allocation7 + $0x3788] ss:$16 sps:$4 sm:$0xff]  }
 0x6f5   :  { %v13188_v15 = vpop.f32.mrf.mxu0  ;;  %13433 = vmatmul.mubr.bf16.vlgmr.msra.gmra.mxu0 %v18738_v25 }
 0x6f6   :  { %v13229_v3 = vpop.f32.mrf.mxu1  ;;  %13474 = vmatmul.mubr.bf16.vlgmr.msra.gmra.mxu1 %v18742_v48  ;;  %v13189_v28 = vadd.f32 %v13188_v15, %v18823_v27  ;;  %13483 = vmatpush1.bf16.msra.mxu0 %v18012_v21  ;;  %v18086_v21 = vld [vmem:[#allocation7 + $0x356c] ss:$16 sps:$4 sm:$0xff]  }
 0x6f7   :  { %13524 = vmatpush1.bf16.msra.mxu1 %v18015_v50  ;;  %v13190_v16 = vpop.f32.mrf.mxu0  ;;  %13484 = vmatprep.subr.bf16.mxu0 %v18020_v34  ;;  %v18089_v50 = vld [vmem:[#allocation7 + $0x376c] ss:$16 sps:$4 sm:$0xff]   ;;  %v18084_v34 = vld [vmem:[#allocation7 + $0x3568] ss:$16 sps:$4 sm:$0xff]  }
 0x6f8   :  { %v13231_v29 = vpop.f32.mrf.mxu1  ;;  %13525 = vmatprep.subr.bf16.mxu1 %v18023_v38  ;;  %v18833_v24 = vadd.f32 %v13229_v3, %v13189_v28  ;;  %v13191_v22 = vadd.f32 %v13190_v16, %v18828_v36  ;;  %13514 = vmatprep.mubr.bf16.mxu0 %v18744_v60  ;;  %v18030_v36 = vld [vmem:[#allocation7 + $0x3488] ss:$16 sps:$4 sm:$0xff]   ;;  %v18092_v15 = vld [vmem:[#allocation7 + $0x354c] ss:$16 sps:$4 sm:$0xff]  }
 0x6f9   :  { %13555 = vmatprep.mubr.bf16.mxu1 %v18746_v13  ;;  %v13192_v25 = vpop.f32.mrf.mxu0  ;;  %v18033_v60 = vld [vmem:[#allocation7 + $0x3688] ss:$16 sps:$4 sm:$0xff]   ;;  %v18038_v13 = vld [vmem:[#allocation7 + $0x346c] ss:$16 sps:$4 sm:$0xff]  }
 0x6fa   :  { %v13233_v48 = vpop.f32.mrf.mxu1  ;;  %v18838_v27 = vadd.f32 %v13231_v29, %v13191_v22  ;;  %13485 = vmatpush1.bf16.msra.mxu0 %v18018_v5  ;;  %v18087_v38 = vld [vmem:[#allocation7 + $0x3768] ss:$16 sps:$4 sm:$0xff]   ;;  %v18095_v3 = vld [vmem:[#allocation7 + $0x374c] ss:$16 sps:$4 sm:$0xff]  }
 0x6fb   :  { %13526 = vmatpush1.bf16.msra.mxu1 %v18021_v62  ;;  %v13193_v43 = vpop.f32.mrf.mxu0  ;;  %13486 = vmatprep.subr.bf16.mxu0 %v18026_v10  ;;  %v18090_v28 = vld [vmem:[#allocation7 + $0x3548] ss:$16 sps:$4 sm:$0xff]   ;;  %v18098_v62 = vld [vmem:[#allocation7 + $0x352c] ss:$16 sps:$4 sm:$0xff]  }
 0x6fc   :  { %v13234_v52 = vpop.f32.mrf.mxu1  ;;  %13527 = vmatprep.subr.bf16.mxu1 %v18029_v30  ;;  %v18093_v5 = vld [vmem:[#allocation7 + $0x3748] ss:$16 sps:$4 sm:$0xff]   ;;  %v18101_v16 = vld [vmem:[#allocation7 + $0x372c] ss:$16 sps:$4 sm:$0xff]  }
 0x6fd   :  { %v18096_v29 = vld [vmem:[#allocation7 + $0x3528] ss:$16 sps:$4 sm:$0xff]   ;;  %v18104_v30 = vld [vmem:[#allocation7 + $0x350c] ss:$16 sps:$4 sm:$0xff]  }
 0x6fe   :  { %13487 = vmatpush1.bf16.msra.mxu0 %v18024_v23  ;;  %v18099_v10 = vld [vmem:[#allocation7 + $0x3728] ss:$16 sps:$4 sm:$0xff]   ;;  %v18107_v22 = vld [vmem:[#allocation7 + $0x370c] ss:$16 sps:$4 sm:$0xff]  }
 0x6ff   :  { %13528 = vmatpush1.bf16.msra.mxu1 %v18027_v58  ;;  %13488 = vmatprep.subr.bf16.mxu0 %v18032_v51  ;;  %v18102_v25 = vld [vmem:[#allocation7 + $0x3508] ss:$16 sps:$4 sm:$0xff]  }
 0x700   :  { %13529 = vmatprep.subr.bf16.mxu1 %v18035_v26  ;;  %v18105_v48 = vld [vmem:[#allocation7 + $0x3708] ss:$16 sps:$4 sm:$0xff]  }
 0x702   :  { %13489 = vmatpush1.bf16.msra.mxu0 %v18030_v36 }
 0x703   :  { %13530 = vmatpush1.bf16.msra.mxu1 %v18033_v60  ;;  %13490 = vmatprep.subr.bf16.mxu0 %v18038_v13 }
 0x704   :  { %13531 = vmatprep.subr.bf16.mxu1 %v18041_v61 }
 0x706   :  { %13491 = vmatpush1.bf16.msra.mxu0 %v18036_v32 }
 0x707   :  { %13532 = vmatpush1.bf16.msra.mxu1 %v18039_v19  ;;  %13492 = vmatprep.subr.bf16.mxu0 %v18044_v18 }
 0x708   :  { %13533 = vmatprep.subr.bf16.mxu1 %v18047_v44 }
 0x70a   :  { %13493 = vmatpush1.bf16.msra.mxu0 %v18042_v14 }
 0x70b   :  { %13534 = vmatpush1.bf16.msra.mxu1 %v18045_v59  ;;  %13494 = vmatprep.subr.bf16.mxu0 %v18050_v11 }
 0x70c   :  { %13535 = vmatprep.subr.bf16.mxu1 %v18053_v47 }
 0x70e   :  { %13495 = vmatpush1.bf16.msra.mxu0 %v18048_v55 }
 0x70f   :  { %13536 = vmatpush1.bf16.msra.mxu1 %v18051_v35  ;;  %13496 = vmatprep.subr.bf16.mxu0 %v18056_v0 }
 0x710   :  { %13537 = vmatprep.subr.bf16.mxu1 %v18059_v6 }
 0x712   :  { %13497 = vmatpush1.bf16.msra.mxu0 %v18054_v31 }
 0x713   :  { %13538 = vmatpush1.bf16.msra.mxu1 %v18057_v39  ;;  %13498 = vmatprep.subr.bf16.mxu0 %v18062_v57 }
 0x714   :  { %13539 = vmatprep.subr.bf16.mxu1 %v18065_v46 }
 0x716   :  { %13499 = vmatpush2.bf16.msra.mxu0 %v18060_v1 }
 0x717   :  { %13540 = vmatpush2.bf16.msra.mxu1 %v18063_v2  ;;  %13500 = vmatprep.subr.bf16.mxu0 %v18068_v7 }
 0x718   :  { %13541 = vmatprep.subr.bf16.mxu1 %v18071_v8 }
 0x71a   :  { %13501 = vmatpush2.bf16.msra.mxu0 %v18066_v63 }
 0x71b   :  { %13542 = vmatpush2.bf16.msra.mxu1 %v18069_v45  ;;  %13502 = vmatprep.subr.bf16.mxu0 %v18074_v54 }
 0x71c   :  { %13543 = vmatprep.subr.bf16.mxu1 %v18077_v17 }
 0x71e   :  { %13503 = vmatpush2.bf16.msra.mxu0 %v18072_v12 }
 0x71f   :  { %13544 = vmatpush2.bf16.msra.mxu1 %v18075_v41  ;;  %13504 = vmatprep.subr.bf16.mxu0 %v18080_v9 }
 0x720   :  { %13545 = vmatprep.subr.bf16.mxu1 %v18083_v42 }
 0x722   :  { %13505 = vmatpush2.bf16.msra.mxu0 %v18078_v33 }
 0x723   :  { %13546 = vmatpush2.bf16.msra.mxu1 %v18081_v37  ;;  %13506 = vmatprep.subr.bf16.mxu0 %v18086_v21 }
 0x724   :  { %13547 = vmatprep.subr.bf16.mxu1 %v18089_v50 }
 0x726   :  { %13507 = vmatpush2.bf16.msra.mxu0 %v18084_v34 }
 0x727   :  { %13548 = vmatpush2.bf16.msra.mxu1 %v18087_v38  ;;  %13508 = vmatprep.subr.bf16.mxu0 %v18092_v15 }
 0x728   :  { %13549 = vmatprep.subr.bf16.mxu1 %v18095_v3  ;;  %v13576_v3 = vrot.slane %v13568_v53, %v18268_v49 }
 0x72a   :  { %13509 = vmatpush2.bf16.msra.mxu0 %v18090_v28 }
 0x72b   :  { %13550 = vmatpush2.bf16.msra.mxu1 %v18093_v5  ;;  %13510 = vmatprep.subr.bf16.mxu0 %v18098_v62 }
 0x72c   :  { %13551 = vmatprep.subr.bf16.mxu1 %v18101_v16 }
 0x72e   :  { %13511 = vmatpush2.bf16.msra.mxu0 %v18096_v29 }
 0x72f   :  { %13552 = vmatpush2.bf16.msra.mxu1 %v18099_v10  ;;  %13512 = vmatprep.subr.bf16.mxu0 %v18104_v30 }
 0x730   :  { %13553 = vmatprep.subr.bf16.mxu1 %v18107_v22 }
 0x732   :  { %13513 = vmatpush2.bf16.msra.mxu0 %v18102_v25 }
 0x733   :  { %13554 = vmatpush2.bf16.msra.mxu1 %v18105_v48 }
 0x735   :  { %v13270_v23 = vpop.f32.mrf.mxu0  ;;  %13515 = vmatmul.mubr.bf16.vlgmr.msra.gmra.mxu0 %v18760_v56 }
 0x736   :  { %v13311_v58 = vpop.f32.mrf.mxu1  ;;  %13556 = vmatmul.mubr.bf16.vlgmr.msra.gmra.mxu1 %v18764_v40  ;;  %v13271_v43 = vadd.f32 %v13270_v23, %v18833_v24 }
 0x737   :  { %v13272_v52 = vpop.f32.mrf.mxu0 }
 0x738   :  { %v13313_v51 = vpop.f32.mrf.mxu1  ;;  %v13312_v26 = vadd.f32 %v13311_v58, %v13271_v43  ;;  %v13273_v36 = vadd.f32 %v13272_v52, %v18838_v27 }
 0x739   :  { %v13274_v60 = vpop.f32.mrf.mxu0 }
 0x73a   :  { %v13315_v13 = vpop.f32.mrf.mxu1  ;;  %v13314_v61 = vadd.f32 %v13313_v51, %v13273_v36 }
 0x73b   :  { %v13275_v32 = vpop.f32.mrf.mxu0 }
 0x73c   :  { %v13316_v19 = vpop.f32.mrf.mxu1 }
 0x775   :  { %v13352_v18 = vpop.f32.mrf.mxu0 }
 0x776   :  { %v13393_v44 = vpop.f32.mrf.mxu1  ;;  %v13353_v14 = vadd.f32 %v13352_v18, %v13312_v26 }
 0x777   :  { %v13354_v59 = vpop.f32.mrf.mxu0 }
 0x778   :  { %v13395_v11 = vpop.f32.mrf.mxu1  ;;  %v13394_v56 = vadd.f32 %v13393_v44, %v13353_v14  ;;  %v13355_v47 = vadd.f32 %v13354_v59, %v13314_v61 }
 0x779   :  { %v13356_v40 = vpop.f32.mrf.mxu0 }
 0x77a   :  { %v13397_v55 = vpop.f32.mrf.mxu1  ;;  %v13396_v24 = vadd.f32 %v13395_v11, %v13355_v47 }
 0x77b   :  { %v13357_v35 = vpop.f32.mrf.mxu0 }
 0x77c   :  { %v13398_v0 = vpop.f32.mrf.mxu1 }
 0x7b5   :  { %v13434_v6 = vpop.f32.mrf.mxu0 }
 0x7b6   :  { %v13475_v31 = vpop.f32.mrf.mxu1  ;;  %v13435_v27 = vadd.f32 %v13434_v6, %v13394_v56 }
 0x7b7   :  { %v13436_v39 = vpop.f32.mrf.mxu0 }
 0x7b8   :  { %v13477_v57 = vpop.f32.mrf.mxu1  ;;  %v13476_v46 = vadd.f32 %v13475_v31, %v13435_v27  ;;  %v13437_v63 = vadd.f32 %v13436_v39, %v13396_v24 }
 0x7b9   :  { %v13438_v1 = vpop.f32.mrf.mxu0 }
 0x7ba   :  { %v13479_v2 = vpop.f32.mrf.mxu1  ;;  %v13478_v17 = vadd.f32 %v13477_v57, %v13437_v63 }
 0x7bb   :  { %v13439_v7 = vpop.f32.mrf.mxu0 }
 0x7bc   :  { %v13480_v8 = vpop.f32.mrf.mxu1 }
 0x7f5   :  { %v13516_v45 = vpop.f32.mrf.mxu0 }
 0x7f6   :  { %v13557_v54 = vpop.f32.mrf.mxu1  ;;  %v13517_v12 = vadd.f32 %v13516_v45, %v13476_v46 }
 0x7f7   :  { %v13518_v41 = vpop.f32.mrf.mxu0 }
 0x7f8   :  { %v13559_v9 = vpop.f32.mrf.mxu1  ;;  %v13519_v42 = vadd.f32 %v13518_v41, %v13478_v17  ;;  %v13558_v21 = vadd.f32 %v13557_v54, %v13517_v12 }
 0x7f9   :  { %v13520_v33 = vpop.f32.mrf.mxu0 }
 0x7fa   :  { %v13561_v37 = vpop.f32.mrf.mxu1  ;;  %v13560_v50 = vadd.f32 %v13559_v9, %v13519_v42 }
 0x7fb   :  { %v13521_v34 = vpop.f32.mrf.mxu0 }
 0x7fc   :  { %v13562_v38 = vpop.f32.mrf.mxu1  ;;  %v13569_v15 = vcombine.low %v13558_v21, %v13560_v50 }
 0x7fe   :  { %v13583_v28 = vrot.slane %v13569_v15, %v18268_v49 }
 0x800   :  { %v13584_v5 = vcombine.low %v13576_v3, %v13583_v28 }
 0x802   :  { %13586 = vst [vmem:[#allocation10 + $0x8] sm:$0xff] %v13584_v5 }
 0x803   :  { %18201 = shalt.err (!%p18198_p10)
}
 0x804   :  { %13596 = dma.vmem_to_hbm [thread:$0]  %s13594_s3, 256, %s18856_s4, [#allocation4]  }
 0x805   :  { %18216 = dma.done.wait [#allocation4], 256  }
 0x806   :  { %18217 = vsyncadd [#allocation4], 4294967040 }
 0x807   :  { %13600 = vsyncpa [#allocation3], 1 }
 0x808   :  { %13601 = vsyncpa [#allocation6], 1 }
 0x809   :  { %13602 = vsyncpa [#allocation9], 1 }
 0x80a   :  { %13603 = vsyncpa [#allocation4], 1 }

</bundles_post_ra>
